<compile_context>
chip_gen: v7x
topology: tpu7x:2x2x1
jax: 0.10.0
libtpu: 0.0.40
codegen_flags: <defaults>
</compile_context>

<pallas_src>
import functools

import numpy as np
import jax
import jax.numpy as jnp
from jax.experimental import pallas as pl
from jax.experimental.pallas import tpu as pltpu


# ---------------- fused Pallas kernel (B images per grid step) ----------------

def fused_net_kernel(x_ref, tw_ref, cb_ref, fw_ref, fb_ref, o_ref, *, width, cout):
    """Conv3x3+bias+ReLU -> MaxPool2x2 -> (Dropout=id) -> FC -> Softmax, fused.

    x_ref : (1, B, F_in)    bf16  flattened zero-padded NHWC images (F_in=HP*WP*Cin)
    tw_ref: (F_in, F_conv)  bf16  conv unrolled to a locally-connected matrix
    cb_ref: (1, F_conv)     f32   conv bias tiled per output position (i, j, c)
    fw_ref: (F_conv, OP)    f32p  bf16 FC weight; rows at odd pool positions are 0
    fb_ref: (1, OP)         f32   FC bias; padded columns hold -1e30 (softmax mask)
    o_ref : (1, B, OP)      f32   softmax probabilities (padded lanes ~ 0)
    """
    x = x_ref[0]                                                   # (B, F_in) bf16

    # ---- Convolution (3x3, stride 1, pad 1): ONE MXU matmul, f32 accumulate --
    y = jnp.dot(x, tw_ref[...], preferred_element_type=jnp.float32)  # (B, F_conv)
    y = jnp.maximum(y + cb_ref[...], 0.0)                           # bias + ReLU (f32)

    # ---- MaxPool2d(2, 2) via lane rolls (XLU) + VPU max ----------------------
    # Conv output flat order is (i, j, c): the j+1 neighbour is `cout` lanes away
    # and the i+1 neighbour is `width*cout` lanes away.  After the two passes the
    # value at every even-(i, j) position is the max of its 2x2 block; picking
    # those positions is folded into the zeroed rows of fw (no compaction here).
    f_conv = y.shape[-1]
    y = jnp.maximum(y, pltpu.roll(y, shift=f_conv - cout, axis=1))
    y = jnp.maximum(y, pltpu.roll(y, shift=f_conv - width * cout, axis=1))

    # ---- Dropout: phase=TEST -> identity -------------------------------------

    # ---- InnerProduct + Softmax (exact normalization) -------------------------
    logits = jnp.dot(y.astype(fw_ref.dtype), fw_ref[...],
                     preferred_element_type=jnp.float32) + fb_ref[...]
    m = jnp.max(logits, axis=-1, keepdims=True)
    e = jnp.exp(logits - m)                                        # padded cols -> 0
    probs = e / jnp.sum(e, axis=-1, keepdims=True)
    o_ref[...] = probs.reshape(o_ref.shape)


# ---------------- parameters ----------------

def init_params(key, cin=4, cout=8, k=3, h=16, w=16, num_output=10):
    """Caffe-style gaussian fillers in PyTorch weight conventions."""
    k1, k2, k3 = jax.random.split(key, 3)
    conv_w = jax.random.normal(k1, (cout, cin, k, k), jnp.float32) * 0.05
    conv_b = jnp.zeros((cout,), jnp.float32)
    fc_in = cout * (h // 2) * (w // 2)
    fc_w = jax.random.normal(k2, (num_output, fc_in), jnp.float32) * 0.05
    fc_b = jax.random.normal(k3, (num_output,), jnp.float32) * 0.01
    return dict(conv_w=conv_w, conv_b=conv_b, fc_w=fc_w, fc_b=fc_b)


def prepare_kernel_params(params, *, h, w, op=128):
    """One-time host-side layout prep (never in the hot path).

    * Conv weights are unrolled into a locally-connected matrix so the conv is
      a single lane-dense MXU matmul inside the kernel.
    * FC weights are scattered onto the full (i, j, c) conv-output grid with
      zeros at odd pooling positions, folding the 2x2-pool compaction and the
      channel selection into the weights (no in-kernel slice/reshape).
    * MXU operands are stored in bf16; biases stay f32.
    """
    conv_w = np.asarray(params["conv_w"], np.float32)      # (Cout, Cin, K, K)
    conv_b = np.asarray(params["conv_b"], np.float32)
    fc_w = np.asarray(params["fc_w"], np.float32)          # (O, Cout*H2*W2)
    fc_b = np.asarray(params["fc_b"], np.float32)
    cout, cin, k, _ = conv_w.shape
    num_output = fc_w.shape[0]
    h2, w2 = h // 2, w // 2
    hp, wp = h + 2, w + 2                                   # pad=1 for 3x3 conv

    # conv -> locally-connected matrix:
    # tw[(hp,wp,ci), (i,j,co)] = conv_w[co, ci, hp-i, wp-j] inside the 3x3 window
    t6 = np.zeros((hp, wp, cin, h, w, cout), np.float32)
    wk = conv_w.transpose(2, 3, 1, 0)                       # (K, K, Cin, Cout)
    for i in range(h):
        for j in range(w):
            t6[i:i + k, j:j + k, :, i, j, :] = wk
    tw = t6.reshape(hp * wp * cin, h * w * cout)

    # conv bias tiled in the same (i, j, c) flat order
    cb = np.tile(conv_b, h * w).reshape(1, h * w * cout)

    # FC: pooled value for block (i2, j2) lives at flat position
    # ((2*i2)*w + 2*j2)*cout + c after the in-kernel roll/max pooling.
    fw4 = np.zeros((h, w, cout, num_output), np.float32)
    fw4[0::2, 0::2, :, :] = (
        fc_w.reshape(num_output, cout, h2, w2).transpose(2, 3, 1, 0))
    fw = fw4.reshape(h * w * cout, num_output)
    fw = np.pad(fw, ((0, 0), (0, op - num_output)))
    # padded bias columns -> -1e30 so the fused softmax ignores them for free
    fb = np.full((1, op), -1e30, np.float32)
    fb[0, :num_output] = fc_b

    return dict(
        tw=jnp.asarray(tw, jnp.bfloat16),
        cb=jnp.asarray(cb, jnp.float32),
        fw=jnp.asarray(fw, jnp.bfloat16),
        fb=jnp.asarray(fb, jnp.float32),
    )


# ---------------- forward ----------------

@functools.partial(jax.jit, static_argnames=("num_output", "block_batch"))
def net_forward(x, kparams, *, num_output, block_batch):
    """x: (N, Cin, H, W) float32 NCHW -> softmax probs (N, num_output)."""
    N, _, H, W = x.shape
    assert N % block_batch == 0, "batch must be divisible by block_batch"
    tw, cb, fw, fb = kparams["tw"], kparams["cb"], kparams["fw"], kparams["fb"]
    OP = fw.shape[-1]
    cout = cb.shape[-1] // (H * W)
    G = N // block_batch

    # Remaining per-call glue (one fused relayout): NCHW -> zero-padded NHWC,
    # flattened lane-dense (HP*WP*Cin lanes), grouped (G, B, F_in), bf16.
    xp = jnp.pad(x.transpose(0, 2, 3, 1), ((0, 0), (1, 1), (1, 1), (0, 0)))
    xf = xp.reshape(G, block_batch, -1).astype(jnp.bfloat16)
    f_in = xf.shape[-1]

    kernel = functools.partial(fused_net_kernel, width=W, cout=cout)

    def weight_spec(shape):
        # constant index_map -> fetched once; single-buffered to halve VMEM
        return pl.BlockSpec(shape, lambda n: (0, 0),
                            pipeline_mode=pl.Buffered(1))

    probs = pl.pallas_call(
        kernel,
        out_shape=jax.ShapeDtypeStruct((G, block_batch, OP), jnp.float32),
        grid_spec=pltpu.PrefetchScalarGridSpec(
            num_scalar_prefetch=0,
            grid=(G,),
            in_specs=[
                pl.BlockSpec((1, block_batch, f_in), lambda n: (n, 0, 0)),
                weight_spec(tw.shape),
                weight_spec(cb.shape),
                weight_spec(fw.shape),
                weight_spec(fb.shape),
            ],
            out_specs=pl.BlockSpec((1, block_batch, OP), lambda n: (n, 0, 0)),
        ),
        compiler_params=pltpu.CompilerParams(
            dimension_semantics=("parallel",)),
    )(xf, tw, cb, fw, fb)

    return probs.reshape(N, OP)[:, :num_output]


# ---------------- pure-JAX reference (correctness check only) ----------------

def reference_forward(x, params):
    conv = jax.lax.conv_general_dilated(
        x, params["conv_w"], window_strides=(1, 1), padding=((1, 1), (1, 1)),
        dimension_numbers=("NCHW", "OIHW", "NCHW"),
        precision=jax.lax.Precision.HIGHEST)
    conv = jnp.maximum(conv + params["conv_b"][None, :, None, None], 0.0)
    pooled = jax.lax.reduce_window(conv, -jnp.inf, jax.lax.max,
                                   (1, 1, 2, 2), (1, 1, 2, 2), "VALID")
    flat = pooled.reshape(x.shape[0], -1)
    logits = jnp.dot(flat, params["fc_w"].T, precision="highest") + params["fc_b"]
    return jax.nn.softmax(logits, axis=-1)


if __name__ == "__main__":
    key = jax.random.PRNGKey(0)
    kx, kp = jax.random.split(key)

    N, CIN, H, W, NUM_OUT = 8, 4, 16, 16, 10        # small shapes; B=4 -> grid=2
    x = jax.random.normal(kx, (N, CIN, H, W), jnp.float32)
    params = init_params(kp, cin=CIN, cout=8, k=3, h=H, w=W, num_output=NUM_OUT)
    kparams = prepare_kernel_params(params, h=H, w=W)

    out = net_forward(x, kparams, num_output=NUM_OUT, block_batch=4)
    out = jax.block_until_ready(out)

    assert out.shape == (N, NUM_OUT) and out.dtype == jnp.float32
    assert bool(jnp.all(jnp.isfinite(out)))
    # exact-normalization softmax: rows sum to 1
    assert float(jnp.max(jnp.abs(jnp.sum(out, axis=-1) - 1.0))) < 1e-5
    # match the f32 reference (bf16 MXU operands -> small tolerance)
    ref = reference_forward(x, params)
    assert float(jnp.max(jnp.abs(out - ref))) < 1e-2

    print("KERNEL_OK")
</pallas_src>

<mosaic_0001>
module attributes {stable_mosaic.version = 11 : i64} {
  func.func @fused_net_kernel(%arg0: i32, %arg1: memref<1x4x1296xbf16, #tpu.memory_space<vmem>>, %arg2: memref<1296x2048xbf16, #tpu.memory_space<vmem>>, %arg3: memref<1x2048xf32, #tpu.memory_space<vmem>>, %arg4: memref<2048x128xbf16, #tpu.memory_space<vmem>>, %arg5: memref<1x128xf32, #tpu.memory_space<vmem>>, %arg6: memref<1x4x128xf32, #tpu.memory_space<vmem>>) attributes {dimension_semantics = [#tpu.dimension_semantics<parallel>], iteration_bounds = array<i64: 2>, scalar_prefetch = 0 : i64, scratch_operands = 0 : i64, tpu.core_type = #tpu.core_type<tc>, window_params = [{transform_indices = @transform_0, window_bounds = array<i64: 1, 4, 1296>}, {pipeline_mode = #tpu.pipeline_mode<synchronous>, transform_indices = @transform_1, window_bounds = array<i64: 1296, 2048>}, {pipeline_mode = #tpu.pipeline_mode<synchronous>, transform_indices = @transform_2, window_bounds = array<i64: 1, 2048>}, {pipeline_mode = #tpu.pipeline_mode<synchronous>, transform_indices = @transform_3, window_bounds = array<i64: 2048, 128>}, {pipeline_mode = #tpu.pipeline_mode<synchronous>, transform_indices = @transform_4, window_bounds = array<i64: 1, 128>}, {transform_indices = @transform_5, window_bounds = array<i64: 1, 4, 128>}]} {
    %c0 = arith.constant 0 : index
    %c0_0 = arith.constant 0 : index
    %c0_1 = arith.constant 0 : index
    %0 = vector.load %arg1[%c0, %c0_0, %c0_1] : memref<1x4x1296xbf16, #tpu.memory_space<vmem>>, vector<1x4x1296xbf16>
    %1 = vector.shape_cast %0 : vector<1x4x1296xbf16> to vector<4x1296xbf16>
    %c0_2 = arith.constant 0 : index
    %c0_3 = arith.constant 0 : index
    %2 = vector.load %arg2[%c0_2, %c0_3] : memref<1296x2048xbf16, #tpu.memory_space<vmem>>, vector<1296x2048xbf16>
    %cst = arith.constant dense<0.000000e+00> : vector<4x2048xf32>
    %3 = tpu.matmul %1, %2, %cst {dimension_numbers = #tpu.dot_dimension_numbers<[1], [0], [0], [1], [0, 0, 1, 1], [], []>} : vector<4x1296xbf16>, vector<1296x2048xbf16>, vector<4x2048xf32> -> vector<4x2048xf32>
    %c0_4 = arith.constant 0 : index
    %c0_5 = arith.constant 0 : index
    %4 = vector.load %arg3[%c0_4, %c0_5] : memref<1x2048xf32, #tpu.memory_space<vmem>>, vector<1x2048xf32>
    %5 = vector.broadcast %4 : vector<1x2048xf32> to vector<4x2048xf32>
    %6 = arith.addf %3, %5 : vector<4x2048xf32>
    %cst_6 = arith.constant 0.000000e+00 : f32
    %7 = vector.broadcast %cst_6 : f32 to vector<4x2048xf32>
    %8 = arith.maximumf %6, %7 : vector<4x2048xf32>
    %c2040_i32 = arith.constant 2040 : i32
    %9 = tpu.dynamic_rotate %8 by %c2040_i32 dim 1 : vector<4x2048xf32>, i32 -> vector<4x2048xf32>
    %10 = arith.maximumf %8, %9 : vector<4x2048xf32>
    %c1920_i32 = arith.constant 1920 : i32
    %11 = tpu.dynamic_rotate %10 by %c1920_i32 dim 1 : vector<4x2048xf32>, i32 -> vector<4x2048xf32>
    %12 = arith.maximumf %10, %11 : vector<4x2048xf32>
    %13 = arith.truncf %12 : vector<4x2048xf32> to vector<4x2048xbf16>
    %c0_7 = arith.constant 0 : index
    %c0_8 = arith.constant 0 : index
    %14 = vector.load %arg4[%c0_7, %c0_8] : memref<2048x128xbf16, #tpu.memory_space<vmem>>, vector<2048x128xbf16>
    %cst_9 = arith.constant dense<0.000000e+00> : vector<4x128xf32>
    %15 = tpu.matmul %13, %14, %cst_9 {dimension_numbers = #tpu.dot_dimension_numbers<[1], [0], [0], [1], [0, 0, 1, 1], [], []>} : vector<4x2048xbf16>, vector<2048x128xbf16>, vector<4x128xf32> -> vector<4x128xf32>
    %c0_10 = arith.constant 0 : index
    %c0_11 = arith.constant 0 : index
    %16 = vector.load %arg5[%c0_10, %c0_11] : memref<1x128xf32, #tpu.memory_space<vmem>>, vector<1x128xf32>
    %17 = vector.broadcast %16 : vector<1x128xf32> to vector<4x128xf32>
    %18 = arith.addf %15, %17 : vector<4x128xf32>
    %cst_12 = arith.constant dense<0xFF800000> : vector<4xf32>
    %19 = vector.multi_reduction <maximumf>, %18, %cst_12 [1] : vector<4x128xf32> to vector<4xf32>
    %20 = vector.shape_cast %19 : vector<4xf32> to vector<4x1xf32>
    %21 = vector.broadcast %20 : vector<4x1xf32> to vector<4x128xf32>
    %22 = arith.subf %18, %21 : vector<4x128xf32>
    %23 = math.exp %22 : vector<4x128xf32>
    %cst_13 = arith.constant dense<0.000000e+00> : vector<4xf32>
    %24 = vector.multi_reduction <add>, %23, %cst_13 [1] : vector<4x128xf32> to vector<4xf32>
    %25 = vector.shape_cast %24 : vector<4xf32> to vector<4x1xf32>
    %26 = vector.broadcast %25 : vector<4x1xf32> to vector<4x128xf32>
    %27 = arith.divf %23, %26 : vector<4x128xf32>
    %28 = vector.shape_cast %27 : vector<4x128xf32> to vector<1x4x128xf32>
    %c0_14 = arith.constant 0 : index
    %c0_15 = arith.constant 0 : index
    %c0_16 = arith.constant 0 : index
    %29 = vector.load %arg6[%c0_14, %c0_15, %c0_16] : memref<1x4x128xf32, #tpu.memory_space<vmem>>, vector<1x4x128xf32>
    tpu.vector_store %arg6[%c0_14, %c0_15, %c0_16], %28 {strides = array<i32>} : memref<1x4x128xf32, #tpu.memory_space<vmem>>, vector<1x4x128xf32>,
    return
  }
  func.func @transform_0(%arg0: i32) -> (i32, i32, i32) {
    %c0_i32 = arith.constant 0 : i32
    %c0_i32_0 = arith.constant 0 : i32
    %c0_i32_1 = arith.constant 0 : i32
    return %arg0, %c0_i32, %c0_i32_0 : i32, i32, i32
  }
  func.func @transform_1(%arg0: i32) -> (i32, i32) {
    %c0_i32 = arith.constant 0 : i32
    %c0_i32_0 = arith.constant 0 : i32
    %c0_i32_1 = arith.constant 0 : i32
    return %c0_i32, %c0_i32_0 : i32, i32
  }
  func.func @transform_2(%arg0: i32) -> (i32, i32) {
    %c0_i32 = arith.constant 0 : i32
    %c0_i32_0 = arith.constant 0 : i32
    %c0_i32_1 = arith.constant 0 : i32
    return %c0_i32, %c0_i32_0 : i32, i32
  }
  func.func @transform_3(%arg0: i32) -> (i32, i32) {
    %c0_i32 = arith.constant 0 : i32
    %c0_i32_0 = arith.constant 0 : i32
    %c0_i32_1 = arith.constant 0 : i32
    return %c0_i32, %c0_i32_0 : i32, i32
  }
  func.func @transform_4(%arg0: i32) -> (i32, i32) {
    %c0_i32 = arith.constant 0 : i32
    %c0_i32_0 = arith.constant 0 : i32
    %c0_i32_1 = arith.constant 0 : i32
    return %c0_i32, %c0_i32_0 : i32, i32
  }
  func.func @transform_5(%arg0: i32) -> (i32, i32, i32) {
    %c0_i32 = arith.constant 0 : i32
    %c0_i32_0 = arith.constant 0 : i32
    %c0_i32_1 = arith.constant 0 : i32
    return %arg0, %c0_i32, %c0_i32_0 : i32, i32, i32
  }
}

</mosaic_0001>

<bundles_post_ra>
// kernel: net_forward.1
= control target key start
LH: loop header
LB: loop body
LE: loop exit
PB: predicated region body
PF: predicated region fallthrough
CT: control target
= control target key end

     0   :  { %s14712_s0 = inlined_call_operand.vmem [shape: bf16[2,4,1296], index: 0, kind: input, shape index: {}]   ;;  %s14713_s1 = inlined_call_operand.hbm [shape: bf16[1296,2048], index: 1, kind: input, shape index: {}]   ;;  %s14714_s2 = inlined_call_operand.hbm [shape: f32[1,2048], index: 2, kind: input, shape index: {}]   ;;  %s14715_s3 = inlined_call_operand.hbm [shape: bf16[2048,128], index: 3, kind: input, shape index: {}]   ;;  %s14716_s4 = inlined_call_operand.hbm [shape: f32[1,128], index: 4, kind: input, shape index: {}]   ;;  %s14717_s5 = inlined_call_operand.hbm [shape: f32[2,4,128], index: 5, kind: output, shape index: {}]  }
   0x1   :  { %14721 = sst [smem:[#allocation15_spill]] %s14713_s1 }
   0x2   :  { %10 = vsyncpa [#allocation3], 0 }
   0x3   :  { %11 = vsyncpa [#allocation6], 0 }
   0x4   :  { %12 = vsyncpa [#allocation9], 0 }
   0x5   :  { %13 = vsyncpa [#allocation4], 0 }
   0x6   :  { %15 = vsyncpa [#allocation4 + $0x1], 0  ;;  %s14066_s18 = smov 0   ;;  %s14068_s19 = smov 0  }
   0x7   :  { %s14070_s20 = smov 0   ;;  %s14072_s21 = smov 0  }
   0x8 LB: > { %s14087_s22 = sadd.s32 4294967295, %s14023_s21   ;;  %s11770_s23 = sadd.s32 4294967294, %s14023_s21   ;;  %s14023_s21 = sphi %s14072_s21, %s14740_s21   ;;  %s14019_s20 = sphi %s14070_s20, %s14739_s20   ;;  %s14015_s19 = sphi %s14068_s19, %s14738_s19   ;;  %s14011_s18 = sphi %s14066_s18, %s14737_s18  }
   0x9   : > { %s14091_s24 = sadd.s32 1, %s14023_s21   ;;  %s138_s25 = sadd.s32 1, %s14019_s20 }
   0xa   : > { %s135_s26 = ssub.s32 %s14023_s21, %s14091_s24  ;;  %p148_p0 = scmp.ne.s32.totalorder %s14019_s20, %s14015_s19 }
   0xb   : > { %p136_p1 = scmp.eq.s32.totalorder %s135_s26, 0  ;;  %p149_p2 = scmp.eq.s32.totalorder %s14087_s22, 1 }
   0xc   : > { %p154_p3 = scmp.ne.s32.totalorder %s14015_s19, %s14011_s18  ;;  %p155_p4 = scmp.eq.s32.totalorder %s11770_s23, 1 }
   0xd   : > { %s14102_s27 = scalar_select %p136_p1, %s14019_s20, %s138_s25  }
   0xe   : > { %p14104_p5 = por %p149_p2, %p148_p0  ;;  %p14108_p6 = por %p155_p4, %p154_p3 }
   0xf   : > { %p11771_p7 = scmp.ge.s32.totalorder %s14023_s21, 1  ;;  %p162_p8 = scmp.lt.s32.totalorder %s14023_s21, 3 }
  0x10   : > { %s14722_s28 = scalar_select %p14104_p5, 1, 0 }
  0x11   : > { %s14723_s29 = scalar_select %p14108_p6, 1, 0 }
  0x12   : > { %p14718_p9 = scmp.eq.s32.totalorder %s14087_s22, 0  ;;  %p14115_p10 = pnand %p11771_p7, %p162_p8 }
  0x13   : > { %s14025_s6 = smov [#allocation5]   ;;  %s14026_s8 = smov [#allocation2]  }
  0x14   : > { %s14724_s30 = scalar_select %p14115_p10, 1, 0 }
  0x15   : > { %s188_s7 = sshll.u32 %s14025_s6, 4  ;;  %p13592_p11 = pneg %p14115_p10  ;;  %s189_s7 = int_to_ptr.vmem [resolvable:$true] %s188_s7 }
  0x16   : > { %s174_s9 = sshll.u32 %s14026_s8, 4  ;;  %s14027_s11 = smov [#allocation7]   ;;  %s14127_s9 = int_to_ptr.vmem [resolvable:$true] %s174_s9 }
  0x17   : > { %p14123_p12 = pnand %p14718_p9, %p13592_p11  ;;  %s14129_s12 = sshll.u32 %s14027_s11, 4  ;;  %s199_s12 = int_to_ptr.vmem [resolvable:$true] %s14129_s12 }
  0x18   : > { %s13837_s15 = scalar_lea.hbm %s14714_s2, 256 }
  0x19   : > { %p13838_p13 = scmp.ne.s32.totalorder %s14714_s2, %s13837_s15  ;;  %p14139_p0 = pneg %p14123_p12 }
  0x1a   : > { %p13844_p3 = scmp.lt.u32.totalorder %s13837_s15, %s14714_s2 }
  0x1b   : > { %p13840_p1 = pnand %p14139_p0, %p13838_p13 }
  0x1d   : > { %p13841_p2 = pneg %p13840_p1 }
  0x1f   : > { %p13846_p4 = pnand %p13844_p3, %p13841_p2 }
  0x21   : > { %13849 = shalt.err (!%p13846_p4)
}
  0x22   : > { %s13850_s6 = scalar_lea.vmem %s189_s7, 256  ;;  %p13858_p9 = scmp.lt.s32.totalorder %s189_s7, %s189_s7 }
  0x23   : > { %p13851_p7 = scmp.ne.s32.totalorder %s189_s7, %s13850_s6  ;;  %p13859_p6 = scmp.lt.s32.totalorder %s13850_s6, %s13850_s6 }
  0x25   : > { %p13853_p8 = pnand %p13851_p7, %p14139_p0  ;;  %p13860_p5 = por %p13859_p6, %p13858_p9 }
  0x27   : > { %p13854_p11 = pneg %p13853_p8 }
  0x29   : > { %p13861_p10 = pnand %p13860_p5, %p13854_p11 }
  0x2b   : > { %13864 = shalt.err (!%p13861_p10)
}
  0x2c   : > { %13598 = dma.hbm_to_vmem [thread:$0]  (!%p14123_p12), %s14714_s2, 256, %s189_s7, [#allocation6]  }
  0x2d   : > { %s14727_s1 = sld [smem:[#allocation15_spill]] }
  0x33   : > { %s13865_s15 = scalar_lea.hbm %s14727_s1, 165888 }
  0x34   : > { %p13866_p13 = scmp.ne.s32.totalorder %s14727_s1, %s13865_s15  ;;  %p13872_p5 = scmp.lt.u32.totalorder %s13865_s15, %s14727_s1 }
  0x36   : > { %p13868_p1 = pnand %p13866_p13, %p14139_p0 }
  0x38   : > { %p13869_p6 = pneg %p13868_p1 }
  0x3a   : > { %p13874_p9 = pnand %p13872_p5, %p13869_p6 }
  0x3c   : > { %13877 = shalt.err (!%p13874_p9)
}
  0x3d   : > { %s13878_s7 = scalar_lea.vmem %s14127_s9, 165888  ;;  %p13886_p4 = scmp.lt.s32.totalorder %s14127_s9, %s14127_s9 }
  0x3e   : > { %p13879_p10 = scmp.ne.s32.totalorder %s14127_s9, %s13878_s7  ;;  %p13887_p7 = scmp.lt.s32.totalorder %s13878_s7, %s13878_s7 }
  0x40   : > { %p13881_p2 = pnand %p13879_p10, %p14139_p0  ;;  %p13888_p8 = por %p13887_p7, %p13886_p4 }
  0x42   : > { %p13882_p3 = pneg %p13881_p2 }
  0x44   : > { %p13889_p11 = pnand %p13888_p8, %p13882_p3 }
  0x46   : > { %13892 = shalt.err (!%p13889_p11)
}
  0x47   : > { %s14028_s6 = smov 1024   ;;  %s14029_s8 = smov 64  }
  0x48   : > { %13595 = dma.hbm_to_vmem [thread:$0]  (!%p14123_p12), %s14727_s1, 165888, %s14127_s9, [#allocation3], %s14028_s6, %s14028_s6, %s14029_s8  }
  0x49   : > { %s13893_s16 = scalar_lea.hbm %s14715_s3, 16384 }
  0x4a   : > { %p13894_p13 = scmp.ne.s32.totalorder %s14715_s3, %s13893_s16  ;;  %p13900_p5 = scmp.lt.u32.totalorder %s13893_s16, %s14715_s3 }
  0x4c   : > { %p13896_p1 = pnand %p13894_p13, %p14139_p0 }
  0x4e   : > { %p13897_p6 = pneg %p13896_p1 }
  0x50   : > { %p13902_p9 = pnand %p13900_p5, %p13897_p6 }
  0x52   : > { %13905 = shalt.err (!%p13902_p9)
}
  0x53   : > { %s13906_s11 = scalar_lea.vmem %s199_s12, 16384  ;;  %p13914_p4 = scmp.lt.s32.totalorder %s199_s12, %s199_s12 }
  0x54   : > { %p13907_p10 = scmp.ne.s32.totalorder %s199_s12, %s13906_s11  ;;  %p13915_p7 = scmp.lt.s32.totalorder %s13906_s11, %s13906_s11 }
  0x56   : > { %p13909_p2 = pnand %p13907_p10, %p14139_p0  ;;  %p13916_p8 = por %p13915_p7, %p13914_p4 }
  0x58   : > { %p13910_p3 = pneg %p13909_p2 }
  0x5a   : > { %p13917_p11 = pnand %p13916_p8, %p13910_p3 }
  0x5c   : > { %13920 = shalt.err (!%p13917_p11)
}
  0x5d   : > { %s14030_s9 = smov 4   ;;  %s14031_s14 = smov [#allocation8]  }
  0x5e   : > { %13601 = dma.hbm_to_vmem [thread:$0]  (!%p14123_p12), %s14715_s3, 16384, %s199_s12, [#allocation6], %s14029_s8, %s14029_s8, %s14030_s9  }
  0x5f   : > { %s212_s15 = sshll.u32 %s14031_s14, 4  ;;  %s13921_s25 = scalar_lea.hbm %s14716_s4, 16  ;;  %s213_s15 = int_to_ptr.vmem [resolvable:$true] %s212_s15 }
  0x60   : > { %p13922_p13 = scmp.ne.s32.totalorder %s14716_s4, %s13921_s25  ;;  %p13928_p5 = scmp.lt.u32.totalorder %s13921_s25, %s14716_s4 }
  0x62   : > { %p13924_p1 = pnand %p13922_p13, %p14139_p0 }
  0x64   : > { %p13925_p6 = pneg %p13924_p1 }
  0x66   : > { %p13930_p9 = pnand %p13928_p5, %p13925_p6 }
  0x68   : > { %13933 = shalt.err (!%p13930_p9)
}
  0x69   : > { %s13934_s12 = scalar_lea.vmem %s213_s15, 16  ;;  %s13941_s8 = scalar_lea.vmem %s213_s15, 32 }
  0x6a   : > { %p13935_p10 = scmp.ne.s32.totalorder %s213_s15, %s13934_s12  ;;  %p13942_p4 = scmp.lt.s32.totalorder %s213_s15, %s213_s15 }
  0x6b   : > { %p13943_p7 = scmp.lt.s32.totalorder %s13941_s8, %s13934_s12 }
  0x6c   : > { %p13937_p2 = pnand %p13935_p10, %p14139_p0 }
  0x6d   : > { %p13944_p8 = por %p13943_p7, %p13942_p4 }
  0x6e   : > { %p13938_p3 = pneg %p13937_p2 }
  0x70   : > { %p13945_p11 = pnand %p13944_p8, %p13938_p3 }
  0x72   : > { %13948 = shalt.err (!%p13945_p11)
}
  0x73   : > { %13604 = dma.hbm_to_vmem [thread:$0]  (!%p14123_p12), %s14716_s4, 16, %s213_s15, [#allocation9]  }
  0x74   : > { %p14728_p13 = scmp.ne.s32.totalorder %s14724_s30, 0 }
  0x75   : > { %p14729_p1 = scmp.eq.s32.totalorder (!%p14728_p13), %s14087_s22, 0 }
  0x76   : > { %233 = sbr.rel (%p14728_p13) target bundleno = 2386 (0x952), region = 40 }
  0x7d   : > { %13994 = dma.done.wait (%p14729_p1), [#allocation3], 165888   ;;  %p14730_p0 = pmov %p14729_p1 }
  0x7f   : > { %13996 = vsyncadd (%p14730_p0), [#allocation3], 4294801408  ;;  %p14731_p6 = pmov %p14730_p0 }
  0x80   : > { %p14732_p5 = pmov %p14730_p0 }
  0x81   : > { %13998 = dma.done.wait (%p14731_p6), [#allocation6], 16640  }
  0x82   : > { %14000 = vsyncadd (%p14732_p5), [#allocation6], 4294950656  ;;  %p14733_p9 = pmov %p14730_p0 }
  0x83   : > { %p14734_p12 = pmov %p14730_p0 }
  0x84   : > { %14002 = dma.done.wait (%p14733_p9), [#allocation9], 16  }
  0x85   : > { %14004 = vsyncadd (%p14734_p12), [#allocation9], 4294967280  ;;  %v282_v0 = vld [vmem:[#allocation2] sm:$0xff]  ;;  %v283_v2 = vld [vmem:[#allocation2 + $0x8] sm:$0xff]  ;;  %p273_p10 = scmp.lt.s32.totalorder %s14087_s22, 1  ;;  %v1582_v32 = vlaneseq  ;;  %vm8205_vm0 = vcmask 130048  }
  0x86   : > { %v290_v1 = vld [vmem:[#allocation2 + $0x40] sm:$0xff]  ;;  %v291_v4 = vld [vmem:[#allocation2 + $0x48] sm:$0xff]  ;;  %v14032_v33 = vmov 1983009808   ;;  %s14034_s14 = smov 120   ;;  %vm11643_vm2 = vcmask 1043456  }
  0x87   : > { %v11785_v3 = vcombine.high %v282_v0, %v290_v1  ;;  %v11784_v5 = vcombine.low %v282_v0, %v290_v1  ;;  %v298_v6 = vld [vmem:[#allocation2 + $0x80] sm:$0xff]  ;;  %v11787_v8 = vcombine.high %v283_v2, %v291_v4  ;;  %v11786_v9 = vcombine.low %v283_v2, %v291_v4  ;;  %v299_v11 = vld [vmem:[#allocation2 + $0x88] sm:$0xff]  ;;  %s14231_s1 = scalar_select %p273_p10, %s14087_s22, 1 }
  0x88   : > { %v306_v7 = vld [vmem:[#allocation2 + $0xc0] sm:$0xff]  ;;  %v307_v12 = vld [vmem:[#allocation2 + $0xc8] sm:$0xff]  ;;  %v1667_v34 = vunpack.c.l.s4 %v14032_v33  ;;  %v14235_v43 = vshrl.u32 %v1582_v32, 7  ;;  %s270_s15 = sand.u32 1, %s14015_s19   ;;  %s13218_s17 = sshll.u32 %s14087_s22, 6 }
  0x89   : > { %v11801_v10 = vcombine.high %v298_v6, %v306_v7  ;;  %v314_v13 = vld [vmem:[#allocation2 + $0x100] sm:$0xff]  ;;  %8209 = vmatprep.subr.bf16.mxu0 %v11785_v3  ;;  %v11803_v14 = vcombine.high %v299_v11, %v307_v12  ;;  %v315_v16 = vld [vmem:[#allocation2 + $0x108] sm:$0xff]  ;;  %8455 = vmatprep.subr.bf16.mxu1 %v11787_v8  ;;  %v11800_v18 = vcombine.low %v298_v6, %v306_v7  ;;  %s13573_s30 = smul.u32 22, %s14231_s1  ;;  %s11782_s16 = sshll.u32 %s270_s15, 2 }
  0x8a   : > { %v322_v15 = vld [vmem:[#allocation2 + $0x140] sm:$0xff]  ;;  %v323_v17 = vld [vmem:[#allocation2 + $0x148] sm:$0xff]  ;;  %8210 = vmatpush1.bf16.msra.mxu0 %v11784_v5  ;;  %8456 = vmatpush1.bf16.msra.mxu1 %v11786_v9  ;;  %v11802_v19 = vcombine.low %v299_v11, %v307_v12  ;;  %v1668_v44 = vunpack.c.0.s8 %v1667_v34  ;;  %s272_s25 = scalar_lea.vmem [#allocation10], %s11782_s16  ;;  %s14670_s12 = scalar_lea.hbm %s14717_s5, %s13218_s17 }
  0x8b   : > { %8211 = vmatprep.subr.bf16.mxu0 %v11801_v10  ;;  %v11817_v20 = vcombine.high %v314_v13, %v322_v15  ;;  %8457 = vmatprep.subr.bf16.mxu1 %v11803_v14  ;;  %v11819_v21 = vcombine.high %v315_v16, %v323_v17  ;;  %v330_v22 = vld [vmem:[#allocation2 + $0x180] sm:$0xff]  ;;  %v331_v24 = vld [vmem:[#allocation2 + $0x188] sm:$0xff]  ;;  %v11816_v26 = vcombine.low %v314_v13, %v322_v15  ;;  %s14240_s13 = scalar_lea.vmem %s14712_s0, %s13573_s30  ;;  %s11670_s26 = sshll.u32 %s272_s25, 4  ;;  %s14672_s26 = int_to_ptr.vmem [resolvable:$true] %s11670_s26 }
  0x8c   : > { %v338_v23 = vld [vmem:[#allocation2 + $0x1c0] sm:$0xff]  ;;  %v339_v25 = vld [vmem:[#allocation2 + $0x1c8] sm:$0xff]  ;;  %v11818_v27 = vcombine.low %v315_v16, %v323_v17  ;;  %v14243_v53 = vsub.s32 %v1668_v44, %v14235_v43  ;;  %s11657_s8 = scalar_lea.sflag [#allocation4], %s270_s15  ;;  %s13949_s9 = scalar_lea.vmem %s14672_s26, 64 }
  0x8d   : > { %v11833_v28 = vcombine.high %v330_v22, %v338_v23  ;;  %v11835_v29 = vcombine.high %v331_v24, %v339_v25  ;;  %v346_v30 = vld [vmem:[#allocation2 + $0x200] sm:$0xff]  ;;  %v347_v35 = vld [vmem:[#allocation2 + $0x208] sm:$0xff]  ;;  %v11832_v37 = vcombine.low %v330_v22, %v338_v23  ;;  %v11834_v38 = vcombine.low %v331_v24, %v339_v25  ;;  %p13950_p2 = scmp.ne.s32.totalorder %s14672_s26, %s13949_s9  ;;  %p14735_p3 = scmp.ne.s32.totalorder %s14722_s28, 0 }
  0x8e   : > { %8212 = vmatpush1.bf16.msra.mxu0 %v11800_v18  ;;  %8458 = vmatpush1.bf16.msra.mxu1 %v11802_v19  ;;  %v354_v31 = vld [vmem:[#allocation2 + $0x240] sm:$0xff]  ;;  %v355_v36 = vld [vmem:[#allocation2 + $0x248] sm:$0xff]  ;;  %s14035_s22 = smov [#allocation10]  }
  0x8f   : > { %8213 = vmatprep.subr.bf16.mxu0 %v11817_v20  ;;  %8459 = vmatprep.subr.bf16.mxu1 %v11819_v21  ;;  %v11849_v39 = vcombine.high %v346_v30, %v354_v31  ;;  %v11851_v40 = vcombine.high %v347_v35, %v355_v36  ;;  %v362_v41 = vld [vmem:[#allocation2 + $0x280] sm:$0xff]  ;;  %v363_v45 = vld [vmem:[#allocation2 + $0x288] sm:$0xff]  ;;  %v11848_v47 = vcombine.low %v346_v30, %v354_v31  ;;  %p13951_p4 = pnand %p13950_p2, %p14735_p3  ;;  %s13953_s6 = sshll.u32 %s14035_s22, 4  ;;  %s13954_s6 = int_to_ptr.vmem [resolvable:$false] %s13953_s6 }
  0x90   : > { %v370_v42 = vld [vmem:[#allocation2 + $0x2c0] sm:$0xff]  ;;  %v371_v46 = vld [vmem:[#allocation2 + $0x2c8] sm:$0xff]  ;;  %v11850_v48 = vcombine.low %v347_v35, %v355_v36  ;;  %s13955_s1 = scalar_lea.vmem %s13954_s6, 128  ;;  %p13956_p8 = scmp.lt.s32.totalorder %s14672_s26, %s13954_s6 }
  0x91   : > { %v11865_v49 = vcombine.high %v362_v41, %v370_v42  ;;  %v11867_v50 = vcombine.high %v363_v45, %v371_v46  ;;  %v378_v51 = vld [vmem:[#allocation2 + $0x300] sm:$0xff]  ;;  %v379_v54 = vld [vmem:[#allocation2 + $0x308] sm:$0xff]  ;;  %v11864_v56 = vcombine.low %v362_v41, %v370_v42  ;;  %v11866_v57 = vcombine.low %v363_v45, %v371_v46  ;;  %p13952_p7 = pneg %p13951_p4  ;;  %p13957_p11 = scmp.lt.s32.totalorder %s13955_s1, %s13949_s9 }
  0x92   : > { %8214 = vmatpush1.bf16.msra.mxu0 %v11816_v26  ;;  %8460 = vmatpush1.bf16.msra.mxu1 %v11818_v27  ;;  %v386_v52 = vld [vmem:[#allocation2 + $0x340] sm:$0xff]  ;;  %v387_v55 = vld [vmem:[#allocation2 + $0x348] sm:$0xff] }
  0x93   : > { %8215 = vmatprep.subr.bf16.mxu0 %v11833_v28  ;;  %8461 = vmatprep.subr.bf16.mxu1 %v11835_v29  ;;  %v11881_v58 = vcombine.high %v378_v51, %v386_v52  ;;  %v14246_v59 = vld [vmem:[%s14240_s13] sm:$0xff]  ;;  %v11883_v60 = vcombine.high %v379_v54, %v387_v55  ;;  %v395_v0 = vld [vmem:[#allocation2 + $0x388] sm:$0xff]  ;;  %v11880_v2 = vcombine.low %v378_v51, %v386_v52  ;;  %p13958_p13 = por %p13957_p11, %p13956_p8 }
  0x94   : > { %v394_v61 = vld [vmem:[#allocation2 + $0x380] sm:$0xff]  ;;  %v14250_v63 = vrot.slane %v14246_v59, %v14243_v53  ;;  %v403_v1 = vld [vmem:[#allocation2 + $0x3c8] sm:$0xff]  ;;  %v11882_v4 = vcombine.low %v379_v54, %v387_v55 }
  0x95   : > { %v402_v62 = vld [vmem:[#allocation2 + $0x3c0] sm:$0xff]  ;;  %v11899_v6 = vcombine.high %v395_v0, %v403_v1  ;;  %v411_v9 = vld [vmem:[#allocation2 + $0x408] sm:$0xff]  ;;  %v11898_v12 = vcombine.low %v395_v0, %v403_v1  ;;  %p13959_p1 = pnand %p13958_p13, %p13952_p7 }
  0x96   : > { %8216 = vmatpush1.bf16.msra.mxu0 %v11832_v37  ;;  %8462 = vmatpush1.bf16.msra.mxu1 %v11834_v38  ;;  %v14254_v3 = vcombine.high %v14250_v63, %v14250_v63  ;;  %v11897_v5 = vcombine.high %v394_v61, %v402_v62  ;;  %v410_v7 = vld [vmem:[#allocation2 + $0x400] sm:$0xff]  ;;  %v419_v10 = vld [vmem:[#allocation2 + $0x448] sm:$0xff]  ;;  %v11896_v11 = vcombine.low %v394_v61, %v402_v62 }
  0x97   : > { %8217 = vmatprep.subr.bf16.mxu0 %v11849_v39  ;;  %8463 = vmatprep.subr.bf16.mxu1 %v11851_v40  ;;  %v418_v8 = vld [vmem:[#allocation2 + $0x440] sm:$0xff]  ;;  %v11915_v14 = vcombine.high %v411_v9, %v419_v10  ;;  %v427_v17 = vld [vmem:[#allocation2 + $0x488] sm:$0xff]  ;;  %v11914_v20 = vcombine.low %v411_v9, %v419_v10 }
  0x98   : > { %8241 = vmatprep.mubr.bf16.mxu0 %v14254_v3  ;;  %8487 = vmatprep.mubr.bf16.mxu1 %v14254_v3  ;;  %v11913_v13 = vcombine.high %v410_v7, %v418_v8  ;;  %v426_v15 = vld [vmem:[#allocation2 + $0x480] sm:$0xff]  ;;  %v435_v18 = vld [vmem:[#allocation2 + $0x4c8] sm:$0xff]  ;;  %v11912_v19 = vcombine.low %v410_v7, %v418_v8 }
  0x99   : > { %v434_v16 = vld [vmem:[#allocation2 + $0x4c0] sm:$0xff]  ;;  %v11931_v22 = vcombine.high %v427_v17, %v435_v18  ;;  %v443_v25 = vld [vmem:[#allocation2 + $0x508] sm:$0xff]  ;;  %v11930_v28 = vcombine.low %v427_v17, %v435_v18 }
  0x9a   : > { %8218 = vmatpush1.bf16.msra.mxu0 %v11848_v47  ;;  %8464 = vmatpush1.bf16.msra.mxu1 %v11850_v48  ;;  %v11929_v21 = vcombine.high %v426_v15, %v434_v16  ;;  %v442_v23 = vld [vmem:[#allocation2 + $0x500] sm:$0xff]  ;;  %v451_v26 = vld [vmem:[#allocation2 + $0x548] sm:$0xff]  ;;  %v11928_v27 = vcombine.low %v426_v15, %v434_v16  ;;  %v1665_v15 = vcombine.high %v14246_v59, %v14246_v59 }
  0x9b   : > { %8219 = vmatprep.subr.bf16.mxu0 %v11865_v49  ;;  %8465 = vmatprep.subr.bf16.mxu1 %v11867_v50  ;;  %v450_v24 = vld [vmem:[#allocation2 + $0x540] sm:$0xff]  ;;  %v11947_v30 = vcombine.high %v443_v25, %v451_v26  ;;  %v459_v34 = vld [vmem:[#allocation2 + $0x588] sm:$0xff]  ;;  %v11946_v37 = vcombine.low %v443_v25, %v451_v26 }
  0x9c   : > { %v11945_v29 = vcombine.high %v442_v23, %v450_v24  ;;  %v458_v31 = vld [vmem:[#allocation2 + $0x580] sm:$0xff]  ;;  %v467_v35 = vld [vmem:[#allocation2 + $0x5c8] sm:$0xff]  ;;  %v11944_v36 = vcombine.low %v442_v23, %v450_v24  ;;  %v14261_v24 = vrot.slane %v1665_v15, %v14243_v53 }
  0x9d   : > { %v466_v33 = vld [vmem:[#allocation2 + $0x5c0] sm:$0xff]  ;;  %v11963_v39 = vcombine.high %v459_v34, %v467_v35  ;;  %v475_v42 = vld [vmem:[#allocation2 + $0x608] sm:$0xff]  ;;  %v11962_v46 = vcombine.low %v459_v34, %v467_v35 }
  0x9e   : > { %8220 = vmatpush1.bf16.msra.mxu0 %v11864_v56  ;;  %8466 = vmatpush1.bf16.msra.mxu1 %v11866_v57  ;;  %v11961_v38 = vcombine.high %v458_v31, %v466_v33  ;;  %v474_v40 = vld [vmem:[#allocation2 + $0x600] sm:$0xff]  ;;  %v483_v44 = vld [vmem:[#allocation2 + $0x648] sm:$0xff]  ;;  %v11960_v45 = vcombine.low %v458_v31, %v466_v33  ;;  %v14265_v35 = vcombine.high %v14261_v24, %v14261_v24 }
  0x9f   : > { %8221 = vmatprep.subr.bf16.mxu0 %v11881_v58  ;;  %8467 = vmatprep.subr.bf16.mxu1 %v11883_v60  ;;  %v482_v41 = vld [vmem:[#allocation2 + $0x640] sm:$0xff]  ;;  %v11979_v48 = vcombine.high %v475_v42, %v483_v44  ;;  %v491_v51 = vld [vmem:[#allocation2 + $0x688] sm:$0xff]  ;;  %v11978_v55 = vcombine.low %v475_v42, %v483_v44 }
  0xa0   : > { %v11977_v47 = vcombine.high %v474_v40, %v482_v41  ;;  %v490_v49 = vld [vmem:[#allocation2 + $0x680] sm:$0xff]  ;;  %v499_v52 = vld [vmem:[#allocation2 + $0x6c8] sm:$0xff]  ;;  %v11976_v54 = vcombine.low %v474_v40, %v482_v41 }
  0xa1   : > { %v498_v50 = vld [vmem:[#allocation2 + $0x6c0] sm:$0xff]  ;;  %v11995_v57 = vcombine.high %v491_v51, %v499_v52  ;;  %v507_v61 = vld [vmem:[#allocation2 + $0x708] sm:$0xff]  ;;  %v11994_v1 = vcombine.low %v491_v51, %v499_v52 }
  0xa2   : > { %8222 = vmatpush1.bf16.msra.mxu0 %v11880_v2  ;;  %8468 = vmatpush1.bf16.msra.mxu1 %v11882_v4  ;;  %v11993_v56 = vcombine.high %v490_v49, %v498_v50  ;;  %v506_v58 = vld [vmem:[#allocation2 + $0x700] sm:$0xff]  ;;  %v515_v62 = vld [vmem:[#allocation2 + $0x748] sm:$0xff]  ;;  %v11992_v0 = vcombine.low %v490_v49, %v498_v50 }
  0xa3   : > { %8223 = vmatprep.subr.bf16.mxu0 %v11897_v5  ;;  %8469 = vmatprep.subr.bf16.mxu1 %v11899_v6  ;;  %v514_v60 = vld [vmem:[#allocation2 + $0x740] sm:$0xff]  ;;  %v12011_v4 = vcombine.high %v507_v61, %v515_v62  ;;  %v523_v7 = vld [vmem:[#allocation2 + $0x788] sm:$0xff]  ;;  %v12010_v10 = vcombine.low %v507_v61, %v515_v62 }
  0xa4   : > { %v12009_v2 = vcombine.high %v506_v58, %v514_v60  ;;  %v522_v5 = vld [vmem:[#allocation2 + $0x780] sm:$0xff]  ;;  %v531_v8 = vld [vmem:[#allocation2 + $0x7c8] sm:$0xff]  ;;  %v12008_v9 = vcombine.low %v506_v58, %v514_v60 }
  0xa5   : > { %v530_v6 = vld [vmem:[#allocation2 + $0x7c0] sm:$0xff]  ;;  %v539_v16 = vld [vmem:[#allocation2 + $0x808] sm:$0xff] }
  0xa6   : > { %8224 = vmatpush1.bf16.msra.mxu0 %v11896_v11  ;;  %8470 = vmatpush1.bf16.msra.mxu1 %v11898_v12  ;;  %v12025_v11 = vcombine.high %v522_v5, %v530_v6  ;;  %v12027_v12 = vcombine.high %v523_v7, %v531_v8  ;;  %v547_v17 = vld [vmem:[#allocation2 + $0x848] sm:$0xff]  ;;  %v12024_v18 = vcombine.low %v522_v5, %v530_v6  ;;  %v562_v23 = vld [vmem:[#allocation2 + $0x8c0] sm:$0xff] }
  0xa7   : > { %8225 = vmatprep.subr.bf16.mxu0 %v11913_v13  ;;  %8471 = vmatprep.subr.bf16.mxu1 %v11915_v14  ;;  %v538_v13 = vld [vmem:[#allocation2 + $0x800] sm:$0xff]  ;;  %v555_v25 = vld [vmem:[#allocation2 + $0x888] sm:$0xff]  ;;  %v12042_v59 = vcombine.low %v539_v16, %v547_v17 }
  0xa8   : > { %v546_v14 = vld [vmem:[#allocation2 + $0x840] sm:$0xff]  ;;  %v563_v26 = vld [vmem:[#allocation2 + $0x8c8] sm:$0xff] }
  0xa9   : > { %v571_v31 = vld [vmem:[#allocation2 + $0x908] sm:$0xff]  ;;  %v12059_v33 = vcombine.high %v555_v25, %v563_v26  ;;  %v594_v40 = vld [vmem:[#allocation2 + $0x9c0] sm:$0xff] }
  0xaa   : > { %8226 = vmatpush1.bf16.msra.mxu0 %v11912_v19  ;;  %8472 = vmatpush1.bf16.msra.mxu1 %v11914_v20  ;;  %v12026_v19 = vcombine.low %v523_v7, %v531_v8  ;;  %v12041_v20 = vcombine.high %v538_v13, %v546_v14  ;;  %v579_v34 = vld [vmem:[#allocation2 + $0x948] sm:$0xff]  ;;  %v610_v49 = vld [vmem:[#allocation2 + $0xa40] sm:$0xff] }
  0xab   : > { %8227 = vmatprep.subr.bf16.mxu0 %v11929_v21  ;;  %8473 = vmatprep.subr.bf16.mxu1 %v11931_v22  ;;  %v12043_v21 = vcombine.high %v539_v16, %v547_v17  ;;  %v554_v22 = vld [vmem:[#allocation2 + $0x880] sm:$0xff]  ;;  %v587_v41 = vld [vmem:[#allocation2 + $0x988] sm:$0xff]  ;;  %v12075_v42 = vcombine.high %v571_v31, %v579_v34 }
  0xac   : > { %v595_v44 = vld [vmem:[#allocation2 + $0x9c8] sm:$0xff]  ;;  %v626_v58 = vld [vmem:[#allocation2 + $0xac0] sm:$0xff] }
  0xad   : > { %v603_v50 = vld [vmem:[#allocation2 + $0xa08] sm:$0xff]  ;;  %v12091_v51 = vcombine.high %v587_v41, %v595_v44  ;;  %v642_v5 = vld [vmem:[#allocation2 + $0xb40] sm:$0xff] }
  0xae   : > { %8228 = vmatpush1.bf16.msra.mxu0 %v11928_v27  ;;  %8474 = vmatpush1.bf16.msra.mxu1 %v11930_v28  ;;  %v12040_v27 = vcombine.low %v538_v13, %v546_v14  ;;  %v12057_v28 = vcombine.high %v554_v22, %v562_v23  ;;  %v611_v52 = vld [vmem:[#allocation2 + $0xa48] sm:$0xff]  ;;  %v658_v13 = vld [vmem:[#allocation2 + $0xbc0] sm:$0xff] }
  0xaf   : > { %8229 = vmatprep.subr.bf16.mxu0 %v11945_v29  ;;  %8475 = vmatprep.subr.bf16.mxu1 %v11947_v30  ;;  %v570_v29 = vld [vmem:[#allocation2 + $0x900] sm:$0xff]  ;;  %v619_v60 = vld [vmem:[#allocation2 + $0xa88] sm:$0xff]  ;;  %v12107_v61 = vcombine.high %v603_v50, %v611_v52 }
  0xb0   : > { %v578_v30 = vld [vmem:[#allocation2 + $0x940] sm:$0xff]  ;;  %v627_v62 = vld [vmem:[#allocation2 + $0xac8] sm:$0xff] }
  0xb1   : > { %v635_v6 = vld [vmem:[#allocation2 + $0xb08] sm:$0xff]  ;;  %v12123_v7 = vcombine.high %v619_v60, %v627_v62 }
  0xb2   : > { %8230 = vmatpush1.bf16.msra.mxu0 %v11944_v36  ;;  %8476 = vmatpush1.bf16.msra.mxu1 %v11946_v37  ;;  %v12056_v36 = vcombine.low %v554_v22, %v562_v23  ;;  %v12058_v37 = vcombine.low %v555_v25, %v563_v26  ;;  %v643_v8 = vld [vmem:[#allocation2 + $0xb48] sm:$0xff] }
  0xb3   : > { %8231 = vmatprep.subr.bf16.mxu0 %v11961_v38  ;;  %8477 = vmatprep.subr.bf16.mxu1 %v11963_v39  ;;  %v12073_v38 = vcombine.high %v570_v29, %v578_v30  ;;  %v586_v39 = vld [vmem:[#allocation2 + $0x980] sm:$0xff]  ;;  %v651_v14 = vld [vmem:[#allocation2 + $0xb88] sm:$0xff]  ;;  %v12139_v15 = vcombine.high %v635_v6, %v643_v8 }
  0xb4   : > { %v659_v16 = vld [vmem:[#allocation2 + $0xbc8] sm:$0xff] }
  0xb5   : > { %v667_v22 = vld [vmem:[#allocation2 + $0xc08] sm:$0xff]  ;;  %v12155_v23 = vcombine.high %v651_v14, %v659_v16 }
  0xb6   : > { %8232 = vmatpush1.bf16.msra.mxu0 %v11960_v45  ;;  %8478 = vmatpush1.bf16.msra.mxu1 %v11962_v46  ;;  %v12072_v45 = vcombine.low %v570_v29, %v578_v30  ;;  %v12074_v46 = vcombine.low %v571_v31, %v579_v34  ;;  %v675_v25 = vld [vmem:[#allocation2 + $0xc48] sm:$0xff]  ;;  %v690_v29 = vld [vmem:[#allocation2 + $0xcc0] sm:$0xff] }
  0xb7   : > { %8233 = vmatprep.subr.bf16.mxu0 %v11977_v47  ;;  %8479 = vmatprep.subr.bf16.mxu1 %v11979_v48  ;;  %v12089_v47 = vcombine.high %v586_v39, %v594_v40  ;;  %v602_v48 = vld [vmem:[#allocation2 + $0xa00] sm:$0xff]  ;;  %v683_v30 = vld [vmem:[#allocation2 + $0xc88] sm:$0xff]  ;;  %v12171_v31 = vcombine.high %v667_v22, %v675_v25 }
  0xba   : > { %8234 = vmatpush1.bf16.msra.mxu0 %v11976_v54  ;;  %8480 = vmatpush1.bf16.msra.mxu1 %v11978_v55  ;;  %v12088_v54 = vcombine.low %v586_v39, %v594_v40  ;;  %v12090_v55 = vcombine.low %v587_v41, %v595_v44  ;;  %v706_v39 = vld [vmem:[#allocation2 + $0xd40] sm:$0xff]  ;;  %v699_v40 = vld [vmem:[#allocation2 + $0xd08] sm:$0xff] }
  0xbb   : > { %8235 = vmatprep.subr.bf16.mxu0 %v11993_v56  ;;  %8481 = vmatprep.subr.bf16.mxu1 %v11995_v57  ;;  %v12105_v56 = vcombine.high %v602_v48, %v610_v49  ;;  %v618_v57 = vld [vmem:[#allocation2 + $0xa80] sm:$0xff] }
  0xbe   : > { %8236 = vmatpush1.bf16.msra.mxu0 %v11992_v0  ;;  %8482 = vmatpush1.bf16.msra.mxu1 %v11994_v1  ;;  %v12104_v0 = vcombine.low %v602_v48, %v610_v49  ;;  %v12106_v1 = vcombine.low %v603_v50, %v611_v52  ;;  %v722_v48 = vld [vmem:[#allocation2 + $0xdc0] sm:$0xff]  ;;  %v715_v49 = vld [vmem:[#allocation2 + $0xd88] sm:$0xff] }
  0xbf   : > { %8237 = vmatprep.subr.bf16.mxu0 %v12009_v2  ;;  %8483 = vmatprep.subr.bf16.mxu1 %v12011_v4  ;;  %v12121_v2 = vcombine.high %v618_v57, %v626_v58  ;;  %v634_v4 = vld [vmem:[#allocation2 + $0xb00] sm:$0xff] }
  0xc0   : > { %v12136_v17 = vcombine.low %v634_v4, %v642_v5 }
  0xc2   : > { %8238 = vmatpush1.bf16.msra.mxu0 %v12008_v9  ;;  %8484 = vmatpush1.bf16.msra.mxu1 %v12010_v10  ;;  %v12120_v9 = vcombine.low %v618_v57, %v626_v58  ;;  %v12122_v10 = vcombine.low %v619_v60, %v627_v62  ;;  %v738_v57 = vld [vmem:[#allocation2 + $0xe40] sm:$0xff]  ;;  %v731_v58 = vld [vmem:[#allocation2 + $0xe08] sm:$0xff] }
  0xc3   : > { %8239 = vmatprep.subr.bf16.mxu0 %v12025_v11  ;;  %8485 = vmatprep.subr.bf16.mxu1 %v12027_v12  ;;  %v12137_v11 = vcombine.high %v634_v4, %v642_v5  ;;  %v650_v12 = vld [vmem:[#allocation2 + $0xb80] sm:$0xff]  ;;  %v747_v5 = vld [vmem:[#allocation2 + $0xe88] sm:$0xff] }
  0xc4   : > { %v12152_v26 = vcombine.low %v650_v12, %v658_v13  ;;  %v754_v4 = vld [vmem:[#allocation2 + $0xec0] sm:$0xff] }
  0xc6   : > { %8240 = vmatpush1.bf16.msra.mxu0 %v12024_v18  ;;  %8486 = vmatpush1.bf16.msra.mxu1 %v12026_v19  ;;  %v12138_v18 = vcombine.low %v635_v6, %v643_v8  ;;  %v12153_v19 = vcombine.high %v650_v12, %v658_v13  ;;  %v770_v12 = vld [vmem:[#allocation2 + $0xf40] sm:$0xff]  ;;  %v763_v13 = vld [vmem:[#allocation2 + $0xf08] sm:$0xff] }
  0xc7   : > { %8250 = vmatprep.subr.bf16.mxu0 %v12041_v20  ;;  %8496 = vmatprep.subr.bf16.mxu1 %v12043_v21  ;;  %v666_v20 = vld [vmem:[#allocation2 + $0xc00] sm:$0xff] }
  0xc8   : > { %v674_v21 = vld [vmem:[#allocation2 + $0xc40] sm:$0xff] }
  0xc9   : > { %8242 = vmatmul.mubr.bf16.vlgmr.msra.gmra.mrb[0].mxu0 %v14250_v63  ;;  %8488 = vmatmul.mubr.bf16.vlgmr.msra.gmra.mrb[0].mxu1 %v14250_v63  ;;  %v12168_v34 = vcombine.low %v666_v20, %v674_v21 }
  0xca   : > { %8251 = vmatpush1.bf16.msra.mxu0 %v12040_v27  ;;  %8497 = vmatpush1.bf16.msra.mxu1 %v12042_v59  ;;  %v12154_v27 = vcombine.low %v651_v14, %v659_v16  ;;  %v12169_v59 = vcombine.high %v666_v20, %v674_v21  ;;  %v786_v20 = vld [vmem:[#allocation2 + $0xfc0] sm:$0xff]  ;;  %v779_v21 = vld [vmem:[#allocation2 + $0xf88] sm:$0xff] }
  0xcb   : > { %8252 = vmatprep.subr.bf16.mxu0 %v12057_v28  ;;  %8498 = vmatprep.subr.bf16.mxu1 %v12059_v33  ;;  %v682_v28 = vld [vmem:[#allocation2 + $0xc80] sm:$0xff]  ;;  %v691_v33 = vld [vmem:[#allocation2 + $0xcc8] sm:$0xff] }
  0xcc   : > { %8282 = vmatprep.mubr.bf16.mxu0 %v14265_v35  ;;  %8528 = vmatprep.mubr.bf16.mxu1 %v14265_v35  ;;  %v12187_v41 = vcombine.high %v683_v30, %v691_v33  ;;  %v12184_v44 = vcombine.low %v682_v28, %v690_v29 }
  0xce   : > { %8253 = vmatpush1.bf16.msra.mxu0 %v12056_v36  ;;  %8499 = vmatpush1.bf16.msra.mxu1 %v12058_v37  ;;  %v12170_v36 = vcombine.low %v667_v22, %v675_v25  ;;  %v12185_v37 = vcombine.high %v682_v28, %v690_v29  ;;  %v802_v28 = vld [vmem:[#allocation2 + $0x1040] sm:$0xff]  ;;  %v795_v29 = vld [vmem:[#allocation2 + $0x1008] sm:$0xff] }
  0xcf   : > { %8254 = vmatprep.subr.bf16.mxu0 %v12073_v38  ;;  %8500 = vmatprep.subr.bf16.mxu1 %v12075_v42  ;;  %v698_v38 = vld [vmem:[#allocation2 + $0xd00] sm:$0xff]  ;;  %v707_v42 = vld [vmem:[#allocation2 + $0xd48] sm:$0xff] }
  0xd0   : > { %v12203_v50 = vcombine.high %v699_v40, %v707_v42  ;;  %v12200_v52 = vcombine.low %v698_v38, %v706_v39 }
  0xd2   : > { %8255 = vmatpush1.bf16.msra.mxu0 %v12072_v45  ;;  %8501 = vmatpush1.bf16.msra.mxu1 %v12074_v46  ;;  %v12186_v45 = vcombine.low %v683_v30, %v691_v33  ;;  %v12201_v46 = vcombine.high %v698_v38, %v706_v39  ;;  %v803_v30 = vld [vmem:[#allocation2 + $0x1048] sm:$0xff]  ;;  %v810_v38 = vld [vmem:[#allocation2 + $0x1080] sm:$0xff] }
  0xd3   : > { %8256 = vmatprep.subr.bf16.mxu0 %v12089_v47  ;;  %8502 = vmatprep.subr.bf16.mxu1 %v12091_v51  ;;  %v714_v47 = vld [vmem:[#allocation2 + $0xd80] sm:$0xff]  ;;  %v723_v51 = vld [vmem:[#allocation2 + $0xdc8] sm:$0xff] }
  0xd4   : > { %v12219_v60 = vcombine.high %v715_v49, %v723_v51  ;;  %v12216_v62 = vcombine.low %v714_v47, %v722_v48  ;;  %v14272_v33 = vld [vmem:[%s14240_s13 + $0x8] sm:$0xff]  ;;  %v818_v39 = vld [vmem:[#allocation2 + $0x10c0] sm:$0xff] }
  0xd6   : > { %8257 = vmatpush1.bf16.msra.mxu0 %v12088_v54  ;;  %8503 = vmatpush1.bf16.msra.mxu1 %v12090_v55  ;;  %v12202_v54 = vcombine.low %v699_v40, %v707_v42  ;;  %v12217_v55 = vcombine.high %v714_v47, %v722_v48  ;;  %v811_v40 = vld [vmem:[#allocation2 + $0x1088] sm:$0xff]  ;;  %v12313_v47 = vcombine.high %v810_v38, %v818_v39  ;;  %v826_v48 = vld [vmem:[#allocation2 + $0x1100] sm:$0xff] }
  0xd7   : > { %8258 = vmatprep.subr.bf16.mxu0 %v12105_v56  ;;  %8504 = vmatprep.subr.bf16.mxu1 %v12107_v61  ;;  %v730_v56 = vld [vmem:[#allocation2 + $0xe00] sm:$0xff]  ;;  %v739_v61 = vld [vmem:[#allocation2 + $0xe48] sm:$0xff] }
  0xd8   : > { %v12235_v6 = vcombine.high %v731_v58, %v739_v61  ;;  %v12232_v8 = vcombine.low %v730_v56, %v738_v57  ;;  %v819_v42 = vld [vmem:[#allocation2 + $0x10c8] sm:$0xff] }
  0xda   : > { %8259 = vmatpush1.bf16.msra.mxu0 %v12104_v0  ;;  %8505 = vmatpush1.bf16.msra.mxu1 %v12106_v1  ;;  %v12218_v0 = vcombine.low %v715_v49, %v723_v51  ;;  %v12233_v1 = vcombine.high %v730_v56, %v738_v57  ;;  %v834_v49 = vld [vmem:[#allocation2 + $0x1140] sm:$0xff]  ;;  %v12315_v51 = vcombine.high %v811_v40, %v819_v42 }
  0xdb   : > { %8260 = vmatprep.subr.bf16.mxu0 %v12121_v2  ;;  %8506 = vmatprep.subr.bf16.mxu1 %v12123_v7  ;;  %v746_v2 = vld [vmem:[#allocation2 + $0xe80] sm:$0xff]  ;;  %v755_v7 = vld [vmem:[#allocation2 + $0xec8] sm:$0xff]  ;;  %v12314_v56 = vcombine.low %v811_v40, %v819_v42  ;;  %v12329_v57 = vcombine.high %v826_v48, %v834_v49 }
  0xdc   : > { %v12251_v14 = vcombine.high %v747_v5, %v755_v7  ;;  %v12248_v16 = vcombine.low %v746_v2, %v754_v4  ;;  %v922_v40 = vld [vmem:[#allocation2 + $0x1400] sm:$0xff]  ;;  %v923_v42 = vld [vmem:[#allocation2 + $0x1408] sm:$0xff] }
  0xde   : > { %8261 = vmatpush1.bf16.msra.mxu0 %v12120_v9  ;;  %8507 = vmatpush1.bf16.msra.mxu1 %v12122_v10  ;;  %v12234_v9 = vcombine.low %v731_v58, %v739_v61  ;;  %v12249_v10 = vcombine.high %v746_v2, %v754_v4  ;;  %v842_v58 = vld [vmem:[#allocation2 + $0x1180] sm:$0xff]  ;;  %v843_v61 = vld [vmem:[#allocation2 + $0x1188] sm:$0xff] }
  0xdf   : > { %8262 = vmatprep.subr.bf16.mxu0 %v12137_v11  ;;  %8508 = vmatprep.subr.bf16.mxu1 %v12139_v15  ;;  %v762_v11 = vld [vmem:[#allocation2 + $0xf00] sm:$0xff]  ;;  %v771_v15 = vld [vmem:[#allocation2 + $0xf48] sm:$0xff] }
  0xe0   : > { %v12267_v22 = vcombine.high %v763_v13, %v771_v15  ;;  %v12264_v25 = vcombine.low %v762_v11, %v770_v12 }
  0xe2   : > { %8263 = vmatpush1.bf16.msra.mxu0 %v12136_v17  ;;  %8509 = vmatpush1.bf16.msra.mxu1 %v12138_v18  ;;  %v12250_v17 = vcombine.low %v747_v5, %v755_v7  ;;  %v12265_v18 = vcombine.high %v762_v11, %v770_v12  ;;  %v858_v5 = vld [vmem:[#allocation2 + $0x1200] sm:$0xff]  ;;  %v859_v7 = vld [vmem:[#allocation2 + $0x1208] sm:$0xff] }
  0xe3   : > { %8264 = vmatprep.subr.bf16.mxu0 %v12153_v19  ;;  %8510 = vmatprep.subr.bf16.mxu1 %v12155_v23  ;;  %v778_v19 = vld [vmem:[#allocation2 + $0xf80] sm:$0xff]  ;;  %v787_v23 = vld [vmem:[#allocation2 + $0xfc8] sm:$0xff] }
  0xe6   : > { %8265 = vmatpush1.bf16.msra.mxu0 %v12152_v26  ;;  %8511 = vmatpush1.bf16.msra.mxu1 %v12154_v27  ;;  %v794_v26 = vld [vmem:[#allocation2 + $0x1000] sm:$0xff]  ;;  %v12266_v27 = vcombine.low %v763_v13, %v771_v15  ;;  %v875_v15 = vld [vmem:[#allocation2 + $0x1288] sm:$0xff] }
  0xe7   : > { %8266 = vmatprep.subr.bf16.mxu0 %v12169_v59  ;;  %8512 = vmatprep.subr.bf16.mxu1 %v12171_v31  ;;  %v12281_v59 = vcombine.high %v778_v19, %v786_v20  ;;  %v12283_v31 = vcombine.high %v779_v21, %v787_v23  ;;  %v874_v13 = vld [vmem:[#allocation2 + $0x1280] sm:$0xff] }
  0xea   : > { %8267 = vmatpush1.bf16.msra.mxu0 %v12168_v34  ;;  %8513 = vmatpush1.bf16.msra.mxu1 %v12170_v36  ;;  %v12280_v34 = vcombine.low %v778_v19, %v786_v20  ;;  %v12282_v36 = vcombine.low %v779_v21, %v787_v23  ;;  %v890_v21 = vld [vmem:[#allocation2 + $0x1300] sm:$0xff]  ;;  %v891_v23 = vld [vmem:[#allocation2 + $0x1308] sm:$0xff] }
  0xeb   : > { %8268 = vmatprep.subr.bf16.mxu0 %v12185_v37  ;;  %8514 = vmatprep.subr.bf16.mxu1 %v12187_v41  ;;  %v12297_v37 = vcombine.high %v794_v26, %v802_v28  ;;  %v12299_v41 = vcombine.high %v795_v29, %v803_v30 }
  0xee   : > { %8269 = vmatpush1.bf16.msra.mxu0 %v12184_v44  ;;  %8515 = vmatpush1.bf16.msra.mxu1 %v12186_v45  ;;  %v14276_v44 = vrot.slane %v14272_v33, %v14243_v53  ;;  %v12296_v45 = vcombine.low %v794_v26, %v802_v28  ;;  %v899_v26 = vld [vmem:[#allocation2 + $0x1348] sm:$0xff] }
  0xef   : > { %8270 = vmatprep.subr.bf16.mxu0 %v12201_v46  ;;  %8516 = vmatprep.subr.bf16.mxu1 %v12203_v50  ;;  %v12298_v46 = vcombine.low %v795_v29, %v803_v30  ;;  %v827_v50 = vld [vmem:[#allocation2 + $0x1108] sm:$0xff]  ;;  %v906_v29 = vld [vmem:[#allocation2 + $0x1380] sm:$0xff] }
  0xf0   : > { %v914_v30 = vld [vmem:[#allocation2 + $0x13c0] sm:$0xff] }
  0xf2   : > { %8271 = vmatpush1.bf16.msra.mxu0 %v12200_v52  ;;  %8517 = vmatpush1.bf16.msra.mxu1 %v12202_v54  ;;  %v835_v52 = vld [vmem:[#allocation2 + $0x1148] sm:$0xff]  ;;  %v14280_v54 = vcombine.high %v14276_v44, %v14276_v44 }
  0xf3   : > { %8272 = vmatprep.subr.bf16.mxu0 %v12217_v55  ;;  %8518 = vmatprep.subr.bf16.mxu1 %v12219_v60  ;;  %v12312_v55 = vcombine.low %v810_v38, %v818_v39  ;;  %v850_v60 = vld [vmem:[#allocation2 + $0x11c0] sm:$0xff]  ;;  %v12330_v2 = vcombine.low %v827_v50, %v835_v52  ;;  %v12394_v38 = vcombine.low %v891_v23, %v899_v26 }
  0xf4   : > { %v12345_v4 = vcombine.high %v842_v58, %v850_v60  ;;  %v12409_v39 = vcombine.high %v906_v29, %v914_v30 }
  0xf6   : > { %8273 = vmatpush1.bf16.msra.mxu0 %v12216_v62  ;;  %8519 = vmatpush1.bf16.msra.mxu1 %v12218_v0  ;;  %v12331_v62 = vcombine.high %v827_v50, %v835_v52  ;;  %v851_v0 = vld [vmem:[#allocation2 + $0x11c8] sm:$0xff]  ;;  %v938_v50 = vld [vmem:[#allocation2 + $0x1480] sm:$0xff] }
  0xf7   : > { %8274 = vmatprep.subr.bf16.mxu0 %v12233_v1  ;;  %8520 = vmatprep.subr.bf16.mxu1 %v12235_v6  ;;  %v12328_v1 = vcombine.low %v826_v48, %v834_v49  ;;  %v866_v6 = vld [vmem:[#allocation2 + $0x1240] sm:$0xff]  ;;  %v12346_v11 = vcombine.low %v843_v61, %v851_v0  ;;  %v939_v52 = vld [vmem:[#allocation2 + $0x1488] sm:$0xff] }
  0xf8   : > { %v12361_v12 = vcombine.high %v858_v5, %v866_v6 }
  0xfa   : > { %8275 = vmatpush1.bf16.msra.mxu0 %v12232_v8  ;;  %8521 = vmatpush1.bf16.msra.mxu1 %v12234_v9  ;;  %v12347_v8 = vcombine.high %v843_v61, %v851_v0  ;;  %v867_v9 = vld [vmem:[#allocation2 + $0x1248] sm:$0xff]  ;;  %v954_v61 = vld [vmem:[#allocation2 + $0x1500] sm:$0xff] }
  0xfb   : > { %8276 = vmatprep.subr.bf16.mxu0 %v12249_v10  ;;  %8522 = vmatprep.subr.bf16.mxu1 %v12251_v14  ;;  %v12344_v10 = vcombine.low %v842_v58, %v850_v60  ;;  %v882_v14 = vld [vmem:[#allocation2 + $0x12c0] sm:$0xff]  ;;  %v12362_v19 = vcombine.low %v859_v7, %v867_v9  ;;  %v955_v0 = vld [vmem:[#allocation2 + $0x1508] sm:$0xff] }
  0xfc   : > { %v12377_v20 = vcombine.high %v874_v13, %v882_v14 }
  0xfe   : > { %8277 = vmatpush1.bf16.msra.mxu0 %v12248_v16  ;;  %8523 = vmatpush1.bf16.msra.mxu1 %v12250_v17  ;;  %v12363_v16 = vcombine.high %v859_v7, %v867_v9  ;;  %v883_v17 = vld [vmem:[#allocation2 + $0x12c8] sm:$0xff]  ;;  %v970_v7 = vld [vmem:[#allocation2 + $0x1580] sm:$0xff] }
  0xff   : > { %8278 = vmatprep.subr.bf16.mxu0 %v12265_v18  ;;  %8524 = vmatprep.subr.bf16.mxu1 %v12267_v22  ;;  %v12360_v18 = vcombine.low %v858_v5, %v866_v6  ;;  %v898_v22 = vld [vmem:[#allocation2 + $0x1340] sm:$0xff]  ;;  %v971_v9 = vld [vmem:[#allocation2 + $0x1588] sm:$0xff] }
 0x100   : > { %v12393_v28 = vcombine.high %v890_v21, %v898_v22 }
 0x102   : > { %8279 = vmatpush1.bf16.msra.mxu0 %v12264_v25  ;;  %8525 = vmatpush1.bf16.msra.mxu1 %v12266_v27  ;;  %v12379_v25 = vcombine.high %v875_v15, %v883_v17  ;;  %v12376_v27 = vcombine.low %v874_v13, %v882_v14 }
 0x103   : > { %8280 = vmatprep.subr.bf16.mxu0 %v12281_v59  ;;  %8526 = vmatprep.subr.bf16.mxu1 %v12283_v31  ;;  %v12378_v59 = vcombine.low %v875_v15, %v883_v17  ;;  %v907_v31 = vld [vmem:[#allocation2 + $0x1388] sm:$0xff]  ;;  %v986_v15 = vld [vmem:[#allocation2 + $0x1600] sm:$0xff] }
 0x104   : > { %v987_v17 = vld [vmem:[#allocation2 + $0x1608] sm:$0xff] }
 0x106   : > { %8281 = vmatpush1.bf16.msra.mxu0 %v12280_v34  ;;  %8527 = vmatpush1.bf16.msra.mxu1 %v12282_v36  ;;  %v12395_v34 = vcombine.high %v891_v23, %v899_v26  ;;  %v915_v36 = vld [vmem:[#allocation2 + $0x13c8] sm:$0xff]  ;;  %v1002_v23 = vld [vmem:[#allocation2 + $0x1680] sm:$0xff] }
 0x107   : > { %8291 = vmatprep.subr.bf16.mxu0 %v12297_v37  ;;  %8537 = vmatprep.subr.bf16.mxu1 %v12299_v41  ;;  %v12392_v37 = vcombine.low %v890_v21, %v898_v22  ;;  %v930_v41 = vld [vmem:[#allocation2 + $0x1440] sm:$0xff]  ;;  %v12410_v48 = vcombine.low %v907_v31, %v915_v36  ;;  %v1003_v26 = vld [vmem:[#allocation2 + $0x1688] sm:$0xff] }
 0x108   : > { %v12425_v49 = vcombine.high %v922_v40, %v930_v41 }
 0x109   : > { %8283 = vmatmul.mubr.bf16.vlgmr.msra.gmra.mrb[0].mxu0 %v14261_v24  ;;  %8529 = vmatmul.mubr.bf16.vlgmr.msra.gmra.mrb[0].mxu1 %v14261_v24 }
 0x10a   : > { %8292 = vmatpush1.bf16.msra.mxu0 %v12296_v45  ;;  %8538 = vmatpush1.bf16.msra.mxu1 %v12298_v46  ;;  %v12411_v45 = vcombine.high %v907_v31, %v915_v36  ;;  %v931_v46 = vld [vmem:[#allocation2 + $0x1448] sm:$0xff]  ;;  %v1018_v31 = vld [vmem:[#allocation2 + $0x1700] sm:$0xff] }
 0x10b   : > { %8293 = vmatprep.subr.bf16.mxu0 %v12313_v47  ;;  %8539 = vmatprep.subr.bf16.mxu1 %v12315_v51  ;;  %v12408_v47 = vcombine.low %v906_v29, %v914_v30  ;;  %v946_v51 = vld [vmem:[#allocation2 + $0x14c0] sm:$0xff]  ;;  %v12426_v58 = vcombine.low %v923_v42, %v931_v46  ;;  %v1019_v36 = vld [vmem:[#allocation2 + $0x1708] sm:$0xff] }
 0x10c   : > { %8323 = vmatprep.mubr.bf16.mxu0 %v14280_v54  ;;  %8569 = vmatprep.mubr.bf16.mxu1 %v14280_v54  ;;  %v12441_v60 = vcombine.high %v938_v50, %v946_v51 }
 0x10e   : > { %8294 = vmatpush1.bf16.msra.mxu0 %v12312_v55  ;;  %8540 = vmatpush1.bf16.msra.mxu1 %v12314_v56  ;;  %v12427_v55 = vcombine.high %v923_v42, %v931_v46  ;;  %v947_v56 = vld [vmem:[#allocation2 + $0x14c8] sm:$0xff]  ;;  %v1034_v42 = vld [vmem:[#allocation2 + $0x1780] sm:$0xff] }
 0x10f   : > { %8295 = vmatprep.subr.bf16.mxu0 %v12329_v57  ;;  %8541 = vmatprep.subr.bf16.mxu1 %v12331_v62  ;;  %v12424_v57 = vcombine.low %v922_v40, %v930_v41  ;;  %v962_v62 = vld [vmem:[#allocation2 + $0x1540] sm:$0xff]  ;;  %v12442_v5 = vcombine.low %v939_v52, %v947_v56  ;;  %v1035_v46 = vld [vmem:[#allocation2 + $0x1788] sm:$0xff] }
 0x110   : > { %v12457_v6 = vcombine.high %v954_v61, %v962_v62 }
 0x112   : > { %8296 = vmatpush1.bf16.msra.mxu0 %v12328_v1  ;;  %8542 = vmatpush1.bf16.msra.mxu1 %v12330_v2  ;;  %v12443_v1 = vcombine.high %v939_v52, %v947_v56  ;;  %v963_v2 = vld [vmem:[#allocation2 + $0x1548] sm:$0xff]  ;;  %v1050_v52 = vld [vmem:[#allocation2 + $0x1800] sm:$0xff] }
 0x113   : > { %8297 = vmatprep.subr.bf16.mxu0 %v12345_v4  ;;  %8543 = vmatprep.subr.bf16.mxu1 %v12347_v8  ;;  %v12440_v4 = vcombine.low %v938_v50, %v946_v51  ;;  %v978_v8 = vld [vmem:[#allocation2 + $0x15c0] sm:$0xff]  ;;  %v12458_v13 = vcombine.low %v955_v0, %v963_v2  ;;  %v1051_v56 = vld [vmem:[#allocation2 + $0x1808] sm:$0xff] }
 0x114   : > { %v12473_v14 = vcombine.high %v970_v7, %v978_v8 }
 0x116   : > { %8298 = vmatpush1.bf16.msra.mxu0 %v12344_v10  ;;  %8544 = vmatpush1.bf16.msra.mxu1 %v12346_v11  ;;  %v12459_v10 = vcombine.high %v955_v0, %v963_v2  ;;  %v979_v11 = vld [vmem:[#allocation2 + $0x15c8] sm:$0xff]  ;;  %v1074_v2 = vld [vmem:[#allocation2 + $0x18c0] sm:$0xff] }
 0x117   : > { %8299 = vmatprep.subr.bf16.mxu0 %v12361_v12  ;;  %8545 = vmatprep.subr.bf16.mxu1 %v12363_v16  ;;  %v12456_v12 = vcombine.low %v954_v61, %v962_v62  ;;  %v994_v16 = vld [vmem:[#allocation2 + $0x1640] sm:$0xff]  ;;  %v12474_v21 = vcombine.low %v971_v9, %v979_v11 }
 0x118   : > { %v12489_v22 = vcombine.high %v986_v15, %v994_v16 }
 0x11a   : > { %8300 = vmatpush1.bf16.msra.mxu0 %v12360_v18  ;;  %8546 = vmatpush1.bf16.msra.mxu1 %v12362_v19  ;;  %v12475_v18 = vcombine.high %v971_v9, %v979_v11  ;;  %v995_v19 = vld [vmem:[#allocation2 + $0x1648] sm:$0xff]  ;;  %v1082_v11 = vld [vmem:[#allocation2 + $0x1900] sm:$0xff] }
 0x11b   : > { %8301 = vmatprep.subr.bf16.mxu0 %v12377_v20  ;;  %8547 = vmatprep.subr.bf16.mxu1 %v12379_v25  ;;  %v12472_v20 = vcombine.low %v970_v7, %v978_v8  ;;  %v1010_v25 = vld [vmem:[#allocation2 + $0x16c0] sm:$0xff]  ;;  %v12490_v29 = vcombine.low %v987_v17, %v995_v19 }
 0x11c   : > { %v12505_v30 = vcombine.high %v1002_v23, %v1010_v25 }
 0x11e   : > { %8302 = vmatpush1.bf16.msra.mxu0 %v12376_v27  ;;  %8548 = vmatpush1.bf16.msra.mxu1 %v12378_v59  ;;  %v12491_v27 = vcombine.high %v987_v17, %v995_v19  ;;  %v1011_v59 = vld [vmem:[#allocation2 + $0x16c8] sm:$0xff] }
 0x11f   : > { %8303 = vmatprep.subr.bf16.mxu0 %v12393_v28  ;;  %8549 = vmatprep.subr.bf16.mxu1 %v12395_v34  ;;  %v12488_v28 = vcombine.low %v986_v15, %v994_v16  ;;  %v1026_v34 = vld [vmem:[#allocation2 + $0x1740] sm:$0xff]  ;;  %v12506_v40 = vcombine.low %v1003_v26, %v1011_v59  ;;  %v1091_v15 = vld [vmem:[#allocation2 + $0x1948] sm:$0xff] }
 0x120   : > { %v12521_v41 = vcombine.high %v1018_v31, %v1026_v34 }
 0x122   : > { %8304 = vmatpush1.bf16.msra.mxu0 %v12392_v37  ;;  %8550 = vmatpush1.bf16.msra.mxu1 %v12394_v38  ;;  %v12507_v37 = vcombine.high %v1003_v26, %v1011_v59  ;;  %v1027_v38 = vld [vmem:[#allocation2 + $0x1748] sm:$0xff] }
 0x123   : > { %8305 = vmatprep.subr.bf16.mxu0 %v12409_v39  ;;  %8551 = vmatprep.subr.bf16.mxu1 %v12411_v45  ;;  %v12504_v39 = vcombine.low %v1002_v23, %v1010_v25  ;;  %v1042_v45 = vld [vmem:[#allocation2 + $0x17c0] sm:$0xff]  ;;  %v12522_v50 = vcombine.low %v1019_v36, %v1027_v38  ;;  %v1107_v23 = vld [vmem:[#allocation2 + $0x19c8] sm:$0xff] }
 0x124   : > { %v12537_v51 = vcombine.high %v1034_v42, %v1042_v45  ;;  %v12536_v61 = vcombine.low %v1034_v42, %v1042_v45  ;;  %v1139_v42 = vld [vmem:[#allocation2 + $0x1ac8] sm:$0xff] }
 0x126   : > { %8306 = vmatpush1.bf16.msra.mxu0 %v12408_v47  ;;  %8552 = vmatpush1.bf16.msra.mxu1 %v12410_v48  ;;  %v12523_v47 = vcombine.high %v1019_v36, %v1027_v38  ;;  %v1043_v48 = vld [vmem:[#allocation2 + $0x17c8] sm:$0xff] }
 0x127   : > { %8307 = vmatprep.subr.bf16.mxu0 %v12425_v49  ;;  %8553 = vmatprep.subr.bf16.mxu1 %v12427_v55  ;;  %v12520_v49 = vcombine.low %v1018_v31, %v1026_v34  ;;  %v1058_v55 = vld [vmem:[#allocation2 + $0x1840] sm:$0xff]  ;;  %v12538_v62 = vcombine.low %v1035_v46, %v1043_v48  ;;  %v1123_v31 = vld [vmem:[#allocation2 + $0x1a48] sm:$0xff] }
 0x128   : > { %v12553_v0 = vcombine.high %v1050_v52, %v1058_v55  ;;  %v12552_v8 = vcombine.low %v1050_v52, %v1058_v55  ;;  %v1155_v52 = vld [vmem:[#allocation2 + $0x1b48] sm:$0xff] }
 0x12a   : > { %8308 = vmatpush1.bf16.msra.mxu0 %v12424_v57  ;;  %8554 = vmatpush1.bf16.msra.mxu1 %v12426_v58  ;;  %v12539_v57 = vcombine.high %v1035_v46, %v1043_v48  ;;  %v1059_v58 = vld [vmem:[#allocation2 + $0x1848] sm:$0xff] }
 0x12b   : > { %8309 = vmatprep.subr.bf16.mxu0 %v12441_v60  ;;  %8555 = vmatprep.subr.bf16.mxu1 %v12443_v1  ;;  %v1682_v60 = vcombine.high %v14272_v33, %v14272_v33  ;;  %v1066_v1 = vld [vmem:[#allocation2 + $0x1880] sm:$0xff]  ;;  %v12554_v33 = vcombine.low %v1051_v56, %v1059_v58 }
 0x12c   : > { %v12569_v9 = vcombine.high %v1066_v1, %v1074_v2  ;;  %v12568_v16 = vcombine.low %v1066_v1, %v1074_v2 }
 0x12d   : > { %v14289_v7 = vrot.slane %v1682_v60, %v14243_v53  ;;  %v1162_v60 = vld [vmem:[#allocation2 + $0x1b80] sm:$0xff] }
 0x12e   : > { %8310 = vmatpush1.bf16.msra.mxu0 %v12440_v4  ;;  %8556 = vmatpush1.bf16.msra.mxu1 %v12442_v5  ;;  %v12555_v4 = vcombine.high %v1051_v56, %v1059_v58  ;;  %v1067_v5 = vld [vmem:[#allocation2 + $0x1888] sm:$0xff] }
 0x12f   : > { %8311 = vmatprep.subr.bf16.mxu0 %v12457_v6  ;;  %8557 = vmatprep.subr.bf16.mxu1 %v12459_v10  ;;  %v1075_v6 = vld [vmem:[#allocation2 + $0x18c8] sm:$0xff] }
 0x130   : > { %v12571_v10 = vcombine.high %v1067_v5, %v1075_v6  ;;  %v12570_v17 = vcombine.low %v1067_v5, %v1075_v6  ;;  %v1178_v6 = vld [vmem:[#allocation2 + $0x1c00] sm:$0xff] }
 0x132   : > { %8312 = vmatpush1.bf16.msra.mxu0 %v12456_v12  ;;  %8558 = vmatpush1.bf16.msra.mxu1 %v12458_v13  ;;  %v1090_v12 = vld [vmem:[#allocation2 + $0x1940] sm:$0xff]  ;;  %v14293_v13 = vcombine.high %v14289_v7, %v14289_v7 }
 0x133   : > { %8313 = vmatprep.subr.bf16.mxu0 %v12473_v14  ;;  %8559 = vmatprep.subr.bf16.mxu1 %v12475_v18  ;;  %v1083_v14 = vld [vmem:[#allocation2 + $0x1908] sm:$0xff]  ;;  %v12585_v18 = vcombine.high %v1082_v11, %v1090_v12  ;;  %v12584_v25 = vcombine.low %v1082_v11, %v1090_v12 }
 0x134   : > { %v12587_v19 = vcombine.high %v1083_v14, %v1091_v15  ;;  %v12586_v26 = vcombine.low %v1083_v14, %v1091_v15  ;;  %v1194_v15 = vld [vmem:[#allocation2 + $0x1c80] sm:$0xff] }
 0x136   : > { %8314 = vmatpush1.bf16.msra.mxu0 %v12472_v20  ;;  %8560 = vmatpush1.bf16.msra.mxu1 %v12474_v21  ;;  %v1098_v20 = vld [vmem:[#allocation2 + $0x1980] sm:$0xff] }
 0x137   : > { %8315 = vmatprep.subr.bf16.mxu0 %v12489_v22  ;;  %8561 = vmatprep.subr.bf16.mxu1 %v12491_v27  ;;  %v1106_v21 = vld [vmem:[#allocation2 + $0x19c0] sm:$0xff]  ;;  %v1099_v22 = vld [vmem:[#allocation2 + $0x1988] sm:$0xff] }
 0x138   : > { %v12601_v27 = vcombine.high %v1098_v20, %v1106_v21  ;;  %v12603_v59 = vcombine.high %v1099_v22, %v1107_v23  ;;  %v12600_v34 = vcombine.low %v1098_v20, %v1106_v21  ;;  %v12602_v36 = vcombine.low %v1099_v22, %v1107_v23  ;;  %v1210_v23 = vld [vmem:[#allocation2 + $0x1d00] sm:$0xff] }
 0x13a   : > { %8316 = vmatpush1.bf16.msra.mxu0 %v12488_v28  ;;  %8562 = vmatpush1.bf16.msra.mxu1 %v12490_v29  ;;  %v1114_v28 = vld [vmem:[#allocation2 + $0x1a00] sm:$0xff] }
 0x13b   : > { %8317 = vmatprep.subr.bf16.mxu0 %v12505_v30  ;;  %8563 = vmatprep.subr.bf16.mxu1 %v12507_v37  ;;  %v1122_v29 = vld [vmem:[#allocation2 + $0x1a40] sm:$0xff]  ;;  %v1115_v30 = vld [vmem:[#allocation2 + $0x1a08] sm:$0xff] }
 0x13c   : > { %v12617_v37 = vcombine.high %v1114_v28, %v1122_v29  ;;  %v12619_v38 = vcombine.high %v1115_v30, %v1123_v31  ;;  %v12616_v45 = vcombine.low %v1114_v28, %v1122_v29  ;;  %v12618_v46 = vcombine.low %v1115_v30, %v1123_v31  ;;  %v1226_v31 = vld [vmem:[#allocation2 + $0x1d80] sm:$0xff] }
 0x13e   : > { %8318 = vmatpush1.bf16.msra.mxu0 %v12504_v39  ;;  %8564 = vmatpush1.bf16.msra.mxu1 %v12506_v40  ;;  %v1130_v39 = vld [vmem:[#allocation2 + $0x1a80] sm:$0xff] }
 0x13f   : > { %8319 = vmatprep.subr.bf16.mxu0 %v12521_v41  ;;  %8565 = vmatprep.subr.bf16.mxu1 %v12523_v47  ;;  %v1138_v40 = vld [vmem:[#allocation2 + $0x1ac0] sm:$0xff]  ;;  %v1131_v41 = vld [vmem:[#allocation2 + $0x1a88] sm:$0xff] }
 0x140   : > { %v12633_v47 = vcombine.high %v1130_v39, %v1138_v40  ;;  %v12635_v48 = vcombine.high %v1131_v41, %v1139_v42  ;;  %v12632_v55 = vcombine.low %v1130_v39, %v1138_v40  ;;  %v12634_v56 = vcombine.low %v1131_v41, %v1139_v42  ;;  %v1242_v42 = vld [vmem:[#allocation2 + $0x1e00] sm:$0xff] }
 0x142   : > { %8320 = vmatpush1.bf16.msra.mxu0 %v12520_v49  ;;  %8566 = vmatpush1.bf16.msra.mxu1 %v12522_v50  ;;  %v1146_v49 = vld [vmem:[#allocation2 + $0x1b00] sm:$0xff] }
 0x143   : > { %8321 = vmatprep.subr.bf16.mxu0 %v12537_v51  ;;  %8567 = vmatprep.subr.bf16.mxu1 %v12539_v57  ;;  %v1154_v50 = vld [vmem:[#allocation2 + $0x1b40] sm:$0xff]  ;;  %v1147_v51 = vld [vmem:[#allocation2 + $0x1b08] sm:$0xff] }
 0x144   : > { %v12649_v57 = vcombine.high %v1146_v49, %v1154_v50  ;;  %v12651_v58 = vcombine.high %v1147_v51, %v1155_v52  ;;  %v12648_v1 = vcombine.low %v1146_v49, %v1154_v50  ;;  %v12650_v2 = vcombine.low %v1147_v51, %v1155_v52  ;;  %v1258_v52 = vld [vmem:[#allocation2 + $0x1e80] sm:$0xff] }
 0x146   : > { %8322 = vmatpush1.bf16.msra.mxu0 %v12536_v61  ;;  %8568 = vmatpush1.bf16.msra.mxu1 %v12538_v62  ;;  %v1170_v61 = vld [vmem:[#allocation2 + $0x1bc0] sm:$0xff]  ;;  %v1163_v62 = vld [vmem:[#allocation2 + $0x1b88] sm:$0xff] }
 0x147   : > { %8332 = vmatprep.subr.bf16.mxu0 %v12553_v0  ;;  %8578 = vmatprep.subr.bf16.mxu1 %v12555_v4  ;;  %v1171_v0 = vld [vmem:[#allocation2 + $0x1bc8] sm:$0xff]  ;;  %v12665_v4 = vcombine.high %v1162_v60, %v1170_v61 }
 0x148   : > { %v12667_v5 = vcombine.high %v1163_v62, %v1171_v0  ;;  %v12666_v11 = vcombine.low %v1163_v62, %v1171_v0  ;;  %v1274_v0 = vld [vmem:[#allocation2 + $0x1f00] sm:$0xff] }
 0x149   : > { %8324 = vmatmul.mubr.bf16.vlgmr.msra.gmra.mrb[0].mxu0 %v14276_v44  ;;  %8570 = vmatmul.mubr.bf16.vlgmr.msra.gmra.mrb[0].mxu1 %v14276_v44 }
 0x14a   : > { %8333 = vmatpush1.bf16.msra.mxu0 %v12552_v8  ;;  %8579 = vmatpush1.bf16.msra.mxu1 %v12554_v33  ;;  %v1186_v8 = vld [vmem:[#allocation2 + $0x1c40] sm:$0xff]  ;;  %v1179_v33 = vld [vmem:[#allocation2 + $0x1c08] sm:$0xff] }
 0x14b   : > { %8334 = vmatprep.subr.bf16.mxu0 %v12569_v9  ;;  %8580 = vmatprep.subr.bf16.mxu1 %v12571_v10  ;;  %v1187_v9 = vld [vmem:[#allocation2 + $0x1c48] sm:$0xff]  ;;  %v12664_v10 = vcombine.low %v1162_v60, %v1170_v61  ;;  %v12681_v12 = vcombine.high %v1178_v6, %v1186_v8 }
 0x14c   : > { %8364 = vmatprep.mubr.bf16.mxu0 %v14293_v13  ;;  %8610 = vmatprep.mubr.bf16.mxu1 %v14293_v13  ;;  %v12683_v14 = vcombine.high %v1179_v33, %v1187_v9  ;;  %v12682_v20 = vcombine.low %v1179_v33, %v1187_v9  ;;  %v1290_v9 = vld [vmem:[#allocation2 + $0x1f80] sm:$0xff] }
 0x14e   : > { %8335 = vmatpush1.bf16.msra.mxu0 %v12568_v16  ;;  %8581 = vmatpush1.bf16.msra.mxu1 %v12570_v17  ;;  %v1202_v16 = vld [vmem:[#allocation2 + $0x1cc0] sm:$0xff]  ;;  %v1195_v17 = vld [vmem:[#allocation2 + $0x1c88] sm:$0xff] }
 0x14f   : > { %8336 = vmatprep.subr.bf16.mxu0 %v12585_v18  ;;  %8582 = vmatprep.subr.bf16.mxu1 %v12587_v19  ;;  %v1203_v18 = vld [vmem:[#allocation2 + $0x1cc8] sm:$0xff]  ;;  %v12680_v19 = vcombine.low %v1178_v6, %v1186_v8  ;;  %v12697_v21 = vcombine.high %v1194_v15, %v1202_v16 }
 0x150   : > { %v12699_v22 = vcombine.high %v1195_v17, %v1203_v18  ;;  %v12698_v28 = vcombine.low %v1195_v17, %v1203_v18  ;;  %v1306_v18 = vld [vmem:[#allocation2 + $0x2000] sm:$0xff] }
 0x152   : > { %8337 = vmatpush1.bf16.msra.mxu0 %v12584_v25  ;;  %8583 = vmatpush1.bf16.msra.mxu1 %v12586_v26  ;;  %v1218_v25 = vld [vmem:[#allocation2 + $0x1d40] sm:$0xff]  ;;  %v1211_v26 = vld [vmem:[#allocation2 + $0x1d08] sm:$0xff] }
 0x153   : > { %8338 = vmatprep.subr.bf16.mxu0 %v12601_v27  ;;  %8584 = vmatprep.subr.bf16.mxu1 %v12603_v59  ;;  %v1219_v27 = vld [vmem:[#allocation2 + $0x1d48] sm:$0xff]  ;;  %v12696_v59 = vcombine.low %v1194_v15, %v1202_v16  ;;  %v12713_v29 = vcombine.high %v1210_v23, %v1218_v25 }
 0x154   : > { %v12715_v30 = vcombine.high %v1211_v26, %v1219_v27  ;;  %v12714_v39 = vcombine.low %v1211_v26, %v1219_v27 }
 0x156   : > { %8339 = vmatpush1.bf16.msra.mxu0 %v12600_v34  ;;  %8585 = vmatpush1.bf16.msra.mxu1 %v12602_v36  ;;  %v1234_v34 = vld [vmem:[#allocation2 + $0x1dc0] sm:$0xff]  ;;  %v1227_v36 = vld [vmem:[#allocation2 + $0x1d88] sm:$0xff] }
 0x157   : > { %8340 = vmatprep.subr.bf16.mxu0 %v12617_v37  ;;  %8586 = vmatprep.subr.bf16.mxu1 %v12619_v38  ;;  %v1235_v37 = vld [vmem:[#allocation2 + $0x1dc8] sm:$0xff]  ;;  %v12712_v38 = vcombine.low %v1210_v23, %v1218_v25  ;;  %v12729_v40 = vcombine.high %v1226_v31, %v1234_v34 }
 0x158   : > { %v12731_v41 = vcombine.high %v1227_v36, %v1235_v37  ;;  %v12730_v49 = vcombine.low %v1227_v36, %v1235_v37 }
 0x15a   : > { %8341 = vmatpush1.bf16.msra.mxu0 %v12616_v45  ;;  %8587 = vmatpush1.bf16.msra.mxu1 %v12618_v46  ;;  %v1250_v45 = vld [vmem:[#allocation2 + $0x1e40] sm:$0xff]  ;;  %v1243_v46 = vld [vmem:[#allocation2 + $0x1e08] sm:$0xff] }
 0x15b   : > { %8342 = vmatprep.subr.bf16.mxu0 %v12633_v47  ;;  %8588 = vmatprep.subr.bf16.mxu1 %v12635_v48  ;;  %v1251_v47 = vld [vmem:[#allocation2 + $0x1e48] sm:$0xff]  ;;  %v12728_v48 = vcombine.low %v1226_v31, %v1234_v34  ;;  %v12745_v50 = vcombine.high %v1242_v42, %v1250_v45 }
 0x15c   : > { %v12747_v51 = vcombine.high %v1243_v46, %v1251_v47  ;;  %v12746_v60 = vcombine.low %v1243_v46, %v1251_v47  ;;  %v1331_v31 = vld [vmem:[#allocation2 + $0x20c8] sm:$0xff] }
 0x15e   : > { %8343 = vmatpush1.bf16.msra.mxu0 %v12632_v55  ;;  %8589 = vmatpush1.bf16.msra.mxu1 %v12634_v56  ;;  %v1266_v55 = vld [vmem:[#allocation2 + $0x1ec0] sm:$0xff]  ;;  %v1259_v56 = vld [vmem:[#allocation2 + $0x1e88] sm:$0xff] }
 0x15f   : > { %8344 = vmatprep.subr.bf16.mxu0 %v12649_v57  ;;  %8590 = vmatprep.subr.bf16.mxu1 %v12651_v58  ;;  %v1267_v57 = vld [vmem:[#allocation2 + $0x1ec8] sm:$0xff]  ;;  %v12744_v58 = vcombine.low %v1242_v42, %v1250_v45  ;;  %v12761_v61 = vcombine.high %v1258_v52, %v1266_v55 }
 0x160   : > { %v12763_v62 = vcombine.high %v1259_v56, %v1267_v57  ;;  %v12762_v6 = vcombine.low %v1259_v56, %v1267_v57  ;;  %v1339_v42 = vld [vmem:[#allocation2 + $0x2108] sm:$0xff] }
 0x161   : > { %v1347_v45 = vld [vmem:[#allocation2 + $0x2148] sm:$0xff] }
 0x162   : > { %8345 = vmatpush1.bf16.msra.mxu0 %v12648_v1  ;;  %8591 = vmatpush1.bf16.msra.mxu1 %v12650_v2  ;;  %v1282_v1 = vld [vmem:[#allocation2 + $0x1f40] sm:$0xff]  ;;  %v1275_v2 = vld [vmem:[#allocation2 + $0x1f08] sm:$0xff]  ;;  %v12842_v57 = vcombine.low %v1339_v42, %v1347_v45 }
 0x163   : > { %8346 = vmatprep.subr.bf16.mxu0 %v12665_v4  ;;  %8592 = vmatprep.subr.bf16.mxu1 %v12667_v5  ;;  %v1283_v4 = vld [vmem:[#allocation2 + $0x1f48] sm:$0xff]  ;;  %v12760_v5 = vcombine.low %v1258_v52, %v1266_v55  ;;  %v12777_v8 = vcombine.high %v1274_v0, %v1282_v1 }
 0x164   : > { %v12779_v33 = vcombine.high %v1275_v2, %v1283_v4  ;;  %v12778_v15 = vcombine.low %v1275_v2, %v1283_v4  ;;  %v1355_v52 = vld [vmem:[#allocation2 + $0x2188] sm:$0xff] }
 0x165   : > { %v1363_v55 = vld [vmem:[#allocation2 + $0x21c8] sm:$0xff] }
 0x166   : > { %8347 = vmatpush1.bf16.msra.mxu0 %v12664_v10  ;;  %8593 = vmatpush1.bf16.msra.mxu1 %v12666_v11  ;;  %v1298_v10 = vld [vmem:[#allocation2 + $0x1fc0] sm:$0xff]  ;;  %v1291_v11 = vld [vmem:[#allocation2 + $0x1f88] sm:$0xff]  ;;  %v12858_v4 = vcombine.low %v1355_v52, %v1363_v55 }
 0x167   : > { %8348 = vmatprep.subr.bf16.mxu0 %v12681_v12  ;;  %8594 = vmatprep.subr.bf16.mxu1 %v12683_v14  ;;  %v1299_v12 = vld [vmem:[#allocation2 + $0x1fc8] sm:$0xff]  ;;  %v12776_v14 = vcombine.low %v1274_v0, %v1282_v1  ;;  %v12793_v16 = vcombine.high %v1290_v9, %v1298_v10  ;;  %v12792_v23 = vcombine.low %v1290_v9, %v1298_v10 }
 0x168   : > { %v12795_v17 = vcombine.high %v1291_v11, %v1299_v12  ;;  %v12794_v25 = vcombine.low %v1291_v11, %v1299_v12  ;;  %v1371_v0 = vld [vmem:[#allocation2 + $0x2208] sm:$0xff] }
 0x169   : > { %v1379_v1 = vld [vmem:[#allocation2 + $0x2248] sm:$0xff] }
 0x16a   : > { %8349 = vmatpush1.bf16.msra.mxu0 %v12680_v19  ;;  %8595 = vmatpush1.bf16.msra.mxu1 %v12682_v20  ;;  %v1314_v19 = vld [vmem:[#allocation2 + $0x2040] sm:$0xff]  ;;  %v1307_v20 = vld [vmem:[#allocation2 + $0x2008] sm:$0xff]  ;;  %v12874_v12 = vcombine.low %v1371_v0, %v1379_v1 }
 0x16b   : > { %8350 = vmatprep.subr.bf16.mxu0 %v12697_v21  ;;  %8596 = vmatprep.subr.bf16.mxu1 %v12699_v22  ;;  %v1315_v21 = vld [vmem:[#allocation2 + $0x2048] sm:$0xff]  ;;  %v14300_v22 = vld [vmem:[%s14240_s13 + $0x10] sm:$0x3f]  ;;  %v12809_v26 = vcombine.high %v1306_v18, %v1314_v19  ;;  %v12808_v34 = vcombine.low %v1306_v18, %v1314_v19 }
 0x16c   : > { %v12811_v27 = vcombine.high %v1307_v20, %v1315_v21  ;;  %v12810_v36 = vcombine.low %v1307_v20, %v1315_v21  ;;  %v1387_v9 = vld [vmem:[#allocation2 + $0x2288] sm:$0xff] }
 0x16d   : > { %v1395_v10 = vld [vmem:[#allocation2 + $0x22c8] sm:$0xff] }
 0x16e   : > { %8351 = vmatpush1.bf16.msra.mxu0 %v12696_v59  ;;  %8597 = vmatpush1.bf16.msra.mxu1 %v12698_v28  ;;  %v1322_v59 = vld [vmem:[#allocation2 + $0x2080] sm:$0xff]  ;;  %v1403_v18 = vld [vmem:[#allocation2 + $0x2308] sm:$0xff]  ;;  %v12890_v21 = vcombine.low %v1387_v9, %v1395_v10 }
 0x16f   : > { %8352 = vmatprep.subr.bf16.mxu0 %v12713_v29  ;;  %8598 = vmatprep.subr.bf16.mxu1 %v12715_v30  ;;  %v1330_v28 = vld [vmem:[#allocation2 + $0x20c0] sm:$0xff]  ;;  %v14304_v29 = vrot.slane %v14300_v22, %v14243_v53  ;;  %v1323_v30 = vld [vmem:[#allocation2 + $0x2088] sm:$0xff] }
 0x170   : > { %v12825_v37 = vcombine.high %v1322_v59, %v1330_v28  ;;  %v12824_v46 = vcombine.low %v1322_v59, %v1330_v28  ;;  %v12826_v47 = vcombine.low %v1323_v30, %v1331_v31  ;;  %v1411_v19 = vld [vmem:[#allocation2 + $0x2348] sm:$0xff] }
 0x171   : > { %v1419_v59 = vld [vmem:[#allocation2 + $0x2388] sm:$0xff] }
 0x172   : > { %8353 = vmatpush1.bf16.msra.mxu0 %v12712_v38  ;;  %8599 = vmatpush1.bf16.msra.mxu1 %v12714_v39  ;;  %v12827_v38 = vcombine.high %v1323_v30, %v1331_v31  ;;  %v1338_v39 = vld [vmem:[#allocation2 + $0x2100] sm:$0xff]  ;;  %v1427_v28 = vld [vmem:[#allocation2 + $0x23c8] sm:$0xff]  ;;  %v12906_v31 = vcombine.low %v1403_v18, %v1411_v19 }
 0x173   : > { %8354 = vmatprep.subr.bf16.mxu0 %v12729_v40  ;;  %8600 = vmatprep.subr.bf16.mxu1 %v12731_v41  ;;  %v1346_v40 = vld [vmem:[#allocation2 + $0x2140] sm:$0xff]  ;;  %v14308_v41 = vcombine.high %v14304_v29, %v14304_v29 }
 0x174   : > { %v12840_v56 = vcombine.low %v1338_v39, %v1346_v40 }
 0x176   : > { %8355 = vmatpush1.bf16.msra.mxu0 %v12728_v48  ;;  %8601 = vmatpush1.bf16.msra.mxu1 %v12730_v49  ;;  %v12841_v48 = vcombine.high %v1338_v39, %v1346_v40  ;;  %v12843_v49 = vcombine.high %v1339_v42, %v1347_v45  ;;  %v1435_v39 = vld [vmem:[#allocation2 + $0x2408] sm:$0xff]  ;;  %v12922_v45 = vcombine.low %v1419_v59, %v1427_v28 }
 0x177   : > { %8356 = vmatprep.subr.bf16.mxu0 %v12745_v50  ;;  %8602 = vmatprep.subr.bf16.mxu1 %v12747_v51  ;;  %v1354_v50 = vld [vmem:[#allocation2 + $0x2180] sm:$0xff]  ;;  %v1443_v40 = vld [vmem:[#allocation2 + $0x2448] sm:$0xff] }
 0x178   : > { %v1362_v51 = vld [vmem:[#allocation2 + $0x21c0] sm:$0xff] }
 0x179   : > { %v12856_v2 = vcombine.low %v1354_v50, %v1362_v51 }
 0x17a   : > { %8357 = vmatpush1.bf16.msra.mxu0 %v12744_v58  ;;  %8603 = vmatpush1.bf16.msra.mxu1 %v12746_v60  ;;  %v12857_v58 = vcombine.high %v1354_v50, %v1362_v51  ;;  %v12859_v60 = vcombine.high %v1355_v52, %v1363_v55  ;;  %v1451_v50 = vld [vmem:[#allocation2 + $0x2488] sm:$0xff]  ;;  %v12938_v55 = vcombine.low %v1435_v39, %v1443_v40 }
 0x17b   : > { %8358 = vmatprep.subr.bf16.mxu0 %v12761_v61  ;;  %8604 = vmatprep.subr.bf16.mxu1 %v12763_v62  ;;  %v1370_v61 = vld [vmem:[#allocation2 + $0x2200] sm:$0xff]  ;;  %v1459_v51 = vld [vmem:[#allocation2 + $0x24c8] sm:$0xff] }
 0x17c   : > { %v1378_v62 = vld [vmem:[#allocation2 + $0x2240] sm:$0xff] }
 0x17d   : > { %v12872_v11 = vcombine.low %v1370_v61, %v1378_v62 }
 0x17e   : > { %8359 = vmatpush1.bf16.msra.mxu0 %v12760_v5  ;;  %8605 = vmatpush1.bf16.msra.mxu1 %v12762_v6  ;;  %v12873_v5 = vcombine.high %v1370_v61, %v1378_v62  ;;  %v12875_v6 = vcombine.high %v1371_v0, %v1379_v1  ;;  %v1467_v61 = vld [vmem:[#allocation2 + $0x2508] sm:$0xff]  ;;  %v12954_v1 = vcombine.low %v1451_v50, %v1459_v51 }
 0x17f   : > { %8360 = vmatprep.subr.bf16.mxu0 %v12777_v8  ;;  %8606 = vmatprep.subr.bf16.mxu1 %v12779_v33  ;;  %v1386_v8 = vld [vmem:[#allocation2 + $0x2280] sm:$0xff]  ;;  %v1475_v62 = vld [vmem:[#allocation2 + $0x2548] sm:$0xff] }
 0x180   : > { %v1394_v33 = vld [vmem:[#allocation2 + $0x22c0] sm:$0xff] }
 0x181   : > { %v12888_v20 = vcombine.low %v1386_v8, %v1394_v33 }
 0x182   : > { %8361 = vmatpush1.bf16.msra.mxu0 %v12776_v14  ;;  %8607 = vmatpush1.bf16.msra.mxu1 %v12778_v15  ;;  %v12889_v14 = vcombine.high %v1386_v8, %v1394_v33  ;;  %v12891_v15 = vcombine.high %v1387_v9, %v1395_v10  ;;  %v1483_v8 = vld [vmem:[#allocation2 + $0x2588] sm:$0xff]  ;;  %v12970_v10 = vcombine.low %v1467_v61, %v1475_v62 }
 0x183   : > { %8362 = vmatprep.subr.bf16.mxu0 %v12793_v16  ;;  %8608 = vmatprep.subr.bf16.mxu1 %v12795_v17  ;;  %v1402_v16 = vld [vmem:[#allocation2 + $0x2300] sm:$0xff]  ;;  %v1491_v33 = vld [vmem:[#allocation2 + $0x25c8] sm:$0xff] }
 0x184   : > { %v1410_v17 = vld [vmem:[#allocation2 + $0x2340] sm:$0xff] }
 0x185   : > { %v12904_v30 = vcombine.low %v1402_v16, %v1410_v17 }
 0x186   : > { %8363 = vmatpush1.bf16.msra.mxu0 %v12792_v23  ;;  %8609 = vmatpush1.bf16.msra.mxu1 %v12794_v25  ;;  %v12905_v23 = vcombine.high %v1402_v16, %v1410_v17  ;;  %v12907_v25 = vcombine.high %v1403_v18, %v1411_v19  ;;  %v1499_v16 = vld [vmem:[#allocation2 + $0x2608] sm:$0xff]  ;;  %v12986_v19 = vcombine.low %v1483_v8, %v1491_v33 }
 0x187   : > { %8373 = vmatprep.subr.bf16.mxu0 %v12809_v26  ;;  %8619 = vmatprep.subr.bf16.mxu1 %v12811_v27  ;;  %v1418_v26 = vld [vmem:[#allocation2 + $0x2380] sm:$0xff]  ;;  %v1507_v17 = vld [vmem:[#allocation2 + $0x2648] sm:$0xff] }
 0x188   : > { %v1426_v27 = vld [vmem:[#allocation2 + $0x23c0] sm:$0xff] }
 0x189   : > { %8365 = vmatmul.mubr.bf16.vlgmr.msra.gmra.mrb[0].mxu0 %v14289_v7  ;;  %8611 = vmatmul.mubr.bf16.vlgmr.msra.gmra.mrb[0].mxu1 %v14289_v7  ;;  %v12920_v42 = vcombine.low %v1418_v26, %v1426_v27 }
 0x18a   : > { %8374 = vmatpush1.bf16.msra.mxu0 %v12808_v34  ;;  %8620 = vmatpush1.bf16.msra.mxu1 %v12810_v36  ;;  %v12921_v34 = vcombine.high %v1418_v26, %v1426_v27  ;;  %v12923_v36 = vcombine.high %v1419_v59, %v1427_v28  ;;  %v1515_v26 = vld [vmem:[#allocation2 + $0x2688] sm:$0xff]  ;;  %v13002_v28 = vcombine.low %v1499_v16, %v1507_v17 }
 0x18b   : > { %8375 = vmatprep.subr.bf16.mxu0 %v12825_v37  ;;  %8621 = vmatprep.subr.bf16.mxu1 %v12827_v38  ;;  %v1434_v37 = vld [vmem:[#allocation2 + $0x2400] sm:$0xff]  ;;  %v1523_v27 = vld [vmem:[#allocation2 + $0x26c8] sm:$0xff] }
 0x18c   : > { %8405 = vmatprep.mubr.bf16.mxu0 %v14308_v41  ;;  %8651 = vmatprep.mubr.bf16.mxu1 %v14308_v41  ;;  %v1442_v38 = vld [vmem:[#allocation2 + $0x2440] sm:$0xff] }
 0x18d   : > { %v12936_v52 = vcombine.low %v1434_v37, %v1442_v38 }
 0x18e   : > { %8376 = vmatpush1.bf16.msra.mxu0 %v12824_v46  ;;  %8622 = vmatpush1.bf16.msra.mxu1 %v12826_v47  ;;  %v12937_v46 = vcombine.high %v1434_v37, %v1442_v38  ;;  %v12939_v47 = vcombine.high %v1435_v39, %v1443_v40  ;;  %v1531_v37 = vld [vmem:[#allocation2 + $0x2708] sm:$0xff]  ;;  %v13018_v40 = vcombine.low %v1515_v26, %v1523_v27 }
 0x18f   : > { %8377 = vmatprep.subr.bf16.mxu0 %v12841_v48  ;;  %8623 = vmatprep.subr.bf16.mxu1 %v12843_v49  ;;  %v1450_v48 = vld [vmem:[#allocation2 + $0x2480] sm:$0xff]  ;;  %v1539_v38 = vld [vmem:[#allocation2 + $0x2748] sm:$0xff] }
 0x190   : > { %v1458_v49 = vld [vmem:[#allocation2 + $0x24c0] sm:$0xff] }
 0x191   : > { %v12952_v0 = vcombine.low %v1450_v48, %v1458_v49 }
 0x192   : > { %8378 = vmatpush1.bf16.msra.mxu0 %v12840_v56  ;;  %8624 = vmatpush1.bf16.msra.mxu1 %v12842_v57  ;;  %v12953_v56 = vcombine.high %v1450_v48, %v1458_v49  ;;  %v12955_v57 = vcombine.high %v1451_v50, %v1459_v51  ;;  %v1547_v48 = vld [vmem:[#allocation2 + $0x2788] sm:$0xff]  ;;  %v13034_v51 = vcombine.low %v1531_v37, %v1539_v38 }
 0x193   : > { %8379 = vmatprep.subr.bf16.mxu0 %v12857_v58  ;;  %8625 = vmatprep.subr.bf16.mxu1 %v12859_v60  ;;  %v1466_v58 = vld [vmem:[#allocation2 + $0x2500] sm:$0xff]  ;;  %v1555_v49 = vld [vmem:[#allocation2 + $0x27c8] sm:$0xff] }
 0x194   : > { %v1474_v60 = vld [vmem:[#allocation2 + $0x2540] sm:$0xff] }
 0x195   : > { %v12968_v9 = vcombine.low %v1466_v58, %v1474_v60 }
 0x196   : > { %8380 = vmatpush1.bf16.msra.mxu0 %v12856_v2  ;;  %8626 = vmatpush1.bf16.msra.mxu1 %v12858_v4  ;;  %v12969_v2 = vcombine.high %v1466_v58, %v1474_v60  ;;  %v12971_v4 = vcombine.high %v1467_v61, %v1475_v62  ;;  %v1563_v58 = vld [vmem:[#allocation2 + $0x2808] sm:$0xff]  ;;  %v13050_v62 = vcombine.low %v1547_v48, %v1555_v49 }
 0x197   : > { %8381 = vmatprep.subr.bf16.mxu0 %v12873_v5  ;;  %8627 = vmatprep.subr.bf16.mxu1 %v12875_v6  ;;  %v1482_v5 = vld [vmem:[#allocation2 + $0x2580] sm:$0xff]  ;;  %v1571_v60 = vld [vmem:[#allocation2 + $0x2848] sm:$0xff] }
 0x198   : > { %v1490_v6 = vld [vmem:[#allocation2 + $0x25c0] sm:$0xff] }
 0x199   : > { %v12984_v18 = vcombine.low %v1482_v5, %v1490_v6 }
 0x19a   : > { %8382 = vmatpush1.bf16.msra.mxu0 %v12872_v11  ;;  %8628 = vmatpush1.bf16.msra.mxu1 %v12874_v12  ;;  %v12985_v11 = vcombine.high %v1482_v5, %v1490_v6  ;;  %v12987_v12 = vcombine.high %v1483_v8, %v1491_v33  ;;  %v285_v6 = vld [vmem:[#allocation2 + $0x18] sm:$0xff]  ;;  %v13066_v33 = vcombine.low %v1563_v58, %v1571_v60 }
 0x19b   : > { %8383 = vmatprep.subr.bf16.mxu0 %v12889_v14  ;;  %8629 = vmatprep.subr.bf16.mxu1 %v12891_v15  ;;  %v1498_v14 = vld [vmem:[#allocation2 + $0x2600] sm:$0xff]  ;;  %v293_v8 = vld [vmem:[#allocation2 + $0x58] sm:$0xff] }
 0x19c   : > { %v1506_v15 = vld [vmem:[#allocation2 + $0x2640] sm:$0xff] }
 0x19d   : > { %v13000_v59 = vcombine.low %v1498_v14, %v1506_v15 }
 0x19e   : > { %8384 = vmatpush1.bf16.msra.mxu0 %v12888_v20  ;;  %8630 = vmatpush1.bf16.msra.mxu1 %v12890_v21  ;;  %v13001_v20 = vcombine.high %v1498_v14, %v1506_v15  ;;  %v13003_v21 = vcombine.high %v1499_v16, %v1507_v17  ;;  %v300_v14 = vld [vmem:[#allocation2 + $0x90] sm:$0xff]  ;;  %v301_v17 = vld [vmem:[#allocation2 + $0x98] sm:$0xff] }
 0x19f   : > { %8385 = vmatprep.subr.bf16.mxu0 %v12905_v23  ;;  %8631 = vmatprep.subr.bf16.mxu1 %v12907_v25  ;;  %v1514_v23 = vld [vmem:[#allocation2 + $0x2680] sm:$0xff]  ;;  %v308_v15 = vld [vmem:[#allocation2 + $0xd0] sm:$0xff] }
 0x1a0   : > { %v1522_v25 = vld [vmem:[#allocation2 + $0x26c0] sm:$0xff] }
 0x1a1   : > { %v13016_v39 = vcombine.low %v1514_v23, %v1522_v25 }
 0x1a2   : > { %8386 = vmatpush1.bf16.msra.mxu0 %v12904_v30  ;;  %8632 = vmatpush1.bf16.msra.mxu1 %v12906_v31  ;;  %v13017_v30 = vcombine.high %v1514_v23, %v1522_v25  ;;  %v13019_v31 = vcombine.high %v1515_v26, %v1523_v27  ;;  %v316_v25 = vld [vmem:[#allocation2 + $0x110] sm:$0xff]  ;;  %v317_v27 = vld [vmem:[#allocation2 + $0x118] sm:$0xff] }
 0x1a3   : > { %8387 = vmatprep.subr.bf16.mxu0 %v12921_v34  ;;  %8633 = vmatprep.subr.bf16.mxu1 %v12923_v36  ;;  %v1530_v34 = vld [vmem:[#allocation2 + $0x2700] sm:$0xff]  ;;  %v324_v26 = vld [vmem:[#allocation2 + $0x150] sm:$0xff] }
 0x1a4   : > { %v1538_v36 = vld [vmem:[#allocation2 + $0x2740] sm:$0xff] }
 0x1a5   : > { %v13032_v50 = vcombine.low %v1530_v34, %v1538_v36 }
 0x1a6   : > { %8388 = vmatpush1.bf16.msra.mxu0 %v12920_v42  ;;  %8634 = vmatpush1.bf16.msra.mxu1 %v12922_v45  ;;  %v13033_v42 = vcombine.high %v1530_v34, %v1538_v36  ;;  %v13035_v45 = vcombine.high %v1531_v37, %v1539_v38  ;;  %v340_v34 = vld [vmem:[#allocation2 + $0x1d0] sm:$0xff]  ;;  %v333_v36 = vld [vmem:[#allocation2 + $0x198] sm:$0xff]  ;;  %v11820_v38 = vcombine.low %v316_v25, %v324_v26 }
 0x1a7   : > { %8389 = vmatprep.subr.bf16.mxu0 %v12937_v46  ;;  %8635 = vmatprep.subr.bf16.mxu1 %v12939_v47  ;;  %v1546_v46 = vld [vmem:[#allocation2 + $0x2780] sm:$0xff]  ;;  %v341_v37 = vld [vmem:[#allocation2 + $0x1d8] sm:$0xff] }
 0x1a8   : > { %v1554_v47 = vld [vmem:[#allocation2 + $0x27c0] sm:$0xff] }
 0x1a9   : > { %v13048_v61 = vcombine.low %v1546_v46, %v1554_v47 }
 0x1aa   : > { %8390 = vmatpush1.bf16.msra.mxu0 %v12936_v52  ;;  %8636 = vmatpush1.bf16.msra.mxu1 %v12938_v55  ;;  %v13049_v52 = vcombine.high %v1546_v46, %v1554_v47  ;;  %v13051_v55 = vcombine.high %v1547_v48, %v1555_v49  ;;  %v356_v46 = vld [vmem:[#allocation2 + $0x250] sm:$0xff]  ;;  %v349_v47 = vld [vmem:[#allocation2 + $0x218] sm:$0xff] }
 0x1ab   : > { %8391 = vmatprep.subr.bf16.mxu0 %v12953_v56  ;;  %8637 = vmatprep.subr.bf16.mxu1 %v12955_v57  ;;  %v1562_v56 = vld [vmem:[#allocation2 + $0x2800] sm:$0xff]  ;;  %v357_v48 = vld [vmem:[#allocation2 + $0x258] sm:$0xff] }
 0x1ac   : > { %v1570_v57 = vld [vmem:[#allocation2 + $0x2840] sm:$0xff] }
 0x1ad   : > { %v13064_v5 = vcombine.low %v1562_v56, %v1570_v57 }
 0x1ae   : > { %8392 = vmatpush1.bf16.msra.mxu0 %v12952_v0  ;;  %8638 = vmatpush1.bf16.msra.mxu1 %v12954_v1  ;;  %v13065_v0 = vcombine.high %v1562_v56, %v1570_v57  ;;  %v13067_v1 = vcombine.high %v1563_v58, %v1571_v60  ;;  %v372_v56 = vld [vmem:[#allocation2 + $0x2d0] sm:$0xff]  ;;  %v365_v57 = vld [vmem:[#allocation2 + $0x298] sm:$0xff] }
 0x1af   : > { %8393 = vmatprep.subr.bf16.mxu0 %v12969_v2  ;;  %8639 = vmatprep.subr.bf16.mxu1 %v12971_v4  ;;  %v284_v2 = vld [vmem:[#allocation2 + $0x10] sm:$0xff]  ;;  %v373_v58 = vld [vmem:[#allocation2 + $0x2d8] sm:$0xff] }
 0x1b0   : > { %v292_v4 = vld [vmem:[#allocation2 + $0x50] sm:$0xff] }
 0x1b2   : > { %8394 = vmatpush1.bf16.msra.mxu0 %v12968_v9  ;;  %8640 = vmatpush1.bf16.msra.mxu1 %v12970_v10  ;;  %v11789_v9 = vcombine.high %v284_v2, %v292_v4  ;;  %v11791_v10 = vcombine.high %v285_v6, %v293_v8 }
 0x1b3   : > { %8395 = vmatprep.subr.bf16.mxu0 %v12985_v11  ;;  %8641 = vmatprep.subr.bf16.mxu1 %v12987_v12  ;;  %v14033_v11 = vmov 0   ;;  %v1699_v12 = vcombine.high %v14300_v22, %v14300_v22 }
 0x1b5   : > { %v14321_v16 = vrot.slane %v1699_v12, %v14243_v53  ;;  %v11804_v53 = vcombine.low %v300_v14, %v308_v15  ;;  %v404_v12 = vld [vmem:[#allocation2 + $0x3d0] sm:$0xff] }
 0x1b6   : > { %8396 = vmatpush1.bf16.msra.mxu0 %v12984_v18  ;;  %8642 = vmatpush1.bf16.msra.mxu1 %v12986_v19  ;;  %v309_v18 = vld [vmem:[#allocation2 + $0xd8] sm:$0xff]  ;;  %v11788_v19 = vcombine.low %v284_v2, %v292_v4  ;;  %v388_v2 = vld [vmem:[#allocation2 + $0x350] sm:$0xff] }
 0x1b7   : > { %8397 = vmatprep.subr.bf16.mxu0 %v13001_v20  ;;  %8643 = vmatprep.subr.bf16.mxu1 %v13003_v21  ;;  %v11790_v20 = vcombine.low %v285_v6, %v293_v8  ;;  %v11805_v21 = vcombine.high %v300_v14, %v308_v15  ;;  %v11807_v23 = vcombine.high %v301_v17, %v309_v18  ;;  %v381_v4 = vld [vmem:[#allocation2 + $0x318] sm:$0xff] }
 0x1b8   : > { %v11806_v22 = vcombine.low %v301_v17, %v309_v18  ;;  %v11870_v8 = vcombine.low %v365_v57, %v373_v58  ;;  %v397_v14 = vld [vmem:[#allocation2 + $0x398] sm:$0xff] }
 0x1b9   : > { %v405_v15 = vld [vmem:[#allocation2 + $0x3d8] sm:$0xff] }
 0x1ba   : > { %8398 = vmatpush1.bf16.msra.mxu0 %v13000_v59  ;;  %8644 = vmatpush1.bf16.msra.mxu1 %v13002_v28  ;;  %v325_v59 = vld [vmem:[#allocation2 + $0x158] sm:$0xff]  ;;  %v11821_v28 = vcombine.high %v316_v25, %v324_v26 }
 0x1bb   : > { %8399 = vmatprep.subr.bf16.mxu0 %v13017_v30  ;;  %8645 = vmatprep.subr.bf16.mxu1 %v13019_v31  ;;  %v11823_v30 = vcombine.high %v317_v27, %v325_v59  ;;  %v332_v31 = vld [vmem:[#allocation2 + $0x190] sm:$0xff]  ;;  %v413_v25 = vld [vmem:[#allocation2 + $0x418] sm:$0xff] }
 0x1bc   : > { %v11836_v49 = vcombine.low %v332_v31, %v340_v34  ;;  %v421_v26 = vld [vmem:[#allocation2 + $0x458] sm:$0xff] }
 0x1be   : > { %8400 = vmatpush1.bf16.msra.mxu0 %v13016_v39  ;;  %8646 = vmatpush1.bf16.msra.mxu1 %v13018_v40  ;;  %v11822_v39 = vcombine.low %v317_v27, %v325_v59  ;;  %v11837_v40 = vcombine.high %v332_v31, %v340_v34  ;;  %v11902_v59 = vcombine.low %v397_v14, %v405_v15  ;;  %v429_v31 = vld [vmem:[#allocation2 + $0x498] sm:$0xff] }
 0x1bf   : > { %8401 = vmatprep.subr.bf16.mxu0 %v13033_v42  ;;  %8647 = vmatprep.subr.bf16.mxu1 %v13035_v45  ;;  %v11839_v42 = vcombine.high %v333_v36, %v341_v37  ;;  %v348_v45 = vld [vmem:[#allocation2 + $0x210] sm:$0xff]  ;;  %v437_v34 = vld [vmem:[#allocation2 + $0x4d8] sm:$0xff] }
 0x1c0   : > { %v11852_v60 = vcombine.low %v348_v45, %v356_v46 }
 0x1c2   : > { %8402 = vmatpush1.bf16.msra.mxu0 %v13032_v50  ;;  %8648 = vmatpush1.bf16.msra.mxu1 %v13034_v51  ;;  %v11838_v50 = vcombine.low %v333_v36, %v341_v37  ;;  %v11853_v51 = vcombine.high %v348_v45, %v356_v46  ;;  %v11918_v37 = vcombine.low %v413_v25, %v421_v26  ;;  %v445_v45 = vld [vmem:[#allocation2 + $0x518] sm:$0xff] }
 0x1c3   : > { %8403 = vmatprep.subr.bf16.mxu0 %v13049_v52  ;;  %8649 = vmatprep.subr.bf16.mxu1 %v13051_v55  ;;  %v11855_v52 = vcombine.high %v349_v47, %v357_v48  ;;  %v364_v55 = vld [vmem:[#allocation2 + $0x290] sm:$0xff]  ;;  %v453_v46 = vld [vmem:[#allocation2 + $0x558] sm:$0xff] }
 0x1c4   : > { %v11868_v6 = vcombine.low %v364_v55, %v372_v56 }
 0x1c6   : > { %8404 = vmatpush1.bf16.msra.mxu0 %v13048_v61  ;;  %8650 = vmatpush1.bf16.msra.mxu1 %v13050_v62  ;;  %v11854_v61 = vcombine.low %v349_v47, %v357_v48  ;;  %v11869_v62 = vcombine.high %v364_v55, %v372_v56  ;;  %v11934_v48 = vcombine.low %v429_v31, %v437_v34  ;;  %v461_v55 = vld [vmem:[#allocation2 + $0x598] sm:$0xff] }
 0x1c7   : > { %8414 = vmatprep.subr.bf16.mxu0 %v13065_v0  ;;  %8660 = vmatprep.subr.bf16.mxu1 %v13067_v1  ;;  %v11871_v0 = vcombine.high %v365_v57, %v373_v58  ;;  %v380_v1 = vld [vmem:[#allocation2 + $0x310] sm:$0xff]  ;;  %v469_v56 = vld [vmem:[#allocation2 + $0x5d8] sm:$0xff]  ;;  %v11950_v58 = vcombine.low %v445_v45, %v453_v46 }
 0x1c8   : > { %v11884_v17 = vcombine.low %v380_v1, %v388_v2 }
 0x1c9   : > { %8406 = vmatmul.mubr.bf16.vlgmr.msra.gmra.mrb[0].mxu0 %v14304_v29  ;;  %8652 = vmatmul.mubr.bf16.vlgmr.msra.gmra.mrb[0].mxu1 %v14304_v29 }
 0x1ca   : > { %8415 = vmatpush1.bf16.msra.mxu0 %v13064_v5  ;;  %8661 = vmatpush1.bf16.msra.mxu1 %v13066_v33  ;;  %v389_v5 = vld [vmem:[#allocation2 + $0x358] sm:$0xff]  ;;  %v11885_v33 = vcombine.high %v380_v1, %v388_v2 }
 0x1cb   : > { %8446 = vmatprep.mubr.bf16.mxu0 %v14033_v11  ;;  %8692 = vmatprep.mubr.bf16.mxu1 %v14033_v11  ;;  %v11886_v18 = vcombine.low %v381_v4, %v389_v5  ;;  %v477_v1 = vld [vmem:[#allocation2 + $0x618] sm:$0xff] }
 0x1cc   : > { %8701 = vmatprep.subr.bf16.mxu0 %v11789_v9  ;;  %8947 = vmatprep.subr.bf16.mxu1 %v11791_v10  ;;  %v11887_v9 = vcombine.high %v381_v4, %v389_v5  ;;  %v396_v10 = vld [vmem:[#allocation2 + $0x390] sm:$0xff]  ;;  %v485_v2 = vld [vmem:[#allocation2 + $0x658] sm:$0xff]  ;;  %v11966_v5 = vcombine.low %v461_v55, %v469_v56 }
 0x1cd   : > { %v11900_v27 = vcombine.low %v396_v10, %v404_v12 }
 0x1d5   : > { %13080 = vmatmul.mubr.msk.bf16.vlgmr.msra.gmra.mrb[0].mxu0 %vm8205_vm0, %v14321_v16  ;;  %13081 = vmatmul.mubr.msk.bf16.vlgmr.msra.gmra.mrb[0].mxu1 %vm8205_vm0, %v14321_v16 }
 0x1d6   : > { %8702 = vmatpush1.bf16.msra.mxu0 %v11788_v19  ;;  %8948 = vmatpush1.bf16.msra.mxu1 %v11790_v20  ;;  %v11901_v19 = vcombine.high %v396_v10, %v404_v12  ;;  %v11903_v20 = vcombine.high %v397_v14, %v405_v15  ;;  %v493_v10 = vld [vmem:[#allocation2 + $0x698] sm:$0xff]  ;;  %v11982_v15 = vcombine.low %v477_v1, %v485_v2 }
 0x1d7   : > { %8703 = vmatprep.subr.bf16.mxu0 %v11805_v21  ;;  %8949 = vmatprep.subr.bf16.mxu1 %v11807_v23  ;;  %v412_v21 = vld [vmem:[#allocation2 + $0x410] sm:$0xff]  ;;  %v501_v12 = vld [vmem:[#allocation2 + $0x6d8] sm:$0xff] }
 0x1d8   : > { %8733 = vmatprep.mubr.bf16.mxu0 %v14254_v3  ;;  %8979 = vmatprep.mubr.bf16.mxu1 %v14254_v3  ;;  %v420_v23 = vld [vmem:[#allocation2 + $0x450] sm:$0xff] }
 0x1d9   : > { %v11916_v36 = vcombine.low %v412_v21, %v420_v23 }
 0x1da   : > { %8704 = vmatpush1.bf16.msra.mxu0 %v11804_v53  ;;  %8950 = vmatpush1.bf16.msra.mxu1 %v11806_v22  ;;  %v11917_v53 = vcombine.high %v412_v21, %v420_v23  ;;  %v11919_v22 = vcombine.high %v413_v25, %v421_v26  ;;  %v509_v21 = vld [vmem:[#allocation2 + $0x718] sm:$0xff]  ;;  %v11998_v26 = vcombine.low %v493_v10, %v501_v12 }
 0x1db   : > { %8705 = vmatprep.subr.bf16.mxu0 %v11821_v28  ;;  %8951 = vmatprep.subr.bf16.mxu1 %v11823_v30  ;;  %v428_v28 = vld [vmem:[#allocation2 + $0x490] sm:$0xff]  ;;  %v517_v23 = vld [vmem:[#allocation2 + $0x758] sm:$0xff] }
 0x1dc   : > { %v436_v30 = vld [vmem:[#allocation2 + $0x4d0] sm:$0xff] }
 0x1dd   : > { %v11932_v47 = vcombine.low %v428_v28, %v436_v30 }
 0x1de   : > { %8706 = vmatpush1.bf16.msra.mxu0 %v11820_v38  ;;  %8952 = vmatpush1.bf16.msra.mxu1 %v11822_v39  ;;  %v11933_v38 = vcombine.high %v428_v28, %v436_v30  ;;  %v11935_v39 = vcombine.high %v429_v31, %v437_v34  ;;  %v525_v28 = vld [vmem:[#allocation2 + $0x798] sm:$0xff]  ;;  %v12014_v34 = vcombine.low %v509_v21, %v517_v23 }
 0x1df   : > { %8707 = vmatprep.subr.bf16.mxu0 %v11837_v40  ;;  %8953 = vmatprep.subr.bf16.mxu1 %v11839_v42  ;;  %v444_v40 = vld [vmem:[#allocation2 + $0x510] sm:$0xff]  ;;  %v533_v30 = vld [vmem:[#allocation2 + $0x7d8] sm:$0xff] }
 0x1e0   : > { %v452_v42 = vld [vmem:[#allocation2 + $0x550] sm:$0xff] }
 0x1e1   : > { %v11948_v57 = vcombine.low %v444_v40, %v452_v42 }
 0x1e2   : > { %8708 = vmatpush1.bf16.msra.mxu0 %v11836_v49  ;;  %8954 = vmatpush1.bf16.msra.mxu1 %v11838_v50  ;;  %v11949_v49 = vcombine.high %v444_v40, %v452_v42  ;;  %v11951_v50 = vcombine.high %v445_v45, %v453_v46  ;;  %v541_v40 = vld [vmem:[#allocation2 + $0x818] sm:$0xff]  ;;  %v12030_v46 = vcombine.low %v525_v28, %v533_v30 }
 0x1e3   : > { %8709 = vmatprep.subr.bf16.mxu0 %v11853_v51  ;;  %8955 = vmatprep.subr.bf16.mxu1 %v11855_v52  ;;  %v460_v51 = vld [vmem:[#allocation2 + $0x590] sm:$0xff]  ;;  %v549_v42 = vld [vmem:[#allocation2 + $0x858] sm:$0xff] }
 0x1e4   : > { %v468_v52 = vld [vmem:[#allocation2 + $0x5d0] sm:$0xff] }
 0x1e5   : > { %v11964_v4 = vcombine.low %v460_v51, %v468_v52 }
 0x1e6   : > { %8710 = vmatpush1.bf16.msra.mxu0 %v11852_v60  ;;  %8956 = vmatpush1.bf16.msra.mxu1 %v11854_v61  ;;  %v11965_v60 = vcombine.high %v460_v51, %v468_v52  ;;  %v11967_v61 = vcombine.high %v461_v55, %v469_v56  ;;  %v557_v51 = vld [vmem:[#allocation2 + $0x898] sm:$0xff]  ;;  %v12046_v56 = vcombine.low %v541_v40, %v549_v42 }
 0x1e7   : > { %8711 = vmatprep.subr.bf16.mxu0 %v11869_v62  ;;  %8957 = vmatprep.subr.bf16.mxu1 %v11871_v0  ;;  %v476_v62 = vld [vmem:[#allocation2 + $0x610] sm:$0xff]  ;;  %v565_v52 = vld [vmem:[#allocation2 + $0x8d8] sm:$0xff] }
 0x1e8   : > { %v484_v0 = vld [vmem:[#allocation2 + $0x650] sm:$0xff] }
 0x1e9   : > { %v11980_v14 = vcombine.low %v476_v62, %v484_v0 }
 0x1ea   : > { %8712 = vmatpush1.bf16.msra.mxu0 %v11868_v6  ;;  %8958 = vmatpush1.bf16.msra.mxu1 %v11870_v8  ;;  %v11981_v6 = vcombine.high %v476_v62, %v484_v0  ;;  %v11983_v8 = vcombine.high %v477_v1, %v485_v2  ;;  %v573_v62 = vld [vmem:[#allocation2 + $0x918] sm:$0xff]  ;;  %v12062_v2 = vcombine.low %v557_v51, %v565_v52 }
 0x1eb   : > { %8713 = vmatprep.subr.bf16.mxu0 %v11885_v33  ;;  %8959 = vmatprep.subr.bf16.mxu1 %v11887_v9  ;;  %v492_v33 = vld [vmem:[#allocation2 + $0x690] sm:$0xff]  ;;  %v581_v0 = vld [vmem:[#allocation2 + $0x958] sm:$0xff] }
 0x1ec   : > { %v500_v9 = vld [vmem:[#allocation2 + $0x6d0] sm:$0xff] }
 0x1ed   : > { %v11996_v25 = vcombine.low %v492_v33, %v500_v9 }
 0x1ee   : > { %8714 = vmatpush1.bf16.msra.mxu0 %v11884_v17  ;;  %8960 = vmatpush1.bf16.msra.mxu1 %v11886_v18  ;;  %v11997_v17 = vcombine.high %v492_v33, %v500_v9  ;;  %v11999_v18 = vcombine.high %v493_v10, %v501_v12  ;;  %v589_v33 = vld [vmem:[#allocation2 + $0x998] sm:$0xff]  ;;  %v12078_v12 = vcombine.low %v573_v62, %v581_v0 }
 0x1ef   : > { %8715 = vmatprep.subr.bf16.mxu0 %v11901_v19  ;;  %8961 = vmatprep.subr.bf16.mxu1 %v11903_v20  ;;  %v508_v19 = vld [vmem:[#allocation2 + $0x710] sm:$0xff]  ;;  %v597_v9 = vld [vmem:[#allocation2 + $0x9d8] sm:$0xff] }
 0x1f0   : > { %v516_v20 = vld [vmem:[#allocation2 + $0x750] sm:$0xff] }
 0x1f1   : > { %v12012_v31 = vcombine.low %v508_v19, %v516_v20 }
 0x1f2   : > { %8716 = vmatpush1.bf16.msra.mxu0 %v11900_v27  ;;  %8962 = vmatpush1.bf16.msra.mxu1 %v11902_v59  ;;  %v12013_v27 = vcombine.high %v508_v19, %v516_v20  ;;  %v12015_v59 = vcombine.high %v509_v21, %v517_v23  ;;  %v605_v19 = vld [vmem:[#allocation2 + $0xa18] sm:$0xff]  ;;  %v12094_v23 = vcombine.low %v589_v33, %v597_v9 }
 0x1f3   : > { %8717 = vmatprep.subr.bf16.mxu0 %v11917_v53  ;;  %8963 = vmatprep.subr.bf16.mxu1 %v11919_v22  ;;  %v524_v53 = vld [vmem:[#allocation2 + $0x790] sm:$0xff]  ;;  %v613_v20 = vld [vmem:[#allocation2 + $0xa58] sm:$0xff] }
 0x1f4   : > { %v532_v22 = vld [vmem:[#allocation2 + $0x7d0] sm:$0xff] }
 0x1f5   : > { %v12028_v45 = vcombine.low %v524_v53, %v532_v22 }
 0x1f6   : > { %8718 = vmatpush1.bf16.msra.mxu0 %v11916_v36  ;;  %8964 = vmatpush1.bf16.msra.mxu1 %v11918_v37  ;;  %v12029_v36 = vcombine.high %v524_v53, %v532_v22  ;;  %v12031_v37 = vcombine.high %v525_v28, %v533_v30  ;;  %v621_v53 = vld [vmem:[#allocation2 + $0xa98] sm:$0xff]  ;;  %v12110_v30 = vcombine.low %v605_v19, %v613_v20 }
 0x1f7   : > { %8719 = vmatprep.subr.bf16.mxu0 %v11933_v38  ;;  %8965 = vmatprep.subr.bf16.mxu1 %v11935_v39  ;;  %v540_v38 = vld [vmem:[#allocation2 + $0x810] sm:$0xff]  ;;  %v629_v22 = vld [vmem:[#allocation2 + $0xad8] sm:$0xff] }
 0x1f8   : > { %v548_v39 = vld [vmem:[#allocation2 + $0x850] sm:$0xff] }
 0x1f9   : > { %v12044_v55 = vcombine.low %v540_v38, %v548_v39 }
 0x1fa   : > { %8720 = vmatpush1.bf16.msra.mxu0 %v11932_v47  ;;  %8966 = vmatpush1.bf16.msra.mxu1 %v11934_v48  ;;  %v12045_v47 = vcombine.high %v540_v38, %v548_v39  ;;  %v12047_v48 = vcombine.high %v541_v40, %v549_v42  ;;  %v637_v38 = vld [vmem:[#allocation2 + $0xb18] sm:$0xff]  ;;  %v12126_v42 = vcombine.low %v621_v53, %v629_v22 }
 0x1fb   : > { %8721 = vmatprep.subr.bf16.mxu0 %v11949_v49  ;;  %8967 = vmatprep.subr.bf16.mxu1 %v11951_v50  ;;  %v556_v49 = vld [vmem:[#allocation2 + $0x890] sm:$0xff]  ;;  %v645_v39 = vld [vmem:[#allocation2 + $0xb58] sm:$0xff] }
 0x1fc   : > { %v564_v50 = vld [vmem:[#allocation2 + $0x8d0] sm:$0xff] }
 0x1fd   : > { %v12060_v1 = vcombine.low %v556_v49, %v564_v50 }
 0x1fe   : > { %8722 = vmatpush1.bf16.msra.mxu0 %v11948_v57  ;;  %8968 = vmatpush1.bf16.msra.mxu1 %v11950_v58  ;;  %v12061_v57 = vcombine.high %v556_v49, %v564_v50  ;;  %v12063_v58 = vcombine.high %v557_v51, %v565_v52  ;;  %v653_v49 = vld [vmem:[#allocation2 + $0xb98] sm:$0xff]  ;;  %v12142_v52 = vcombine.low %v637_v38, %v645_v39 }
 0x1ff   : > { %8723 = vmatprep.subr.bf16.mxu0 %v11965_v60  ;;  %8969 = vmatprep.subr.bf16.mxu1 %v11967_v61  ;;  %v572_v60 = vld [vmem:[#allocation2 + $0x910] sm:$0xff]  ;;  %v661_v50 = vld [vmem:[#allocation2 + $0xbd8] sm:$0xff] }
 0x200   : > { %v580_v61 = vld [vmem:[#allocation2 + $0x950] sm:$0xff] }
 0x201   : > { %v12076_v10 = vcombine.low %v572_v60, %v580_v61 }
 0x202   : > { %8724 = vmatpush1.bf16.msra.mxu0 %v11964_v4  ;;  %8970 = vmatpush1.bf16.msra.mxu1 %v11966_v5  ;;  %v12077_v4 = vcombine.high %v572_v60, %v580_v61  ;;  %v12079_v5 = vcombine.high %v573_v62, %v581_v0  ;;  %v669_v60 = vld [vmem:[#allocation2 + $0xc18] sm:$0xff]  ;;  %v12158_v0 = vcombine.low %v653_v49, %v661_v50 }
 0x203   : > { %8725 = vmatprep.subr.bf16.mxu0 %v11981_v6  ;;  %8971 = vmatprep.subr.bf16.mxu1 %v11983_v8  ;;  %v588_v6 = vld [vmem:[#allocation2 + $0x990] sm:$0xff]  ;;  %v677_v61 = vld [vmem:[#allocation2 + $0xc58] sm:$0xff] }
 0x204   : > { %v596_v8 = vld [vmem:[#allocation2 + $0x9d0] sm:$0xff] }
 0x205   : > { %v12092_v21 = vcombine.low %v588_v6, %v596_v8 }
 0x206   : > { %8726 = vmatpush1.bf16.msra.mxu0 %v11980_v14  ;;  %8972 = vmatpush1.bf16.msra.mxu1 %v11982_v15  ;;  %v12093_v14 = vcombine.high %v588_v6, %v596_v8  ;;  %v12095_v15 = vcombine.high %v589_v33, %v597_v9  ;;  %v685_v6 = vld [vmem:[#allocation2 + $0xc98] sm:$0xff]  ;;  %v12174_v9 = vcombine.low %v669_v60, %v677_v61 }
 0x207   : > { %8727 = vmatprep.subr.bf16.mxu0 %v11997_v17  ;;  %8973 = vmatprep.subr.bf16.mxu1 %v11999_v18  ;;  %v604_v17 = vld [vmem:[#allocation2 + $0xa10] sm:$0xff]  ;;  %v693_v8 = vld [vmem:[#allocation2 + $0xcd8] sm:$0xff] }
 0x208   : > { %v612_v18 = vld [vmem:[#allocation2 + $0xa50] sm:$0xff] }
 0x209   : > { %v12108_v28 = vcombine.low %v604_v17, %v612_v18 }
 0x20a   : > { %8728 = vmatpush1.bf16.msra.mxu0 %v11996_v25  ;;  %8974 = vmatpush1.bf16.msra.mxu1 %v11998_v26  ;;  %v12109_v25 = vcombine.high %v604_v17, %v612_v18  ;;  %v12111_v26 = vcombine.high %v605_v19, %v613_v20  ;;  %v701_v17 = vld [vmem:[#allocation2 + $0xd18] sm:$0xff]  ;;  %v12190_v20 = vcombine.low %v685_v6, %v693_v8 }
 0x20b   : > { %8729 = vmatprep.subr.bf16.mxu0 %v12013_v27  ;;  %8975 = vmatprep.subr.bf16.mxu1 %v12015_v59  ;;  %v620_v27 = vld [vmem:[#allocation2 + $0xa90] sm:$0xff]  ;;  %v709_v18 = vld [vmem:[#allocation2 + $0xd58] sm:$0xff] }
 0x20c   : > { %v628_v59 = vld [vmem:[#allocation2 + $0xad0] sm:$0xff] }
 0x20d   : > { %v12124_v40 = vcombine.low %v620_v27, %v628_v59 }
 0x20e   : > { %8730 = vmatpush1.bf16.msra.mxu0 %v12012_v31  ;;  %8976 = vmatpush1.bf16.msra.mxu1 %v12014_v34  ;;  %v12125_v31 = vcombine.high %v620_v27, %v628_v59  ;;  %v12127_v34 = vcombine.high %v621_v53, %v629_v22  ;;  %v717_v27 = vld [vmem:[#allocation2 + $0xd98] sm:$0xff]  ;;  %v12206_v22 = vcombine.low %v701_v17, %v709_v18 }
 0x20f   : > { %8731 = vmatprep.subr.bf16.mxu0 %v12029_v36  ;;  %8977 = vmatprep.subr.bf16.mxu1 %v12031_v37  ;;  %v636_v36 = vld [vmem:[#allocation2 + $0xb10] sm:$0xff]  ;;  %v725_v59 = vld [vmem:[#allocation2 + $0xdd8] sm:$0xff] }
 0x210   : > { %v644_v37 = vld [vmem:[#allocation2 + $0xb50] sm:$0xff] }
 0x211   : > { %v12140_v51 = vcombine.low %v636_v36, %v644_v37 }
 0x212   : > { %8732 = vmatpush1.bf16.msra.mxu0 %v12028_v45  ;;  %8978 = vmatpush1.bf16.msra.mxu1 %v12030_v46  ;;  %v12141_v45 = vcombine.high %v636_v36, %v644_v37  ;;  %v12143_v46 = vcombine.high %v637_v38, %v645_v39  ;;  %v733_v36 = vld [vmem:[#allocation2 + $0xe18] sm:$0xff]  ;;  %v12222_v39 = vcombine.low %v717_v27, %v725_v59 }
 0x213   : > { %8742 = vmatprep.subr.bf16.mxu0 %v12045_v47  ;;  %8988 = vmatprep.subr.bf16.mxu1 %v12047_v48  ;;  %v652_v47 = vld [vmem:[#allocation2 + $0xb90] sm:$0xff]  ;;  %v741_v37 = vld [vmem:[#allocation2 + $0xe58] sm:$0xff] }
 0x214   : > { %v660_v48 = vld [vmem:[#allocation2 + $0xbd0] sm:$0xff] }
 0x215   : > { %8734 = vmatmul.mubr.bf16.vlgmr.msra.gmra.mrb[4].mxu0 %v14250_v63  ;;  %8980 = vmatmul.mubr.bf16.vlgmr.msra.gmra.mrb[4].mxu1 %v14250_v63  ;;  %v12156_v62 = vcombine.low %v652_v47, %v660_v48 }
 0x216   : > { %8743 = vmatpush1.bf16.msra.mxu0 %v12044_v55  ;;  %8989 = vmatpush1.bf16.msra.mxu1 %v12046_v56  ;;  %v12157_v55 = vcombine.high %v652_v47, %v660_v48  ;;  %v12159_v56 = vcombine.high %v653_v49, %v661_v50  ;;  %v749_v47 = vld [vmem:[#allocation2 + $0xe98] sm:$0xff]  ;;  %v12238_v50 = vcombine.low %v733_v36, %v741_v37 }
 0x217   : > { %8744 = vmatprep.subr.bf16.mxu0 %v12061_v57  ;;  %8990 = vmatprep.subr.bf16.mxu1 %v12063_v58  ;;  %v668_v57 = vld [vmem:[#allocation2 + $0xc10] sm:$0xff]  ;;  %v757_v48 = vld [vmem:[#allocation2 + $0xed8] sm:$0xff] }
 0x218   : > { %8774 = vmatprep.mubr.bf16.mxu0 %v14265_v35  ;;  %9020 = vmatprep.mubr.bf16.mxu1 %v14265_v35  ;;  %v676_v58 = vld [vmem:[#allocation2 + $0xc50] sm:$0xff] }
 0x219   : > { %v12172_v33 = vcombine.low %v668_v57, %v676_v58 }
 0x21a   : > { %8745 = vmatpush1.bf16.msra.mxu0 %v12060_v1  ;;  %8991 = vmatpush1.bf16.msra.mxu1 %v12062_v2  ;;  %v12173_v1 = vcombine.high %v668_v57, %v676_v58  ;;  %v12175_v2 = vcombine.high %v669_v60, %v677_v61  ;;  %v765_v57 = vld [vmem:[#allocation2 + $0xf18] sm:$0xff]  ;;  %v12254_v61 = vcombine.low %v749_v47, %v757_v48 }
 0x21b   : > { %8746 = vmatprep.subr.bf16.mxu0 %v12077_v4  ;;  %8992 = vmatprep.subr.bf16.mxu1 %v12079_v5  ;;  %v684_v4 = vld [vmem:[#allocation2 + $0xc90] sm:$0xff]  ;;  %v773_v58 = vld [vmem:[#allocation2 + $0xf58] sm:$0xff] }
 0x21c   : > { %v692_v5 = vld [vmem:[#allocation2 + $0xcd0] sm:$0xff] }
 0x21d   : > { %v12188_v19 = vcombine.low %v684_v4, %v692_v5 }
 0x21e   : > { %8747 = vmatpush1.bf16.msra.mxu0 %v12076_v10  ;;  %8993 = vmatpush1.bf16.msra.mxu1 %v12078_v12  ;;  %v12189_v10 = vcombine.high %v684_v4, %v692_v5  ;;  %v12191_v12 = vcombine.high %v685_v6, %v693_v8  ;;  %v781_v4 = vld [vmem:[#allocation2 + $0xf98] sm:$0xff]  ;;  %v12270_v8 = vcombine.low %v765_v57, %v773_v58 }
 0x21f   : > { %8748 = vmatprep.subr.bf16.mxu0 %v12093_v14  ;;  %8994 = vmatprep.subr.bf16.mxu1 %v12095_v15  ;;  %v700_v14 = vld [vmem:[#allocation2 + $0xd10] sm:$0xff]  ;;  %v789_v5 = vld [vmem:[#allocation2 + $0xfd8] sm:$0xff] }
 0x220   : > { %v708_v15 = vld [vmem:[#allocation2 + $0xd50] sm:$0xff] }
 0x221   : > { %v12204_v53 = vcombine.low %v700_v14, %v708_v15 }
 0x222   : > { %8749 = vmatpush1.bf16.msra.mxu0 %v12092_v21  ;;  %8995 = vmatpush1.bf16.msra.mxu1 %v12094_v23  ;;  %v12205_v21 = vcombine.high %v700_v14, %v708_v15  ;;  %v12207_v23 = vcombine.high %v701_v17, %v709_v18  ;;  %v797_v14 = vld [vmem:[#allocation2 + $0x1018] sm:$0xff]  ;;  %v12286_v18 = vcombine.low %v781_v4, %v789_v5 }
 0x223   : > { %8750 = vmatprep.subr.bf16.mxu0 %v12109_v25  ;;  %8996 = vmatprep.subr.bf16.mxu1 %v12111_v26  ;;  %v716_v25 = vld [vmem:[#allocation2 + $0xd90] sm:$0xff]  ;;  %v805_v15 = vld [vmem:[#allocation2 + $0x1058] sm:$0xff] }
 0x224   : > { %v724_v26 = vld [vmem:[#allocation2 + $0xdd0] sm:$0xff] }
 0x225   : > { %v12220_v38 = vcombine.low %v716_v25, %v724_v26 }
 0x226   : > { %8751 = vmatpush1.bf16.msra.mxu0 %v12108_v28  ;;  %8997 = vmatpush1.bf16.msra.mxu1 %v12110_v30  ;;  %v12221_v28 = vcombine.high %v716_v25, %v724_v26  ;;  %v12223_v30 = vcombine.high %v717_v27, %v725_v59  ;;  %v813_v25 = vld [vmem:[#allocation2 + $0x1098] sm:$0xff]  ;;  %v12302_v59 = vcombine.low %v797_v14, %v805_v15 }
 0x227   : > { %8752 = vmatprep.subr.bf16.mxu0 %v12125_v31  ;;  %8998 = vmatprep.subr.bf16.mxu1 %v12127_v34  ;;  %v732_v31 = vld [vmem:[#allocation2 + $0xe10] sm:$0xff]  ;;  %v821_v26 = vld [vmem:[#allocation2 + $0x10d8] sm:$0xff] }
 0x228   : > { %v740_v34 = vld [vmem:[#allocation2 + $0xe50] sm:$0xff] }
 0x229   : > { %v12236_v49 = vcombine.low %v732_v31, %v740_v34 }
 0x22a   : > { %8753 = vmatpush1.bf16.msra.mxu0 %v12124_v40  ;;  %8999 = vmatpush1.bf16.msra.mxu1 %v12126_v42  ;;  %v12237_v40 = vcombine.high %v732_v31, %v740_v34  ;;  %v12239_v42 = vcombine.high %v733_v36, %v741_v37  ;;  %v829_v31 = vld [vmem:[#allocation2 + $0x1118] sm:$0xff]  ;;  %v12318_v37 = vcombine.low %v813_v25, %v821_v26 }
 0x22b   : > { %8754 = vmatprep.subr.bf16.mxu0 %v12141_v45  ;;  %9000 = vmatprep.subr.bf16.mxu1 %v12143_v46  ;;  %v748_v45 = vld [vmem:[#allocation2 + $0xe90] sm:$0xff]  ;;  %v837_v34 = vld [vmem:[#allocation2 + $0x1158] sm:$0xff] }
 0x22c   : > { %v756_v46 = vld [vmem:[#allocation2 + $0xed0] sm:$0xff] }
 0x22d   : > { %v12252_v60 = vcombine.low %v748_v45, %v756_v46 }
 0x22e   : > { %8755 = vmatpush1.bf16.msra.mxu0 %v12140_v51  ;;  %9001 = vmatpush1.bf16.msra.mxu1 %v12142_v52  ;;  %v12253_v51 = vcombine.high %v748_v45, %v756_v46  ;;  %v12255_v52 = vcombine.high %v749_v47, %v757_v48  ;;  %v845_v45 = vld [vmem:[#allocation2 + $0x1198] sm:$0xff]  ;;  %v12334_v48 = vcombine.low %v829_v31, %v837_v34 }
 0x22f   : > { %8756 = vmatprep.subr.bf16.mxu0 %v12157_v55  ;;  %9002 = vmatprep.subr.bf16.mxu1 %v12159_v56  ;;  %v764_v55 = vld [vmem:[#allocation2 + $0xf10] sm:$0xff]  ;;  %v853_v46 = vld [vmem:[#allocation2 + $0x11d8] sm:$0xff] }
 0x230   : > { %v772_v56 = vld [vmem:[#allocation2 + $0xf50] sm:$0xff] }
 0x231   : > { %v12268_v6 = vcombine.low %v764_v55, %v772_v56 }
 0x232   : > { %8757 = vmatpush1.bf16.msra.mxu0 %v12156_v62  ;;  %9003 = vmatpush1.bf16.msra.mxu1 %v12158_v0  ;;  %v12269_v62 = vcombine.high %v764_v55, %v772_v56  ;;  %v12271_v0 = vcombine.high %v765_v57, %v773_v58  ;;  %v861_v55 = vld [vmem:[#allocation2 + $0x1218] sm:$0xff]  ;;  %v12350_v58 = vcombine.low %v845_v45, %v853_v46 }
 0x233   : > { %8758 = vmatprep.subr.bf16.mxu0 %v12173_v1  ;;  %9004 = vmatprep.subr.bf16.mxu1 %v12175_v2  ;;  %v780_v1 = vld [vmem:[#allocation2 + $0xf90] sm:$0xff]  ;;  %v869_v56 = vld [vmem:[#allocation2 + $0x1258] sm:$0xff] }
 0x234   : > { %v788_v2 = vld [vmem:[#allocation2 + $0xfd0] sm:$0xff] }
 0x235   : > { %v12284_v17 = vcombine.low %v780_v1, %v788_v2 }
 0x236   : > { %8759 = vmatpush1.bf16.msra.mxu0 %v12172_v33  ;;  %9005 = vmatpush1.bf16.msra.mxu1 %v12174_v9  ;;  %v12285_v33 = vcombine.high %v780_v1, %v788_v2  ;;  %v12287_v9 = vcombine.high %v781_v4, %v789_v5  ;;  %v877_v1 = vld [vmem:[#allocation2 + $0x1298] sm:$0xff]  ;;  %v12366_v5 = vcombine.low %v861_v55, %v869_v56 }
 0x237   : > { %8760 = vmatprep.subr.bf16.mxu0 %v12189_v10  ;;  %9006 = vmatprep.subr.bf16.mxu1 %v12191_v12  ;;  %v796_v10 = vld [vmem:[#allocation2 + $0x1010] sm:$0xff]  ;;  %v885_v2 = vld [vmem:[#allocation2 + $0x12d8] sm:$0xff] }
 0x238   : > { %v804_v12 = vld [vmem:[#allocation2 + $0x1050] sm:$0xff] }
 0x239   : > { %v12300_v27 = vcombine.low %v796_v10, %v804_v12 }
 0x23a   : > { %8761 = vmatpush1.bf16.msra.mxu0 %v12188_v19  ;;  %9007 = vmatpush1.bf16.msra.mxu1 %v12190_v20  ;;  %v12301_v19 = vcombine.high %v796_v10, %v804_v12  ;;  %v12303_v20 = vcombine.high %v797_v14, %v805_v15  ;;  %v893_v10 = vld [vmem:[#allocation2 + $0x1318] sm:$0xff]  ;;  %v12382_v15 = vcombine.low %v877_v1, %v885_v2 }
 0x23b   : > { %8762 = vmatprep.subr.bf16.mxu0 %v12205_v21  ;;  %9008 = vmatprep.subr.bf16.mxu1 %v12207_v23  ;;  %v812_v21 = vld [vmem:[#allocation2 + $0x1090] sm:$0xff]  ;;  %v901_v12 = vld [vmem:[#allocation2 + $0x1358] sm:$0xff] }
 0x23c   : > { %v820_v23 = vld [vmem:[#allocation2 + $0x10d0] sm:$0xff] }
 0x23d   : > { %v12316_v36 = vcombine.low %v812_v21, %v820_v23 }
 0x23e   : > { %8763 = vmatpush1.bf16.msra.mxu0 %v12204_v53  ;;  %9009 = vmatpush1.bf16.msra.mxu1 %v12206_v22  ;;  %v12317_v53 = vcombine.high %v812_v21, %v820_v23  ;;  %v12319_v22 = vcombine.high %v813_v25, %v821_v26  ;;  %v909_v21 = vld [vmem:[#allocation2 + $0x1398] sm:$0xff]  ;;  %v12398_v26 = vcombine.low %v893_v10, %v901_v12 }
 0x23f   : > { %8764 = vmatprep.subr.bf16.mxu0 %v12221_v28  ;;  %9010 = vmatprep.subr.bf16.mxu1 %v12223_v30  ;;  %v828_v28 = vld [vmem:[#allocation2 + $0x1110] sm:$0xff]  ;;  %v917_v23 = vld [vmem:[#allocation2 + $0x13d8] sm:$0xff] }
 0x240   : > { %v836_v30 = vld [vmem:[#allocation2 + $0x1150] sm:$0xff] }
 0x241   : > { %v12332_v47 = vcombine.low %v828_v28, %v836_v30 }
 0x242   : > { %8765 = vmatpush1.bf16.msra.mxu0 %v12220_v38  ;;  %9011 = vmatpush1.bf16.msra.mxu1 %v12222_v39  ;;  %v12333_v38 = vcombine.high %v828_v28, %v836_v30  ;;  %v12335_v39 = vcombine.high %v829_v31, %v837_v34  ;;  %v925_v28 = vld [vmem:[#allocation2 + $0x1418] sm:$0xff]  ;;  %v12414_v34 = vcombine.low %v909_v21, %v917_v23 }
 0x243   : > { %8766 = vmatprep.subr.bf16.mxu0 %v12237_v40  ;;  %9012 = vmatprep.subr.bf16.mxu1 %v12239_v42  ;;  %v844_v40 = vld [vmem:[#allocation2 + $0x1190] sm:$0xff]  ;;  %v933_v30 = vld [vmem:[#allocation2 + $0x1458] sm:$0xff] }
 0x244   : > { %v852_v42 = vld [vmem:[#allocation2 + $0x11d0] sm:$0xff] }
 0x245   : > { %v12348_v57 = vcombine.low %v844_v40, %v852_v42 }
 0x246   : > { %8767 = vmatpush1.bf16.msra.mxu0 %v12236_v49  ;;  %9013 = vmatpush1.bf16.msra.mxu1 %v12238_v50  ;;  %v12349_v49 = vcombine.high %v844_v40, %v852_v42  ;;  %v12351_v50 = vcombine.high %v845_v45, %v853_v46  ;;  %v941_v40 = vld [vmem:[#allocation2 + $0x1498] sm:$0xff]  ;;  %v12430_v46 = vcombine.low %v925_v28, %v933_v30 }
 0x247   : > { %8768 = vmatprep.subr.bf16.mxu0 %v12253_v51  ;;  %9014 = vmatprep.subr.bf16.mxu1 %v12255_v52  ;;  %v860_v51 = vld [vmem:[#allocation2 + $0x1210] sm:$0xff]  ;;  %v949_v42 = vld [vmem:[#allocation2 + $0x14d8] sm:$0xff] }
 0x248   : > { %v868_v52 = vld [vmem:[#allocation2 + $0x1250] sm:$0xff] }
 0x249   : > { %v12364_v4 = vcombine.low %v860_v51, %v868_v52 }
 0x24a   : > { %8769 = vmatpush1.bf16.msra.mxu0 %v12252_v60  ;;  %9015 = vmatpush1.bf16.msra.mxu1 %v12254_v61  ;;  %v12365_v60 = vcombine.high %v860_v51, %v868_v52  ;;  %v12367_v61 = vcombine.high %v861_v55, %v869_v56  ;;  %v957_v51 = vld [vmem:[#allocation2 + $0x1518] sm:$0xff]  ;;  %v12446_v56 = vcombine.low %v941_v40, %v949_v42 }
 0x24b   : > { %8770 = vmatprep.subr.bf16.mxu0 %v12269_v62  ;;  %9016 = vmatprep.subr.bf16.mxu1 %v12271_v0  ;;  %v876_v62 = vld [vmem:[#allocation2 + $0x1290] sm:$0xff]  ;;  %v965_v52 = vld [vmem:[#allocation2 + $0x1558] sm:$0xff] }
 0x24c   : > { %v884_v0 = vld [vmem:[#allocation2 + $0x12d0] sm:$0xff] }
 0x24d   : > { %v12380_v14 = vcombine.low %v876_v62, %v884_v0 }
 0x24e   : > { %8771 = vmatpush1.bf16.msra.mxu0 %v12268_v6  ;;  %9017 = vmatpush1.bf16.msra.mxu1 %v12270_v8  ;;  %v12381_v6 = vcombine.high %v876_v62, %v884_v0  ;;  %v12383_v8 = vcombine.high %v877_v1, %v885_v2  ;;  %v973_v62 = vld [vmem:[#allocation2 + $0x1598] sm:$0xff]  ;;  %v12462_v2 = vcombine.low %v957_v51, %v965_v52 }
 0x24f   : > { %8772 = vmatprep.subr.bf16.mxu0 %v12285_v33  ;;  %9018 = vmatprep.subr.bf16.mxu1 %v12287_v9  ;;  %v892_v33 = vld [vmem:[#allocation2 + $0x1310] sm:$0xff]  ;;  %v981_v0 = vld [vmem:[#allocation2 + $0x15d8] sm:$0xff] }
 0x250   : > { %v900_v9 = vld [vmem:[#allocation2 + $0x1350] sm:$0xff] }
 0x251   : > { %v12396_v25 = vcombine.low %v892_v33, %v900_v9 }
 0x252   : > { %8773 = vmatpush1.bf16.msra.mxu0 %v12284_v17  ;;  %9019 = vmatpush1.bf16.msra.mxu1 %v12286_v18  ;;  %v12397_v17 = vcombine.high %v892_v33, %v900_v9  ;;  %v12399_v18 = vcombine.high %v893_v10, %v901_v12  ;;  %v989_v33 = vld [vmem:[#allocation2 + $0x1618] sm:$0xff]  ;;  %v12478_v12 = vcombine.low %v973_v62, %v981_v0 }
 0x253   : > { %8783 = vmatprep.subr.bf16.mxu0 %v12301_v19  ;;  %9029 = vmatprep.subr.bf16.mxu1 %v12303_v20  ;;  %v908_v19 = vld [vmem:[#allocation2 + $0x1390] sm:$0xff]  ;;  %v997_v9 = vld [vmem:[#allocation2 + $0x1658] sm:$0xff] }
 0x254   : > { %v916_v20 = vld [vmem:[#allocation2 + $0x13d0] sm:$0xff] }
 0x255   : > { %8775 = vmatmul.mubr.bf16.vlgmr.msra.gmra.mrb[4].mxu0 %v14261_v24  ;;  %9021 = vmatmul.mubr.bf16.vlgmr.msra.gmra.mrb[4].mxu1 %v14261_v24  ;;  %v12412_v31 = vcombine.low %v908_v19, %v916_v20 }
 0x256   : > { %8784 = vmatpush1.bf16.msra.mxu0 %v12300_v27  ;;  %9030 = vmatpush1.bf16.msra.mxu1 %v12302_v59  ;;  %v12413_v27 = vcombine.high %v908_v19, %v916_v20  ;;  %v12415_v59 = vcombine.high %v909_v21, %v917_v23  ;;  %v1005_v19 = vld [vmem:[#allocation2 + $0x1698] sm:$0xff]  ;;  %v12494_v23 = vcombine.low %v989_v33, %v997_v9 }
 0x257   : > { %8785 = vmatprep.subr.bf16.mxu0 %v12317_v53  ;;  %9031 = vmatprep.subr.bf16.mxu1 %v12319_v22  ;;  %v924_v53 = vld [vmem:[#allocation2 + $0x1410] sm:$0xff]  ;;  %v1013_v20 = vld [vmem:[#allocation2 + $0x16d8] sm:$0xff] }
 0x258   : > { %8815 = vmatprep.mubr.bf16.mxu0 %v14280_v54  ;;  %9061 = vmatprep.mubr.bf16.mxu1 %v14280_v54  ;;  %v932_v22 = vld [vmem:[#allocation2 + $0x1450] sm:$0xff] }
 0x259   : > { %v12428_v45 = vcombine.low %v924_v53, %v932_v22 }
 0x25a   : > { %8786 = vmatpush1.bf16.msra.mxu0 %v12316_v36  ;;  %9032 = vmatpush1.bf16.msra.mxu1 %v12318_v37  ;;  %v12429_v36 = vcombine.high %v924_v53, %v932_v22  ;;  %v12431_v37 = vcombine.high %v925_v28, %v933_v30  ;;  %v1021_v53 = vld [vmem:[#allocation2 + $0x1718] sm:$0xff]  ;;  %v12510_v30 = vcombine.low %v1005_v19, %v1013_v20 }
 0x25b   : > { %8787 = vmatprep.subr.bf16.mxu0 %v12333_v38  ;;  %9033 = vmatprep.subr.bf16.mxu1 %v12335_v39  ;;  %v940_v38 = vld [vmem:[#allocation2 + $0x1490] sm:$0xff]  ;;  %v1029_v22 = vld [vmem:[#allocation2 + $0x1758] sm:$0xff] }
 0x25c   : > { %v948_v39 = vld [vmem:[#allocation2 + $0x14d0] sm:$0xff] }
 0x25d   : > { %v12444_v55 = vcombine.low %v940_v38, %v948_v39 }
 0x25e   : > { %8788 = vmatpush1.bf16.msra.mxu0 %v12332_v47  ;;  %9034 = vmatpush1.bf16.msra.mxu1 %v12334_v48  ;;  %v12445_v47 = vcombine.high %v940_v38, %v948_v39  ;;  %v12447_v48 = vcombine.high %v941_v40, %v949_v42  ;;  %v1037_v38 = vld [vmem:[#allocation2 + $0x1798] sm:$0xff]  ;;  %v12526_v42 = vcombine.low %v1021_v53, %v1029_v22 }
 0x25f   : > { %8789 = vmatprep.subr.bf16.mxu0 %v12349_v49  ;;  %9035 = vmatprep.subr.bf16.mxu1 %v12351_v50  ;;  %v956_v49 = vld [vmem:[#allocation2 + $0x1510] sm:$0xff]  ;;  %v1045_v39 = vld [vmem:[#allocation2 + $0x17d8] sm:$0xff] }
 0x260   : > { %v964_v50 = vld [vmem:[#allocation2 + $0x1550] sm:$0xff] }
 0x261   : > { %v12460_v1 = vcombine.low %v956_v49, %v964_v50 }
 0x262   : > { %8790 = vmatpush1.bf16.msra.mxu0 %v12348_v57  ;;  %9036 = vmatpush1.bf16.msra.mxu1 %v12350_v58  ;;  %v12461_v57 = vcombine.high %v956_v49, %v964_v50  ;;  %v12463_v58 = vcombine.high %v957_v51, %v965_v52  ;;  %v1053_v49 = vld [vmem:[#allocation2 + $0x1818] sm:$0xff]  ;;  %v12542_v52 = vcombine.low %v1037_v38, %v1045_v39 }
 0x263   : > { %8791 = vmatprep.subr.bf16.mxu0 %v12365_v60  ;;  %9037 = vmatprep.subr.bf16.mxu1 %v12367_v61  ;;  %v972_v60 = vld [vmem:[#allocation2 + $0x1590] sm:$0xff]  ;;  %v1061_v50 = vld [vmem:[#allocation2 + $0x1858] sm:$0xff] }
 0x264   : > { %v980_v61 = vld [vmem:[#allocation2 + $0x15d0] sm:$0xff] }
 0x265   : > { %v12476_v10 = vcombine.low %v972_v60, %v980_v61 }
 0x266   : > { %8792 = vmatpush1.bf16.msra.mxu0 %v12364_v4  ;;  %9038 = vmatpush1.bf16.msra.mxu1 %v12366_v5  ;;  %v12477_v4 = vcombine.high %v972_v60, %v980_v61  ;;  %v12479_v5 = vcombine.high %v973_v62, %v981_v0  ;;  %v1069_v60 = vld [vmem:[#allocation2 + $0x1898] sm:$0xff]  ;;  %v12558_v0 = vcombine.low %v1053_v49, %v1061_v50 }
 0x267   : > { %8793 = vmatprep.subr.bf16.mxu0 %v12381_v6  ;;  %9039 = vmatprep.subr.bf16.mxu1 %v12383_v8  ;;  %v988_v6 = vld [vmem:[#allocation2 + $0x1610] sm:$0xff]  ;;  %v1077_v61 = vld [vmem:[#allocation2 + $0x18d8] sm:$0xff] }
 0x268   : > { %v996_v8 = vld [vmem:[#allocation2 + $0x1650] sm:$0xff] }
 0x269   : > { %v12492_v21 = vcombine.low %v988_v6, %v996_v8 }
 0x26a   : > { %8794 = vmatpush1.bf16.msra.mxu0 %v12380_v14  ;;  %9040 = vmatpush1.bf16.msra.mxu1 %v12382_v15  ;;  %v12493_v14 = vcombine.high %v988_v6, %v996_v8  ;;  %v12495_v15 = vcombine.high %v989_v33, %v997_v9  ;;  %v1085_v6 = vld [vmem:[#allocation2 + $0x1918] sm:$0xff]  ;;  %v12574_v9 = vcombine.low %v1069_v60, %v1077_v61 }
 0x26b   : > { %8795 = vmatprep.subr.bf16.mxu0 %v12397_v17  ;;  %9041 = vmatprep.subr.bf16.mxu1 %v12399_v18  ;;  %v1004_v17 = vld [vmem:[#allocation2 + $0x1690] sm:$0xff]  ;;  %v1093_v8 = vld [vmem:[#allocation2 + $0x1958] sm:$0xff] }
 0x26c   : > { %v1012_v18 = vld [vmem:[#allocation2 + $0x16d0] sm:$0xff] }
 0x26d   : > { %v12508_v28 = vcombine.low %v1004_v17, %v1012_v18 }
 0x26e   : > { %8796 = vmatpush1.bf16.msra.mxu0 %v12396_v25  ;;  %9042 = vmatpush1.bf16.msra.mxu1 %v12398_v26  ;;  %v12509_v25 = vcombine.high %v1004_v17, %v1012_v18  ;;  %v12511_v26 = vcombine.high %v1005_v19, %v1013_v20  ;;  %v1101_v17 = vld [vmem:[#allocation2 + $0x1998] sm:$0xff]  ;;  %v12590_v20 = vcombine.low %v1085_v6, %v1093_v8 }
 0x26f   : > { %8797 = vmatprep.subr.bf16.mxu0 %v12413_v27  ;;  %9043 = vmatprep.subr.bf16.mxu1 %v12415_v59  ;;  %v1020_v27 = vld [vmem:[#allocation2 + $0x1710] sm:$0xff]  ;;  %v1109_v18 = vld [vmem:[#allocation2 + $0x19d8] sm:$0xff] }
 0x270   : > { %v1028_v59 = vld [vmem:[#allocation2 + $0x1750] sm:$0xff] }
 0x271   : > { %v12524_v40 = vcombine.low %v1020_v27, %v1028_v59 }
 0x272   : > { %8798 = vmatpush1.bf16.msra.mxu0 %v12412_v31  ;;  %9044 = vmatpush1.bf16.msra.mxu1 %v12414_v34  ;;  %v12525_v31 = vcombine.high %v1020_v27, %v1028_v59  ;;  %v12527_v34 = vcombine.high %v1021_v53, %v1029_v22  ;;  %v1117_v27 = vld [vmem:[#allocation2 + $0x1a18] sm:$0xff]  ;;  %v12606_v22 = vcombine.low %v1101_v17, %v1109_v18 }
 0x273   : > { %8799 = vmatprep.subr.bf16.mxu0 %v12429_v36  ;;  %9045 = vmatprep.subr.bf16.mxu1 %v12431_v37  ;;  %v1036_v36 = vld [vmem:[#allocation2 + $0x1790] sm:$0xff]  ;;  %v1125_v59 = vld [vmem:[#allocation2 + $0x1a58] sm:$0xff] }
 0x274   : > { %v1044_v37 = vld [vmem:[#allocation2 + $0x17d0] sm:$0xff] }
 0x275   : > { %v12540_v51 = vcombine.low %v1036_v36, %v1044_v37 }
 0x276   : > { %8800 = vmatpush1.bf16.msra.mxu0 %v12428_v45  ;;  %9046 = vmatpush1.bf16.msra.mxu1 %v12430_v46  ;;  %v12541_v45 = vcombine.high %v1036_v36, %v1044_v37  ;;  %v12543_v46 = vcombine.high %v1037_v38, %v1045_v39  ;;  %v1133_v36 = vld [vmem:[#allocation2 + $0x1a98] sm:$0xff]  ;;  %v1584_v39 = vsub.s32 0, %v14235_v43 }
 0x277   : > { %8801 = vmatprep.subr.bf16.mxu0 %v12445_v47  ;;  %9047 = vmatprep.subr.bf16.mxu1 %v12447_v48  ;;  %v1052_v47 = vld [vmem:[#allocation2 + $0x1810] sm:$0xff]  ;;  %v1141_v37 = vld [vmem:[#allocation2 + $0x1ad8] sm:$0xff] }
 0x278   : > { %v1060_v48 = vld [vmem:[#allocation2 + $0x1850] sm:$0xff] }
 0x279   : > { %v12556_v62 = vcombine.low %v1052_v47, %v1060_v48 }
 0x27a   : > { %8802 = vmatpush1.bf16.msra.mxu0 %v12444_v55  ;;  %9048 = vmatpush1.bf16.msra.mxu1 %v12446_v56  ;;  %v12557_v55 = vcombine.high %v1052_v47, %v1060_v48  ;;  %v12559_v56 = vcombine.high %v1053_v49, %v1061_v50  ;;  %v1596_v48 = vsub.s32 3, %v14235_v43  ;;  %v12639_v49 = vcombine.high %v1133_v36, %v1141_v37  ;;  %v1148_v50 = vld [vmem:[#allocation2 + $0x1b10] sm:$0xff] }
 0x27b   : > { %8803 = vmatprep.subr.bf16.mxu0 %v12461_v57  ;;  %9049 = vmatprep.subr.bf16.mxu1 %v12463_v58  ;;  %v1068_v57 = vld [vmem:[#allocation2 + $0x1890] sm:$0xff] }
 0x27c   : > { %v1076_v58 = vld [vmem:[#allocation2 + $0x18d0] sm:$0xff] }
 0x27d   : > { %v12572_v33 = vcombine.low %v1068_v57, %v1076_v58 }
 0x27e   : > { %8804 = vmatpush1.bf16.msra.mxu0 %v12460_v1  ;;  %9050 = vmatpush1.bf16.msra.mxu1 %v12462_v2  ;;  %v12573_v1 = vcombine.high %v1068_v57, %v1076_v58  ;;  %v12575_v2 = vcombine.high %v1069_v60, %v1077_v61  ;;  %v12638_v61 = vcombine.low %v1133_v36, %v1141_v37 }
 0x27f   : > { %8805 = vmatprep.subr.bf16.mxu0 %v12477_v4  ;;  %9051 = vmatprep.subr.bf16.mxu1 %v12479_v5  ;;  %v1084_v4 = vld [vmem:[#allocation2 + $0x1910] sm:$0xff] }
 0x280   : > { %v1092_v5 = vld [vmem:[#allocation2 + $0x1950] sm:$0xff] }
 0x281   : > { %v12588_v19 = vcombine.low %v1084_v4, %v1092_v5 }
 0x282   : > { %8806 = vmatpush1.bf16.msra.mxu0 %v12476_v10  ;;  %9052 = vmatpush1.bf16.msra.mxu1 %v12478_v12  ;;  %v12589_v10 = vcombine.high %v1084_v4, %v1092_v5  ;;  %v12591_v12 = vcombine.high %v1085_v6, %v1093_v8  ;;  %v1164_v4 = vld [vmem:[#allocation2 + $0x1b90] sm:$0xff] }
 0x283   : > { %8807 = vmatprep.subr.bf16.mxu0 %v12493_v14  ;;  %9053 = vmatprep.subr.bf16.mxu1 %v12495_v15  ;;  %v1100_v14 = vld [vmem:[#allocation2 + $0x1990] sm:$0xff] }
 0x284   : > { %v1108_v15 = vld [vmem:[#allocation2 + $0x19d0] sm:$0xff] }
 0x285   : > { %v12604_v53 = vcombine.low %v1100_v14, %v1108_v15  ;;  %v1172_v5 = vld [vmem:[#allocation2 + $0x1bd0] sm:$0xff] }
 0x286   : > { %8808 = vmatpush1.bf16.msra.mxu0 %v12492_v21  ;;  %9054 = vmatpush1.bf16.msra.mxu1 %v12494_v23  ;;  %v12605_v21 = vcombine.high %v1100_v14, %v1108_v15  ;;  %v12607_v23 = vcombine.high %v1101_v17, %v1109_v18  ;;  %v12668_v37 = vcombine.low %v1164_v4, %v1172_v5 }
 0x287   : > { %8809 = vmatprep.subr.bf16.mxu0 %v12509_v25  ;;  %9055 = vmatprep.subr.bf16.mxu1 %v12511_v26  ;;  %v1116_v25 = vld [vmem:[#allocation2 + $0x1a10] sm:$0xff] }
 0x288   : > { %v1124_v26 = vld [vmem:[#allocation2 + $0x1a50] sm:$0xff] }
 0x289   : > { %v12620_v38 = vcombine.low %v1116_v25, %v1124_v26 }
 0x28a   : > { %8810 = vmatpush1.bf16.msra.mxu0 %v12508_v28  ;;  %9056 = vmatpush1.bf16.msra.mxu1 %v12510_v30  ;;  %v12621_v28 = vcombine.high %v1116_v25, %v1124_v26  ;;  %v12623_v30 = vcombine.high %v1117_v27, %v1125_v59  ;;  %v12669_v25 = vcombine.high %v1164_v4, %v1172_v5 }
 0x28b   : > { %8811 = vmatprep.subr.bf16.mxu0 %v12525_v31  ;;  %9057 = vmatprep.subr.bf16.mxu1 %v12527_v34  ;;  %v1132_v31 = vld [vmem:[#allocation2 + $0x1a90] sm:$0xff] }
 0x28c   : > { %v1140_v34 = vld [vmem:[#allocation2 + $0x1ad0] sm:$0xff] }
 0x28d   : > { %v12637_v47 = vcombine.high %v1132_v31, %v1140_v34  ;;  %v12636_v58 = vcombine.low %v1132_v31, %v1140_v34  ;;  %v1189_v31 = vld [vmem:[#allocation2 + $0x1c58] sm:$0xff] }
 0x28e   : > { %8812 = vmatpush1.bf16.msra.mxu0 %v12524_v40  ;;  %9058 = vmatpush1.bf16.msra.mxu1 %v12526_v42  ;;  %v1592_v40 = vsub.s32 2, %v14235_v43  ;;  %v1588_v42 = vsub.s32 1, %v14235_v43 }
 0x28f   : > { %8813 = vmatprep.subr.bf16.mxu0 %v12541_v45  ;;  %9059 = vmatprep.subr.bf16.mxu1 %v12543_v46  ;;  %v12622_v45 = vcombine.low %v1117_v27, %v1125_v59  ;;  %v1578_v46 = vld [vmem:[#allocation5] sm:$0xff] }
 0x290   : > { %v1593_v57 = vrot.slane %v1578_v46, %v1592_v40  ;;  %v1589_v60 = vrot.slane %v1578_v46, %v1588_v42 }
 0x292   : > { %8814 = vmatpush1.bf16.msra.mxu0 %v12540_v51  ;;  %9060 = vmatpush1.bf16.msra.mxu1 %v12542_v52  ;;  %v1156_v51 = vld [vmem:[#allocation2 + $0x1b50] sm:$0xff]  ;;  %v1149_v52 = vld [vmem:[#allocation2 + $0x1b18] sm:$0xff] }
 0x293   : > { %8824 = vmatprep.subr.bf16.mxu0 %v12557_v55  ;;  %9070 = vmatprep.subr.bf16.mxu1 %v12559_v56  ;;  %v1157_v55 = vld [vmem:[#allocation2 + $0x1b58] sm:$0xff]  ;;  %v1585_v56 = vrot.slane %v1578_v46, %v1584_v39  ;;  %v12652_v18 = vcombine.low %v1148_v50, %v1156_v51 }
 0x295   : > { %8816 = vmatmul.mubr.bf16.vlgmr.msra.gmra.mrb[4].mxu0 %v14276_v44  ;;  %9062 = vmatmul.mubr.bf16.vlgmr.msra.gmra.mrb[4].mxu1 %v14276_v44 }
 0x296   : > { %8825 = vmatpush1.bf16.msra.mxu0 %v12556_v62  ;;  %9071 = vmatpush1.bf16.msra.mxu1 %v12558_v0  ;;  %v1597_v62 = vrot.slane %v1578_v46, %v1596_v48  ;;  %v12653_v0 = vcombine.high %v1148_v50, %v1156_v51  ;;  %v1204_v50 = vld [vmem:[#allocation2 + $0x1cd0] sm:$0xff]  ;;  %v1197_v51 = vld [vmem:[#allocation2 + $0x1c98] sm:$0xff] }
 0x297   : > { %8826 = vmatprep.subr.bf16.mxu0 %v12573_v1  ;;  %9072 = vmatprep.subr.bf16.mxu1 %v12575_v2  ;;  %v12655_v2 = vcombine.high %v1149_v52, %v1157_v55 }
 0x298   : > { %8856 = vmatprep.mubr.bf16.mxu0 %v14293_v13  ;;  %9102 = vmatprep.mubr.bf16.mxu1 %v14293_v13 }
 0x29a   : > { %8827 = vmatpush1.bf16.msra.mxu0 %v12572_v33  ;;  %9073 = vmatpush1.bf16.msra.mxu1 %v12574_v9  ;;  %v1165_v33 = vld [vmem:[#allocation2 + $0x1b98] sm:$0xff] }
 0x29b   : > { %8828 = vmatprep.subr.bf16.mxu0 %v12589_v10  ;;  %9074 = vmatprep.subr.bf16.mxu1 %v12591_v12  ;;  %v1173_v9 = vld [vmem:[#allocation2 + $0x1bd8] sm:$0xff] }
 0x29e   : > { %8829 = vmatpush1.bf16.msra.mxu0 %v12588_v19  ;;  %9075 = vmatpush1.bf16.msra.mxu1 %v12590_v20 }
 0x29f   : > { %8830 = vmatprep.subr.bf16.mxu0 %v12605_v21  ;;  %9076 = vmatprep.subr.bf16.mxu1 %v12607_v23  ;;  %v12654_v23 = vcombine.low %v1149_v52, %v1157_v55  ;;  %v1205_v52 = vld [vmem:[#allocation2 + $0x1cd8] sm:$0xff] }
 0x2a0   : > { %v12702_v4 = vcombine.low %v1197_v51, %v1205_v52 }
 0x2a2   : > { %8831 = vmatpush1.bf16.msra.mxu0 %v12604_v53  ;;  %9077 = vmatpush1.bf16.msra.mxu1 %v12606_v22  ;;  %v12671_v53 = vcombine.high %v1165_v33, %v1173_v9  ;;  %v1180_v22 = vld [vmem:[#allocation2 + $0x1c10] sm:$0xff] }
 0x2a3   : > { %8832 = vmatprep.subr.bf16.mxu0 %v12621_v28  ;;  %9078 = vmatprep.subr.bf16.mxu1 %v12623_v30  ;;  %v1188_v28 = vld [vmem:[#allocation2 + $0x1c50] sm:$0xff]  ;;  %v1181_v30 = vld [vmem:[#allocation2 + $0x1c18] sm:$0xff] }
 0x2a4   : > { %v12685_v46 = vcombine.high %v1180_v22, %v1188_v28 }
 0x2a6   : > { %8833 = vmatpush1.bf16.msra.mxu0 %v12620_v38  ;;  %9079 = vmatpush1.bf16.msra.mxu1 %v12622_v45  ;;  %v12670_v45 = vcombine.low %v1165_v33, %v1173_v9  ;;  %v1236_v33 = vld [vmem:[#allocation2 + $0x1dd0] sm:$0xff]  ;;  %v1229_v9 = vld [vmem:[#allocation2 + $0x1d98] sm:$0xff] }
 0x2a7   : > { %8834 = vmatprep.subr.bf16.mxu0 %v12637_v47  ;;  %9080 = vmatprep.subr.bf16.mxu1 %v12639_v49  ;;  %v12687_v47 = vcombine.high %v1181_v30, %v1189_v31  ;;  %v1196_v49 = vld [vmem:[#allocation2 + $0x1c90] sm:$0xff] }
 0x2a8   : > { %v8448_v1 = vpop.f32.mrb[0].mxu0  ;;  %v8694_v6 = vpop.f32.mrb[0].mxu1 }
 0x2a9   : > { %v8450_v8 = vpop.f32.mrb[1].mxu0  ;;  %v14353_v10 = vadd.f32 %v8448_v1, %v1585_v56  ;;  %v14355_v12 = vadd.f32 %v8694_v6, %v1593_v57  ;;  %v8696_v15 = vpop.f32.mrb[1].mxu1  ;;  %v12684_v56 = vcombine.low %v1180_v22, %v1188_v28  ;;  %v12686_v57 = vcombine.low %v1181_v30, %v1189_v31  ;;  %v1221_v1 = vld [vmem:[#allocation2 + $0x1d58] sm:$0xff] }
 0x2aa   : > { %v14357_v14 = vadd.f32 %v8450_v8, %v1589_v60  ;;  %8835 = vmatpush1.bf16.msra.mxu0 %v12636_v58  ;;  %v8452_v17 = vpop.f32.mrb[2].mxu0  ;;  %v14359_v19 = vadd.f32 %v8696_v15, %v1597_v62  ;;  %9081 = vmatpush1.bf16.msra.mxu1 %v12638_v61  ;;  %v8698_v20 = vpop.f32.mrb[2].mxu1  ;;  %v12701_v58 = vcombine.high %v1196_v49, %v1204_v50  ;;  %v1212_v61 = vld [vmem:[#allocation2 + $0x1d10] sm:$0xff]  ;;  %v1237_v15 = vld [vmem:[#allocation2 + $0x1dd8] sm:$0xff] }
 0x2ab   : > { %v8453_v21 = vpop.f32.mrb[3].mxu0  ;;  %8836 = vmatprep.subr.bf16.mxu0 %v12653_v0  ;;  %v10179_v26 = vmax.f32 %v14355_v12, 0.0  ;;  %v8699_v59 = vpop.f32.mrb[3].mxu1  ;;  %9082 = vmatprep.subr.bf16.mxu1 %v12655_v2  ;;  %v10177_v34 = vmax.f32 %v14353_v10, 0.0  ;;  %v12703_v60 = vcombine.high %v1197_v51, %v1205_v52  ;;  %v1220_v62 = vld [vmem:[#allocation2 + $0x1d50] sm:$0xff]  ;;  %v1213_v0 = vld [vmem:[#allocation2 + $0x1d18] sm:$0xff]  ;;  %v12700_v2 = vcombine.low %v1196_v49, %v1204_v50 }
 0x2ac   : > { %v10178_v27 = vmax.f32 %v14357_v14, 0.0  ;;  %v10180_v36 = vmax.f32 %v14359_v19, 0.0  ;;  %v12717_v5 = vcombine.high %v1212_v61, %v1220_v62  ;;  %v12719_v6 = vcombine.high %v1213_v0, %v1221_v1  ;;  %v1228_v8 = vld [vmem:[#allocation2 + $0x1d90] sm:$0xff]  ;;  %v1245_v59 = vld [vmem:[#allocation2 + $0x1e18] sm:$0xff] }
 0x2ad   : > { %v12716_v17 = vcombine.low %v1212_v61, %v1220_v62  ;;  %v12733_v20 = vcombine.high %v1228_v8, %v1236_v33  ;;  %v12735_v21 = vcombine.high %v1229_v9, %v1237_v15  ;;  %v12732_v22 = vcombine.low %v1228_v8, %v1236_v33  ;;  %v1276_v52 = vld [vmem:[#allocation2 + $0x1f10] sm:$0xff] }
 0x2ae   : > { %8837 = vmatpush1.bf16.msra.mxu0 %v12652_v18  ;;  %v13660_v38 = vpack.i.bf16 %v10179_v26, %v10178_v27  ;;  %9083 = vmatpush1.bf16.msra.mxu1 %v12654_v23  ;;  %v13665_v55 = vpack.i.bf16 %v10177_v34, %v10180_v36  ;;  %v12718_v18 = vcombine.low %v1213_v0, %v1221_v1  ;;  %v1244_v23 = vld [vmem:[#allocation2 + $0x1e10] sm:$0xff] }
 0x2af   : > { %8838 = vmatprep.subr.bf16.mxu0 %v12669_v25  ;;  %9084 = vmatprep.subr.bf16.mxu1 %v12671_v53  ;;  %v1252_v25 = vld [vmem:[#allocation2 + $0x1e50] sm:$0xff]  ;;  %v1253_v53 = vld [vmem:[#allocation2 + $0x1e58] sm:$0xff]  ;;  %v12734_v28 = vcombine.low %v1229_v9, %v1237_v15 }
 0x2b0   : > { %13661 = vrot.lane.b32.xlu0 %v13660_v38, %s14034_s14  ;;  %v12749_v30 = vcombine.high %v1244_v23, %v1252_v25  ;;  %v12751_v31 = vcombine.high %v1245_v59, %v1253_v53  ;;  %v1268_v38 = vld [vmem:[#allocation2 + $0x1ed0] sm:$0xff]  ;;  %v12750_v49 = vcombine.low %v1245_v59, %v1253_v53 }
 0x2b1   : > { %v1292_v0 = vld [vmem:[#allocation2 + $0x1f90] sm:$0xff] }
 0x2b2   : > { %8839 = vmatpush1.bf16.msra.mxu0 %v12668_v37  ;;  %9085 = vmatpush1.bf16.msra.mxu1 %v12670_v45  ;;  %v1260_v37 = vld [vmem:[#allocation2 + $0x1e90] sm:$0xff]  ;;  %v1261_v45 = vld [vmem:[#allocation2 + $0x1e98] sm:$0xff] }
 0x2b3   : > { %8840 = vmatprep.subr.bf16.mxu0 %v12685_v46  ;;  %9086 = vmatprep.subr.bf16.mxu1 %v12687_v47  ;;  %v1269_v46 = vld [vmem:[#allocation2 + $0x1ed8] sm:$0xff]  ;;  %v12748_v47 = vcombine.low %v1244_v23, %v1252_v25  ;;  %v12765_v50 = vcombine.high %v1260_v37, %v1268_v38  ;;  %v1300_v1 = vld [vmem:[#allocation2 + $0x1fd0] sm:$0xff] }
 0x2b4   : > { %13666 = vrot.lane.b32.xlu0 %v13665_v55, %s14034_s14  ;;  %v12767_v51 = vcombine.high %v1261_v45, %v1269_v46  ;;  %v1284_v55 = vld [vmem:[#allocation2 + $0x1f50] sm:$0xff]  ;;  %v12797_v8 = vcombine.high %v1292_v0, %v1300_v1 }
 0x2b5   : > { %v12781_v61 = vcombine.high %v1276_v52, %v1284_v55  ;;  %v1308_v9 = vld [vmem:[#allocation2 + $0x2010] sm:$0xff] }
 0x2b6   : > { %8841 = vmatpush1.bf16.msra.mxu0 %v12684_v56  ;;  %9087 = vmatpush1.bf16.msra.mxu1 %v12686_v57  ;;  %v1277_v56 = vld [vmem:[#allocation2 + $0x1f18] sm:$0xff]  ;;  %v1316_v15 = vld [vmem:[#allocation2 + $0x2050] sm:$0xff] }
 0x2b7   : > { %8842 = vmatprep.subr.bf16.mxu0 %v12701_v58  ;;  %9088 = vmatprep.subr.bf16.mxu1 %v12703_v60  ;;  %v1285_v57 = vld [vmem:[#allocation2 + $0x1f58] sm:$0xff]  ;;  %v12764_v58 = vcombine.low %v1260_v37, %v1268_v38  ;;  %v12766_v60 = vcombine.low %v1261_v45, %v1269_v46  ;;  %v12813_v23 = vcombine.high %v1308_v9, %v1316_v15  ;;  %v1324_v59 = vld [vmem:[#allocation2 + $0x2090] sm:$0xff] }
 0x2b8   : > { %v12783_v62 = vcombine.high %v1277_v56, %v1285_v57  ;;  %v1332_v53 = vld [vmem:[#allocation2 + $0x20d0] sm:$0xff] }
 0x2b9   : > { %v12829_v37 = vcombine.high %v1324_v59, %v1332_v53  ;;  %v1340_v45 = vld [vmem:[#allocation2 + $0x2110] sm:$0xff] }
 0x2ba   : > { %8843 = vmatpush1.bf16.msra.mxu0 %v12700_v2  ;;  %9089 = vmatpush1.bf16.msra.mxu1 %v12702_v4  ;;  %v1293_v2 = vld [vmem:[#allocation2 + $0x1f98] sm:$0xff]  ;;  %v1348_v46 = vld [vmem:[#allocation2 + $0x2150] sm:$0xff] }
 0x2bb   : > { %8844 = vmatprep.subr.bf16.mxu0 %v12717_v5  ;;  %9090 = vmatprep.subr.bf16.mxu1 %v12719_v6  ;;  %v1301_v4 = vld [vmem:[#allocation2 + $0x1fd8] sm:$0xff]  ;;  %v12780_v5 = vcombine.low %v1276_v52, %v1284_v55  ;;  %v12782_v6 = vcombine.low %v1277_v56, %v1285_v57  ;;  %v12845_v52 = vcombine.high %v1340_v45, %v1348_v46  ;;  %v1356_v56 = vld [vmem:[#allocation2 + $0x2190] sm:$0xff] }
 0x2bc   : > { %v12799_v33 = vcombine.high %v1293_v2, %v1301_v4  ;;  %v1364_v57 = vld [vmem:[#allocation2 + $0x21d0] sm:$0xff] }
 0x2be   : > { %8845 = vmatpush1.bf16.msra.mxu0 %v12716_v17  ;;  %9091 = vmatpush1.bf16.msra.mxu1 %v12718_v18  ;;  %v1309_v17 = vld [vmem:[#allocation2 + $0x2018] sm:$0xff] }
 0x2bf   : > { %8846 = vmatprep.subr.bf16.mxu0 %v12733_v20  ;;  %9092 = vmatprep.subr.bf16.mxu1 %v12735_v21  ;;  %v1317_v18 = vld [vmem:[#allocation2 + $0x2058] sm:$0xff]  ;;  %v12796_v20 = vcombine.low %v1292_v0, %v1300_v1  ;;  %v12798_v21 = vcombine.low %v1293_v2, %v1301_v4  ;;  %v12861_v0 = vcombine.high %v1356_v56, %v1364_v57  ;;  %v1372_v2 = vld [vmem:[#allocation2 + $0x2210] sm:$0xff] }
 0x2c0   : > { %v12815_v25 = vcombine.high %v1309_v17, %v1317_v18  ;;  %v1380_v4 = vld [vmem:[#allocation2 + $0x2250] sm:$0xff] }
 0x2c2   : > { %8847 = vmatpush1.bf16.msra.mxu0 %v12732_v22  ;;  %9093 = vmatpush1.bf16.msra.mxu1 %v12734_v28  ;;  %v1325_v22 = vld [vmem:[#allocation2 + $0x2098] sm:$0xff] }
 0x2c3   : > { %8848 = vmatprep.subr.bf16.mxu0 %v12749_v30  ;;  %9094 = vmatprep.subr.bf16.mxu1 %v12751_v31  ;;  %v1333_v28 = vld [vmem:[#allocation2 + $0x20d8] sm:$0xff]  ;;  %v12812_v30 = vcombine.low %v1308_v9, %v1316_v15  ;;  %v12814_v31 = vcombine.low %v1309_v17, %v1317_v18  ;;  %v12877_v9 = vcombine.high %v1372_v2, %v1380_v4  ;;  %v1388_v17 = vld [vmem:[#allocation2 + $0x2290] sm:$0xff] }
 0x2c4   : > { %v12831_v38 = vcombine.high %v1325_v22, %v1333_v28  ;;  %v1396_v18 = vld [vmem:[#allocation2 + $0x22d0] sm:$0xff] }
 0x2c6   : > { %8849 = vmatpush1.bf16.msra.mxu0 %v12748_v47  ;;  %9095 = vmatpush1.bf16.msra.mxu1 %v12750_v49  ;;  %v1341_v47 = vld [vmem:[#allocation2 + $0x2118] sm:$0xff] }
 0x2c7   : > { %8850 = vmatprep.subr.bf16.mxu0 %v12765_v50  ;;  %9096 = vmatprep.subr.bf16.mxu1 %v12767_v51  ;;  %v1349_v49 = vld [vmem:[#allocation2 + $0x2158] sm:$0xff]  ;;  %v12828_v50 = vcombine.low %v1324_v59, %v1332_v53  ;;  %v12830_v51 = vcombine.low %v1325_v22, %v1333_v28  ;;  %v12893_v59 = vcombine.high %v1388_v17, %v1396_v18  ;;  %v1404_v22 = vld [vmem:[#allocation2 + $0x2310] sm:$0xff] }
 0x2c8   : > { %v12847_v55 = vcombine.high %v1341_v47, %v1349_v49  ;;  %v1412_v28 = vld [vmem:[#allocation2 + $0x2350] sm:$0xff] }
 0x2ca   : > { %8851 = vmatpush1.bf16.msra.mxu0 %v12764_v58  ;;  %9097 = vmatpush1.bf16.msra.mxu1 %v12766_v60  ;;  %v1357_v58 = vld [vmem:[#allocation2 + $0x2198] sm:$0xff] }
 0x2cb   : > { %8852 = vmatprep.subr.bf16.mxu0 %v12781_v61  ;;  %9098 = vmatprep.subr.bf16.mxu1 %v12783_v62  ;;  %v1365_v60 = vld [vmem:[#allocation2 + $0x21d8] sm:$0xff]  ;;  %v12844_v61 = vcombine.low %v1340_v45, %v1348_v46  ;;  %v12846_v62 = vcombine.low %v1341_v47, %v1349_v49  ;;  %v12909_v45 = vcombine.high %v1404_v22, %v1412_v28  ;;  %v1420_v47 = vld [vmem:[#allocation2 + $0x2390] sm:$0xff] }
 0x2cc   : > { %v12863_v1 = vcombine.high %v1357_v58, %v1365_v60  ;;  %v1428_v49 = vld [vmem:[#allocation2 + $0x23d0] sm:$0xff] }
 0x2ce   : > { %8853 = vmatpush1.bf16.msra.mxu0 %v12780_v5  ;;  %9099 = vmatpush1.bf16.msra.mxu1 %v12782_v6  ;;  %v1373_v5 = vld [vmem:[#allocation2 + $0x2218] sm:$0xff] }
 0x2cf   : > { %8854 = vmatprep.subr.bf16.mxu0 %v12797_v8  ;;  %9100 = vmatprep.subr.bf16.mxu1 %v12799_v33  ;;  %v1381_v6 = vld [vmem:[#allocation2 + $0x2258] sm:$0xff]  ;;  %v12860_v8 = vcombine.low %v1356_v56, %v1364_v57  ;;  %v12862_v33 = vcombine.low %v1357_v58, %v1365_v60  ;;  %v12925_v56 = vcombine.high %v1420_v47, %v1428_v49  ;;  %v1436_v58 = vld [vmem:[#allocation2 + $0x2410] sm:$0xff] }
 0x2d0   : > { %v12879_v15 = vcombine.high %v1373_v5, %v1381_v6  ;;  %v1444_v60 = vld [vmem:[#allocation2 + $0x2450] sm:$0xff] }
 0x2d2   : > { %8855 = vmatpush1.bf16.msra.mxu0 %v12796_v20  ;;  %9101 = vmatpush1.bf16.msra.mxu1 %v12798_v21  ;;  %v1389_v20 = vld [vmem:[#allocation2 + $0x2298] sm:$0xff] }
 0x2d3   : > { %8865 = vmatprep.subr.bf16.mxu0 %v12813_v23  ;;  %9111 = vmatprep.subr.bf16.mxu1 %v12815_v25  ;;  %v1397_v21 = vld [vmem:[#allocation2 + $0x22d8] sm:$0xff]  ;;  %v12876_v23 = vcombine.low %v1372_v2, %v1380_v4  ;;  %v12878_v25 = vcombine.low %v1373_v5, %v1381_v6  ;;  %v12941_v2 = vcombine.high %v1436_v58, %v1444_v60  ;;  %v1452_v5 = vld [vmem:[#allocation2 + $0x2490] sm:$0xff] }
 0x2d4   : > { %v12895_v53 = vcombine.high %v1389_v20, %v1397_v21  ;;  %v1460_v6 = vld [vmem:[#allocation2 + $0x24d0] sm:$0xff] }
 0x2d5   : > { %8857 = vmatmul.mubr.bf16.vlgmr.msra.gmra.mrb[4].mxu0 %v14289_v7  ;;  %9103 = vmatmul.mubr.bf16.vlgmr.msra.gmra.mrb[4].mxu1 %v14289_v7 }
 0x2d6   : > { %8866 = vmatpush1.bf16.msra.mxu0 %v12812_v30  ;;  %9112 = vmatpush1.bf16.msra.mxu1 %v12814_v31  ;;  %v1405_v30 = vld [vmem:[#allocation2 + $0x2318] sm:$0xff] }
 0x2d7   : > { %8867 = vmatprep.subr.bf16.mxu0 %v12829_v37  ;;  %9113 = vmatprep.subr.bf16.mxu1 %v12831_v38  ;;  %v1413_v31 = vld [vmem:[#allocation2 + $0x2358] sm:$0xff]  ;;  %v12892_v37 = vcombine.low %v1388_v17, %v1396_v18  ;;  %v12894_v38 = vcombine.low %v1389_v20, %v1397_v21  ;;  %v12957_v17 = vcombine.high %v1452_v5, %v1460_v6  ;;  %v1468_v20 = vld [vmem:[#allocation2 + $0x2510] sm:$0xff] }
 0x2d8   : > { %8897 = vmatprep.mubr.bf16.mxu0 %v14308_v41  ;;  %9143 = vmatprep.mubr.bf16.mxu1 %v14308_v41  ;;  %v12911_v46 = vcombine.high %v1405_v30, %v1413_v31  ;;  %v1476_v21 = vld [vmem:[#allocation2 + $0x2550] sm:$0xff] }
 0x2da   : > { %8868 = vmatpush1.bf16.msra.mxu0 %v12828_v50  ;;  %9114 = vmatpush1.bf16.msra.mxu1 %v12830_v51  ;;  %v1421_v50 = vld [vmem:[#allocation2 + $0x2398] sm:$0xff] }
 0x2db   : > { %8869 = vmatprep.subr.bf16.mxu0 %v12845_v52  ;;  %9115 = vmatprep.subr.bf16.mxu1 %v12847_v55  ;;  %v1429_v51 = vld [vmem:[#allocation2 + $0x23d8] sm:$0xff]  ;;  %v12908_v52 = vcombine.low %v1404_v22, %v1412_v28  ;;  %v12910_v55 = vcombine.low %v1405_v30, %v1413_v31  ;;  %v12973_v22 = vcombine.high %v1468_v20, %v1476_v21  ;;  %v1484_v30 = vld [vmem:[#allocation2 + $0x2590] sm:$0xff] }
 0x2dc   : > { %v12927_v57 = vcombine.high %v1421_v50, %v1429_v51  ;;  %v1492_v31 = vld [vmem:[#allocation2 + $0x25d0] sm:$0xff] }
 0x2de   : > { %8870 = vmatpush1.bf16.msra.mxu0 %v12844_v61  ;;  %9116 = vmatpush1.bf16.msra.mxu1 %v12846_v62  ;;  %v1437_v61 = vld [vmem:[#allocation2 + $0x2418] sm:$0xff] }
 0x2df   : > { %8871 = vmatprep.subr.bf16.mxu0 %v12861_v0  ;;  %9117 = vmatprep.subr.bf16.mxu1 %v12863_v1  ;;  %v1445_v62 = vld [vmem:[#allocation2 + $0x2458] sm:$0xff]  ;;  %v12924_v0 = vcombine.low %v1420_v47, %v1428_v49  ;;  %v12926_v1 = vcombine.low %v1421_v50, %v1429_v51  ;;  %v12989_v47 = vcombine.high %v1484_v30, %v1492_v31  ;;  %v1500_v50 = vld [vmem:[#allocation2 + $0x2610] sm:$0xff] }
 0x2e0   : > { %v12943_v4 = vcombine.high %v1437_v61, %v1445_v62  ;;  %v1508_v51 = vld [vmem:[#allocation2 + $0x2650] sm:$0xff] }
 0x2e2   : > { %8872 = vmatpush1.bf16.msra.mxu0 %v12860_v8  ;;  %9118 = vmatpush1.bf16.msra.mxu1 %v12862_v33  ;;  %v1453_v8 = vld [vmem:[#allocation2 + $0x2498] sm:$0xff] }
 0x2e3   : > { %8873 = vmatprep.subr.bf16.mxu0 %v12877_v9  ;;  %9119 = vmatprep.subr.bf16.mxu1 %v12879_v15  ;;  %v1461_v33 = vld [vmem:[#allocation2 + $0x24d8] sm:$0xff]  ;;  %v12940_v9 = vcombine.low %v1436_v58, %v1444_v60  ;;  %v12942_v15 = vcombine.low %v1437_v61, %v1445_v62  ;;  %v13005_v58 = vcombine.high %v1500_v50, %v1508_v51  ;;  %v1516_v61 = vld [vmem:[#allocation2 + $0x2690] sm:$0xff] }
 0x2e4   : > { %v12959_v18 = vcombine.high %v1453_v8, %v1461_v33  ;;  %v1524_v62 = vld [vmem:[#allocation2 + $0x26d0] sm:$0xff] }
 0x2e6   : > { %8874 = vmatpush1.bf16.msra.mxu0 %v12876_v23  ;;  %9120 = vmatpush1.bf16.msra.mxu1 %v12878_v25  ;;  %v1469_v23 = vld [vmem:[#allocation2 + $0x2518] sm:$0xff] }
 0x2e7   : > { %8875 = vmatprep.subr.bf16.mxu0 %v12893_v59  ;;  %9121 = vmatprep.subr.bf16.mxu1 %v12895_v53  ;;  %v1477_v25 = vld [vmem:[#allocation2 + $0x2558] sm:$0xff]  ;;  %v12956_v59 = vcombine.low %v1452_v5, %v1460_v6  ;;  %v12958_v53 = vcombine.low %v1453_v8, %v1461_v33  ;;  %v13021_v5 = vcombine.high %v1516_v61, %v1524_v62  ;;  %v1532_v8 = vld [vmem:[#allocation2 + $0x2710] sm:$0xff] }
 0x2e8   : > { %v12975_v28 = vcombine.high %v1469_v23, %v1477_v25  ;;  %v1540_v33 = vld [vmem:[#allocation2 + $0x2750] sm:$0xff] }
 0x2ea   : > { %8876 = vmatpush1.bf16.msra.mxu0 %v12892_v37  ;;  %9122 = vmatpush1.bf16.msra.mxu1 %v12894_v38  ;;  %v1485_v37 = vld [vmem:[#allocation2 + $0x2598] sm:$0xff] }
 0x2eb   : > { %8877 = vmatprep.subr.bf16.mxu0 %v12909_v45  ;;  %9123 = vmatprep.subr.bf16.mxu1 %v12911_v46  ;;  %v1493_v38 = vld [vmem:[#allocation2 + $0x25d8] sm:$0xff]  ;;  %v12972_v45 = vcombine.low %v1468_v20, %v1476_v21  ;;  %v12974_v46 = vcombine.low %v1469_v23, %v1477_v25  ;;  %v13037_v20 = vcombine.high %v1532_v8, %v1540_v33  ;;  %v1548_v23 = vld [vmem:[#allocation2 + $0x2790] sm:$0xff] }
 0x2ec   : > { %v12991_v49 = vcombine.high %v1485_v37, %v1493_v38  ;;  %v1556_v25 = vld [vmem:[#allocation2 + $0x27d0] sm:$0xff] }
 0x2ee   : > { %8878 = vmatpush1.bf16.msra.mxu0 %v12908_v52  ;;  %9124 = vmatpush1.bf16.msra.mxu1 %v12910_v55  ;;  %v1501_v52 = vld [vmem:[#allocation2 + $0x2618] sm:$0xff] }
 0x2ef   : > { %8879 = vmatprep.subr.bf16.mxu0 %v12925_v56  ;;  %9125 = vmatprep.subr.bf16.mxu1 %v12927_v57  ;;  %v1509_v55 = vld [vmem:[#allocation2 + $0x2658] sm:$0xff]  ;;  %v12988_v56 = vcombine.low %v1484_v30, %v1492_v31  ;;  %v12990_v57 = vcombine.low %v1485_v37, %v1493_v38  ;;  %v13053_v30 = vcombine.high %v1548_v23, %v1556_v25  ;;  %v1564_v37 = vld [vmem:[#allocation2 + $0x2810] sm:$0xff] }
 0x2f0   : > { %v13007_v60 = vcombine.high %v1501_v52, %v1509_v55  ;;  %v1572_v38 = vld [vmem:[#allocation2 + $0x2850] sm:$0xff] }
 0x2f2   : > { %8880 = vmatpush1.bf16.msra.mxu0 %v12924_v0  ;;  %9126 = vmatpush1.bf16.msra.mxu1 %v12926_v1  ;;  %v1517_v0 = vld [vmem:[#allocation2 + $0x2698] sm:$0xff] }
 0x2f3   : > { %8881 = vmatprep.subr.bf16.mxu0 %v12941_v2  ;;  %9127 = vmatprep.subr.bf16.mxu1 %v12943_v4  ;;  %v1525_v1 = vld [vmem:[#allocation2 + $0x26d8] sm:$0xff]  ;;  %v13004_v2 = vcombine.low %v1500_v50, %v1508_v51  ;;  %v13006_v4 = vcombine.low %v1501_v52, %v1509_v55  ;;  %v13069_v50 = vcombine.high %v1564_v37, %v1572_v38  ;;  %v286_v52 = vld [vmem:[#allocation2 + $0x20] sm:$0xff] }
 0x2f4   : > { %v13023_v6 = vcombine.high %v1517_v0, %v1525_v1  ;;  %v294_v55 = vld [vmem:[#allocation2 + $0x60] sm:$0xff] }
 0x2f6   : > { %8882 = vmatpush1.bf16.msra.mxu0 %v12940_v9  ;;  %9128 = vmatpush1.bf16.msra.mxu1 %v12942_v15  ;;  %v1533_v9 = vld [vmem:[#allocation2 + $0x2718] sm:$0xff] }
 0x2f7   : > { %8883 = vmatprep.subr.bf16.mxu0 %v12957_v17  ;;  %9129 = vmatprep.subr.bf16.mxu1 %v12959_v18  ;;  %v1541_v15 = vld [vmem:[#allocation2 + $0x2758] sm:$0xff]  ;;  %v13020_v17 = vcombine.low %v1516_v61, %v1524_v62  ;;  %v13022_v18 = vcombine.low %v1517_v0, %v1525_v1  ;;  %v11793_v61 = vcombine.high %v286_v52, %v294_v55  ;;  %v302_v0 = vld [vmem:[#allocation2 + $0xa0] sm:$0xff] }
 0x2f8   : > { %v13039_v21 = vcombine.high %v1533_v9, %v1541_v15  ;;  %v310_v1 = vld [vmem:[#allocation2 + $0xe0] sm:$0xff] }
 0x2fa   : > { %8884 = vmatpush1.bf16.msra.mxu0 %v12956_v59  ;;  %9130 = vmatpush1.bf16.msra.mxu1 %v12958_v53  ;;  %v1549_v59 = vld [vmem:[#allocation2 + $0x2798] sm:$0xff] }
 0x2fb   : > { %8885 = vmatprep.subr.bf16.mxu0 %v12973_v22  ;;  %9131 = vmatprep.subr.bf16.mxu1 %v12975_v28  ;;  %v1557_v53 = vld [vmem:[#allocation2 + $0x27d8] sm:$0xff]  ;;  %v13036_v22 = vcombine.low %v1532_v8, %v1540_v33  ;;  %v13038_v28 = vcombine.low %v1533_v9, %v1541_v15  ;;  %v11809_v8 = vcombine.high %v302_v0, %v310_v1  ;;  %v318_v9 = vld [vmem:[#allocation2 + $0x120] sm:$0xff] }
 0x2fc   : > { %v13055_v31 = vcombine.high %v1549_v59, %v1557_v53  ;;  %v326_v15 = vld [vmem:[#allocation2 + $0x160] sm:$0xff] }
 0x2fe   : > { %8886 = vmatpush1.bf16.msra.mxu0 %v12972_v45  ;;  %9132 = vmatpush1.bf16.msra.mxu1 %v12974_v46  ;;  %v1565_v45 = vld [vmem:[#allocation2 + $0x2818] sm:$0xff] }
 0x2ff   : > { %8887 = vmatprep.subr.bf16.mxu0 %v12989_v47  ;;  %9133 = vmatprep.subr.bf16.mxu1 %v12991_v49  ;;  %v1573_v46 = vld [vmem:[#allocation2 + $0x2858] sm:$0xff]  ;;  %v13052_v47 = vcombine.low %v1548_v23, %v1556_v25  ;;  %v13054_v49 = vcombine.low %v1549_v59, %v1557_v53  ;;  %v11825_v23 = vcombine.high %v318_v9, %v326_v15  ;;  %v334_v59 = vld [vmem:[#allocation2 + $0x1a0] sm:$0xff] }
 0x300   : > { %v13071_v51 = vcombine.high %v1565_v45, %v1573_v46  ;;  %v342_v53 = vld [vmem:[#allocation2 + $0x1e0] sm:$0xff] }
 0x302   : > { %8888 = vmatpush1.bf16.msra.mxu0 %v12988_v56  ;;  %9134 = vmatpush1.bf16.msra.mxu1 %v12990_v57  ;;  %v13068_v56 = vcombine.low %v1564_v37, %v1572_v38  ;;  %v287_v57 = vld [vmem:[#allocation2 + $0x28] sm:$0xff]  ;;  %v11841_v37 = vcombine.high %v334_v59, %v342_v53 }
 0x303   : > { %8889 = vmatprep.subr.bf16.mxu0 %v13005_v58  ;;  %9135 = vmatprep.subr.bf16.mxu1 %v13007_v60  ;;  %v295_v58 = vld [vmem:[#allocation2 + $0x68] sm:$0xff]  ;;  %v13070_v60 = vcombine.low %v1565_v45, %v1573_v46  ;;  %v350_v45 = vld [vmem:[#allocation2 + $0x220] sm:$0xff] }
 0x304   : > { %v11795_v62 = vcombine.high %v287_v57, %v295_v58  ;;  %v358_v46 = vld [vmem:[#allocation2 + $0x260] sm:$0xff] }
 0x306   : > { %8890 = vmatpush1.bf16.msra.mxu0 %v13004_v2  ;;  %9136 = vmatpush1.bf16.msra.mxu1 %v13006_v4  ;;  %v303_v2 = vld [vmem:[#allocation2 + $0xa8] sm:$0xff] }
 0x307   : > { %8891 = vmatprep.subr.bf16.mxu0 %v13021_v5  ;;  %9137 = vmatprep.subr.bf16.mxu1 %v13023_v6  ;;  %v311_v4 = vld [vmem:[#allocation2 + $0xe8] sm:$0xff]  ;;  %v11792_v5 = vcombine.low %v286_v52, %v294_v55  ;;  %v11794_v6 = vcombine.low %v287_v57, %v295_v58  ;;  %v11857_v52 = vcombine.high %v350_v45, %v358_v46  ;;  %v374_v57 = vld [vmem:[#allocation2 + $0x2e0] sm:$0xff] }
 0x308   : > { %v11811_v33 = vcombine.high %v303_v2, %v311_v4  ;;  %v367_v58 = vld [vmem:[#allocation2 + $0x2a8] sm:$0xff] }
 0x30a   : > { %8892 = vmatpush1.bf16.msra.mxu0 %v13020_v17  ;;  %9138 = vmatpush1.bf16.msra.mxu1 %v13022_v18  ;;  %v319_v17 = vld [vmem:[#allocation2 + $0x128] sm:$0xff] }
 0x30b   : > { %8893 = vmatprep.subr.bf16.mxu0 %v13037_v20  ;;  %9139 = vmatprep.subr.bf16.mxu1 %v13039_v21  ;;  %v327_v18 = vld [vmem:[#allocation2 + $0x168] sm:$0xff]  ;;  %v11808_v20 = vcombine.low %v302_v0, %v310_v1  ;;  %v11810_v21 = vcombine.low %v303_v2, %v311_v4  ;;  %v382_v2 = vld [vmem:[#allocation2 + $0x320] sm:$0xff] }
 0x30c   : > { %v11827_v25 = vcombine.high %v319_v17, %v327_v18  ;;  %v390_v4 = vld [vmem:[#allocation2 + $0x360] sm:$0xff] }
 0x30e   : > { %8894 = vmatpush1.bf16.msra.mxu0 %v13036_v22  ;;  %9140 = vmatpush1.bf16.msra.mxu1 %v13038_v28  ;;  %v335_v22 = vld [vmem:[#allocation2 + $0x1a8] sm:$0xff] }
 0x30f   : > { %8895 = vmatprep.subr.bf16.mxu0 %v13053_v30  ;;  %9141 = vmatprep.subr.bf16.mxu1 %v13055_v31  ;;  %v343_v28 = vld [vmem:[#allocation2 + $0x1e8] sm:$0xff]  ;;  %v11824_v30 = vcombine.low %v318_v9, %v326_v15  ;;  %v11826_v31 = vcombine.low %v319_v17, %v327_v18  ;;  %v11889_v9 = vcombine.high %v382_v2, %v390_v4  ;;  %v398_v17 = vld [vmem:[#allocation2 + $0x3a0] sm:$0xff] }
 0x310   : > { %v11843_v38 = vcombine.high %v335_v22, %v343_v28  ;;  %v406_v18 = vld [vmem:[#allocation2 + $0x3e0] sm:$0xff] }
 0x312   : > { %8896 = vmatpush1.bf16.msra.mxu0 %v13052_v47  ;;  %9142 = vmatpush1.bf16.msra.mxu1 %v13054_v49  ;;  %v351_v47 = vld [vmem:[#allocation2 + $0x228] sm:$0xff] }
 0x313   : > { %8906 = vmatprep.subr.bf16.mxu0 %v13069_v50  ;;  %9152 = vmatprep.subr.bf16.mxu1 %v13071_v51  ;;  %v359_v49 = vld [vmem:[#allocation2 + $0x268] sm:$0xff]  ;;  %v11840_v50 = vcombine.low %v334_v59, %v342_v53  ;;  %v11842_v51 = vcombine.low %v335_v22, %v343_v28  ;;  %v11905_v59 = vcombine.high %v398_v17, %v406_v18  ;;  %v414_v22 = vld [vmem:[#allocation2 + $0x420] sm:$0xff] }
 0x314   : > { %v11859_v55 = vcombine.high %v351_v47, %v359_v49  ;;  %v422_v28 = vld [vmem:[#allocation2 + $0x460] sm:$0xff] }
 0x315   : > { %8898 = vmatmul.mubr.bf16.vlgmr.msra.gmra.mrb[4].mxu0 %v14304_v29  ;;  %9144 = vmatmul.mubr.bf16.vlgmr.msra.gmra.mrb[4].mxu1 %v14304_v29 }
 0x316   : > { %8907 = vmatpush1.bf16.msra.mxu0 %v13068_v56  ;;  %9153 = vmatpush1.bf16.msra.mxu1 %v13070_v60  ;;  %v366_v56 = vld [vmem:[#allocation2 + $0x2a0] sm:$0xff]  ;;  %v375_v60 = vld [vmem:[#allocation2 + $0x2e8] sm:$0xff] }
 0x317   : > { %8938 = vmatprep.mubr.bf16.mxu0 %v14033_v11  ;;  %9184 = vmatprep.mubr.bf16.mxu1 %v14033_v11  ;;  %v11873_v0 = vcombine.high %v366_v56, %v374_v57  ;;  %v11875_v1 = vcombine.high %v367_v58, %v375_v60 }
 0x318   : > { %9193 = vmatprep.subr.bf16.mxu0 %v11793_v61  ;;  %9439 = vmatprep.subr.bf16.mxu1 %v11795_v62  ;;  %v11856_v61 = vcombine.low %v350_v45, %v358_v46  ;;  %v11858_v62 = vcombine.low %v351_v47, %v359_v49  ;;  %v11921_v45 = vcombine.high %v414_v22, %v422_v28  ;;  %v430_v47 = vld [vmem:[#allocation2 + $0x4a0] sm:$0xff] }
 0x319   : > { %v438_v49 = vld [vmem:[#allocation2 + $0x4e0] sm:$0xff] }
 0x321   : > { %13082 = vmatmul.mubr.msk.bf16.vlgmr.msra.gmra.mrb[4].mxu0 %vm8205_vm0, %v14321_v16  ;;  %13083 = vmatmul.mubr.msk.bf16.vlgmr.msra.gmra.mrb[4].mxu1 %vm8205_vm0, %v14321_v16 }
 0x322   : > { %9194 = vmatpush1.bf16.msra.mxu0 %v11792_v5  ;;  %9440 = vmatpush1.bf16.msra.mxu1 %v11794_v6  ;;  %v383_v5 = vld [vmem:[#allocation2 + $0x328] sm:$0xff] }
 0x323   : > { %9195 = vmatprep.subr.bf16.mxu0 %v11809_v8  ;;  %9441 = vmatprep.subr.bf16.mxu1 %v11811_v33  ;;  %v391_v6 = vld [vmem:[#allocation2 + $0x368] sm:$0xff]  ;;  %v11872_v8 = vcombine.low %v366_v56, %v374_v57  ;;  %v11874_v33 = vcombine.low %v367_v58, %v375_v60  ;;  %v11937_v56 = vcombine.high %v430_v47, %v438_v49  ;;  %v446_v58 = vld [vmem:[#allocation2 + $0x520] sm:$0xff] }
 0x324   : > { %9225 = vmatprep.mubr.bf16.mxu0 %v14254_v3  ;;  %9471 = vmatprep.mubr.bf16.mxu1 %v14254_v3  ;;  %v11891_v15 = vcombine.high %v383_v5, %v391_v6  ;;  %v454_v60 = vld [vmem:[#allocation2 + $0x560] sm:$0xff] }
 0x326   : > { %9196 = vmatpush1.bf16.msra.mxu0 %v11808_v20  ;;  %9442 = vmatpush1.bf16.msra.mxu1 %v11810_v21  ;;  %v399_v20 = vld [vmem:[#allocation2 + $0x3a8] sm:$0xff] }
 0x327   : > { %9197 = vmatprep.subr.bf16.mxu0 %v11825_v23  ;;  %9443 = vmatprep.subr.bf16.mxu1 %v11827_v25  ;;  %v407_v21 = vld [vmem:[#allocation2 + $0x3e8] sm:$0xff]  ;;  %v11888_v23 = vcombine.low %v382_v2, %v390_v4  ;;  %v11890_v25 = vcombine.low %v383_v5, %v391_v6  ;;  %v11953_v2 = vcombine.high %v446_v58, %v454_v60  ;;  %v462_v5 = vld [vmem:[#allocation2 + $0x5a0] sm:$0xff] }
 0x328   : > { %v11907_v53 = vcombine.high %v399_v20, %v407_v21  ;;  %v470_v6 = vld [vmem:[#allocation2 + $0x5e0] sm:$0xff] }
 0x32a   : > { %9198 = vmatpush1.bf16.msra.mxu0 %v11824_v30  ;;  %9444 = vmatpush1.bf16.msra.mxu1 %v11826_v31  ;;  %v415_v30 = vld [vmem:[#allocation2 + $0x428] sm:$0xff] }
 0x32b   : > { %9199 = vmatprep.subr.bf16.mxu0 %v11841_v37  ;;  %9445 = vmatprep.subr.bf16.mxu1 %v11843_v38  ;;  %v423_v31 = vld [vmem:[#allocation2 + $0x468] sm:$0xff]  ;;  %v11904_v37 = vcombine.low %v398_v17, %v406_v18  ;;  %v11906_v38 = vcombine.low %v399_v20, %v407_v21  ;;  %v11969_v17 = vcombine.high %v462_v5, %v470_v6  ;;  %v478_v20 = vld [vmem:[#allocation2 + $0x620] sm:$0xff] }
 0x32c   : > { %v11923_v46 = vcombine.high %v415_v30, %v423_v31  ;;  %v486_v21 = vld [vmem:[#allocation2 + $0x660] sm:$0xff] }
 0x32e   : > { %9200 = vmatpush1.bf16.msra.mxu0 %v11840_v50  ;;  %9446 = vmatpush1.bf16.msra.mxu1 %v11842_v51  ;;  %v431_v50 = vld [vmem:[#allocation2 + $0x4a8] sm:$0xff] }
 0x32f   : > { %9201 = vmatprep.subr.bf16.mxu0 %v11857_v52  ;;  %9447 = vmatprep.subr.bf16.mxu1 %v11859_v55  ;;  %v439_v51 = vld [vmem:[#allocation2 + $0x4e8] sm:$0xff]  ;;  %v11920_v52 = vcombine.low %v414_v22, %v422_v28  ;;  %v11922_v55 = vcombine.low %v415_v30, %v423_v31  ;;  %v11985_v22 = vcombine.high %v478_v20, %v486_v21  ;;  %v494_v30 = vld [vmem:[#allocation2 + $0x6a0] sm:$0xff] }
 0x330   : > { %v11939_v57 = vcombine.high %v431_v50, %v439_v51  ;;  %v502_v31 = vld [vmem:[#allocation2 + $0x6e0] sm:$0xff] }
 0x332   : > { %9202 = vmatpush1.bf16.msra.mxu0 %v11856_v61  ;;  %9448 = vmatpush1.bf16.msra.mxu1 %v11858_v62  ;;  %v447_v61 = vld [vmem:[#allocation2 + $0x528] sm:$0xff] }
 0x333   : > { %9203 = vmatprep.subr.bf16.mxu0 %v11873_v0  ;;  %9449 = vmatprep.subr.bf16.mxu1 %v11875_v1  ;;  %v455_v62 = vld [vmem:[#allocation2 + $0x568] sm:$0xff]  ;;  %v11936_v0 = vcombine.low %v430_v47, %v438_v49  ;;  %v11938_v1 = vcombine.low %v431_v50, %v439_v51  ;;  %v12001_v47 = vcombine.high %v494_v30, %v502_v31  ;;  %v510_v50 = vld [vmem:[#allocation2 + $0x720] sm:$0xff] }
 0x334   : > { %v11955_v4 = vcombine.high %v447_v61, %v455_v62  ;;  %v518_v51 = vld [vmem:[#allocation2 + $0x760] sm:$0xff] }
 0x336   : > { %9204 = vmatpush1.bf16.msra.mxu0 %v11872_v8  ;;  %9450 = vmatpush1.bf16.msra.mxu1 %v11874_v33  ;;  %v463_v8 = vld [vmem:[#allocation2 + $0x5a8] sm:$0xff] }
 0x337   : > { %9205 = vmatprep.subr.bf16.mxu0 %v11889_v9  ;;  %9451 = vmatprep.subr.bf16.mxu1 %v11891_v15  ;;  %v471_v33 = vld [vmem:[#allocation2 + $0x5e8] sm:$0xff]  ;;  %v11952_v9 = vcombine.low %v446_v58, %v454_v60  ;;  %v11954_v15 = vcombine.low %v447_v61, %v455_v62  ;;  %v12017_v58 = vcombine.high %v510_v50, %v518_v51  ;;  %v526_v61 = vld [vmem:[#allocation2 + $0x7a0] sm:$0xff] }
 0x338   : > { %v11971_v18 = vcombine.high %v463_v8, %v471_v33  ;;  %v534_v62 = vld [vmem:[#allocation2 + $0x7e0] sm:$0xff] }
 0x33a   : > { %9206 = vmatpush1.bf16.msra.mxu0 %v11888_v23  ;;  %9452 = vmatpush1.bf16.msra.mxu1 %v11890_v25  ;;  %v479_v23 = vld [vmem:[#allocation2 + $0x628] sm:$0xff] }
 0x33b   : > { %9207 = vmatprep.subr.bf16.mxu0 %v11905_v59  ;;  %9453 = vmatprep.subr.bf16.mxu1 %v11907_v53  ;;  %v487_v25 = vld [vmem:[#allocation2 + $0x668] sm:$0xff]  ;;  %v11968_v59 = vcombine.low %v462_v5, %v470_v6  ;;  %v11970_v53 = vcombine.low %v463_v8, %v471_v33  ;;  %v12033_v5 = vcombine.high %v526_v61, %v534_v62  ;;  %v542_v8 = vld [vmem:[#allocation2 + $0x820] sm:$0xff] }
 0x33c   : > { %v11987_v28 = vcombine.high %v479_v23, %v487_v25  ;;  %v550_v33 = vld [vmem:[#allocation2 + $0x860] sm:$0xff] }
 0x33e   : > { %9208 = vmatpush1.bf16.msra.mxu0 %v11904_v37  ;;  %9454 = vmatpush1.bf16.msra.mxu1 %v11906_v38  ;;  %v495_v37 = vld [vmem:[#allocation2 + $0x6a8] sm:$0xff] }
 0x33f   : > { %9209 = vmatprep.subr.bf16.mxu0 %v11921_v45  ;;  %9455 = vmatprep.subr.bf16.mxu1 %v11923_v46  ;;  %v503_v38 = vld [vmem:[#allocation2 + $0x6e8] sm:$0xff]  ;;  %v11984_v45 = vcombine.low %v478_v20, %v486_v21  ;;  %v11986_v46 = vcombine.low %v479_v23, %v487_v25  ;;  %v12049_v20 = vcombine.high %v542_v8, %v550_v33  ;;  %v558_v23 = vld [vmem:[#allocation2 + $0x8a0] sm:$0xff] }
 0x340   : > { %v12003_v49 = vcombine.high %v495_v37, %v503_v38  ;;  %v566_v25 = vld [vmem:[#allocation2 + $0x8e0] sm:$0xff] }
 0x342   : > { %9210 = vmatpush1.bf16.msra.mxu0 %v11920_v52  ;;  %9456 = vmatpush1.bf16.msra.mxu1 %v11922_v55  ;;  %v511_v52 = vld [vmem:[#allocation2 + $0x728] sm:$0xff] }
 0x343   : > { %9211 = vmatprep.subr.bf16.mxu0 %v11937_v56  ;;  %9457 = vmatprep.subr.bf16.mxu1 %v11939_v57  ;;  %v519_v55 = vld [vmem:[#allocation2 + $0x768] sm:$0xff]  ;;  %v12000_v56 = vcombine.low %v494_v30, %v502_v31  ;;  %v12002_v57 = vcombine.low %v495_v37, %v503_v38  ;;  %v12065_v30 = vcombine.high %v558_v23, %v566_v25  ;;  %v574_v37 = vld [vmem:[#allocation2 + $0x920] sm:$0xff] }
 0x344   : > { %v12019_v60 = vcombine.high %v511_v52, %v519_v55  ;;  %v582_v38 = vld [vmem:[#allocation2 + $0x960] sm:$0xff] }
 0x346   : > { %9212 = vmatpush1.bf16.msra.mxu0 %v11936_v0  ;;  %9458 = vmatpush1.bf16.msra.mxu1 %v11938_v1  ;;  %v527_v0 = vld [vmem:[#allocation2 + $0x7a8] sm:$0xff] }
 0x347   : > { %9213 = vmatprep.subr.bf16.mxu0 %v11953_v2  ;;  %9459 = vmatprep.subr.bf16.mxu1 %v11955_v4  ;;  %v535_v1 = vld [vmem:[#allocation2 + $0x7e8] sm:$0xff]  ;;  %v12016_v2 = vcombine.low %v510_v50, %v518_v51  ;;  %v12018_v4 = vcombine.low %v511_v52, %v519_v55  ;;  %v12081_v50 = vcombine.high %v574_v37, %v582_v38  ;;  %v590_v52 = vld [vmem:[#allocation2 + $0x9a0] sm:$0xff] }
 0x348   : > { %v12035_v6 = vcombine.high %v527_v0, %v535_v1  ;;  %v598_v55 = vld [vmem:[#allocation2 + $0x9e0] sm:$0xff] }
 0x34a   : > { %9214 = vmatpush1.bf16.msra.mxu0 %v11952_v9  ;;  %9460 = vmatpush1.bf16.msra.mxu1 %v11954_v15  ;;  %v543_v9 = vld [vmem:[#allocation2 + $0x828] sm:$0xff] }
 0x34b   : > { %9215 = vmatprep.subr.bf16.mxu0 %v11969_v17  ;;  %9461 = vmatprep.subr.bf16.mxu1 %v11971_v18  ;;  %v551_v15 = vld [vmem:[#allocation2 + $0x868] sm:$0xff]  ;;  %v12032_v17 = vcombine.low %v526_v61, %v534_v62  ;;  %v12034_v18 = vcombine.low %v527_v0, %v535_v1  ;;  %v12097_v61 = vcombine.high %v590_v52, %v598_v55  ;;  %v606_v0 = vld [vmem:[#allocation2 + $0xa20] sm:$0xff] }
 0x34c   : > { %v12051_v21 = vcombine.high %v543_v9, %v551_v15  ;;  %v614_v1 = vld [vmem:[#allocation2 + $0xa60] sm:$0xff] }
 0x34e   : > { %9216 = vmatpush1.bf16.msra.mxu0 %v11968_v59  ;;  %9462 = vmatpush1.bf16.msra.mxu1 %v11970_v53  ;;  %v559_v59 = vld [vmem:[#allocation2 + $0x8a8] sm:$0xff] }
 0x34f   : > { %9217 = vmatprep.subr.bf16.mxu0 %v11985_v22  ;;  %9463 = vmatprep.subr.bf16.mxu1 %v11987_v28  ;;  %v567_v53 = vld [vmem:[#allocation2 + $0x8e8] sm:$0xff]  ;;  %v12048_v22 = vcombine.low %v542_v8, %v550_v33  ;;  %v12050_v28 = vcombine.low %v543_v9, %v551_v15  ;;  %v12113_v8 = vcombine.high %v606_v0, %v614_v1  ;;  %v622_v9 = vld [vmem:[#allocation2 + $0xaa0] sm:$0xff] }
 0x350   : > { %v12067_v31 = vcombine.high %v559_v59, %v567_v53  ;;  %v630_v15 = vld [vmem:[#allocation2 + $0xae0] sm:$0xff] }
 0x352   : > { %9218 = vmatpush1.bf16.msra.mxu0 %v11984_v45  ;;  %9464 = vmatpush1.bf16.msra.mxu1 %v11986_v46  ;;  %v575_v45 = vld [vmem:[#allocation2 + $0x928] sm:$0xff] }
 0x353   : > { %9219 = vmatprep.subr.bf16.mxu0 %v12001_v47  ;;  %9465 = vmatprep.subr.bf16.mxu1 %v12003_v49  ;;  %v583_v46 = vld [vmem:[#allocation2 + $0x968] sm:$0xff]  ;;  %v12064_v47 = vcombine.low %v558_v23, %v566_v25  ;;  %v12066_v49 = vcombine.low %v559_v59, %v567_v53  ;;  %v12129_v23 = vcombine.high %v622_v9, %v630_v15  ;;  %v638_v59 = vld [vmem:[#allocation2 + $0xb20] sm:$0xff] }
 0x354   : > { %v12083_v51 = vcombine.high %v575_v45, %v583_v46  ;;  %v646_v53 = vld [vmem:[#allocation2 + $0xb60] sm:$0xff] }
 0x356   : > { %9220 = vmatpush1.bf16.msra.mxu0 %v12000_v56  ;;  %9466 = vmatpush1.bf16.msra.mxu1 %v12002_v57  ;;  %v591_v56 = vld [vmem:[#allocation2 + $0x9a8] sm:$0xff] }
 0x357   : > { %9221 = vmatprep.subr.bf16.mxu0 %v12017_v58  ;;  %9467 = vmatprep.subr.bf16.mxu1 %v12019_v60  ;;  %v599_v57 = vld [vmem:[#allocation2 + $0x9e8] sm:$0xff]  ;;  %v12080_v58 = vcombine.low %v574_v37, %v582_v38  ;;  %v12082_v60 = vcombine.low %v575_v45, %v583_v46  ;;  %v12145_v37 = vcombine.high %v638_v59, %v646_v53  ;;  %v654_v45 = vld [vmem:[#allocation2 + $0xba0] sm:$0xff] }
 0x358   : > { %v12099_v62 = vcombine.high %v591_v56, %v599_v57  ;;  %v662_v46 = vld [vmem:[#allocation2 + $0xbe0] sm:$0xff] }
 0x35a   : > { %9222 = vmatpush1.bf16.msra.mxu0 %v12016_v2  ;;  %9468 = vmatpush1.bf16.msra.mxu1 %v12018_v4  ;;  %v607_v2 = vld [vmem:[#allocation2 + $0xa28] sm:$0xff] }
 0x35b   : > { %9223 = vmatprep.subr.bf16.mxu0 %v12033_v5  ;;  %9469 = vmatprep.subr.bf16.mxu1 %v12035_v6  ;;  %v615_v4 = vld [vmem:[#allocation2 + $0xa68] sm:$0xff]  ;;  %v12096_v5 = vcombine.low %v590_v52, %v598_v55  ;;  %v12098_v6 = vcombine.low %v591_v56, %v599_v57  ;;  %v12161_v52 = vcombine.high %v654_v45, %v662_v46  ;;  %v670_v56 = vld [vmem:[#allocation2 + $0xc20] sm:$0xff] }
 0x35c   : > { %v12115_v33 = vcombine.high %v607_v2, %v615_v4  ;;  %v678_v57 = vld [vmem:[#allocation2 + $0xc60] sm:$0xff] }
 0x35e   : > { %9224 = vmatpush1.bf16.msra.mxu0 %v12032_v17  ;;  %9470 = vmatpush1.bf16.msra.mxu1 %v12034_v18  ;;  %v623_v17 = vld [vmem:[#allocation2 + $0xaa8] sm:$0xff] }
 0x35f   : > { %9234 = vmatprep.subr.bf16.mxu0 %v12049_v20  ;;  %9480 = vmatprep.subr.bf16.mxu1 %v12051_v21  ;;  %v631_v18 = vld [vmem:[#allocation2 + $0xae8] sm:$0xff]  ;;  %v12112_v20 = vcombine.low %v606_v0, %v614_v1  ;;  %v12114_v21 = vcombine.low %v607_v2, %v615_v4  ;;  %v12177_v0 = vcombine.high %v670_v56, %v678_v57  ;;  %v686_v2 = vld [vmem:[#allocation2 + $0xca0] sm:$0xff] }
 0x360   : > { %v12131_v25 = vcombine.high %v623_v17, %v631_v18  ;;  %v694_v4 = vld [vmem:[#allocation2 + $0xce0] sm:$0xff] }
 0x361   : > { %9226 = vmatmul.mubr.bf16.vlgmr.msra.gmra.mrb[8].mxu0 %v14250_v63  ;;  %9472 = vmatmul.mubr.bf16.vlgmr.msra.gmra.mrb[8].mxu1 %v14250_v63 }
 0x362   : > { %9235 = vmatpush1.bf16.msra.mxu0 %v12048_v22  ;;  %9481 = vmatpush1.bf16.msra.mxu1 %v12050_v28  ;;  %v639_v22 = vld [vmem:[#allocation2 + $0xb28] sm:$0xff] }
 0x363   : > { %9236 = vmatprep.subr.bf16.mxu0 %v12065_v30  ;;  %9482 = vmatprep.subr.bf16.mxu1 %v12067_v31  ;;  %v647_v28 = vld [vmem:[#allocation2 + $0xb68] sm:$0xff]  ;;  %v12128_v30 = vcombine.low %v622_v9, %v630_v15  ;;  %v12130_v31 = vcombine.low %v623_v17, %v631_v18  ;;  %v12193_v9 = vcombine.high %v686_v2, %v694_v4  ;;  %v702_v17 = vld [vmem:[#allocation2 + $0xd20] sm:$0xff] }
 0x364   : > { %9266 = vmatprep.mubr.bf16.mxu0 %v14265_v35  ;;  %9512 = vmatprep.mubr.bf16.mxu1 %v14265_v35  ;;  %v12147_v38 = vcombine.high %v639_v22, %v647_v28  ;;  %v710_v18 = vld [vmem:[#allocation2 + $0xd60] sm:$0xff] }
 0x366   : > { %9237 = vmatpush1.bf16.msra.mxu0 %v12064_v47  ;;  %9483 = vmatpush1.bf16.msra.mxu1 %v12066_v49  ;;  %v655_v47 = vld [vmem:[#allocation2 + $0xba8] sm:$0xff] }
 0x367   : > { %9238 = vmatprep.subr.bf16.mxu0 %v12081_v50  ;;  %9484 = vmatprep.subr.bf16.mxu1 %v12083_v51  ;;  %v663_v49 = vld [vmem:[#allocation2 + $0xbe8] sm:$0xff]  ;;  %v12144_v50 = vcombine.low %v638_v59, %v646_v53  ;;  %v12146_v51 = vcombine.low %v639_v22, %v647_v28  ;;  %v12209_v59 = vcombine.high %v702_v17, %v710_v18  ;;  %v718_v22 = vld [vmem:[#allocation2 + $0xda0] sm:$0xff] }
 0x368   : > { %v12163_v55 = vcombine.high %v655_v47, %v663_v49  ;;  %v726_v28 = vld [vmem:[#allocation2 + $0xde0] sm:$0xff] }
 0x36a   : > { %9239 = vmatpush1.bf16.msra.mxu0 %v12080_v58  ;;  %9485 = vmatpush1.bf16.msra.mxu1 %v12082_v60  ;;  %v671_v58 = vld [vmem:[#allocation2 + $0xc28] sm:$0xff] }
 0x36b   : > { %9240 = vmatprep.subr.bf16.mxu0 %v12097_v61  ;;  %9486 = vmatprep.subr.bf16.mxu1 %v12099_v62  ;;  %v679_v60 = vld [vmem:[#allocation2 + $0xc68] sm:$0xff]  ;;  %v12160_v61 = vcombine.low %v654_v45, %v662_v46  ;;  %v12162_v62 = vcombine.low %v655_v47, %v663_v49  ;;  %v12225_v45 = vcombine.high %v718_v22, %v726_v28  ;;  %v734_v47 = vld [vmem:[#allocation2 + $0xe20] sm:$0xff] }
 0x36c   : > { %v12179_v1 = vcombine.high %v671_v58, %v679_v60  ;;  %v742_v49 = vld [vmem:[#allocation2 + $0xe60] sm:$0xff] }
 0x36e   : > { %9241 = vmatpush1.bf16.msra.mxu0 %v12096_v5  ;;  %9487 = vmatpush1.bf16.msra.mxu1 %v12098_v6  ;;  %v687_v5 = vld [vmem:[#allocation2 + $0xca8] sm:$0xff] }
 0x36f   : > { %9242 = vmatprep.subr.bf16.mxu0 %v12113_v8  ;;  %9488 = vmatprep.subr.bf16.mxu1 %v12115_v33  ;;  %v695_v6 = vld [vmem:[#allocation2 + $0xce8] sm:$0xff]  ;;  %v12176_v8 = vcombine.low %v670_v56, %v678_v57  ;;  %v12178_v33 = vcombine.low %v671_v58, %v679_v60  ;;  %v12241_v56 = vcombine.high %v734_v47, %v742_v49  ;;  %v750_v58 = vld [vmem:[#allocation2 + $0xea0] sm:$0xff] }
 0x370   : > { %v12195_v15 = vcombine.high %v687_v5, %v695_v6  ;;  %v758_v60 = vld [vmem:[#allocation2 + $0xee0] sm:$0xff] }
 0x372   : > { %9243 = vmatpush1.bf16.msra.mxu0 %v12112_v20  ;;  %9489 = vmatpush1.bf16.msra.mxu1 %v12114_v21  ;;  %v703_v20 = vld [vmem:[#allocation2 + $0xd28] sm:$0xff] }
 0x373   : > { %9244 = vmatprep.subr.bf16.mxu0 %v12129_v23  ;;  %9490 = vmatprep.subr.bf16.mxu1 %v12131_v25  ;;  %v711_v21 = vld [vmem:[#allocation2 + $0xd68] sm:$0xff]  ;;  %v12192_v23 = vcombine.low %v686_v2, %v694_v4  ;;  %v12194_v25 = vcombine.low %v687_v5, %v695_v6  ;;  %v12257_v2 = vcombine.high %v750_v58, %v758_v60  ;;  %v766_v5 = vld [vmem:[#allocation2 + $0xf20] sm:$0xff] }
 0x374   : > { %v12211_v53 = vcombine.high %v703_v20, %v711_v21  ;;  %v774_v6 = vld [vmem:[#allocation2 + $0xf60] sm:$0xff] }
 0x376   : > { %9245 = vmatpush1.bf16.msra.mxu0 %v12128_v30  ;;  %9491 = vmatpush1.bf16.msra.mxu1 %v12130_v31  ;;  %v719_v30 = vld [vmem:[#allocation2 + $0xda8] sm:$0xff] }
 0x377   : > { %9246 = vmatprep.subr.bf16.mxu0 %v12145_v37  ;;  %9492 = vmatprep.subr.bf16.mxu1 %v12147_v38  ;;  %v727_v31 = vld [vmem:[#allocation2 + $0xde8] sm:$0xff]  ;;  %v12208_v37 = vcombine.low %v702_v17, %v710_v18  ;;  %v12210_v38 = vcombine.low %v703_v20, %v711_v21  ;;  %v12273_v17 = vcombine.high %v766_v5, %v774_v6  ;;  %v782_v20 = vld [vmem:[#allocation2 + $0xfa0] sm:$0xff] }
 0x378   : > { %v12227_v46 = vcombine.high %v719_v30, %v727_v31  ;;  %v790_v21 = vld [vmem:[#allocation2 + $0xfe0] sm:$0xff] }
 0x37a   : > { %9247 = vmatpush1.bf16.msra.mxu0 %v12144_v50  ;;  %9493 = vmatpush1.bf16.msra.mxu1 %v12146_v51  ;;  %v735_v50 = vld [vmem:[#allocation2 + $0xe28] sm:$0xff] }
 0x37b   : > { %9248 = vmatprep.subr.bf16.mxu0 %v12161_v52  ;;  %9494 = vmatprep.subr.bf16.mxu1 %v12163_v55  ;;  %v743_v51 = vld [vmem:[#allocation2 + $0xe68] sm:$0xff]  ;;  %v12224_v52 = vcombine.low %v718_v22, %v726_v28  ;;  %v12226_v55 = vcombine.low %v719_v30, %v727_v31  ;;  %v12289_v22 = vcombine.high %v782_v20, %v790_v21  ;;  %v798_v30 = vld [vmem:[#allocation2 + $0x1020] sm:$0xff] }
 0x37c   : > { %v12243_v57 = vcombine.high %v735_v50, %v743_v51  ;;  %v806_v31 = vld [vmem:[#allocation2 + $0x1060] sm:$0xff] }
 0x37e   : > { %9249 = vmatpush1.bf16.msra.mxu0 %v12160_v61  ;;  %9495 = vmatpush1.bf16.msra.mxu1 %v12162_v62  ;;  %v751_v61 = vld [vmem:[#allocation2 + $0xea8] sm:$0xff] }
 0x37f   : > { %9250 = vmatprep.subr.bf16.mxu0 %v12177_v0  ;;  %9496 = vmatprep.subr.bf16.mxu1 %v12179_v1  ;;  %v759_v62 = vld [vmem:[#allocation2 + $0xee8] sm:$0xff]  ;;  %v12240_v0 = vcombine.low %v734_v47, %v742_v49  ;;  %v12242_v1 = vcombine.low %v735_v50, %v743_v51  ;;  %v12305_v47 = vcombine.high %v798_v30, %v806_v31  ;;  %v814_v50 = vld [vmem:[#allocation2 + $0x10a0] sm:$0xff] }
 0x380   : > { %v12259_v4 = vcombine.high %v751_v61, %v759_v62  ;;  %v822_v51 = vld [vmem:[#allocation2 + $0x10e0] sm:$0xff] }
 0x382   : > { %9251 = vmatpush1.bf16.msra.mxu0 %v12176_v8  ;;  %9497 = vmatpush1.bf16.msra.mxu1 %v12178_v33  ;;  %v767_v8 = vld [vmem:[#allocation2 + $0xf28] sm:$0xff] }
 0x383   : > { %9252 = vmatprep.subr.bf16.mxu0 %v12193_v9  ;;  %9498 = vmatprep.subr.bf16.mxu1 %v12195_v15  ;;  %v775_v33 = vld [vmem:[#allocation2 + $0xf68] sm:$0xff]  ;;  %v12256_v9 = vcombine.low %v750_v58, %v758_v60  ;;  %v12258_v15 = vcombine.low %v751_v61, %v759_v62  ;;  %v12321_v58 = vcombine.high %v814_v50, %v822_v51  ;;  %v830_v61 = vld [vmem:[#allocation2 + $0x1120] sm:$0xff] }
 0x384   : > { %v12275_v18 = vcombine.high %v767_v8, %v775_v33  ;;  %v838_v62 = vld [vmem:[#allocation2 + $0x1160] sm:$0xff] }
 0x386   : > { %9253 = vmatpush1.bf16.msra.mxu0 %v12192_v23  ;;  %9499 = vmatpush1.bf16.msra.mxu1 %v12194_v25  ;;  %v783_v23 = vld [vmem:[#allocation2 + $0xfa8] sm:$0xff] }
 0x387   : > { %9254 = vmatprep.subr.bf16.mxu0 %v12209_v59  ;;  %9500 = vmatprep.subr.bf16.mxu1 %v12211_v53  ;;  %v791_v25 = vld [vmem:[#allocation2 + $0xfe8] sm:$0xff]  ;;  %v12272_v59 = vcombine.low %v766_v5, %v774_v6  ;;  %v12274_v53 = vcombine.low %v767_v8, %v775_v33  ;;  %v12337_v5 = vcombine.high %v830_v61, %v838_v62  ;;  %v846_v8 = vld [vmem:[#allocation2 + $0x11a0] sm:$0xff] }
 0x388   : > { %v12291_v28 = vcombine.high %v783_v23, %v791_v25  ;;  %v854_v33 = vld [vmem:[#allocation2 + $0x11e0] sm:$0xff] }
 0x38a   : > { %9255 = vmatpush1.bf16.msra.mxu0 %v12208_v37  ;;  %9501 = vmatpush1.bf16.msra.mxu1 %v12210_v38  ;;  %v799_v37 = vld [vmem:[#allocation2 + $0x1028] sm:$0xff] }
 0x38b   : > { %9256 = vmatprep.subr.bf16.mxu0 %v12225_v45  ;;  %9502 = vmatprep.subr.bf16.mxu1 %v12227_v46  ;;  %v807_v38 = vld [vmem:[#allocation2 + $0x1068] sm:$0xff]  ;;  %v12288_v45 = vcombine.low %v782_v20, %v790_v21  ;;  %v12290_v46 = vcombine.low %v783_v23, %v791_v25  ;;  %v12353_v20 = vcombine.high %v846_v8, %v854_v33  ;;  %v862_v23 = vld [vmem:[#allocation2 + $0x1220] sm:$0xff] }
 0x38c   : > { %v12307_v49 = vcombine.high %v799_v37, %v807_v38  ;;  %v870_v25 = vld [vmem:[#allocation2 + $0x1260] sm:$0xff] }
 0x38e   : > { %9257 = vmatpush1.bf16.msra.mxu0 %v12224_v52  ;;  %9503 = vmatpush1.bf16.msra.mxu1 %v12226_v55  ;;  %v815_v52 = vld [vmem:[#allocation2 + $0x10a8] sm:$0xff] }
 0x38f   : > { %9258 = vmatprep.subr.bf16.mxu0 %v12241_v56  ;;  %9504 = vmatprep.subr.bf16.mxu1 %v12243_v57  ;;  %v823_v55 = vld [vmem:[#allocation2 + $0x10e8] sm:$0xff]  ;;  %v12304_v56 = vcombine.low %v798_v30, %v806_v31  ;;  %v12306_v57 = vcombine.low %v799_v37, %v807_v38  ;;  %v12369_v30 = vcombine.high %v862_v23, %v870_v25  ;;  %v878_v37 = vld [vmem:[#allocation2 + $0x12a0] sm:$0xff] }
 0x390   : > { %v12323_v60 = vcombine.high %v815_v52, %v823_v55  ;;  %v886_v38 = vld [vmem:[#allocation2 + $0x12e0] sm:$0xff] }
 0x392   : > { %9259 = vmatpush1.bf16.msra.mxu0 %v12240_v0  ;;  %9505 = vmatpush1.bf16.msra.mxu1 %v12242_v1  ;;  %v831_v0 = vld [vmem:[#allocation2 + $0x1128] sm:$0xff] }
 0x393   : > { %9260 = vmatprep.subr.bf16.mxu0 %v12257_v2  ;;  %9506 = vmatprep.subr.bf16.mxu1 %v12259_v4  ;;  %v839_v1 = vld [vmem:[#allocation2 + $0x1168] sm:$0xff]  ;;  %v12320_v2 = vcombine.low %v814_v50, %v822_v51  ;;  %v12322_v4 = vcombine.low %v815_v52, %v823_v55  ;;  %v12385_v50 = vcombine.high %v878_v37, %v886_v38  ;;  %v894_v52 = vld [vmem:[#allocation2 + $0x1320] sm:$0xff] }
 0x394   : > { %v12339_v6 = vcombine.high %v831_v0, %v839_v1  ;;  %v902_v55 = vld [vmem:[#allocation2 + $0x1360] sm:$0xff] }
 0x396   : > { %9261 = vmatpush1.bf16.msra.mxu0 %v12256_v9  ;;  %9507 = vmatpush1.bf16.msra.mxu1 %v12258_v15  ;;  %v847_v9 = vld [vmem:[#allocation2 + $0x11a8] sm:$0xff] }
 0x397   : > { %9262 = vmatprep.subr.bf16.mxu0 %v12273_v17  ;;  %9508 = vmatprep.subr.bf16.mxu1 %v12275_v18  ;;  %v855_v15 = vld [vmem:[#allocation2 + $0x11e8] sm:$0xff]  ;;  %v12336_v17 = vcombine.low %v830_v61, %v838_v62  ;;  %v12338_v18 = vcombine.low %v831_v0, %v839_v1  ;;  %v12401_v61 = vcombine.high %v894_v52, %v902_v55  ;;  %v910_v0 = vld [vmem:[#allocation2 + $0x13a0] sm:$0xff] }
 0x398   : > { %v12355_v21 = vcombine.high %v847_v9, %v855_v15  ;;  %v918_v1 = vld [vmem:[#allocation2 + $0x13e0] sm:$0xff] }
 0x39a   : > { %9263 = vmatpush1.bf16.msra.mxu0 %v12272_v59  ;;  %9509 = vmatpush1.bf16.msra.mxu1 %v12274_v53  ;;  %v863_v59 = vld [vmem:[#allocation2 + $0x1228] sm:$0xff] }
 0x39b   : > { %9264 = vmatprep.subr.bf16.mxu0 %v12289_v22  ;;  %9510 = vmatprep.subr.bf16.mxu1 %v12291_v28  ;;  %v871_v53 = vld [vmem:[#allocation2 + $0x1268] sm:$0xff]  ;;  %v12352_v22 = vcombine.low %v846_v8, %v854_v33  ;;  %v12354_v28 = vcombine.low %v847_v9, %v855_v15  ;;  %v12417_v8 = vcombine.high %v910_v0, %v918_v1  ;;  %v926_v9 = vld [vmem:[#allocation2 + $0x1420] sm:$0xff] }
 0x39c   : > { %v12371_v31 = vcombine.high %v863_v59, %v871_v53  ;;  %v934_v15 = vld [vmem:[#allocation2 + $0x1460] sm:$0xff] }
 0x39e   : > { %9265 = vmatpush1.bf16.msra.mxu0 %v12288_v45  ;;  %9511 = vmatpush1.bf16.msra.mxu1 %v12290_v46  ;;  %v879_v45 = vld [vmem:[#allocation2 + $0x12a8] sm:$0xff] }
 0x39f   : > { %9275 = vmatprep.subr.bf16.mxu0 %v12305_v47  ;;  %9521 = vmatprep.subr.bf16.mxu1 %v12307_v49  ;;  %v887_v46 = vld [vmem:[#allocation2 + $0x12e8] sm:$0xff]  ;;  %v12368_v47 = vcombine.low %v862_v23, %v870_v25  ;;  %v12370_v49 = vcombine.low %v863_v59, %v871_v53  ;;  %v12433_v23 = vcombine.high %v926_v9, %v934_v15  ;;  %v942_v59 = vld [vmem:[#allocation2 + $0x14a0] sm:$0xff] }
 0x3a0   : > { %v12387_v51 = vcombine.high %v879_v45, %v887_v46  ;;  %v950_v53 = vld [vmem:[#allocation2 + $0x14e0] sm:$0xff] }
 0x3a1   : > { %9267 = vmatmul.mubr.bf16.vlgmr.msra.gmra.mrb[8].mxu0 %v14261_v24  ;;  %9513 = vmatmul.mubr.bf16.vlgmr.msra.gmra.mrb[8].mxu1 %v14261_v24 }
 0x3a2   : > { %9276 = vmatpush1.bf16.msra.mxu0 %v12304_v56  ;;  %9522 = vmatpush1.bf16.msra.mxu1 %v12306_v57  ;;  %v895_v56 = vld [vmem:[#allocation2 + $0x1328] sm:$0xff] }
 0x3a3   : > { %9277 = vmatprep.subr.bf16.mxu0 %v12321_v58  ;;  %9523 = vmatprep.subr.bf16.mxu1 %v12323_v60  ;;  %v903_v57 = vld [vmem:[#allocation2 + $0x1368] sm:$0xff]  ;;  %v12384_v58 = vcombine.low %v878_v37, %v886_v38  ;;  %v12386_v60 = vcombine.low %v879_v45, %v887_v46  ;;  %v12449_v37 = vcombine.high %v942_v59, %v950_v53  ;;  %v958_v45 = vld [vmem:[#allocation2 + $0x1520] sm:$0xff] }
 0x3a4   : > { %9307 = vmatprep.mubr.bf16.mxu0 %v14280_v54  ;;  %9553 = vmatprep.mubr.bf16.mxu1 %v14280_v54  ;;  %v12403_v62 = vcombine.high %v895_v56, %v903_v57  ;;  %v966_v46 = vld [vmem:[#allocation2 + $0x1560] sm:$0xff] }
 0x3a6   : > { %9278 = vmatpush1.bf16.msra.mxu0 %v12320_v2  ;;  %9524 = vmatpush1.bf16.msra.mxu1 %v12322_v4  ;;  %v911_v2 = vld [vmem:[#allocation2 + $0x13a8] sm:$0xff] }
 0x3a7   : > { %9279 = vmatprep.subr.bf16.mxu0 %v12337_v5  ;;  %9525 = vmatprep.subr.bf16.mxu1 %v12339_v6  ;;  %v919_v4 = vld [vmem:[#allocation2 + $0x13e8] sm:$0xff]  ;;  %v12400_v5 = vcombine.low %v894_v52, %v902_v55  ;;  %v12402_v6 = vcombine.low %v895_v56, %v903_v57  ;;  %v12465_v52 = vcombine.high %v958_v45, %v966_v46  ;;  %v974_v56 = vld [vmem:[#allocation2 + $0x15a0] sm:$0xff] }
 0x3a8   : > { %v12419_v33 = vcombine.high %v911_v2, %v919_v4  ;;  %v982_v57 = vld [vmem:[#allocation2 + $0x15e0] sm:$0xff] }
 0x3aa   : > { %9280 = vmatpush1.bf16.msra.mxu0 %v12336_v17  ;;  %9526 = vmatpush1.bf16.msra.mxu1 %v12338_v18  ;;  %v927_v17 = vld [vmem:[#allocation2 + $0x1428] sm:$0xff] }
 0x3ab   : > { %9281 = vmatprep.subr.bf16.mxu0 %v12353_v20  ;;  %9527 = vmatprep.subr.bf16.mxu1 %v12355_v21  ;;  %v935_v18 = vld [vmem:[#allocation2 + $0x1468] sm:$0xff]  ;;  %v12416_v20 = vcombine.low %v910_v0, %v918_v1  ;;  %v12418_v21 = vcombine.low %v911_v2, %v919_v4  ;;  %v12481_v0 = vcombine.high %v974_v56, %v982_v57  ;;  %v990_v2 = vld [vmem:[#allocation2 + $0x1620] sm:$0xff] }
 0x3ac   : > { %v12435_v25 = vcombine.high %v927_v17, %v935_v18  ;;  %v998_v4 = vld [vmem:[#allocation2 + $0x1660] sm:$0xff] }
 0x3ae   : > { %9282 = vmatpush1.bf16.msra.mxu0 %v12352_v22  ;;  %9528 = vmatpush1.bf16.msra.mxu1 %v12354_v28  ;;  %v943_v22 = vld [vmem:[#allocation2 + $0x14a8] sm:$0xff] }
 0x3af   : > { %9283 = vmatprep.subr.bf16.mxu0 %v12369_v30  ;;  %9529 = vmatprep.subr.bf16.mxu1 %v12371_v31  ;;  %v951_v28 = vld [vmem:[#allocation2 + $0x14e8] sm:$0xff]  ;;  %v12432_v30 = vcombine.low %v926_v9, %v934_v15  ;;  %v12434_v31 = vcombine.low %v927_v17, %v935_v18  ;;  %v12497_v9 = vcombine.high %v990_v2, %v998_v4  ;;  %v1006_v17 = vld [vmem:[#allocation2 + $0x16a0] sm:$0xff] }
 0x3b0   : > { %v12451_v38 = vcombine.high %v943_v22, %v951_v28  ;;  %v1014_v18 = vld [vmem:[#allocation2 + $0x16e0] sm:$0xff] }
 0x3b2   : > { %9284 = vmatpush1.bf16.msra.mxu0 %v12368_v47  ;;  %9530 = vmatpush1.bf16.msra.mxu1 %v12370_v49  ;;  %v959_v47 = vld [vmem:[#allocation2 + $0x1528] sm:$0xff] }
 0x3b3   : > { %9285 = vmatprep.subr.bf16.mxu0 %v12385_v50  ;;  %9531 = vmatprep.subr.bf16.mxu1 %v12387_v51  ;;  %v967_v49 = vld [vmem:[#allocation2 + $0x1568] sm:$0xff]  ;;  %v12448_v50 = vcombine.low %v942_v59, %v950_v53  ;;  %v12450_v51 = vcombine.low %v943_v22, %v951_v28  ;;  %v12513_v59 = vcombine.high %v1006_v17, %v1014_v18  ;;  %v1022_v22 = vld [vmem:[#allocation2 + $0x1720] sm:$0xff] }
 0x3b4   : > { %v12467_v55 = vcombine.high %v959_v47, %v967_v49  ;;  %v1030_v28 = vld [vmem:[#allocation2 + $0x1760] sm:$0xff] }
 0x3b6   : > { %9286 = vmatpush1.bf16.msra.mxu0 %v12384_v58  ;;  %9532 = vmatpush1.bf16.msra.mxu1 %v12386_v60  ;;  %v975_v58 = vld [vmem:[#allocation2 + $0x15a8] sm:$0xff] }
 0x3b7   : > { %9287 = vmatprep.subr.bf16.mxu0 %v12401_v61  ;;  %9533 = vmatprep.subr.bf16.mxu1 %v12403_v62  ;;  %v983_v60 = vld [vmem:[#allocation2 + $0x15e8] sm:$0xff]  ;;  %v12464_v61 = vcombine.low %v958_v45, %v966_v46  ;;  %v12466_v62 = vcombine.low %v959_v47, %v967_v49  ;;  %v12529_v45 = vcombine.high %v1022_v22, %v1030_v28  ;;  %v1038_v47 = vld [vmem:[#allocation2 + $0x17a0] sm:$0xff] }
 0x3b8   : > { %v12483_v1 = vcombine.high %v975_v58, %v983_v60  ;;  %v1046_v49 = vld [vmem:[#allocation2 + $0x17e0] sm:$0xff] }
 0x3ba   : > { %9288 = vmatpush1.bf16.msra.mxu0 %v12400_v5  ;;  %9534 = vmatpush1.bf16.msra.mxu1 %v12402_v6  ;;  %v991_v5 = vld [vmem:[#allocation2 + $0x1628] sm:$0xff] }
 0x3bb   : > { %9289 = vmatprep.subr.bf16.mxu0 %v12417_v8  ;;  %9535 = vmatprep.subr.bf16.mxu1 %v12419_v33  ;;  %v999_v6 = vld [vmem:[#allocation2 + $0x1668] sm:$0xff]  ;;  %v12480_v8 = vcombine.low %v974_v56, %v982_v57  ;;  %v12482_v33 = vcombine.low %v975_v58, %v983_v60  ;;  %v12545_v56 = vcombine.high %v1038_v47, %v1046_v49  ;;  %v1054_v58 = vld [vmem:[#allocation2 + $0x1820] sm:$0xff] }
 0x3bc   : > { %v12499_v15 = vcombine.high %v991_v5, %v999_v6  ;;  %v1062_v60 = vld [vmem:[#allocation2 + $0x1860] sm:$0xff] }
 0x3be   : > { %9290 = vmatpush1.bf16.msra.mxu0 %v12416_v20  ;;  %9536 = vmatpush1.bf16.msra.mxu1 %v12418_v21  ;;  %v1007_v20 = vld [vmem:[#allocation2 + $0x16a8] sm:$0xff] }
 0x3bf   : > { %9291 = vmatprep.subr.bf16.mxu0 %v12433_v23  ;;  %9537 = vmatprep.subr.bf16.mxu1 %v12435_v25  ;;  %v1015_v21 = vld [vmem:[#allocation2 + $0x16e8] sm:$0xff]  ;;  %v12496_v23 = vcombine.low %v990_v2, %v998_v4  ;;  %v12498_v25 = vcombine.low %v991_v5, %v999_v6  ;;  %v12561_v2 = vcombine.high %v1054_v58, %v1062_v60  ;;  %v1070_v5 = vld [vmem:[#allocation2 + $0x18a0] sm:$0xff] }
 0x3c0   : > { %v12515_v53 = vcombine.high %v1007_v20, %v1015_v21  ;;  %v1078_v6 = vld [vmem:[#allocation2 + $0x18e0] sm:$0xff] }
 0x3c2   : > { %9292 = vmatpush1.bf16.msra.mxu0 %v12432_v30  ;;  %9538 = vmatpush1.bf16.msra.mxu1 %v12434_v31  ;;  %v1023_v30 = vld [vmem:[#allocation2 + $0x1728] sm:$0xff] }
 0x3c3   : > { %9293 = vmatprep.subr.bf16.mxu0 %v12449_v37  ;;  %9539 = vmatprep.subr.bf16.mxu1 %v12451_v38  ;;  %v1031_v31 = vld [vmem:[#allocation2 + $0x1768] sm:$0xff]  ;;  %v12512_v37 = vcombine.low %v1006_v17, %v1014_v18  ;;  %v12514_v38 = vcombine.low %v1007_v20, %v1015_v21  ;;  %v12577_v17 = vcombine.high %v1070_v5, %v1078_v6  ;;  %v1086_v20 = vld [vmem:[#allocation2 + $0x1920] sm:$0xff] }
 0x3c4   : > { %v12531_v46 = vcombine.high %v1023_v30, %v1031_v31  ;;  %v1094_v21 = vld [vmem:[#allocation2 + $0x1960] sm:$0xff] }
 0x3c6   : > { %9294 = vmatpush1.bf16.msra.mxu0 %v12448_v50  ;;  %9540 = vmatpush1.bf16.msra.mxu1 %v12450_v51  ;;  %v1039_v50 = vld [vmem:[#allocation2 + $0x17a8] sm:$0xff] }
 0x3c7   : > { %9295 = vmatprep.subr.bf16.mxu0 %v12465_v52  ;;  %9541 = vmatprep.subr.bf16.mxu1 %v12467_v55  ;;  %v1047_v51 = vld [vmem:[#allocation2 + $0x17e8] sm:$0xff]  ;;  %v12528_v52 = vcombine.low %v1022_v22, %v1030_v28  ;;  %v12530_v55 = vcombine.low %v1023_v30, %v1031_v31  ;;  %v12593_v22 = vcombine.high %v1086_v20, %v1094_v21  ;;  %v1102_v30 = vld [vmem:[#allocation2 + $0x19a0] sm:$0xff] }
 0x3c8   : > { %v12547_v57 = vcombine.high %v1039_v50, %v1047_v51  ;;  %v1110_v31 = vld [vmem:[#allocation2 + $0x19e0] sm:$0xff] }
 0x3ca   : > { %9296 = vmatpush1.bf16.msra.mxu0 %v12464_v61  ;;  %9542 = vmatpush1.bf16.msra.mxu1 %v12466_v62  ;;  %v1055_v61 = vld [vmem:[#allocation2 + $0x1828] sm:$0xff] }
 0x3cb   : > { %9297 = vmatprep.subr.bf16.mxu0 %v12481_v0  ;;  %9543 = vmatprep.subr.bf16.mxu1 %v12483_v1  ;;  %v1063_v62 = vld [vmem:[#allocation2 + $0x1868] sm:$0xff]  ;;  %v12544_v0 = vcombine.low %v1038_v47, %v1046_v49  ;;  %v12546_v1 = vcombine.low %v1039_v50, %v1047_v51  ;;  %v12609_v47 = vcombine.high %v1102_v30, %v1110_v31  ;;  %v1118_v50 = vld [vmem:[#allocation2 + $0x1a20] sm:$0xff] }
 0x3cc   : > { %v12563_v4 = vcombine.high %v1055_v61, %v1063_v62  ;;  %v1126_v51 = vld [vmem:[#allocation2 + $0x1a60] sm:$0xff] }
 0x3ce   : > { %9298 = vmatpush1.bf16.msra.mxu0 %v12480_v8  ;;  %9544 = vmatpush1.bf16.msra.mxu1 %v12482_v33  ;;  %v1071_v8 = vld [vmem:[#allocation2 + $0x18a8] sm:$0xff] }
 0x3cf   : > { %9299 = vmatprep.subr.bf16.mxu0 %v12497_v9  ;;  %9545 = vmatprep.subr.bf16.mxu1 %v12499_v15  ;;  %v1079_v33 = vld [vmem:[#allocation2 + $0x18e8] sm:$0xff]  ;;  %v12560_v9 = vcombine.low %v1054_v58, %v1062_v60  ;;  %v12562_v15 = vcombine.low %v1055_v61, %v1063_v62  ;;  %v12625_v58 = vcombine.high %v1118_v50, %v1126_v51  ;;  %v1134_v61 = vld [vmem:[#allocation2 + $0x1aa0] sm:$0xff] }
 0x3d0   : > { %v12579_v18 = vcombine.high %v1071_v8, %v1079_v33  ;;  %v1142_v62 = vld [vmem:[#allocation2 + $0x1ae0] sm:$0xff] }
 0x3d2   : > { %9300 = vmatpush1.bf16.msra.mxu0 %v12496_v23  ;;  %9546 = vmatpush1.bf16.msra.mxu1 %v12498_v25  ;;  %v1087_v23 = vld [vmem:[#allocation2 + $0x1928] sm:$0xff] }
 0x3d3   : > { %9301 = vmatprep.subr.bf16.mxu0 %v12513_v59  ;;  %9547 = vmatprep.subr.bf16.mxu1 %v12515_v53  ;;  %v1095_v25 = vld [vmem:[#allocation2 + $0x1968] sm:$0xff]  ;;  %v12576_v59 = vcombine.low %v1070_v5, %v1078_v6  ;;  %v12578_v53 = vcombine.low %v1071_v8, %v1079_v33  ;;  %v1608_v5 = vsub.s32 6, %v14235_v43  ;;  %v1604_v6 = vsub.s32 5, %v14235_v43 }
 0x3d4   : > { %v12595_v28 = vcombine.high %v1087_v23, %v1095_v25  ;;  %v12641_v33 = vcombine.high %v1134_v61, %v1142_v62 }
 0x3d6   : > { %9302 = vmatpush1.bf16.msra.mxu0 %v12512_v37  ;;  %9548 = vmatpush1.bf16.msra.mxu1 %v12514_v38  ;;  %v1103_v37 = vld [vmem:[#allocation2 + $0x19a8] sm:$0xff] }
 0x3d7   : > { %9303 = vmatprep.subr.bf16.mxu0 %v12529_v45  ;;  %9549 = vmatprep.subr.bf16.mxu1 %v12531_v46  ;;  %v1111_v38 = vld [vmem:[#allocation2 + $0x19e8] sm:$0xff]  ;;  %v12592_v45 = vcombine.low %v1086_v20, %v1094_v21  ;;  %v12594_v46 = vcombine.low %v1087_v23, %v1095_v25  ;;  %v13835_v20 = vld [vmem:[#allocation5] sm:$0xff] }
 0x3d8   : > { %v12611_v49 = vcombine.high %v1103_v37, %v1111_v38  ;;  %v1151_v23 = vld [vmem:[#allocation2 + $0x1b28] sm:$0xff] }
 0x3d9   : > { %v1159_v25 = vld [vmem:[#allocation2 + $0x1b68] sm:$0xff] }
 0x3da   : > { %9304 = vmatpush1.bf16.msra.mxu0 %v12528_v52  ;;  %9550 = vmatpush1.bf16.msra.mxu1 %v12530_v55  ;;  %v1119_v52 = vld [vmem:[#allocation2 + $0x1a28] sm:$0xff] }
 0x3db   : > { %9305 = vmatprep.subr.bf16.mxu0 %v12545_v56  ;;  %9551 = vmatprep.subr.bf16.mxu1 %v12547_v57  ;;  %v1127_v55 = vld [vmem:[#allocation2 + $0x1a68] sm:$0xff]  ;;  %v12608_v56 = vcombine.low %v1102_v30, %v1110_v31  ;;  %v12610_v57 = vcombine.low %v1103_v37, %v1111_v38  ;;  %v12659_v38 = vcombine.high %v1151_v23, %v1159_v25 }
 0x3dc   : > { %v12627_v60 = vcombine.high %v1119_v52, %v1127_v55  ;;  %v12626_v8 = vcombine.low %v1119_v52, %v1127_v55  ;;  %v1175_v52 = vld [vmem:[#allocation2 + $0x1be8] sm:$0xff] }
 0x3de   : > { %9306 = vmatpush1.bf16.msra.mxu0 %v12544_v0  ;;  %9552 = vmatpush1.bf16.msra.mxu1 %v12546_v1  ;;  %v1600_v0 = vsub.s32 4, %v14235_v43  ;;  %v1135_v1 = vld [vmem:[#allocation2 + $0x1aa8] sm:$0xff] }
 0x3df   : > { %9316 = vmatprep.subr.bf16.mxu0 %v12561_v2  ;;  %9562 = vmatprep.subr.bf16.mxu1 %v12563_v4  ;;  %v1143_v2 = vld [vmem:[#allocation2 + $0x1ae8] sm:$0xff]  ;;  %v12624_v4 = vcombine.low %v1118_v50, %v1126_v51 }
 0x3e0   : > { %v1601_v21 = vrot.slane %v13835_v20, %v1600_v0  ;;  %v1167_v51 = vld [vmem:[#allocation2 + $0x1ba8] sm:$0xff] }
 0x3e1   : > { %9308 = vmatmul.mubr.bf16.vlgmr.msra.gmra.mrb[8].mxu0 %v14276_v44  ;;  %9554 = vmatmul.mubr.bf16.vlgmr.msra.gmra.mrb[8].mxu1 %v14276_v44 }
 0x3e2   : > { %9317 = vmatpush1.bf16.msra.mxu0 %v12560_v9  ;;  %9563 = vmatpush1.bf16.msra.mxu1 %v12562_v15  ;;  %v1612_v9 = vsub.s32 7, %v14235_v43  ;;  %v12643_v15 = vcombine.high %v1135_v1, %v1143_v2 }
 0x3e3   : > { %9318 = vmatprep.subr.bf16.mxu0 %v12577_v17  ;;  %9564 = vmatprep.subr.bf16.mxu1 %v12579_v18  ;;  %v1150_v17 = vld [vmem:[#allocation2 + $0x1b20] sm:$0xff] }
 0x3e4   : > { %9348 = vmatprep.mubr.bf16.mxu0 %v14293_v13  ;;  %9594 = vmatprep.mubr.bf16.mxu1 %v14293_v13  ;;  %v1158_v18 = vld [vmem:[#allocation2 + $0x1b60] sm:$0xff]  ;;  %v1613_v30 = vrot.slane %v13835_v20, %v1612_v9 }
 0x3e5   : > { %v12657_v31 = vcombine.high %v1150_v17, %v1158_v18 }
 0x3e6   : > { %9319 = vmatpush1.bf16.msra.mxu0 %v12576_v59  ;;  %9565 = vmatpush1.bf16.msra.mxu1 %v12578_v53  ;;  %v1609_v59 = vrot.slane %v13835_v20, %v1608_v5  ;;  %v12640_v53 = vcombine.low %v1134_v61, %v1142_v62 }
 0x3e7   : > { %9320 = vmatprep.subr.bf16.mxu0 %v12593_v22  ;;  %9566 = vmatprep.subr.bf16.mxu1 %v12595_v28  ;;  %v1605_v22 = vrot.slane %v13835_v20, %v1604_v6  ;;  %v12642_v28 = vcombine.low %v1135_v1, %v1143_v2  ;;  %v12675_v20 = vcombine.high %v1167_v51, %v1175_v52 }
 0x3ea   : > { %9321 = vmatpush1.bf16.msra.mxu0 %v12592_v45  ;;  %9567 = vmatpush1.bf16.msra.mxu1 %v12594_v46  ;;  %v1166_v45 = vld [vmem:[#allocation2 + $0x1ba0] sm:$0xff] }
 0x3eb   : > { %9322 = vmatprep.subr.bf16.mxu0 %v12609_v47  ;;  %9568 = vmatprep.subr.bf16.mxu1 %v12611_v49  ;;  %v1174_v46 = vld [vmem:[#allocation2 + $0x1be0] sm:$0xff] }
 0x3ee   : > { %9323 = vmatpush1.bf16.msra.mxu0 %v12608_v56  ;;  %9569 = vmatpush1.bf16.msra.mxu1 %v12610_v57 }
 0x3ef   : > { %9324 = vmatprep.subr.bf16.mxu0 %v12625_v58  ;;  %9570 = vmatprep.subr.bf16.mxu1 %v12627_v60  ;;  %v12656_v60 = vcombine.low %v1150_v17, %v1158_v18 }
 0x3f2   : > { %9325 = vmatpush1.bf16.msra.mxu0 %v12624_v4  ;;  %9571 = vmatpush1.bf16.msra.mxu1 %v12626_v8  ;;  %v12658_v4 = vcombine.low %v1151_v23, %v1159_v25  ;;  %v12673_v8 = vcombine.high %v1166_v45, %v1174_v46  ;;  %v12674_v25 = vcombine.low %v1167_v51, %v1175_v52 }
 0x3f3   : > { %9326 = vmatprep.subr.bf16.mxu0 %v12641_v33  ;;  %9572 = vmatprep.subr.bf16.mxu1 %v12643_v15 }
 0x3f4   : > { %v8940_v37 = vpop.f32.mrb[4].mxu0  ;;  %v9186_v49 = vpop.f32.mrb[4].mxu1 }
 0x3f5   : > { %v14413_v47 = vadd.f32 %v8940_v37, %v1601_v21  ;;  %v8942_v50 = vpop.f32.mrb[5].mxu0  ;;  %v14415_v55 = vadd.f32 %v9186_v49, %v1609_v59  ;;  %v9188_v57 = vpop.f32.mrb[5].mxu1  ;;  %v1182_v21 = vld [vmem:[#allocation2 + $0x1c20] sm:$0xff]  ;;  %v1199_v49 = vld [vmem:[#allocation2 + $0x1ca8] sm:$0xff] }
 0x3f6   : > { %v14417_v56 = vadd.f32 %v8942_v50, %v1605_v22  ;;  %9327 = vmatpush1.bf16.msra.mxu0 %v12640_v53  ;;  %v8944_v58 = vpop.f32.mrb[6].mxu0  ;;  %v14420_v62 = vadd.f32 %v9188_v57, %v1613_v30  ;;  %9573 = vmatpush1.bf16.msra.mxu1 %v12642_v28  ;;  %v9190_v1 = vpop.f32.mrb[6].mxu1  ;;  %v1190_v59 = vld [vmem:[#allocation2 + $0x1c60] sm:$0xff]  ;;  %v1183_v53 = vld [vmem:[#allocation2 + $0x1c28] sm:$0xff]  ;;  %v12672_v28 = vcombine.low %v1166_v45, %v1174_v46 }
 0x3f7   : > { %v10181_v61 = vmax.f32 %v14413_v47, 0.0  ;;  %v8945_v2 = vpop.f32.mrb[7].mxu0  ;;  %9328 = vmatprep.subr.bf16.mxu0 %v12657_v31  ;;  %v9191_v15 = vpop.f32.mrb[7].mxu1  ;;  %9574 = vmatprep.subr.bf16.mxu1 %v12659_v38  ;;  %v1191_v22 = vld [vmem:[#allocation2 + $0x1c68] sm:$0xff]  ;;  %v10183_v17 = vmax.f32 %v14415_v55, 0.0  ;;  %v12689_v30 = vcombine.high %v1182_v21, %v1190_v59  ;;  %v1198_v37 = vld [vmem:[#allocation2 + $0x1ca0] sm:$0xff]  ;;  %v12688_v46 = vcombine.low %v1182_v21, %v1190_v59 }
 0x3f8   : > { %v10182_v33 = vmax.f32 %v14417_v56, 0.0  ;;  %v10184_v18 = vmax.f32 %v14420_v62, 0.0  ;;  %v12691_v31 = vcombine.high %v1183_v53, %v1191_v22  ;;  %v1206_v38 = vld [vmem:[#allocation2 + $0x1ce0] sm:$0xff]  ;;  %v1207_v50 = vld [vmem:[#allocation2 + $0x1ce8] sm:$0xff]  ;;  %v12690_v57 = vcombine.low %v1183_v53, %v1191_v22  ;;  %v13710_v47 = vld [vmem:[#allocation7 + $0x88] sm:$0xff]  }
 0x3f9   : > { %v12705_v51 = vcombine.high %v1198_v37, %v1206_v38  ;;  %v12707_v52 = vcombine.high %v1199_v49, %v1207_v50  ;;  %v1214_v58 = vld [vmem:[#allocation2 + $0x1d20] sm:$0xff]  ;;  %v1215_v1 = vld [vmem:[#allocation2 + $0x1d28] sm:$0xff] }
 0x3fa   : > { %9329 = vmatpush1.bf16.msra.mxu0 %v12656_v60  ;;  %v13670_v23 = vpack.i.bf16 %v10182_v33, %v10181_v61  ;;  %9575 = vmatpush1.bf16.msra.mxu1 %v12658_v4  ;;  %v13675_v45 = vpack.i.bf16 %v10184_v18, %v10183_v17  ;;  %v1222_v60 = vld [vmem:[#allocation2 + $0x1d60] sm:$0xff]  ;;  %v1223_v2 = vld [vmem:[#allocation2 + $0x1d68] sm:$0xff]  ;;  %v12704_v4 = vcombine.low %v1198_v37, %v1206_v38 }
 0x3fb   : > { %9330 = vmatprep.subr.bf16.mxu0 %v12673_v8  ;;  %9576 = vmatprep.subr.bf16.mxu1 %v12675_v20  ;;  %v12706_v8 = vcombine.low %v1199_v49, %v1207_v50  ;;  %v12721_v15 = vcombine.high %v1214_v58, %v1222_v60  ;;  %v12723_v20 = vcombine.high %v1215_v1, %v1223_v2  ;;  %v1230_v21 = vld [vmem:[#allocation2 + $0x1da0] sm:$0xff]  ;;  %v1231_v53 = vld [vmem:[#allocation2 + $0x1da8] sm:$0xff] }
 0x3fc   : > { %13671 = vrot.lane.b32.xlu1 %v13670_v23, %s14034_s14  ;;  %v1238_v59 = vld [vmem:[#allocation2 + $0x1de0] sm:$0xff]  ;;  %v1239_v22 = vld [vmem:[#allocation2 + $0x1de8] sm:$0xff]  ;;  %v12722_v23 = vcombine.low %v1215_v1, %v1223_v2 }
 0x3fd   : > { %v1254_v37 = vld [vmem:[#allocation2 + $0x1e60] sm:$0xff]  ;;  %v1247_v38 = vld [vmem:[#allocation2 + $0x1e28] sm:$0xff]  ;;  %v12736_v49 = vcombine.low %v1230_v21, %v1238_v59  ;;  %v12738_v50 = vcombine.low %v1231_v53, %v1239_v22 }
 0x3fe   : > { %9331 = vmatpush1.bf16.msra.mxu0 %v12672_v28  ;;  %9577 = vmatpush1.bf16.msra.mxu1 %v12674_v25  ;;  %v12720_v28 = vcombine.low %v1214_v58, %v1222_v60  ;;  %v12737_v25 = vcombine.high %v1230_v21, %v1238_v59  ;;  %v1263_v58 = vld [vmem:[#allocation2 + $0x1ea8] sm:$0xff] }
 0x3ff   : > { %9332 = vmatprep.subr.bf16.mxu0 %v12689_v30  ;;  %9578 = vmatprep.subr.bf16.mxu1 %v12691_v31  ;;  %v12739_v30 = vcombine.high %v1231_v53, %v1239_v22  ;;  %v1246_v31 = vld [vmem:[#allocation2 + $0x1e20] sm:$0xff]  ;;  %v1271_v60 = vld [vmem:[#allocation2 + $0x1ee8] sm:$0xff] }
 0x400   : > { %13676 = vrot.lane.b32.xlu1 %v13675_v45, %s14034_s14  ;;  %v1255_v45 = vld [vmem:[#allocation2 + $0x1e68] sm:$0xff]  ;;  %v12752_v1 = vcombine.low %v1246_v31, %v1254_v37  ;;  %v12770_v22 = vcombine.low %v1263_v58, %v1271_v60 }
 0x401   : > { %v12754_v2 = vcombine.low %v1247_v38, %v1255_v45  ;;  %v1279_v21 = vld [vmem:[#allocation2 + $0x1f28] sm:$0xff] }
 0x402   : > { %9333 = vmatpush1.bf16.msra.mxu0 %v12688_v46  ;;  %9579 = vmatpush1.bf16.msra.mxu1 %v12690_v57  ;;  %v12753_v46 = vcombine.high %v1246_v31, %v1254_v37  ;;  %v12755_v57 = vcombine.high %v1247_v38, %v1255_v45  ;;  %v1287_v59 = vld [vmem:[#allocation2 + $0x1f68] sm:$0xff] }
 0x403   : > { %9334 = vmatprep.subr.bf16.mxu0 %v12705_v51  ;;  %9580 = vmatprep.subr.bf16.mxu1 %v12707_v52  ;;  %v1262_v51 = vld [vmem:[#allocation2 + $0x1ea0] sm:$0xff]  ;;  %v1295_v31 = vld [vmem:[#allocation2 + $0x1fa8] sm:$0xff]  ;;  %v12786_v45 = vcombine.low %v1279_v21, %v1287_v59 }
 0x404   : > { %v1270_v52 = vld [vmem:[#allocation2 + $0x1ee0] sm:$0xff]  ;;  %v1303_v37 = vld [vmem:[#allocation2 + $0x1fe8] sm:$0xff] }
 0x405   : > { %v12768_v53 = vcombine.low %v1262_v51, %v1270_v52 }
 0x406   : > { %9335 = vmatpush1.bf16.msra.mxu0 %v12704_v4  ;;  %9581 = vmatpush1.bf16.msra.mxu1 %v12706_v8  ;;  %v12769_v4 = vcombine.high %v1262_v51, %v1270_v52  ;;  %v12771_v8 = vcombine.high %v1263_v58, %v1271_v60  ;;  %v1311_v51 = vld [vmem:[#allocation2 + $0x2028] sm:$0xff]  ;;  %v12802_v60 = vcombine.low %v1295_v31, %v1303_v37 }
 0x407   : > { %9336 = vmatprep.subr.bf16.mxu0 %v12721_v15  ;;  %9582 = vmatprep.subr.bf16.mxu1 %v12723_v20  ;;  %v1278_v15 = vld [vmem:[#allocation2 + $0x1f20] sm:$0xff]  ;;  %v1319_v52 = vld [vmem:[#allocation2 + $0x2068] sm:$0xff] }
 0x408   : > { %v1286_v20 = vld [vmem:[#allocation2 + $0x1f60] sm:$0xff] }
 0x409   : > { %v12784_v38 = vcombine.low %v1278_v15, %v1286_v20 }
 0x40a   : > { %9337 = vmatpush1.bf16.msra.mxu0 %v12720_v28  ;;  %9583 = vmatpush1.bf16.msra.mxu1 %v12722_v23  ;;  %v12785_v28 = vcombine.high %v1278_v15, %v1286_v20  ;;  %v12787_v23 = vcombine.high %v1279_v21, %v1287_v59  ;;  %v1327_v15 = vld [vmem:[#allocation2 + $0x20a8] sm:$0xff]  ;;  %v12818_v59 = vcombine.low %v1311_v51, %v1319_v52 }
 0x40b   : > { %9338 = vmatprep.subr.bf16.mxu0 %v12737_v25  ;;  %9584 = vmatprep.subr.bf16.mxu1 %v12739_v30  ;;  %v1294_v25 = vld [vmem:[#allocation2 + $0x1fa0] sm:$0xff]  ;;  %v1335_v20 = vld [vmem:[#allocation2 + $0x20e8] sm:$0xff] }
 0x40c   : > { %v1302_v30 = vld [vmem:[#allocation2 + $0x1fe0] sm:$0xff] }
 0x40d   : > { %v12800_v58 = vcombine.low %v1294_v25, %v1302_v30 }
 0x40e   : > { %9339 = vmatpush1.bf16.msra.mxu0 %v12736_v49  ;;  %9585 = vmatpush1.bf16.msra.mxu1 %v12738_v50  ;;  %v12801_v49 = vcombine.high %v1294_v25, %v1302_v30  ;;  %v12803_v50 = vcombine.high %v1295_v31, %v1303_v37  ;;  %v1343_v25 = vld [vmem:[#allocation2 + $0x2128] sm:$0xff]  ;;  %v12834_v37 = vcombine.low %v1327_v15, %v1335_v20 }
 0x40f   : > { %9340 = vmatprep.subr.bf16.mxu0 %v12753_v46  ;;  %9586 = vmatprep.subr.bf16.mxu1 %v12755_v57  ;;  %v1310_v46 = vld [vmem:[#allocation2 + $0x2020] sm:$0xff]  ;;  %v1351_v30 = vld [vmem:[#allocation2 + $0x2168] sm:$0xff] }
 0x410   : > { %v1318_v57 = vld [vmem:[#allocation2 + $0x2060] sm:$0xff] }
 0x411   : > { %v12816_v21 = vcombine.low %v1310_v46, %v1318_v57 }
 0x412   : > { %9341 = vmatpush1.bf16.msra.mxu0 %v12752_v1  ;;  %9587 = vmatpush1.bf16.msra.mxu1 %v12754_v2  ;;  %v12817_v1 = vcombine.high %v1310_v46, %v1318_v57  ;;  %v12819_v2 = vcombine.high %v1311_v51, %v1319_v52  ;;  %v1359_v46 = vld [vmem:[#allocation2 + $0x21a8] sm:$0xff]  ;;  %v12850_v52 = vcombine.low %v1343_v25, %v1351_v30 }
 0x413   : > { %9342 = vmatprep.subr.bf16.mxu0 %v12769_v4  ;;  %9588 = vmatprep.subr.bf16.mxu1 %v12771_v8  ;;  %v1326_v4 = vld [vmem:[#allocation2 + $0x20a0] sm:$0xff]  ;;  %v1367_v57 = vld [vmem:[#allocation2 + $0x21e8] sm:$0xff] }
 0x414   : > { %v1334_v8 = vld [vmem:[#allocation2 + $0x20e0] sm:$0xff] }
 0x415   : > { %v12832_v31 = vcombine.low %v1326_v4, %v1334_v8 }
 0x416   : > { %9343 = vmatpush1.bf16.msra.mxu0 %v12768_v53  ;;  %9589 = vmatpush1.bf16.msra.mxu1 %v12770_v22  ;;  %v12833_v53 = vcombine.high %v1326_v4, %v1334_v8  ;;  %v12835_v22 = vcombine.high %v1327_v15, %v1335_v20  ;;  %v1375_v4 = vld [vmem:[#allocation2 + $0x2228] sm:$0xff]  ;;  %v12866_v20 = vcombine.low %v1359_v46, %v1367_v57 }
 0x417   : > { %9344 = vmatprep.subr.bf16.mxu0 %v12785_v28  ;;  %9590 = vmatprep.subr.bf16.mxu1 %v12787_v23  ;;  %v1342_v28 = vld [vmem:[#allocation2 + $0x2120] sm:$0xff]  ;;  %v1383_v8 = vld [vmem:[#allocation2 + $0x2268] sm:$0xff] }
 0x418   : > { %v1350_v23 = vld [vmem:[#allocation2 + $0x2160] sm:$0xff] }
 0x419   : > { %v12848_v51 = vcombine.low %v1342_v28, %v1350_v23 }
 0x41a   : > { %9345 = vmatpush1.bf16.msra.mxu0 %v12784_v38  ;;  %9591 = vmatpush1.bf16.msra.mxu1 %v12786_v45  ;;  %v12849_v38 = vcombine.high %v1342_v28, %v1350_v23  ;;  %v12851_v45 = vcombine.high %v1343_v25, %v1351_v30  ;;  %v1391_v28 = vld [vmem:[#allocation2 + $0x22a8] sm:$0xff]  ;;  %v12882_v30 = vcombine.low %v1375_v4, %v1383_v8 }
 0x41b   : > { %9346 = vmatprep.subr.bf16.mxu0 %v12801_v49  ;;  %9592 = vmatprep.subr.bf16.mxu1 %v12803_v50  ;;  %v1358_v49 = vld [vmem:[#allocation2 + $0x21a0] sm:$0xff]  ;;  %v1399_v23 = vld [vmem:[#allocation2 + $0x22e8] sm:$0xff] }
 0x41c   : > { %v1366_v50 = vld [vmem:[#allocation2 + $0x21e0] sm:$0xff] }
 0x41d   : > { %v12864_v15 = vcombine.low %v1358_v49, %v1366_v50 }
 0x41e   : > { %9347 = vmatpush1.bf16.msra.mxu0 %v12800_v58  ;;  %9593 = vmatpush1.bf16.msra.mxu1 %v12802_v60  ;;  %v12865_v58 = vcombine.high %v1358_v49, %v1366_v50  ;;  %v12867_v60 = vcombine.high %v1359_v46, %v1367_v57  ;;  %v1407_v49 = vld [vmem:[#allocation2 + $0x2328] sm:$0xff]  ;;  %v12898_v57 = vcombine.low %v1391_v28, %v1399_v23 }
 0x41f   : > { %9357 = vmatprep.subr.bf16.mxu0 %v12817_v1  ;;  %9603 = vmatprep.subr.bf16.mxu1 %v12819_v2  ;;  %v1374_v1 = vld [vmem:[#allocation2 + $0x2220] sm:$0xff]  ;;  %v1415_v50 = vld [vmem:[#allocation2 + $0x2368] sm:$0xff] }
 0x420   : > { %v1382_v2 = vld [vmem:[#allocation2 + $0x2260] sm:$0xff] }
 0x421   : > { %9349 = vmatmul.mubr.bf16.vlgmr.msra.gmra.mrb[8].mxu0 %v14289_v7  ;;  %9595 = vmatmul.mubr.bf16.vlgmr.msra.gmra.mrb[8].mxu1 %v14289_v7  ;;  %v12880_v25 = vcombine.low %v1374_v1, %v1382_v2 }
 0x422   : > { %9358 = vmatpush1.bf16.msra.mxu0 %v12816_v21  ;;  %9604 = vmatpush1.bf16.msra.mxu1 %v12818_v59  ;;  %v12881_v21 = vcombine.high %v1374_v1, %v1382_v2  ;;  %v12883_v59 = vcombine.high %v1375_v4, %v1383_v8  ;;  %v1423_v1 = vld [vmem:[#allocation2 + $0x23a8] sm:$0xff]  ;;  %v12914_v8 = vcombine.low %v1407_v49, %v1415_v50 }
 0x423   : > { %9359 = vmatprep.subr.bf16.mxu0 %v12833_v53  ;;  %9605 = vmatprep.subr.bf16.mxu1 %v12835_v22  ;;  %v1390_v53 = vld [vmem:[#allocation2 + $0x22a0] sm:$0xff]  ;;  %v1431_v2 = vld [vmem:[#allocation2 + $0x23e8] sm:$0xff] }
 0x424   : > { %9389 = vmatprep.mubr.bf16.mxu0 %v14308_v41  ;;  %9635 = vmatprep.mubr.bf16.mxu1 %v14308_v41  ;;  %v1398_v22 = vld [vmem:[#allocation2 + $0x22e0] sm:$0xff] }
 0x425   : > { %v12896_v46 = vcombine.low %v1390_v53, %v1398_v22 }
 0x426   : > { %9360 = vmatpush1.bf16.msra.mxu0 %v12832_v31  ;;  %9606 = vmatpush1.bf16.msra.mxu1 %v12834_v37  ;;  %v12897_v31 = vcombine.high %v1390_v53, %v1398_v22  ;;  %v12899_v37 = vcombine.high %v1391_v28, %v1399_v23  ;;  %v1439_v53 = vld [vmem:[#allocation2 + $0x2428] sm:$0xff]  ;;  %v12930_v23 = vcombine.low %v1423_v1, %v1431_v2 }
 0x427   : > { %9361 = vmatprep.subr.bf16.mxu0 %v12849_v38  ;;  %9607 = vmatprep.subr.bf16.mxu1 %v12851_v45  ;;  %v1406_v38 = vld [vmem:[#allocation2 + $0x2320] sm:$0xff]  ;;  %v1447_v22 = vld [vmem:[#allocation2 + $0x2468] sm:$0xff] }
 0x428   : > { %v1414_v45 = vld [vmem:[#allocation2 + $0x2360] sm:$0xff] }
 0x429   : > { %v12912_v4 = vcombine.low %v1406_v38, %v1414_v45 }
 0x42a   : > { %9362 = vmatpush1.bf16.msra.mxu0 %v12848_v51  ;;  %9608 = vmatpush1.bf16.msra.mxu1 %v12850_v52  ;;  %v12913_v51 = vcombine.high %v1406_v38, %v1414_v45  ;;  %v12915_v52 = vcombine.high %v1407_v49, %v1415_v50  ;;  %v1455_v38 = vld [vmem:[#allocation2 + $0x24a8] sm:$0xff]  ;;  %v12946_v50 = vcombine.low %v1439_v53, %v1447_v22 }
 0x42b   : > { %9363 = vmatprep.subr.bf16.mxu0 %v12865_v58  ;;  %9609 = vmatprep.subr.bf16.mxu1 %v12867_v60  ;;  %v1422_v58 = vld [vmem:[#allocation2 + $0x23a0] sm:$0xff]  ;;  %v1463_v45 = vld [vmem:[#allocation2 + $0x24e8] sm:$0xff] }
 0x42c   : > { %v1430_v60 = vld [vmem:[#allocation2 + $0x23e0] sm:$0xff] }
 0x42d   : > { %v12928_v28 = vcombine.low %v1422_v58, %v1430_v60 }
 0x42e   : > { %9364 = vmatpush1.bf16.msra.mxu0 %v12864_v15  ;;  %9610 = vmatpush1.bf16.msra.mxu1 %v12866_v20  ;;  %v12929_v15 = vcombine.high %v1422_v58, %v1430_v60  ;;  %v12931_v20 = vcombine.high %v1423_v1, %v1431_v2  ;;  %v1471_v58 = vld [vmem:[#allocation2 + $0x2528] sm:$0xff]  ;;  %v12962_v2 = vcombine.low %v1455_v38, %v1463_v45 }
 0x42f   : > { %9365 = vmatprep.subr.bf16.mxu0 %v12881_v21  ;;  %9611 = vmatprep.subr.bf16.mxu1 %v12883_v59  ;;  %v1438_v21 = vld [vmem:[#allocation2 + $0x2420] sm:$0xff]  ;;  %v1479_v60 = vld [vmem:[#allocation2 + $0x2568] sm:$0xff] }
 0x430   : > { %v1446_v59 = vld [vmem:[#allocation2 + $0x2460] sm:$0xff] }
 0x431   : > { %v12944_v49 = vcombine.low %v1438_v21, %v1446_v59 }
 0x432   : > { %9366 = vmatpush1.bf16.msra.mxu0 %v12880_v25  ;;  %9612 = vmatpush1.bf16.msra.mxu1 %v12882_v30  ;;  %v12945_v25 = vcombine.high %v1438_v21, %v1446_v59  ;;  %v12947_v30 = vcombine.high %v1439_v53, %v1447_v22  ;;  %v1487_v21 = vld [vmem:[#allocation2 + $0x25a8] sm:$0xff]  ;;  %v12978_v22 = vcombine.low %v1471_v58, %v1479_v60 }
 0x433   : > { %9367 = vmatprep.subr.bf16.mxu0 %v12897_v31  ;;  %9613 = vmatprep.subr.bf16.mxu1 %v12899_v37  ;;  %v1454_v31 = vld [vmem:[#allocation2 + $0x24a0] sm:$0xff]  ;;  %v1495_v59 = vld [vmem:[#allocation2 + $0x25e8] sm:$0xff] }
 0x434   : > { %v1462_v37 = vld [vmem:[#allocation2 + $0x24e0] sm:$0xff] }
 0x435   : > { %v12960_v1 = vcombine.low %v1454_v31, %v1462_v37 }
 0x436   : > { %9368 = vmatpush1.bf16.msra.mxu0 %v12896_v46  ;;  %9614 = vmatpush1.bf16.msra.mxu1 %v12898_v57  ;;  %v12961_v46 = vcombine.high %v1454_v31, %v1462_v37  ;;  %v12963_v57 = vcombine.high %v1455_v38, %v1463_v45  ;;  %v1503_v31 = vld [vmem:[#allocation2 + $0x2628] sm:$0xff]  ;;  %v12994_v45 = vcombine.low %v1487_v21, %v1495_v59 }
 0x437   : > { %9369 = vmatprep.subr.bf16.mxu0 %v12913_v51  ;;  %9615 = vmatprep.subr.bf16.mxu1 %v12915_v52  ;;  %v1470_v51 = vld [vmem:[#allocation2 + $0x2520] sm:$0xff]  ;;  %v1511_v37 = vld [vmem:[#allocation2 + $0x2668] sm:$0xff] }
 0x438   : > { %v1478_v52 = vld [vmem:[#allocation2 + $0x2560] sm:$0xff] }
 0x439   : > { %v12976_v53 = vcombine.low %v1470_v51, %v1478_v52 }
 0x43a   : > { %9370 = vmatpush1.bf16.msra.mxu0 %v12912_v4  ;;  %9616 = vmatpush1.bf16.msra.mxu1 %v12914_v8  ;;  %v12977_v4 = vcombine.high %v1470_v51, %v1478_v52  ;;  %v12979_v8 = vcombine.high %v1471_v58, %v1479_v60  ;;  %v1519_v51 = vld [vmem:[#allocation2 + $0x26a8] sm:$0xff]  ;;  %v13010_v60 = vcombine.low %v1503_v31, %v1511_v37 }
 0x43b   : > { %9371 = vmatprep.subr.bf16.mxu0 %v12929_v15  ;;  %9617 = vmatprep.subr.bf16.mxu1 %v12931_v20  ;;  %v1486_v15 = vld [vmem:[#allocation2 + $0x25a0] sm:$0xff]  ;;  %v1527_v52 = vld [vmem:[#allocation2 + $0x26e8] sm:$0xff] }
 0x43c   : > { %v1494_v20 = vld [vmem:[#allocation2 + $0x25e0] sm:$0xff] }
 0x43d   : > { %v12992_v38 = vcombine.low %v1486_v15, %v1494_v20 }
 0x43e   : > { %9372 = vmatpush1.bf16.msra.mxu0 %v12928_v28  ;;  %9618 = vmatpush1.bf16.msra.mxu1 %v12930_v23  ;;  %v12993_v28 = vcombine.high %v1486_v15, %v1494_v20  ;;  %v12995_v23 = vcombine.high %v1487_v21, %v1495_v59  ;;  %v1535_v15 = vld [vmem:[#allocation2 + $0x2728] sm:$0xff]  ;;  %v13026_v59 = vcombine.low %v1519_v51, %v1527_v52 }
 0x43f   : > { %9373 = vmatprep.subr.bf16.mxu0 %v12945_v25  ;;  %9619 = vmatprep.subr.bf16.mxu1 %v12947_v30  ;;  %v1502_v25 = vld [vmem:[#allocation2 + $0x2620] sm:$0xff]  ;;  %v1543_v20 = vld [vmem:[#allocation2 + $0x2768] sm:$0xff] }
 0x440   : > { %v1510_v30 = vld [vmem:[#allocation2 + $0x2660] sm:$0xff] }
 0x441   : > { %v13008_v58 = vcombine.low %v1502_v25, %v1510_v30 }
 0x442   : > { %9374 = vmatpush1.bf16.msra.mxu0 %v12944_v49  ;;  %9620 = vmatpush1.bf16.msra.mxu1 %v12946_v50  ;;  %v13009_v49 = vcombine.high %v1502_v25, %v1510_v30  ;;  %v13011_v50 = vcombine.high %v1503_v31, %v1511_v37  ;;  %v1551_v25 = vld [vmem:[#allocation2 + $0x27a8] sm:$0xff]  ;;  %v13042_v37 = vcombine.low %v1535_v15, %v1543_v20 }
 0x443   : > { %9375 = vmatprep.subr.bf16.mxu0 %v12961_v46  ;;  %9621 = vmatprep.subr.bf16.mxu1 %v12963_v57  ;;  %v1518_v46 = vld [vmem:[#allocation2 + $0x26a0] sm:$0xff]  ;;  %v1559_v30 = vld [vmem:[#allocation2 + $0x27e8] sm:$0xff] }
 0x444   : > { %v1526_v57 = vld [vmem:[#allocation2 + $0x26e0] sm:$0xff] }
 0x445   : > { %v13024_v21 = vcombine.low %v1518_v46, %v1526_v57 }
 0x446   : > { %9376 = vmatpush1.bf16.msra.mxu0 %v12960_v1  ;;  %9622 = vmatpush1.bf16.msra.mxu1 %v12962_v2  ;;  %v13025_v1 = vcombine.high %v1518_v46, %v1526_v57  ;;  %v13027_v2 = vcombine.high %v1519_v51, %v1527_v52  ;;  %v1567_v46 = vld [vmem:[#allocation2 + $0x2828] sm:$0xff]  ;;  %v13058_v52 = vcombine.low %v1551_v25, %v1559_v30 }
 0x447   : > { %9377 = vmatprep.subr.bf16.mxu0 %v12977_v4  ;;  %9623 = vmatprep.subr.bf16.mxu1 %v12979_v8  ;;  %v1534_v4 = vld [vmem:[#allocation2 + $0x2720] sm:$0xff]  ;;  %v1575_v57 = vld [vmem:[#allocation2 + $0x2868] sm:$0xff] }
 0x448   : > { %v1542_v8 = vld [vmem:[#allocation2 + $0x2760] sm:$0xff] }
 0x449   : > { %v13040_v31 = vcombine.low %v1534_v4, %v1542_v8 }
 0x44a   : > { %9378 = vmatpush1.bf16.msra.mxu0 %v12976_v53  ;;  %9624 = vmatpush1.bf16.msra.mxu1 %v12978_v22  ;;  %v13041_v53 = vcombine.high %v1534_v4, %v1542_v8  ;;  %v13043_v22 = vcombine.high %v1535_v15, %v1543_v20  ;;  %v289_v8 = vld [vmem:[#allocation2 + $0x38] sm:$0xff]  ;;  %v13074_v20 = vcombine.low %v1567_v46, %v1575_v57 }
 0x44b   : > { %9379 = vmatprep.subr.bf16.mxu0 %v12993_v28  ;;  %9625 = vmatprep.subr.bf16.mxu1 %v12995_v23  ;;  %v1550_v28 = vld [vmem:[#allocation2 + $0x27a0] sm:$0xff]  ;;  %v297_v15 = vld [vmem:[#allocation2 + $0x78] sm:$0xff] }
 0x44c   : > { %v1558_v23 = vld [vmem:[#allocation2 + $0x27e0] sm:$0xff] }
 0x44d   : > { %v13056_v51 = vcombine.low %v1550_v28, %v1558_v23 }
 0x44e   : > { %9380 = vmatpush1.bf16.msra.mxu0 %v12992_v38  ;;  %9626 = vmatpush1.bf16.msra.mxu1 %v12994_v45  ;;  %v13057_v38 = vcombine.high %v1550_v28, %v1558_v23  ;;  %v13059_v45 = vcombine.high %v1551_v25, %v1559_v30  ;;  %v305_v28 = vld [vmem:[#allocation2 + $0xb8] sm:$0xff]  ;;  %v11798_v30 = vcombine.low %v289_v8, %v297_v15 }
 0x44f   : > { %9381 = vmatprep.subr.bf16.mxu0 %v13009_v49  ;;  %9627 = vmatprep.subr.bf16.mxu1 %v13011_v50  ;;  %v1566_v49 = vld [vmem:[#allocation2 + $0x2820] sm:$0xff]  ;;  %v313_v23 = vld [vmem:[#allocation2 + $0xf8] sm:$0xff] }
 0x450   : > { %v1574_v50 = vld [vmem:[#allocation2 + $0x2860] sm:$0xff] }
 0x451   : > { %v13072_v4 = vcombine.low %v1566_v49, %v1574_v50 }
 0x452   : > { %9382 = vmatpush1.bf16.msra.mxu0 %v13008_v58  ;;  %9628 = vmatpush1.bf16.msra.mxu1 %v13010_v60  ;;  %v13073_v58 = vcombine.high %v1566_v49, %v1574_v50  ;;  %v13075_v60 = vcombine.high %v1567_v46, %v1575_v57  ;;  %v321_v49 = vld [vmem:[#allocation2 + $0x138] sm:$0xff]  ;;  %v11814_v57 = vcombine.low %v305_v28, %v313_v23 }
 0x453   : > { %9383 = vmatprep.subr.bf16.mxu0 %v13025_v1  ;;  %9629 = vmatprep.subr.bf16.mxu1 %v13027_v2  ;;  %v288_v1 = vld [vmem:[#allocation2 + $0x30] sm:$0xff]  ;;  %v329_v50 = vld [vmem:[#allocation2 + $0x178] sm:$0xff] }
 0x454   : > { %v296_v2 = vld [vmem:[#allocation2 + $0x70] sm:$0xff] }
 0x455   : > { %v11796_v25 = vcombine.low %v288_v1, %v296_v2 }
 0x456   : > { %9384 = vmatpush1.bf16.msra.mxu0 %v13024_v21  ;;  %9630 = vmatpush1.bf16.msra.mxu1 %v13026_v59  ;;  %v11797_v21 = vcombine.high %v288_v1, %v296_v2  ;;  %v11799_v59 = vcombine.high %v289_v8, %v297_v15  ;;  %v337_v1 = vld [vmem:[#allocation2 + $0x1b8] sm:$0xff]  ;;  %v11830_v8 = vcombine.low %v321_v49, %v329_v50 }
 0x457   : > { %9385 = vmatprep.subr.bf16.mxu0 %v13041_v53  ;;  %9631 = vmatprep.subr.bf16.mxu1 %v13043_v22  ;;  %v304_v53 = vld [vmem:[#allocation2 + $0xb0] sm:$0xff]  ;;  %v345_v2 = vld [vmem:[#allocation2 + $0x1f8] sm:$0xff] }
 0x458   : > { %v312_v22 = vld [vmem:[#allocation2 + $0xf0] sm:$0xff] }
 0x459   : > { %v11812_v46 = vcombine.low %v304_v53, %v312_v22 }
 0x45a   : > { %9386 = vmatpush1.bf16.msra.mxu0 %v13040_v31  ;;  %9632 = vmatpush1.bf16.msra.mxu1 %v13042_v37  ;;  %v11813_v31 = vcombine.high %v304_v53, %v312_v22  ;;  %v11815_v37 = vcombine.high %v305_v28, %v313_v23  ;;  %v353_v53 = vld [vmem:[#allocation2 + $0x238] sm:$0xff]  ;;  %v11846_v23 = vcombine.low %v337_v1, %v345_v2 }
 0x45b   : > { %9387 = vmatprep.subr.bf16.mxu0 %v13057_v38  ;;  %9633 = vmatprep.subr.bf16.mxu1 %v13059_v45  ;;  %v320_v38 = vld [vmem:[#allocation2 + $0x130] sm:$0xff]  ;;  %v361_v22 = vld [vmem:[#allocation2 + $0x278] sm:$0xff] }
 0x45c   : > { %v328_v45 = vld [vmem:[#allocation2 + $0x170] sm:$0xff] }
 0x45e   : > { %9388 = vmatpush1.bf16.msra.mxu0 %v13056_v51  ;;  %9634 = vmatpush1.bf16.msra.mxu1 %v13058_v52  ;;  %v11829_v51 = vcombine.high %v320_v38, %v328_v45  ;;  %v11831_v52 = vcombine.high %v321_v49, %v329_v50  ;;  %v11862_v49 = vcombine.low %v353_v53, %v361_v22 }
 0x45f   : > { %9398 = vmatprep.subr.bf16.mxu0 %v13073_v58  ;;  %9644 = vmatprep.subr.bf16.mxu1 %v13075_v60  ;;  %v336_v58 = vld [vmem:[#allocation2 + $0x1b0] sm:$0xff] }
 0x460   : > { %v344_v60 = vld [vmem:[#allocation2 + $0x1f0] sm:$0xff] }
 0x461   : > { %9390 = vmatmul.mubr.bf16.vlgmr.msra.gmra.mrb[8].mxu0 %v14304_v29  ;;  %9636 = vmatmul.mubr.bf16.vlgmr.msra.gmra.mrb[8].mxu1 %v14304_v29  ;;  %v11845_v15 = vcombine.high %v336_v58, %v344_v60  ;;  %v11844_v28 = vcombine.low %v336_v58, %v344_v60  ;;  %v393_v58 = vld [vmem:[#allocation2 + $0x378] sm:$0xff] }
 0x462   : > { %9399 = vmatpush1.bf16.msra.mxu0 %v13072_v4  ;;  %9645 = vmatpush1.bf16.msra.mxu1 %v13074_v20  ;;  %v11828_v4 = vcombine.low %v320_v38, %v328_v45  ;;  %v11847_v20 = vcombine.high %v337_v1, %v345_v2  ;;  %v377_v38 = vld [vmem:[#allocation2 + $0x2f8] sm:$0xff] }
 0x463   : > { %9430 = vmatprep.mubr.bf16.mxu0 %v14033_v11  ;;  %9676 = vmatprep.mubr.bf16.mxu1 %v14033_v11 }
 0x464   : > { %9685 = vmatprep.subr.bf16.mxu0 %v11797_v21  ;;  %9931 = vmatprep.subr.bf16.mxu1 %v11799_v59  ;;  %v352_v21 = vld [vmem:[#allocation2 + $0x230] sm:$0xff] }
 0x465   : > { %v360_v59 = vld [vmem:[#allocation2 + $0x270] sm:$0xff] }
 0x466   : > { %v11860_v45 = vcombine.low %v352_v21, %v360_v59 }
 0x46d   : > { %13084 = vmatmul.mubr.msk.bf16.vlgmr.msra.gmra.mrb[8].mxu0 %vm8205_vm0, %v14321_v16  ;;  %13085 = vmatmul.mubr.msk.bf16.vlgmr.msra.gmra.mrb[8].mxu1 %vm8205_vm0, %v14321_v16 }
 0x46e   : > { %9686 = vmatpush1.bf16.msra.mxu0 %v11796_v25  ;;  %9932 = vmatpush1.bf16.msra.mxu1 %v11798_v30  ;;  %v11861_v25 = vcombine.high %v352_v21, %v360_v59  ;;  %v368_v30 = vld [vmem:[#allocation2 + $0x2b0] sm:$0xff]  ;;  %v409_v21 = vld [vmem:[#allocation2 + $0x3f8] sm:$0xff] }
 0x46f   : > { %9687 = vmatprep.subr.bf16.mxu0 %v11813_v31  ;;  %9933 = vmatprep.subr.bf16.mxu1 %v11815_v37  ;;  %v376_v31 = vld [vmem:[#allocation2 + $0x2f0] sm:$0xff]  ;;  %v369_v37 = vld [vmem:[#allocation2 + $0x2b8] sm:$0xff] }
 0x470   : > { %9717 = vmatprep.mubr.bf16.mxu0 %v14254_v3  ;;  %9963 = vmatprep.mubr.bf16.mxu1 %v14254_v3  ;;  %v11863_v3 = vcombine.high %v353_v53, %v361_v22  ;;  %v11877_v50 = vcombine.high %v368_v30, %v376_v31  ;;  %v11876_v60 = vcombine.low %v368_v30, %v376_v31  ;;  %v425_v30 = vld [vmem:[#allocation2 + $0x478] sm:$0xff] }
 0x471   : > { %v11878_v1 = vcombine.low %v369_v37, %v377_v38 }
 0x472   : > { %9688 = vmatpush1.bf16.msra.mxu0 %v11812_v46  ;;  %9934 = vmatpush1.bf16.msra.mxu1 %v11814_v57  ;;  %v11879_v46 = vcombine.high %v369_v37, %v377_v38  ;;  %v384_v57 = vld [vmem:[#allocation2 + $0x330] sm:$0xff] }
 0x473   : > { %9689 = vmatprep.subr.bf16.mxu0 %v11829_v51  ;;  %9935 = vmatprep.subr.bf16.mxu1 %v11831_v52  ;;  %v392_v51 = vld [vmem:[#allocation2 + $0x370] sm:$0xff]  ;;  %v385_v52 = vld [vmem:[#allocation2 + $0x338] sm:$0xff] }
 0x474   : > { %v11893_v2 = vcombine.high %v384_v57, %v392_v51  ;;  %v11892_v59 = vcombine.low %v384_v57, %v392_v51  ;;  %v11894_v53 = vcombine.low %v385_v52, %v393_v58  ;;  %v441_v57 = vld [vmem:[#allocation2 + $0x4f8] sm:$0xff] }
 0x476   : > { %9690 = vmatpush1.bf16.msra.mxu0 %v11828_v4  ;;  %9936 = vmatpush1.bf16.msra.mxu1 %v11830_v8  ;;  %v11895_v4 = vcombine.high %v385_v52, %v393_v58  ;;  %v400_v8 = vld [vmem:[#allocation2 + $0x3b0] sm:$0xff] }
 0x477   : > { %9691 = vmatprep.subr.bf16.mxu0 %v11845_v15  ;;  %9937 = vmatprep.subr.bf16.mxu1 %v11847_v20  ;;  %v408_v15 = vld [vmem:[#allocation2 + $0x3f0] sm:$0xff]  ;;  %v401_v20 = vld [vmem:[#allocation2 + $0x3b8] sm:$0xff] }
 0x478   : > { %v11909_v22 = vcombine.high %v400_v8, %v408_v15  ;;  %v11908_v31 = vcombine.low %v400_v8, %v408_v15  ;;  %v11910_v37 = vcombine.low %v401_v20, %v409_v21  ;;  %v457_v8 = vld [vmem:[#allocation2 + $0x578] sm:$0xff] }
 0x47a   : > { %9692 = vmatpush1.bf16.msra.mxu0 %v11844_v28  ;;  %9938 = vmatpush1.bf16.msra.mxu1 %v11846_v23  ;;  %v11911_v28 = vcombine.high %v401_v20, %v409_v21  ;;  %v416_v23 = vld [vmem:[#allocation2 + $0x430] sm:$0xff] }
 0x47b   : > { %9693 = vmatprep.subr.bf16.mxu0 %v11861_v25  ;;  %9939 = vmatprep.subr.bf16.mxu1 %v11863_v3  ;;  %v424_v25 = vld [vmem:[#allocation2 + $0x470] sm:$0xff]  ;;  %v417_v3 = vld [vmem:[#allocation2 + $0x438] sm:$0xff] }
 0x47c   : > { %v11925_v38 = vcombine.high %v416_v23, %v424_v25  ;;  %v11924_v51 = vcombine.low %v416_v23, %v424_v25  ;;  %v11926_v52 = vcombine.low %v417_v3, %v425_v30  ;;  %v473_v23 = vld [vmem:[#allocation2 + $0x5f8] sm:$0xff] }
 0x47e   : > { %9694 = vmatpush1.bf16.msra.mxu0 %v11860_v45  ;;  %9940 = vmatpush1.bf16.msra.mxu1 %v11862_v49  ;;  %v11927_v45 = vcombine.high %v417_v3, %v425_v30  ;;  %v432_v49 = vld [vmem:[#allocation2 + $0x4b0] sm:$0xff] }
 0x47f   : > { %9695 = vmatprep.subr.bf16.mxu0 %v11877_v50  ;;  %9941 = vmatprep.subr.bf16.mxu1 %v11879_v46  ;;  %v440_v50 = vld [vmem:[#allocation2 + $0x4f0] sm:$0xff]  ;;  %v433_v46 = vld [vmem:[#allocation2 + $0x4b8] sm:$0xff] }
 0x480   : > { %v11941_v58 = vcombine.high %v432_v49, %v440_v50  ;;  %v11940_v15 = vcombine.low %v432_v49, %v440_v50  ;;  %v11942_v20 = vcombine.low %v433_v46, %v441_v57  ;;  %v489_v49 = vld [vmem:[#allocation2 + $0x678] sm:$0xff] }
 0x482   : > { %9696 = vmatpush1.bf16.msra.mxu0 %v11876_v60  ;;  %9942 = vmatpush1.bf16.msra.mxu1 %v11878_v1  ;;  %v11943_v60 = vcombine.high %v433_v46, %v441_v57  ;;  %v448_v1 = vld [vmem:[#allocation2 + $0x530] sm:$0xff] }
 0x483   : > { %9697 = vmatprep.subr.bf16.mxu0 %v11893_v2  ;;  %9943 = vmatprep.subr.bf16.mxu1 %v11895_v4  ;;  %v456_v2 = vld [vmem:[#allocation2 + $0x570] sm:$0xff]  ;;  %v449_v4 = vld [vmem:[#allocation2 + $0x538] sm:$0xff] }
 0x484   : > { %v11957_v21 = vcombine.high %v448_v1, %v456_v2  ;;  %v11956_v25 = vcombine.low %v448_v1, %v456_v2  ;;  %v11958_v3 = vcombine.low %v449_v4, %v457_v8  ;;  %v505_v1 = vld [vmem:[#allocation2 + $0x6f8] sm:$0xff] }
 0x486   : > { %9698 = vmatpush1.bf16.msra.mxu0 %v11892_v59  ;;  %9944 = vmatpush1.bf16.msra.mxu1 %v11894_v53  ;;  %v11959_v59 = vcombine.high %v449_v4, %v457_v8  ;;  %v464_v53 = vld [vmem:[#allocation2 + $0x5b0] sm:$0xff] }
 0x487   : > { %9699 = vmatprep.subr.bf16.mxu0 %v11909_v22  ;;  %9945 = vmatprep.subr.bf16.mxu1 %v11911_v28  ;;  %v472_v22 = vld [vmem:[#allocation2 + $0x5f0] sm:$0xff]  ;;  %v465_v28 = vld [vmem:[#allocation2 + $0x5b8] sm:$0xff] }
 0x488   : > { %v11973_v30 = vcombine.high %v464_v53, %v472_v22  ;;  %v11972_v50 = vcombine.low %v464_v53, %v472_v22  ;;  %v11974_v46 = vcombine.low %v465_v28, %v473_v23  ;;  %v521_v53 = vld [vmem:[#allocation2 + $0x778] sm:$0xff] }
 0x48a   : > { %9700 = vmatpush1.bf16.msra.mxu0 %v11908_v31  ;;  %9946 = vmatpush1.bf16.msra.mxu1 %v11910_v37  ;;  %v11975_v31 = vcombine.high %v465_v28, %v473_v23  ;;  %v480_v37 = vld [vmem:[#allocation2 + $0x630] sm:$0xff] }
 0x48b   : > { %9701 = vmatprep.subr.bf16.mxu0 %v11925_v38  ;;  %9947 = vmatprep.subr.bf16.mxu1 %v11927_v45  ;;  %v488_v38 = vld [vmem:[#allocation2 + $0x670] sm:$0xff]  ;;  %v481_v45 = vld [vmem:[#allocation2 + $0x638] sm:$0xff] }
 0x48c   : > { %v11989_v57 = vcombine.high %v480_v37, %v488_v38  ;;  %v11988_v2 = vcombine.low %v480_v37, %v488_v38  ;;  %v11990_v4 = vcombine.low %v481_v45, %v489_v49  ;;  %v537_v37 = vld [vmem:[#allocation2 + $0x7f8] sm:$0xff] }
 0x48e   : > { %9702 = vmatpush1.bf16.msra.mxu0 %v11924_v51  ;;  %9948 = vmatpush1.bf16.msra.mxu1 %v11926_v52  ;;  %v11991_v51 = vcombine.high %v481_v45, %v489_v49  ;;  %v496_v52 = vld [vmem:[#allocation2 + $0x6b0] sm:$0xff] }
 0x48f   : > { %9703 = vmatprep.subr.bf16.mxu0 %v11941_v58  ;;  %9949 = vmatprep.subr.bf16.mxu1 %v11943_v60  ;;  %v504_v58 = vld [vmem:[#allocation2 + $0x6f0] sm:$0xff]  ;;  %v497_v60 = vld [vmem:[#allocation2 + $0x6b8] sm:$0xff] }
 0x490   : > { %v12005_v8 = vcombine.high %v496_v52, %v504_v58  ;;  %v12004_v22 = vcombine.low %v496_v52, %v504_v58  ;;  %v12006_v28 = vcombine.low %v497_v60, %v505_v1  ;;  %v553_v52 = vld [vmem:[#allocation2 + $0x878] sm:$0xff] }
 0x492   : > { %9704 = vmatpush1.bf16.msra.mxu0 %v11940_v15  ;;  %9950 = vmatpush1.bf16.msra.mxu1 %v11942_v20  ;;  %v12007_v15 = vcombine.high %v497_v60, %v505_v1  ;;  %v512_v20 = vld [vmem:[#allocation2 + $0x730] sm:$0xff] }
 0x493   : > { %9705 = vmatprep.subr.bf16.mxu0 %v11957_v21  ;;  %9951 = vmatprep.subr.bf16.mxu1 %v11959_v59  ;;  %v520_v21 = vld [vmem:[#allocation2 + $0x770] sm:$0xff]  ;;  %v513_v59 = vld [vmem:[#allocation2 + $0x738] sm:$0xff] }
 0x494   : > { %v12021_v23 = vcombine.high %v512_v20, %v520_v21  ;;  %v12020_v38 = vcombine.low %v512_v20, %v520_v21  ;;  %v12022_v45 = vcombine.low %v513_v59, %v521_v53  ;;  %v569_v20 = vld [vmem:[#allocation2 + $0x8f8] sm:$0xff] }
 0x496   : > { %9706 = vmatpush1.bf16.msra.mxu0 %v11956_v25  ;;  %9952 = vmatpush1.bf16.msra.mxu1 %v11958_v3  ;;  %v12023_v25 = vcombine.high %v513_v59, %v521_v53  ;;  %v528_v3 = vld [vmem:[#allocation2 + $0x7b0] sm:$0xff] }
 0x497   : > { %9707 = vmatprep.subr.bf16.mxu0 %v11973_v30  ;;  %9953 = vmatprep.subr.bf16.mxu1 %v11975_v31  ;;  %v536_v30 = vld [vmem:[#allocation2 + $0x7f0] sm:$0xff]  ;;  %v529_v31 = vld [vmem:[#allocation2 + $0x7b8] sm:$0xff] }
 0x498   : > { %v12037_v49 = vcombine.high %v528_v3, %v536_v30  ;;  %v12036_v58 = vcombine.low %v528_v3, %v536_v30  ;;  %v12038_v60 = vcombine.low %v529_v31, %v537_v37  ;;  %v585_v3 = vld [vmem:[#allocation2 + $0x978] sm:$0xff] }
 0x49a   : > { %9708 = vmatpush1.bf16.msra.mxu0 %v11972_v50  ;;  %9954 = vmatpush1.bf16.msra.mxu1 %v11974_v46  ;;  %v12039_v50 = vcombine.high %v529_v31, %v537_v37  ;;  %v544_v46 = vld [vmem:[#allocation2 + $0x830] sm:$0xff] }
 0x49b   : > { %9709 = vmatprep.subr.bf16.mxu0 %v11989_v57  ;;  %9955 = vmatprep.subr.bf16.mxu1 %v11991_v51  ;;  %v552_v57 = vld [vmem:[#allocation2 + $0x870] sm:$0xff]  ;;  %v545_v51 = vld [vmem:[#allocation2 + $0x838] sm:$0xff] }
 0x49c   : > { %v12053_v1 = vcombine.high %v544_v46, %v552_v57  ;;  %v12052_v21 = vcombine.low %v544_v46, %v552_v57  ;;  %v12054_v59 = vcombine.low %v545_v51, %v553_v52  ;;  %v601_v46 = vld [vmem:[#allocation2 + $0x9f8] sm:$0xff] }
 0x49e   : > { %9710 = vmatpush1.bf16.msra.mxu0 %v11988_v2  ;;  %9956 = vmatpush1.bf16.msra.mxu1 %v11990_v4  ;;  %v12055_v2 = vcombine.high %v545_v51, %v553_v52  ;;  %v560_v4 = vld [vmem:[#allocation2 + $0x8b0] sm:$0xff] }
 0x49f   : > { %9711 = vmatprep.subr.bf16.mxu0 %v12005_v8  ;;  %9957 = vmatprep.subr.bf16.mxu1 %v12007_v15  ;;  %v568_v8 = vld [vmem:[#allocation2 + $0x8f0] sm:$0xff]  ;;  %v561_v15 = vld [vmem:[#allocation2 + $0x8b8] sm:$0xff] }
 0x4a0   : > { %v12069_v53 = vcombine.high %v560_v4, %v568_v8  ;;  %v12068_v30 = vcombine.low %v560_v4, %v568_v8  ;;  %v12070_v31 = vcombine.low %v561_v15, %v569_v20 }
 0x4a2   : > { %9712 = vmatpush1.bf16.msra.mxu0 %v12004_v22  ;;  %9958 = vmatpush1.bf16.msra.mxu1 %v12006_v28  ;;  %v12071_v22 = vcombine.high %v561_v15, %v569_v20  ;;  %v576_v28 = vld [vmem:[#allocation2 + $0x930] sm:$0xff] }
 0x4a3   : > { %9713 = vmatprep.subr.bf16.mxu0 %v12021_v23  ;;  %9959 = vmatprep.subr.bf16.mxu1 %v12023_v25  ;;  %v584_v23 = vld [vmem:[#allocation2 + $0x970] sm:$0xff]  ;;  %v577_v25 = vld [vmem:[#allocation2 + $0x938] sm:$0xff] }
 0x4a4   : > { %v12085_v37 = vcombine.high %v576_v28, %v584_v23  ;;  %v12084_v57 = vcombine.low %v576_v28, %v584_v23  ;;  %v624_v20 = vld [vmem:[#allocation2 + $0xab0] sm:$0xff] }
 0x4a6   : > { %9714 = vmatpush1.bf16.msra.mxu0 %v12020_v38  ;;  %9960 = vmatpush1.bf16.msra.mxu1 %v12022_v45  ;;  %v12087_v38 = vcombine.high %v577_v25, %v585_v3  ;;  %v592_v45 = vld [vmem:[#allocation2 + $0x9b0] sm:$0xff] }
 0x4a7   : > { %9715 = vmatprep.subr.bf16.mxu0 %v12037_v49  ;;  %9961 = vmatprep.subr.bf16.mxu1 %v12039_v50  ;;  %v600_v49 = vld [vmem:[#allocation2 + $0x9f0] sm:$0xff]  ;;  %v593_v50 = vld [vmem:[#allocation2 + $0x9b8] sm:$0xff] }
 0x4a8   : > { %v12101_v51 = vcombine.high %v592_v45, %v600_v49  ;;  %v12103_v52 = vcombine.high %v593_v50, %v601_v46  ;;  %v12100_v4 = vcombine.low %v592_v45, %v600_v49  ;;  %v12102_v8 = vcombine.low %v593_v50, %v601_v46  ;;  %v656_v46 = vld [vmem:[#allocation2 + $0xbb0] sm:$0xff] }
 0x4aa   : > { %9716 = vmatpush1.bf16.msra.mxu0 %v12036_v58  ;;  %9962 = vmatpush1.bf16.msra.mxu1 %v12038_v60  ;;  %v608_v58 = vld [vmem:[#allocation2 + $0xa30] sm:$0xff] }
 0x4ab   : > { %9726 = vmatprep.subr.bf16.mxu0 %v12053_v1  ;;  %9972 = vmatprep.subr.bf16.mxu1 %v12055_v2  ;;  %v616_v60 = vld [vmem:[#allocation2 + $0xa70] sm:$0xff]  ;;  %v609_v1 = vld [vmem:[#allocation2 + $0xa38] sm:$0xff] }
 0x4ac   : > { %v617_v2 = vld [vmem:[#allocation2 + $0xa78] sm:$0xff]  ;;  %v12117_v15 = vcombine.high %v608_v58, %v616_v60 }
 0x4ad   : > { %9718 = vmatmul.mubr.bf16.vlgmr.msra.gmra.mrb[12].mxu0 %v14250_v63  ;;  %9964 = vmatmul.mubr.bf16.vlgmr.msra.gmra.mrb[12].mxu1 %v14250_v63  ;;  %v12086_v63 = vcombine.low %v577_v25, %v585_v3  ;;  %v12118_v28 = vcombine.low %v609_v1, %v617_v2  ;;  %v640_v3 = vld [vmem:[#allocation2 + $0xb30] sm:$0xff] }
 0x4ae   : > { %9727 = vmatpush1.bf16.msra.mxu0 %v12052_v21  ;;  %9973 = vmatpush1.bf16.msra.mxu1 %v12054_v59  ;;  %v632_v21 = vld [vmem:[#allocation2 + $0xaf0] sm:$0xff]  ;;  %v625_v59 = vld [vmem:[#allocation2 + $0xab8] sm:$0xff] }
 0x4af   : > { %9728 = vmatprep.subr.bf16.mxu0 %v12069_v53  ;;  %9974 = vmatprep.subr.bf16.mxu1 %v12071_v22  ;;  %v633_v53 = vld [vmem:[#allocation2 + $0xaf8] sm:$0xff]  ;;  %v12116_v22 = vcombine.low %v608_v58, %v616_v60  ;;  %v12133_v23 = vcombine.high %v624_v20, %v632_v21 }
 0x4b0   : > { %9758 = vmatprep.mubr.bf16.mxu0 %v14265_v35  ;;  %10004 = vmatprep.mubr.bf16.mxu1 %v14265_v35  ;;  %v12119_v35 = vcombine.high %v609_v1, %v617_v2  ;;  %v12135_v25 = vcombine.high %v625_v59, %v633_v53  ;;  %v12134_v45 = vcombine.low %v625_v59, %v633_v53  ;;  %v672_v2 = vld [vmem:[#allocation2 + $0xc30] sm:$0xff] }
 0x4b1   : > { %v688_v53 = vld [vmem:[#allocation2 + $0xcb0] sm:$0xff] }
 0x4b2   : > { %9729 = vmatpush1.bf16.msra.mxu0 %v12068_v30  ;;  %9975 = vmatpush1.bf16.msra.mxu1 %v12070_v31  ;;  %v648_v30 = vld [vmem:[#allocation2 + $0xb70] sm:$0xff]  ;;  %v641_v31 = vld [vmem:[#allocation2 + $0xb38] sm:$0xff] }
 0x4b3   : > { %9730 = vmatprep.subr.bf16.mxu0 %v12085_v37  ;;  %9976 = vmatprep.subr.bf16.mxu1 %v12087_v38  ;;  %v649_v37 = vld [vmem:[#allocation2 + $0xb78] sm:$0xff]  ;;  %v12132_v38 = vcombine.low %v624_v20, %v632_v21  ;;  %v12149_v49 = vcombine.high %v640_v3, %v648_v30 }
 0x4b4   : > { %v12151_v50 = vcombine.high %v641_v31, %v649_v37  ;;  %v12150_v58 = vcombine.low %v641_v31, %v649_v37  ;;  %v704_v37 = vld [vmem:[#allocation2 + $0xd30] sm:$0xff] }
 0x4b6   : > { %9731 = vmatpush1.bf16.msra.mxu0 %v12084_v57  ;;  %9977 = vmatpush1.bf16.msra.mxu1 %v12086_v63  ;;  %v664_v57 = vld [vmem:[#allocation2 + $0xbf0] sm:$0xff]  ;;  %v657_v63 = vld [vmem:[#allocation2 + $0xbb8] sm:$0xff] }
 0x4b7   : > { %9732 = vmatprep.subr.bf16.mxu0 %v12101_v51  ;;  %9978 = vmatprep.subr.bf16.mxu1 %v12103_v52  ;;  %v665_v51 = vld [vmem:[#allocation2 + $0xbf8] sm:$0xff]  ;;  %v12148_v52 = vcombine.low %v640_v3, %v648_v30  ;;  %v12165_v60 = vcombine.high %v656_v46, %v664_v57 }
 0x4b8   : > { %v12167_v1 = vcombine.high %v657_v63, %v665_v51  ;;  %v12166_v20 = vcombine.low %v657_v63, %v665_v51  ;;  %v720_v51 = vld [vmem:[#allocation2 + $0xdb0] sm:$0xff] }
 0x4ba   : > { %9733 = vmatpush1.bf16.msra.mxu0 %v12100_v4  ;;  %9979 = vmatpush1.bf16.msra.mxu1 %v12102_v8  ;;  %v680_v4 = vld [vmem:[#allocation2 + $0xc70] sm:$0xff]  ;;  %v673_v8 = vld [vmem:[#allocation2 + $0xc38] sm:$0xff] }
 0x4bb   : > { %9734 = vmatprep.subr.bf16.mxu0 %v12117_v15  ;;  %9980 = vmatprep.subr.bf16.mxu1 %v12119_v35  ;;  %v681_v15 = vld [vmem:[#allocation2 + $0xc78] sm:$0xff]  ;;  %v12164_v35 = vcombine.low %v656_v46, %v664_v57  ;;  %v12181_v21 = vcombine.high %v672_v2, %v680_v4 }
 0x4bc   : > { %v12183_v59 = vcombine.high %v673_v8, %v681_v15  ;;  %v12182_v3 = vcombine.low %v673_v8, %v681_v15  ;;  %v736_v15 = vld [vmem:[#allocation2 + $0xe30] sm:$0xff] }
 0x4be   : > { %9735 = vmatpush1.bf16.msra.mxu0 %v12116_v22  ;;  %9981 = vmatpush1.bf16.msra.mxu1 %v12118_v28  ;;  %v696_v22 = vld [vmem:[#allocation2 + $0xcf0] sm:$0xff]  ;;  %v689_v28 = vld [vmem:[#allocation2 + $0xcb8] sm:$0xff] }
 0x4bf   : > { %9736 = vmatprep.subr.bf16.mxu0 %v12133_v23  ;;  %9982 = vmatprep.subr.bf16.mxu1 %v12135_v25  ;;  %v697_v23 = vld [vmem:[#allocation2 + $0xcf8] sm:$0xff]  ;;  %v12180_v25 = vcombine.low %v672_v2, %v680_v4  ;;  %v12197_v30 = vcombine.high %v688_v53, %v696_v22 }
 0x4c0   : > { %v12199_v31 = vcombine.high %v689_v28, %v697_v23  ;;  %v12198_v46 = vcombine.low %v689_v28, %v697_v23  ;;  %v752_v23 = vld [vmem:[#allocation2 + $0xeb0] sm:$0xff] }
 0x4c2   : > { %9737 = vmatpush1.bf16.msra.mxu0 %v12132_v38  ;;  %9983 = vmatpush1.bf16.msra.mxu1 %v12134_v45  ;;  %v712_v38 = vld [vmem:[#allocation2 + $0xd70] sm:$0xff]  ;;  %v705_v45 = vld [vmem:[#allocation2 + $0xd38] sm:$0xff] }
 0x4c3   : > { %9738 = vmatprep.subr.bf16.mxu0 %v12149_v49  ;;  %9984 = vmatprep.subr.bf16.mxu1 %v12151_v50  ;;  %v713_v49 = vld [vmem:[#allocation2 + $0xd78] sm:$0xff]  ;;  %v12196_v50 = vcombine.low %v688_v53, %v696_v22  ;;  %v12213_v57 = vcombine.high %v704_v37, %v712_v38 }
 0x4c4   : > { %v12215_v63 = vcombine.high %v705_v45, %v713_v49  ;;  %v12214_v2 = vcombine.low %v705_v45, %v713_v49  ;;  %v768_v49 = vld [vmem:[#allocation2 + $0xf30] sm:$0xff] }
 0x4c6   : > { %9739 = vmatpush1.bf16.msra.mxu0 %v12148_v52  ;;  %9985 = vmatpush1.bf16.msra.mxu1 %v12150_v58  ;;  %v728_v52 = vld [vmem:[#allocation2 + $0xdf0] sm:$0xff]  ;;  %v721_v58 = vld [vmem:[#allocation2 + $0xdb8] sm:$0xff] }
 0x4c7   : > { %9740 = vmatprep.subr.bf16.mxu0 %v12165_v60  ;;  %9986 = vmatprep.subr.bf16.mxu1 %v12167_v1  ;;  %v729_v60 = vld [vmem:[#allocation2 + $0xdf8] sm:$0xff]  ;;  %v12212_v1 = vcombine.low %v704_v37, %v712_v38  ;;  %v12229_v4 = vcombine.high %v720_v51, %v728_v52 }
 0x4c8   : > { %v12231_v8 = vcombine.high %v721_v58, %v729_v60  ;;  %v12230_v53 = vcombine.low %v721_v58, %v729_v60  ;;  %v784_v60 = vld [vmem:[#allocation2 + $0xfb0] sm:$0xff] }
 0x4ca   : > { %9741 = vmatpush1.bf16.msra.mxu0 %v12164_v35  ;;  %9987 = vmatpush1.bf16.msra.mxu1 %v12166_v20  ;;  %v744_v35 = vld [vmem:[#allocation2 + $0xe70] sm:$0xff]  ;;  %v737_v20 = vld [vmem:[#allocation2 + $0xe38] sm:$0xff] }
 0x4cb   : > { %9742 = vmatprep.subr.bf16.mxu0 %v12181_v21  ;;  %9988 = vmatprep.subr.bf16.mxu1 %v12183_v59  ;;  %v745_v21 = vld [vmem:[#allocation2 + $0xe78] sm:$0xff]  ;;  %v12228_v59 = vcombine.low %v720_v51, %v728_v52  ;;  %v12245_v22 = vcombine.high %v736_v15, %v744_v35 }
 0x4cc   : > { %v12247_v28 = vcombine.high %v737_v20, %v745_v21  ;;  %v12246_v37 = vcombine.low %v737_v20, %v745_v21  ;;  %v800_v21 = vld [vmem:[#allocation2 + $0x1030] sm:$0xff] }
 0x4ce   : > { %9743 = vmatpush1.bf16.msra.mxu0 %v12180_v25  ;;  %9989 = vmatpush1.bf16.msra.mxu1 %v12182_v3  ;;  %v760_v25 = vld [vmem:[#allocation2 + $0xef0] sm:$0xff]  ;;  %v753_v3 = vld [vmem:[#allocation2 + $0xeb8] sm:$0xff] }
 0x4cf   : > { %9744 = vmatprep.subr.bf16.mxu0 %v12197_v30  ;;  %9990 = vmatprep.subr.bf16.mxu1 %v12199_v31  ;;  %v761_v30 = vld [vmem:[#allocation2 + $0xef8] sm:$0xff]  ;;  %v12244_v31 = vcombine.low %v736_v15, %v744_v35  ;;  %v12261_v38 = vcombine.high %v752_v23, %v760_v25 }
 0x4d0   : > { %v12263_v45 = vcombine.high %v753_v3, %v761_v30  ;;  %v12262_v51 = vcombine.low %v753_v3, %v761_v30  ;;  %v816_v30 = vld [vmem:[#allocation2 + $0x10b0] sm:$0xff] }
 0x4d2   : > { %9745 = vmatpush1.bf16.msra.mxu0 %v12196_v50  ;;  %9991 = vmatpush1.bf16.msra.mxu1 %v12198_v46  ;;  %v776_v50 = vld [vmem:[#allocation2 + $0xf70] sm:$0xff]  ;;  %v769_v46 = vld [vmem:[#allocation2 + $0xf38] sm:$0xff] }
 0x4d3   : > { %9746 = vmatprep.subr.bf16.mxu0 %v12213_v57  ;;  %9992 = vmatprep.subr.bf16.mxu1 %v12215_v63  ;;  %v777_v57 = vld [vmem:[#allocation2 + $0xf78] sm:$0xff]  ;;  %v12260_v63 = vcombine.low %v752_v23, %v760_v25  ;;  %v12277_v52 = vcombine.high %v768_v49, %v776_v50 }
 0x4d4   : > { %v12279_v58 = vcombine.high %v769_v46, %v777_v57  ;;  %v12278_v15 = vcombine.low %v769_v46, %v777_v57  ;;  %v832_v57 = vld [vmem:[#allocation2 + $0x1130] sm:$0xff] }
 0x4d6   : > { %9747 = vmatpush1.bf16.msra.mxu0 %v12212_v1  ;;  %9993 = vmatpush1.bf16.msra.mxu1 %v12214_v2  ;;  %v792_v1 = vld [vmem:[#allocation2 + $0xff0] sm:$0xff]  ;;  %v785_v2 = vld [vmem:[#allocation2 + $0xfb8] sm:$0xff] }
 0x4d7   : > { %9748 = vmatprep.subr.bf16.mxu0 %v12229_v4  ;;  %9994 = vmatprep.subr.bf16.mxu1 %v12231_v8  ;;  %v793_v4 = vld [vmem:[#allocation2 + $0xff8] sm:$0xff]  ;;  %v12276_v8 = vcombine.low %v768_v49, %v776_v50  ;;  %v12293_v35 = vcombine.high %v784_v60, %v792_v1 }
 0x4d8   : > { %v12295_v20 = vcombine.high %v785_v2, %v793_v4  ;;  %v12294_v23 = vcombine.low %v785_v2, %v793_v4  ;;  %v848_v4 = vld [vmem:[#allocation2 + $0x11b0] sm:$0xff] }
 0x4da   : > { %9749 = vmatpush1.bf16.msra.mxu0 %v12228_v59  ;;  %9995 = vmatpush1.bf16.msra.mxu1 %v12230_v53  ;;  %v808_v59 = vld [vmem:[#allocation2 + $0x1070] sm:$0xff]  ;;  %v801_v53 = vld [vmem:[#allocation2 + $0x1038] sm:$0xff] }
 0x4db   : > { %9750 = vmatprep.subr.bf16.mxu0 %v12245_v22  ;;  %9996 = vmatprep.subr.bf16.mxu1 %v12247_v28  ;;  %v809_v22 = vld [vmem:[#allocation2 + $0x1078] sm:$0xff]  ;;  %v12292_v28 = vcombine.low %v784_v60, %v792_v1  ;;  %v12309_v25 = vcombine.high %v800_v21, %v808_v59 }
 0x4dc   : > { %v12311_v3 = vcombine.high %v801_v53, %v809_v22  ;;  %v12310_v49 = vcombine.low %v801_v53, %v809_v22  ;;  %v864_v53 = vld [vmem:[#allocation2 + $0x1230] sm:$0xff] }
 0x4dd   : > { %v872_v22 = vld [vmem:[#allocation2 + $0x1270] sm:$0xff] }
 0x4de   : > { %9751 = vmatpush1.bf16.msra.mxu0 %v12244_v31  ;;  %9997 = vmatpush1.bf16.msra.mxu1 %v12246_v37  ;;  %v824_v31 = vld [vmem:[#allocation2 + $0x10f0] sm:$0xff]  ;;  %v817_v37 = vld [vmem:[#allocation2 + $0x10b8] sm:$0xff] }
 0x4df   : > { %9752 = vmatprep.subr.bf16.mxu0 %v12261_v38  ;;  %9998 = vmatprep.subr.bf16.mxu1 %v12263_v45  ;;  %v825_v38 = vld [vmem:[#allocation2 + $0x10f8] sm:$0xff]  ;;  %v12308_v45 = vcombine.low %v800_v21, %v808_v59  ;;  %v12325_v50 = vcombine.high %v816_v30, %v824_v31 }
 0x4e0   : > { %v12327_v46 = vcombine.high %v817_v37, %v825_v38  ;;  %v12326_v60 = vcombine.low %v817_v37, %v825_v38  ;;  %v888_v37 = vld [vmem:[#allocation2 + $0x12f0] sm:$0xff]  ;;  %v881_v38 = vld [vmem:[#allocation2 + $0x12b8] sm:$0xff] }
 0x4e2   : > { %9753 = vmatpush1.bf16.msra.mxu0 %v12260_v63  ;;  %9999 = vmatpush1.bf16.msra.mxu1 %v12262_v51  ;;  %v840_v63 = vld [vmem:[#allocation2 + $0x1170] sm:$0xff]  ;;  %v833_v51 = vld [vmem:[#allocation2 + $0x1138] sm:$0xff] }
 0x4e3   : > { %9754 = vmatprep.subr.bf16.mxu0 %v12277_v52  ;;  %10000 = vmatprep.subr.bf16.mxu1 %v12279_v58  ;;  %v841_v52 = vld [vmem:[#allocation2 + $0x1178] sm:$0xff]  ;;  %v12324_v58 = vcombine.low %v816_v30, %v824_v31  ;;  %v12341_v1 = vcombine.high %v832_v57, %v840_v63  ;;  %v12373_v30 = vcombine.high %v864_v53, %v872_v22  ;;  %v880_v31 = vld [vmem:[#allocation2 + $0x12b0] sm:$0xff] }
 0x4e4   : > { %v12343_v2 = vcombine.high %v833_v51, %v841_v52 }
 0x4e6   : > { %9755 = vmatpush1.bf16.msra.mxu0 %v12276_v8  ;;  %10001 = vmatpush1.bf16.msra.mxu1 %v12278_v15  ;;  %v856_v8 = vld [vmem:[#allocation2 + $0x11f0] sm:$0xff]  ;;  %v849_v15 = vld [vmem:[#allocation2 + $0x11b8] sm:$0xff] }
 0x4e7   : > { %9756 = vmatprep.subr.bf16.mxu0 %v12293_v35  ;;  %10002 = vmatprep.subr.bf16.mxu1 %v12295_v20  ;;  %v857_v35 = vld [vmem:[#allocation2 + $0x11f8] sm:$0xff]  ;;  %v12340_v20 = vcombine.low %v832_v57, %v840_v63  ;;  %v12357_v21 = vcombine.high %v848_v4, %v856_v8  ;;  %v896_v63 = vld [vmem:[#allocation2 + $0x1330] sm:$0xff] }
 0x4e8   : > { %v12359_v59 = vcombine.high %v849_v15, %v857_v35 }
 0x4ea   : > { %9757 = vmatpush1.bf16.msra.mxu0 %v12292_v28  ;;  %10003 = vmatpush1.bf16.msra.mxu1 %v12294_v23  ;;  %v865_v28 = vld [vmem:[#allocation2 + $0x1238] sm:$0xff] }
 0x4eb   : > { %9767 = vmatprep.subr.bf16.mxu0 %v12309_v25  ;;  %10013 = vmatprep.subr.bf16.mxu1 %v12311_v3  ;;  %v873_v23 = vld [vmem:[#allocation2 + $0x1278] sm:$0xff]  ;;  %v12356_v25 = vcombine.low %v848_v4, %v856_v8  ;;  %v12358_v3 = vcombine.low %v849_v15, %v857_v35  ;;  %v912_v8 = vld [vmem:[#allocation2 + $0x13b0] sm:$0xff] }
 0x4ec   : > { %v920_v15 = vld [vmem:[#allocation2 + $0x13f0] sm:$0xff]  ;;  %v913_v35 = vld [vmem:[#allocation2 + $0x13b8] sm:$0xff] }
 0x4ed   : > { %9759 = vmatmul.mubr.bf16.vlgmr.msra.gmra.mrb[12].mxu0 %v14261_v24  ;;  %10005 = vmatmul.mubr.bf16.vlgmr.msra.gmra.mrb[12].mxu1 %v14261_v24  ;;  %v12342_v24 = vcombine.low %v833_v51, %v841_v52  ;;  %v904_v51 = vld [vmem:[#allocation2 + $0x1370] sm:$0xff]  ;;  %v897_v52 = vld [vmem:[#allocation2 + $0x1338] sm:$0xff] }
 0x4ee   : > { %9768 = vmatpush1.bf16.msra.mxu0 %v12308_v45  ;;  %10014 = vmatpush1.bf16.msra.mxu1 %v12310_v49  ;;  %v889_v45 = vld [vmem:[#allocation2 + $0x12f8] sm:$0xff]  ;;  %v12372_v49 = vcombine.low %v864_v53, %v872_v22  ;;  %v928_v22 = vld [vmem:[#allocation2 + $0x1430] sm:$0xff] }
 0x4ef   : > { %9769 = vmatprep.subr.bf16.mxu0 %v12325_v50  ;;  %10015 = vmatprep.subr.bf16.mxu1 %v12327_v46  ;;  %v12374_v50 = vcombine.low %v865_v28, %v873_v23  ;;  %v12389_v46 = vcombine.high %v880_v31, %v888_v37  ;;  %v12391_v57 = vcombine.high %v881_v38, %v889_v45 }
 0x4f0   : > { %9799 = vmatprep.mubr.bf16.mxu0 %v14280_v54  ;;  %10045 = vmatprep.mubr.bf16.mxu1 %v14280_v54  ;;  %v12375_v54 = vcombine.high %v865_v28, %v873_v23  ;;  %v936_v28 = vld [vmem:[#allocation2 + $0x1470] sm:$0xff]  ;;  %v929_v23 = vld [vmem:[#allocation2 + $0x1438] sm:$0xff] }
 0x4f2   : > { %9770 = vmatpush1.bf16.msra.mxu0 %v12324_v58  ;;  %10016 = vmatpush1.bf16.msra.mxu1 %v12326_v60  ;;  %v905_v58 = vld [vmem:[#allocation2 + $0x1378] sm:$0xff]  ;;  %v12388_v60 = vcombine.low %v880_v31, %v888_v37  ;;  %v944_v37 = vld [vmem:[#allocation2 + $0x14b0] sm:$0xff] }
 0x4f3   : > { %9771 = vmatprep.subr.bf16.mxu0 %v12341_v1  ;;  %10017 = vmatprep.subr.bf16.mxu1 %v12343_v2  ;;  %v12390_v1 = vcombine.low %v881_v38, %v889_v45  ;;  %v12405_v2 = vcombine.high %v896_v63, %v904_v51  ;;  %v12407_v4 = vcombine.high %v897_v52, %v905_v58  ;;  %v952_v38 = vld [vmem:[#allocation2 + $0x14f0] sm:$0xff]  ;;  %v945_v45 = vld [vmem:[#allocation2 + $0x14b8] sm:$0xff] }
 0x4f6   : > { %9772 = vmatpush1.bf16.msra.mxu0 %v12340_v20  ;;  %10018 = vmatpush1.bf16.msra.mxu1 %v12342_v24  ;;  %v921_v20 = vld [vmem:[#allocation2 + $0x13f8] sm:$0xff]  ;;  %v12404_v24 = vcombine.low %v896_v63, %v904_v51  ;;  %v960_v51 = vld [vmem:[#allocation2 + $0x1530] sm:$0xff] }
 0x4f7   : > { %9773 = vmatprep.subr.bf16.mxu0 %v12357_v21  ;;  %10019 = vmatprep.subr.bf16.mxu1 %v12359_v59  ;;  %v12406_v21 = vcombine.low %v897_v52, %v905_v58  ;;  %v12421_v59 = vcombine.high %v912_v8, %v920_v15  ;;  %v12423_v53 = vcombine.high %v913_v35, %v921_v20  ;;  %v968_v52 = vld [vmem:[#allocation2 + $0x1570] sm:$0xff]  ;;  %v961_v58 = vld [vmem:[#allocation2 + $0x1538] sm:$0xff] }
 0x4fa   : > { %9774 = vmatpush1.bf16.msra.mxu0 %v12356_v25  ;;  %10020 = vmatpush1.bf16.msra.mxu1 %v12358_v3  ;;  %v937_v25 = vld [vmem:[#allocation2 + $0x1478] sm:$0xff]  ;;  %v12420_v3 = vcombine.low %v912_v8, %v920_v15  ;;  %v976_v15 = vld [vmem:[#allocation2 + $0x15b0] sm:$0xff] }
 0x4fb   : > { %9775 = vmatprep.subr.bf16.mxu0 %v12373_v30  ;;  %10021 = vmatprep.subr.bf16.mxu1 %v12375_v54  ;;  %v12422_v30 = vcombine.low %v913_v35, %v921_v20  ;;  %v12437_v54 = vcombine.high %v928_v22, %v936_v28  ;;  %v12439_v31 = vcombine.high %v929_v23, %v937_v25  ;;  %v984_v35 = vld [vmem:[#allocation2 + $0x15f0] sm:$0xff]  ;;  %v977_v20 = vld [vmem:[#allocation2 + $0x15b8] sm:$0xff] }
 0x4fe   : > { %9776 = vmatpush1.bf16.msra.mxu0 %v12372_v49  ;;  %10022 = vmatpush1.bf16.msra.mxu1 %v12374_v50  ;;  %v953_v49 = vld [vmem:[#allocation2 + $0x14f8] sm:$0xff]  ;;  %v12436_v50 = vcombine.low %v928_v22, %v936_v28  ;;  %v992_v28 = vld [vmem:[#allocation2 + $0x1630] sm:$0xff] }
 0x4ff   : > { %9777 = vmatprep.subr.bf16.mxu0 %v12389_v46  ;;  %10023 = vmatprep.subr.bf16.mxu1 %v12391_v57  ;;  %v12438_v46 = vcombine.low %v929_v23, %v937_v25  ;;  %v12453_v57 = vcombine.high %v944_v37, %v952_v38  ;;  %v12455_v63 = vcombine.high %v945_v45, %v953_v49  ;;  %v1000_v23 = vld [vmem:[#allocation2 + $0x1670] sm:$0xff]  ;;  %v993_v25 = vld [vmem:[#allocation2 + $0x1638] sm:$0xff] }
 0x502   : > { %9778 = vmatpush1.bf16.msra.mxu0 %v12388_v60  ;;  %10024 = vmatpush1.bf16.msra.mxu1 %v12390_v1  ;;  %v969_v60 = vld [vmem:[#allocation2 + $0x1578] sm:$0xff]  ;;  %v12452_v1 = vcombine.low %v944_v37, %v952_v38  ;;  %v1008_v38 = vld [vmem:[#allocation2 + $0x16b0] sm:$0xff] }
 0x503   : > { %9779 = vmatprep.subr.bf16.mxu0 %v12405_v2  ;;  %10025 = vmatprep.subr.bf16.mxu1 %v12407_v4  ;;  %v12454_v2 = vcombine.low %v945_v45, %v953_v49  ;;  %v12469_v4 = vcombine.high %v960_v51, %v968_v52  ;;  %v12471_v8 = vcombine.high %v961_v58, %v969_v60  ;;  %v1016_v45 = vld [vmem:[#allocation2 + $0x16f0] sm:$0xff]  ;;  %v1009_v49 = vld [vmem:[#allocation2 + $0x16b8] sm:$0xff] }
 0x506   : > { %9780 = vmatpush1.bf16.msra.mxu0 %v12404_v24  ;;  %10026 = vmatpush1.bf16.msra.mxu1 %v12406_v21  ;;  %v985_v24 = vld [vmem:[#allocation2 + $0x15f8] sm:$0xff]  ;;  %v12468_v21 = vcombine.low %v960_v51, %v968_v52  ;;  %v1024_v52 = vld [vmem:[#allocation2 + $0x1730] sm:$0xff] }
 0x507   : > { %9781 = vmatprep.subr.bf16.mxu0 %v12421_v59  ;;  %10027 = vmatprep.subr.bf16.mxu1 %v12423_v53  ;;  %v12470_v59 = vcombine.low %v961_v58, %v969_v60  ;;  %v12485_v53 = vcombine.high %v976_v15, %v984_v35  ;;  %v12487_v22 = vcombine.high %v977_v20, %v985_v24  ;;  %v1032_v58 = vld [vmem:[#allocation2 + $0x1770] sm:$0xff]  ;;  %v1025_v60 = vld [vmem:[#allocation2 + $0x1738] sm:$0xff] }
 0x50a   : > { %9782 = vmatpush1.bf16.msra.mxu0 %v12420_v3  ;;  %10028 = vmatpush1.bf16.msra.mxu1 %v12422_v30  ;;  %v1001_v3 = vld [vmem:[#allocation2 + $0x1678] sm:$0xff]  ;;  %v12484_v30 = vcombine.low %v976_v15, %v984_v35  ;;  %v1040_v35 = vld [vmem:[#allocation2 + $0x17b0] sm:$0xff] }
 0x50b   : > { %9783 = vmatprep.subr.bf16.mxu0 %v12437_v54  ;;  %10029 = vmatprep.subr.bf16.mxu1 %v12439_v31  ;;  %v12486_v54 = vcombine.low %v977_v20, %v985_v24  ;;  %v12501_v31 = vcombine.high %v992_v28, %v1000_v23  ;;  %v12503_v37 = vcombine.high %v993_v25, %v1001_v3  ;;  %v1048_v20 = vld [vmem:[#allocation2 + $0x17f0] sm:$0xff]  ;;  %v1041_v24 = vld [vmem:[#allocation2 + $0x17b8] sm:$0xff] }
 0x50e   : > { %9784 = vmatpush1.bf16.msra.mxu0 %v12436_v50  ;;  %10030 = vmatpush1.bf16.msra.mxu1 %v12438_v46  ;;  %v1017_v50 = vld [vmem:[#allocation2 + $0x16f8] sm:$0xff]  ;;  %v12500_v46 = vcombine.low %v992_v28, %v1000_v23  ;;  %v1056_v23 = vld [vmem:[#allocation2 + $0x1830] sm:$0xff] }
 0x50f   : > { %9785 = vmatprep.subr.bf16.mxu0 %v12453_v57  ;;  %10031 = vmatprep.subr.bf16.mxu1 %v12455_v63  ;;  %v12502_v57 = vcombine.low %v993_v25, %v1001_v3  ;;  %v12517_v63 = vcombine.high %v1008_v38, %v1016_v45  ;;  %v12519_v51 = vcombine.high %v1009_v49, %v1017_v50  ;;  %v1064_v25 = vld [vmem:[#allocation2 + $0x1870] sm:$0xff]  ;;  %v1057_v3 = vld [vmem:[#allocation2 + $0x1838] sm:$0xff] }
 0x512   : > { %9786 = vmatpush1.bf16.msra.mxu0 %v12452_v1  ;;  %10032 = vmatpush1.bf16.msra.mxu1 %v12454_v2  ;;  %v1033_v1 = vld [vmem:[#allocation2 + $0x1778] sm:$0xff]  ;;  %v12516_v2 = vcombine.low %v1008_v38, %v1016_v45  ;;  %v1072_v45 = vld [vmem:[#allocation2 + $0x18b0] sm:$0xff] }
 0x513   : > { %9787 = vmatprep.subr.bf16.mxu0 %v12469_v4  ;;  %10033 = vmatprep.subr.bf16.mxu1 %v12471_v8  ;;  %v12518_v4 = vcombine.low %v1009_v49, %v1017_v50  ;;  %v12533_v8 = vcombine.high %v1024_v52, %v1032_v58  ;;  %v12535_v15 = vcombine.high %v1025_v60, %v1033_v1  ;;  %v1080_v49 = vld [vmem:[#allocation2 + $0x18f0] sm:$0xff]  ;;  %v1073_v50 = vld [vmem:[#allocation2 + $0x18b8] sm:$0xff] }
 0x516   : > { %9788 = vmatpush1.bf16.msra.mxu0 %v12468_v21  ;;  %10034 = vmatpush1.bf16.msra.mxu1 %v12470_v59  ;;  %v1049_v21 = vld [vmem:[#allocation2 + $0x17f8] sm:$0xff]  ;;  %v12532_v59 = vcombine.low %v1024_v52, %v1032_v58  ;;  %v1088_v58 = vld [vmem:[#allocation2 + $0x1930] sm:$0xff] }
 0x517   : > { %9789 = vmatprep.subr.bf16.mxu0 %v12485_v53  ;;  %10035 = vmatprep.subr.bf16.mxu1 %v12487_v22  ;;  %v12534_v53 = vcombine.low %v1025_v60, %v1033_v1  ;;  %v12549_v22 = vcombine.high %v1040_v35, %v1048_v20  ;;  %v12551_v28 = vcombine.high %v1041_v24, %v1049_v21  ;;  %v1096_v60 = vld [vmem:[#allocation2 + $0x1970] sm:$0xff]  ;;  %v1089_v1 = vld [vmem:[#allocation2 + $0x1938] sm:$0xff] }
 0x51a   : > { %9790 = vmatpush1.bf16.msra.mxu0 %v12484_v30  ;;  %10036 = vmatpush1.bf16.msra.mxu1 %v12486_v54  ;;  %v1065_v30 = vld [vmem:[#allocation2 + $0x1878] sm:$0xff]  ;;  %v12548_v54 = vcombine.low %v1040_v35, %v1048_v20  ;;  %v1104_v20 = vld [vmem:[#allocation2 + $0x19b0] sm:$0xff] }
 0x51b   : > { %9791 = vmatprep.subr.bf16.mxu0 %v12501_v31  ;;  %10037 = vmatprep.subr.bf16.mxu1 %v12503_v37  ;;  %v12550_v31 = vcombine.low %v1041_v24, %v1049_v21  ;;  %v12565_v37 = vcombine.high %v1056_v23, %v1064_v25  ;;  %v12567_v38 = vcombine.high %v1057_v3, %v1065_v30  ;;  %v1112_v24 = vld [vmem:[#allocation2 + $0x19f0] sm:$0xff]  ;;  %v1105_v21 = vld [vmem:[#allocation2 + $0x19b8] sm:$0xff] }
 0x51e   : > { %9792 = vmatpush1.bf16.msra.mxu0 %v12500_v46  ;;  %10038 = vmatpush1.bf16.msra.mxu1 %v12502_v57  ;;  %v1081_v46 = vld [vmem:[#allocation2 + $0x18f8] sm:$0xff]  ;;  %v12564_v57 = vcombine.low %v1056_v23, %v1064_v25  ;;  %v1120_v23 = vld [vmem:[#allocation2 + $0x1a30] sm:$0xff] }
 0x51f   : > { %9793 = vmatprep.subr.bf16.mxu0 %v12517_v63  ;;  %10039 = vmatprep.subr.bf16.mxu1 %v12519_v51  ;;  %v12566_v63 = vcombine.low %v1057_v3, %v1065_v30  ;;  %v12581_v51 = vcombine.high %v1072_v45, %v1080_v49  ;;  %v12583_v52 = vcombine.high %v1073_v50, %v1081_v46  ;;  %v1128_v25 = vld [vmem:[#allocation2 + $0x1a70] sm:$0xff]  ;;  %v1121_v3 = vld [vmem:[#allocation2 + $0x1a38] sm:$0xff] }
 0x520   : > { %v1129_v30 = vld [vmem:[#allocation2 + $0x1a78] sm:$0xff] }
 0x522   : > { %9794 = vmatpush1.bf16.msra.mxu0 %v12516_v2  ;;  %10040 = vmatpush1.bf16.msra.mxu1 %v12518_v4  ;;  %v1097_v2 = vld [vmem:[#allocation2 + $0x1978] sm:$0xff]  ;;  %v12580_v4 = vcombine.low %v1072_v45, %v1080_v49  ;;  %v1144_v45 = vld [vmem:[#allocation2 + $0x1af0] sm:$0xff] }
 0x523   : > { %9795 = vmatprep.subr.bf16.mxu0 %v12533_v8  ;;  %10041 = vmatprep.subr.bf16.mxu1 %v12535_v15  ;;  %v12582_v8 = vcombine.low %v1073_v50, %v1081_v46  ;;  %v12597_v15 = vcombine.high %v1088_v58, %v1096_v60  ;;  %v12599_v35 = vcombine.high %v1089_v1, %v1097_v2  ;;  %v1137_v49 = vld [vmem:[#allocation2 + $0x1ab8] sm:$0xff] }
 0x524   : > { %v1145_v50 = vld [vmem:[#allocation2 + $0x1af8] sm:$0xff]  ;;  %v12628_v46 = vcombine.low %v1120_v23, %v1128_v25 }
 0x526   : > { %9796 = vmatpush1.bf16.msra.mxu0 %v12532_v59  ;;  %10042 = vmatpush1.bf16.msra.mxu1 %v12534_v53  ;;  %v1113_v59 = vld [vmem:[#allocation2 + $0x19f8] sm:$0xff]  ;;  %v12596_v53 = vcombine.low %v1088_v58, %v1096_v60  ;;  %v1152_v58 = vld [vmem:[#allocation2 + $0x1b30] sm:$0xff] }
 0x527   : > { %9797 = vmatprep.subr.bf16.mxu0 %v12549_v22  ;;  %10043 = vmatprep.subr.bf16.mxu1 %v12551_v28  ;;  %v12613_v22 = vcombine.high %v1104_v20, %v1112_v24  ;;  %v12615_v28 = vcombine.high %v1105_v21, %v1113_v59  ;;  %v1160_v60 = vld [vmem:[#allocation2 + $0x1b70] sm:$0xff] }
 0x52a   : > { %9798 = vmatpush1.bf16.msra.mxu0 %v12548_v54  ;;  %10044 = vmatpush1.bf16.msra.mxu1 %v12550_v31  ;;  %v12612_v54 = vcombine.low %v1104_v20, %v1112_v24  ;;  %v12614_v31 = vcombine.low %v1105_v21, %v1113_v59  ;;  %v12646_v20 = vcombine.low %v1137_v49, %v1145_v50 }
 0x52b   : > { %9808 = vmatprep.subr.bf16.mxu0 %v12565_v37  ;;  %10054 = vmatprep.subr.bf16.mxu1 %v12567_v38  ;;  %v12629_v37 = vcombine.high %v1120_v23, %v1128_v25  ;;  %v1136_v38 = vld [vmem:[#allocation2 + $0x1ab0] sm:$0xff]  ;;  %v12661_v21 = vcombine.high %v1152_v58, %v1160_v60  ;;  %v1169_v23 = vld [vmem:[#allocation2 + $0x1bb8] sm:$0xff] }
 0x52c   : > { %v1177_v25 = vld [vmem:[#allocation2 + $0x1bf8] sm:$0xff] }
 0x52d   : > { %9800 = vmatmul.mubr.bf16.vlgmr.msra.gmra.mrb[12].mxu0 %v14276_v44  ;;  %10046 = vmatmul.mubr.bf16.vlgmr.msra.gmra.mrb[12].mxu1 %v14276_v44  ;;  %v12598_v44 = vcombine.low %v1089_v1, %v1097_v2  ;;  %v1153_v2 = vld [vmem:[#allocation2 + $0x1b38] sm:$0xff] }
 0x52e   : > { %9809 = vmatpush1.bf16.msra.mxu0 %v12564_v57  ;;  %10055 = vmatpush1.bf16.msra.mxu1 %v12566_v63  ;;  %v1579_v57 = vld [vmem:[#allocation5 + $0x8] sm:$0xff]  ;;  %v12630_v63 = vcombine.low %v1121_v3, %v1129_v30 }
 0x52f   : > { %9810 = vmatprep.subr.bf16.mxu0 %v12581_v51  ;;  %10056 = vmatprep.subr.bf16.mxu1 %v12583_v52  ;;  %v12645_v51 = vcombine.high %v1136_v38, %v1144_v45  ;;  %v12647_v52 = vcombine.high %v1137_v49, %v1145_v50  ;;  %v1617_v1 = vrot.slane %v1579_v57, %v1584_v39 }
 0x530   : > { %9840 = vmatprep.mubr.bf16.mxu0 %v14293_v13  ;;  %10086 = vmatprep.mubr.bf16.mxu1 %v14293_v13  ;;  %v12631_v13 = vcombine.high %v1121_v3, %v1129_v30  ;;  %v1629_v24 = vrot.slane %v1579_v57, %v1596_v48  ;;  %v12660_v48 = vcombine.low %v1152_v58, %v1160_v60  ;;  %v1185_v60 = vld [vmem:[#allocation2 + $0x1c38] sm:$0xff] }
 0x532   : > { %9811 = vmatpush1.bf16.msra.mxu0 %v12580_v4  ;;  %10057 = vmatpush1.bf16.msra.mxu1 %v12582_v8  ;;  %v1161_v4 = vld [vmem:[#allocation2 + $0x1b78] sm:$0xff]  ;;  %v1625_v8 = vrot.slane %v1579_v57, %v1592_v40 }
 0x533   : > { %9812 = vmatprep.subr.bf16.mxu0 %v12597_v15  ;;  %10058 = vmatprep.subr.bf16.mxu1 %v12599_v35  ;;  %v12644_v15 = vcombine.low %v1136_v38, %v1144_v45  ;;  %v1621_v35 = vrot.slane %v1579_v57, %v1588_v42  ;;  %v12663_v39 = vcombine.high %v1153_v2, %v1161_v4 }
 0x534   : > { %v12662_v45 = vcombine.low %v1153_v2, %v1161_v4 }
 0x536   : > { %9813 = vmatpush1.bf16.msra.mxu0 %v12596_v53  ;;  %10059 = vmatpush1.bf16.msra.mxu1 %v12598_v44  ;;  %v1168_v53 = vld [vmem:[#allocation2 + $0x1bb0] sm:$0xff] }
 0x537   : > { %9814 = vmatprep.subr.bf16.mxu0 %v12613_v22  ;;  %10060 = vmatprep.subr.bf16.mxu1 %v12615_v28  ;;  %v1176_v44 = vld [vmem:[#allocation2 + $0x1bf0] sm:$0xff] }
 0x538   : > { %v12677_v49 = vcombine.high %v1168_v53, %v1176_v44  ;;  %v12676_v2 = vcombine.low %v1168_v53, %v1176_v44 }
 0x53a   : > { %9815 = vmatpush1.bf16.msra.mxu0 %v12612_v54  ;;  %10061 = vmatpush1.bf16.msra.mxu1 %v12614_v31 }
 0x53b   : > { %9816 = vmatprep.subr.bf16.mxu0 %v12629_v37  ;;  %10062 = vmatprep.subr.bf16.mxu1 %v12631_v13 }
 0x53e   : > { %9817 = vmatpush1.bf16.msra.mxu0 %v12628_v46  ;;  %10063 = vmatpush1.bf16.msra.mxu1 %v12630_v63  ;;  %v12679_v63 = vcombine.high %v1169_v23, %v1177_v25 }
 0x53f   : > { %9818 = vmatprep.subr.bf16.mxu0 %v12645_v51  ;;  %10064 = vmatprep.subr.bf16.mxu1 %v12647_v52  ;;  %v1184_v51 = vld [vmem:[#allocation2 + $0x1c30] sm:$0xff] }
 0x540   : > { %v9432_v59 = vpop.f32.mrb[8].mxu0  ;;  %v9678_v28 = vpop.f32.mrb[8].mxu1  ;;  %v1192_v52 = vld [vmem:[#allocation2 + $0x1c70] sm:$0xff] }
 0x541   : > { %v14469_v22 = vadd.f32 %v9432_v59, %v1617_v1  ;;  %v9434_v40 = vpop.f32.mrb[9].mxu0  ;;  %v14471_v3 = vadd.f32 %v9678_v28, %v1625_v8  ;;  %v9680_v30 = vpop.f32.mrb[9].mxu1  ;;  %v1193_v1 = vld [vmem:[#allocation2 + $0x1c78] sm:$0xff]  ;;  %v12692_v53 = vcombine.low %v1184_v51, %v1192_v52 }
 0x542   : > { %v14473_v42 = vadd.f32 %v9434_v40, %v1621_v35  ;;  %9819 = vmatpush1.bf16.msra.mxu0 %v12644_v15  ;;  %v9436_v54 = vpop.f32.mrb[10].mxu0  ;;  %v14476_v37 = vadd.f32 %v9680_v30, %v1629_v24  ;;  %10065 = vmatpush1.bf16.msra.mxu1 %v12646_v20  ;;  %v9682_v13 = vpop.f32.mrb[10].mxu1  ;;  %v12678_v15 = vcombine.low %v1169_v23, %v1177_v25  ;;  %v1200_v24 = vld [vmem:[#allocation2 + $0x1cb0] sm:$0xff]  ;;  %v1201_v59 = vld [vmem:[#allocation2 + $0x1cb8] sm:$0xff] }
 0x543   : > { %v10185_v31 = vmax.f32 %v14469_v22, 0.0  ;;  %v9437_v38 = vpop.f32.mrb[11].mxu0  ;;  %9820 = vmatprep.subr.bf16.mxu0 %v12661_v21  ;;  %v10187_v50 = vmax.f32 %v14471_v3, 0.0  ;;  %v9683_v57 = vpop.f32.mrb[11].mxu1  ;;  %10066 = vmatprep.subr.bf16.mxu1 %v12663_v39  ;;  %v12693_v35 = vcombine.high %v1184_v51, %v1192_v52  ;;  %v12695_v20 = vcombine.high %v1185_v60, %v1193_v1  ;;  %v1208_v21 = vld [vmem:[#allocation2 + $0x1cf0] sm:$0xff]  ;;  %v1209_v39 = vld [vmem:[#allocation2 + $0x1cf8] sm:$0xff] }
 0x544   : > { %v10186_v46 = vmax.f32 %v14473_v42, 0.0  ;;  %v10188_v58 = vmax.f32 %v14476_v37, 0.0  ;;  %v12694_v44 = vcombine.low %v1185_v60, %v1193_v1  ;;  %v12709_v28 = vcombine.high %v1200_v24, %v1208_v21  ;;  %v1216_v23 = vld [vmem:[#allocation2 + $0x1d30] sm:$0xff]  ;;  %v1217_v30 = vld [vmem:[#allocation2 + $0x1d38] sm:$0xff] }
 0x545   : > { %v12711_v40 = vcombine.high %v1201_v59, %v1209_v39  ;;  %v1224_v25 = vld [vmem:[#allocation2 + $0x1d70] sm:$0xff]  ;;  %v1225_v54 = vld [vmem:[#allocation2 + $0x1d78] sm:$0xff]  ;;  %v12710_v13 = vcombine.low %v1201_v59, %v1209_v39 }
 0x546   : > { %v13680_v8 = vpack.i.bf16 %v10186_v46, %v10185_v31  ;;  %9821 = vmatpush1.bf16.msra.mxu0 %v12660_v48  ;;  %v13685_v4 = vpack.i.bf16 %v10188_v58, %v10187_v50  ;;  %10067 = vmatpush1.bf16.msra.mxu1 %v12662_v45  ;;  %v12708_v48 = vcombine.low %v1200_v24, %v1208_v21  ;;  %v1240_v57 = vld [vmem:[#allocation2 + $0x1df0] sm:$0xff]  ;;  %v1241_v51 = vld [vmem:[#allocation2 + $0x1df8] sm:$0xff] }
 0x547   : > { %9822 = vmatprep.subr.bf16.mxu0 %v12677_v49  ;;  %10068 = vmatprep.subr.bf16.mxu1 %v12679_v63  ;;  %v12725_v38 = vcombine.high %v1216_v23, %v1224_v25  ;;  %v12727_v45 = vcombine.high %v1217_v30, %v1225_v54  ;;  %v1232_v49 = vld [vmem:[#allocation2 + $0x1db0] sm:$0xff]  ;;  %v1233_v63 = vld [vmem:[#allocation2 + $0x1db8] sm:$0xff]  ;;  %v12724_v52 = vcombine.low %v1216_v23, %v1224_v25 }
 0x548   : > { %13681 = vrot.lane.b32.xlu0 %v13680_v8, %s14034_s14  ;;  %13686 = vrot.lane.b32.xlu1 %v13685_v4, %s14034_s14  ;;  %v12726_v60 = vcombine.low %v1217_v30, %v1225_v54  ;;  %v12741_v1 = vcombine.high %v1232_v49, %v1240_v57  ;;  %v12743_v8 = vcombine.high %v1233_v63, %v1241_v51  ;;  %v1256_v4 = vld [vmem:[#allocation2 + $0x1e70] sm:$0xff] }
 0x549   : > { %v12742_v24 = vcombine.low %v1233_v63, %v1241_v51  ;;  %v1264_v39 = vld [vmem:[#allocation2 + $0x1eb0] sm:$0xff] }
 0x54a   : > { %9823 = vmatpush1.bf16.msra.mxu0 %v12676_v2  ;;  %10069 = vmatpush1.bf16.msra.mxu1 %v12678_v15  ;;  %v1248_v2 = vld [vmem:[#allocation2 + $0x1e30] sm:$0xff]  ;;  %v1249_v15 = vld [vmem:[#allocation2 + $0x1e38] sm:$0xff] }
 0x54b   : > { %9824 = vmatprep.subr.bf16.mxu0 %v12693_v35  ;;  %10070 = vmatprep.subr.bf16.mxu1 %v12695_v20  ;;  %v1257_v35 = vld [vmem:[#allocation2 + $0x1e78] sm:$0xff]  ;;  %v12740_v20 = vcombine.low %v1232_v49, %v1240_v57  ;;  %v12757_v21 = vcombine.high %v1248_v2, %v1256_v4  ;;  %v1280_v54 = vld [vmem:[#allocation2 + $0x1f30] sm:$0xff] }
 0x54c   : > { %v12759_v59 = vcombine.high %v1249_v15, %v1257_v35  ;;  %v12758_v23 = vcombine.low %v1249_v15, %v1257_v35  ;;  %v1296_v51 = vld [vmem:[#allocation2 + $0x1fb0] sm:$0xff] }
 0x54d   : > { %v1312_v35 = vld [vmem:[#allocation2 + $0x2030] sm:$0xff] }
 0x54e   : > { %9825 = vmatpush1.bf16.msra.mxu0 %v12692_v53  ;;  %10071 = vmatpush1.bf16.msra.mxu1 %v12694_v44  ;;  %v1272_v53 = vld [vmem:[#allocation2 + $0x1ef0] sm:$0xff]  ;;  %v1265_v44 = vld [vmem:[#allocation2 + $0x1eb8] sm:$0xff] }
 0x54f   : > { %9826 = vmatprep.subr.bf16.mxu0 %v12709_v28  ;;  %10072 = vmatprep.subr.bf16.mxu1 %v12711_v40  ;;  %v1273_v28 = vld [vmem:[#allocation2 + $0x1ef8] sm:$0xff]  ;;  %v12756_v40 = vcombine.low %v1248_v2, %v1256_v4  ;;  %v12773_v25 = vcombine.high %v1264_v39, %v1272_v53 }
 0x550   : > { %v12775_v30 = vcombine.high %v1265_v44, %v1273_v28  ;;  %v12774_v49 = vcombine.low %v1265_v44, %v1273_v28  ;;  %v1328_v28 = vld [vmem:[#allocation2 + $0x20b0] sm:$0xff] }
 0x552   : > { %9827 = vmatpush1.bf16.msra.mxu0 %v12708_v48  ;;  %10073 = vmatpush1.bf16.msra.mxu1 %v12710_v13  ;;  %v1288_v48 = vld [vmem:[#allocation2 + $0x1f70] sm:$0xff]  ;;  %v1281_v13 = vld [vmem:[#allocation2 + $0x1f38] sm:$0xff] }
 0x553   : > { %9828 = vmatprep.subr.bf16.mxu0 %v12725_v38  ;;  %10074 = vmatprep.subr.bf16.mxu1 %v12727_v45  ;;  %v1289_v38 = vld [vmem:[#allocation2 + $0x1f78] sm:$0xff]  ;;  %v12772_v45 = vcombine.low %v1264_v39, %v1272_v53  ;;  %v12789_v57 = vcombine.high %v1280_v54, %v1288_v48 }
 0x554   : > { %v12791_v63 = vcombine.high %v1281_v13, %v1289_v38  ;;  %v12790_v2 = vcombine.low %v1281_v13, %v1289_v38  ;;  %v1344_v38 = vld [vmem:[#allocation2 + $0x2130] sm:$0xff] }
 0x556   : > { %9829 = vmatpush1.bf16.msra.mxu0 %v12724_v52  ;;  %10075 = vmatpush1.bf16.msra.mxu1 %v12726_v60  ;;  %v1304_v52 = vld [vmem:[#allocation2 + $0x1ff0] sm:$0xff]  ;;  %v1297_v60 = vld [vmem:[#allocation2 + $0x1fb8] sm:$0xff] }
 0x557   : > { %9830 = vmatprep.subr.bf16.mxu0 %v12741_v1  ;;  %10076 = vmatprep.subr.bf16.mxu1 %v12743_v8  ;;  %v1305_v1 = vld [vmem:[#allocation2 + $0x1ff8] sm:$0xff]  ;;  %v12788_v8 = vcombine.low %v1280_v54, %v1288_v48  ;;  %v12805_v4 = vcombine.high %v1296_v51, %v1304_v52 }
 0x558   : > { %v12807_v15 = vcombine.high %v1297_v60, %v1305_v1  ;;  %v12806_v39 = vcombine.low %v1297_v60, %v1305_v1  ;;  %v1360_v1 = vld [vmem:[#allocation2 + $0x21b0] sm:$0xff] }
 0x55a   : > { %9831 = vmatpush1.bf16.msra.mxu0 %v12740_v20  ;;  %10077 = vmatpush1.bf16.msra.mxu1 %v12742_v24  ;;  %v1320_v20 = vld [vmem:[#allocation2 + $0x2070] sm:$0xff]  ;;  %v1313_v24 = vld [vmem:[#allocation2 + $0x2038] sm:$0xff] }
 0x55b   : > { %9832 = vmatprep.subr.bf16.mxu0 %v12757_v21  ;;  %10078 = vmatprep.subr.bf16.mxu1 %v12759_v59  ;;  %v1321_v21 = vld [vmem:[#allocation2 + $0x2078] sm:$0xff]  ;;  %v12804_v59 = vcombine.low %v1296_v51, %v1304_v52  ;;  %v12821_v53 = vcombine.high %v1312_v35, %v1320_v20 }
 0x55c   : > { %v12823_v44 = vcombine.high %v1313_v24, %v1321_v21  ;;  %v12822_v54 = vcombine.low %v1313_v24, %v1321_v21  ;;  %v1376_v24 = vld [vmem:[#allocation2 + $0x2230] sm:$0xff] }
 0x55d   : > { %v1384_v21 = vld [vmem:[#allocation2 + $0x2270] sm:$0xff] }
 0x55e   : > { %9833 = vmatpush1.bf16.msra.mxu0 %v12756_v40  ;;  %10079 = vmatpush1.bf16.msra.mxu1 %v12758_v23  ;;  %v1336_v40 = vld [vmem:[#allocation2 + $0x20f0] sm:$0xff]  ;;  %v1329_v23 = vld [vmem:[#allocation2 + $0x20b8] sm:$0xff] }
 0x55f   : > { %9834 = vmatprep.subr.bf16.mxu0 %v12773_v25  ;;  %10080 = vmatprep.subr.bf16.mxu1 %v12775_v30  ;;  %v1337_v25 = vld [vmem:[#allocation2 + $0x20f8] sm:$0xff]  ;;  %v12820_v30 = vcombine.low %v1312_v35, %v1320_v20  ;;  %v12837_v48 = vcombine.high %v1328_v28, %v1336_v40 }
 0x560   : > { %v12839_v13 = vcombine.high %v1329_v23, %v1337_v25  ;;  %v12838_v51 = vcombine.low %v1329_v23, %v1337_v25  ;;  %v1400_v23 = vld [vmem:[#allocation2 + $0x22f0] sm:$0xff]  ;;  %v1393_v25 = vld [vmem:[#allocation2 + $0x22b8] sm:$0xff] }
 0x562   : > { %9835 = vmatpush1.bf16.msra.mxu0 %v12772_v45  ;;  %10081 = vmatpush1.bf16.msra.mxu1 %v12774_v49  ;;  %v1352_v45 = vld [vmem:[#allocation2 + $0x2170] sm:$0xff]  ;;  %v1345_v49 = vld [vmem:[#allocation2 + $0x2138] sm:$0xff] }
 0x563   : > { %9836 = vmatprep.subr.bf16.mxu0 %v12789_v57  ;;  %10082 = vmatprep.subr.bf16.mxu1 %v12791_v63  ;;  %v1353_v57 = vld [vmem:[#allocation2 + $0x2178] sm:$0xff]  ;;  %v12836_v63 = vcombine.low %v1328_v28, %v1336_v40  ;;  %v12853_v52 = vcombine.high %v1344_v38, %v1352_v45  ;;  %v12885_v28 = vcombine.high %v1376_v24, %v1384_v21  ;;  %v1392_v40 = vld [vmem:[#allocation2 + $0x22b0] sm:$0xff] }
 0x564   : > { %v12855_v60 = vcombine.high %v1345_v49, %v1353_v57 }
 0x566   : > { %9837 = vmatpush1.bf16.msra.mxu0 %v12788_v8  ;;  %10083 = vmatpush1.bf16.msra.mxu1 %v12790_v2  ;;  %v1368_v8 = vld [vmem:[#allocation2 + $0x21f0] sm:$0xff]  ;;  %v1361_v2 = vld [vmem:[#allocation2 + $0x21b8] sm:$0xff] }
 0x567   : > { %9838 = vmatprep.subr.bf16.mxu0 %v12805_v4  ;;  %10084 = vmatprep.subr.bf16.mxu1 %v12807_v15  ;;  %v1369_v4 = vld [vmem:[#allocation2 + $0x21f8] sm:$0xff]  ;;  %v12852_v15 = vcombine.low %v1344_v38, %v1352_v45  ;;  %v12869_v35 = vcombine.high %v1360_v1, %v1368_v8  ;;  %v1408_v45 = vld [vmem:[#allocation2 + $0x2330] sm:$0xff] }
 0x568   : > { %v12871_v20 = vcombine.high %v1361_v2, %v1369_v4 }
 0x56a   : > { %9839 = vmatpush1.bf16.msra.mxu0 %v12804_v59  ;;  %10085 = vmatpush1.bf16.msra.mxu1 %v12806_v39  ;;  %v1377_v59 = vld [vmem:[#allocation2 + $0x2238] sm:$0xff] }
 0x56b   : > { %9849 = vmatprep.subr.bf16.mxu0 %v12821_v53  ;;  %10095 = vmatprep.subr.bf16.mxu1 %v12823_v44  ;;  %v1385_v39 = vld [vmem:[#allocation2 + $0x2278] sm:$0xff]  ;;  %v12868_v53 = vcombine.low %v1360_v1, %v1368_v8  ;;  %v12870_v44 = vcombine.low %v1361_v2, %v1369_v4  ;;  %v1424_v8 = vld [vmem:[#allocation2 + $0x23b0] sm:$0xff] }
 0x56c   : > { %v1432_v2 = vld [vmem:[#allocation2 + $0x23f0] sm:$0xff]  ;;  %v1425_v4 = vld [vmem:[#allocation2 + $0x23b8] sm:$0xff] }
 0x56d   : > { %9841 = vmatmul.mubr.bf16.vlgmr.msra.gmra.mrb[12].mxu0 %v14289_v7  ;;  %10087 = vmatmul.mubr.bf16.vlgmr.msra.gmra.mrb[12].mxu1 %v14289_v7  ;;  %v12854_v7 = vcombine.low %v1345_v49, %v1353_v57  ;;  %v1416_v49 = vld [vmem:[#allocation2 + $0x2370] sm:$0xff]  ;;  %v1409_v57 = vld [vmem:[#allocation2 + $0x2338] sm:$0xff] }
 0x56e   : > { %9850 = vmatpush1.bf16.msra.mxu0 %v12820_v30  ;;  %10096 = vmatpush1.bf16.msra.mxu1 %v12822_v54  ;;  %v1401_v30 = vld [vmem:[#allocation2 + $0x22f8] sm:$0xff]  ;;  %v12884_v54 = vcombine.low %v1376_v24, %v1384_v21  ;;  %v1440_v21 = vld [vmem:[#allocation2 + $0x2430] sm:$0xff] }
 0x56f   : > { %9851 = vmatprep.subr.bf16.mxu0 %v12837_v48  ;;  %10097 = vmatprep.subr.bf16.mxu1 %v12839_v13  ;;  %v12886_v48 = vcombine.low %v1377_v59, %v1385_v39  ;;  %v12901_v13 = vcombine.high %v1392_v40, %v1400_v23  ;;  %v12903_v38 = vcombine.high %v1393_v25, %v1401_v30 }
 0x570   : > { %9881 = vmatprep.mubr.bf16.mxu0 %v14308_v41  ;;  %10127 = vmatprep.mubr.bf16.mxu1 %v14308_v41  ;;  %v12887_v41 = vcombine.high %v1377_v59, %v1385_v39  ;;  %v1448_v59 = vld [vmem:[#allocation2 + $0x2470] sm:$0xff]  ;;  %v1441_v39 = vld [vmem:[#allocation2 + $0x2438] sm:$0xff] }
 0x572   : > { %9852 = vmatpush1.bf16.msra.mxu0 %v12836_v63  ;;  %10098 = vmatpush1.bf16.msra.mxu1 %v12838_v51  ;;  %v1417_v63 = vld [vmem:[#allocation2 + $0x2378] sm:$0xff]  ;;  %v12900_v51 = vcombine.low %v1392_v40, %v1400_v23  ;;  %v1456_v23 = vld [vmem:[#allocation2 + $0x24b0] sm:$0xff] }
 0x573   : > { %9853 = vmatprep.subr.bf16.mxu0 %v12853_v52  ;;  %10099 = vmatprep.subr.bf16.mxu1 %v12855_v60  ;;  %v12902_v52 = vcombine.low %v1393_v25, %v1401_v30  ;;  %v12917_v60 = vcombine.high %v1408_v45, %v1416_v49  ;;  %v12919_v1 = vcombine.high %v1409_v57, %v1417_v63  ;;  %v1464_v25 = vld [vmem:[#allocation2 + $0x24f0] sm:$0xff]  ;;  %v1457_v30 = vld [vmem:[#allocation2 + $0x24b8] sm:$0xff] }
 0x576   : > { %9854 = vmatpush1.bf16.msra.mxu0 %v12852_v15  ;;  %10100 = vmatpush1.bf16.msra.mxu1 %v12854_v7  ;;  %v1433_v15 = vld [vmem:[#allocation2 + $0x23f8] sm:$0xff]  ;;  %v12916_v7 = vcombine.low %v1408_v45, %v1416_v49  ;;  %v1472_v49 = vld [vmem:[#allocation2 + $0x2530] sm:$0xff] }
 0x577   : > { %9855 = vmatprep.subr.bf16.mxu0 %v12869_v35  ;;  %10101 = vmatprep.subr.bf16.mxu1 %v12871_v20  ;;  %v12918_v35 = vcombine.low %v1409_v57, %v1417_v63  ;;  %v12933_v20 = vcombine.high %v1424_v8, %v1432_v2  ;;  %v12935_v24 = vcombine.high %v1425_v4, %v1433_v15  ;;  %v1480_v57 = vld [vmem:[#allocation2 + $0x2570] sm:$0xff]  ;;  %v1473_v63 = vld [vmem:[#allocation2 + $0x2538] sm:$0xff] }
 0x57a   : > { %9856 = vmatpush1.bf16.msra.mxu0 %v12868_v53  ;;  %10102 = vmatpush1.bf16.msra.mxu1 %v12870_v44  ;;  %v1449_v53 = vld [vmem:[#allocation2 + $0x2478] sm:$0xff]  ;;  %v12932_v44 = vcombine.low %v1424_v8, %v1432_v2  ;;  %v1488_v2 = vld [vmem:[#allocation2 + $0x25b0] sm:$0xff] }
 0x57b   : > { %9857 = vmatprep.subr.bf16.mxu0 %v12885_v28  ;;  %10103 = vmatprep.subr.bf16.mxu1 %v12887_v41  ;;  %v12934_v28 = vcombine.low %v1425_v4, %v1433_v15  ;;  %v12949_v41 = vcombine.high %v1440_v21, %v1448_v59  ;;  %v12951_v40 = vcombine.high %v1441_v39, %v1449_v53  ;;  %v1496_v4 = vld [vmem:[#allocation2 + $0x25f0] sm:$0xff]  ;;  %v1489_v15 = vld [vmem:[#allocation2 + $0x25b8] sm:$0xff] }
 0x57e   : > { %9858 = vmatpush1.bf16.msra.mxu0 %v12884_v54  ;;  %10104 = vmatpush1.bf16.msra.mxu1 %v12886_v48  ;;  %v1465_v54 = vld [vmem:[#allocation2 + $0x24f8] sm:$0xff]  ;;  %v12948_v48 = vcombine.low %v1440_v21, %v1448_v59  ;;  %v1504_v59 = vld [vmem:[#allocation2 + $0x2630] sm:$0xff] }
 0x57f   : > { %9859 = vmatprep.subr.bf16.mxu0 %v12901_v13  ;;  %10105 = vmatprep.subr.bf16.mxu1 %v12903_v38  ;;  %v12950_v13 = vcombine.low %v1441_v39, %v1449_v53  ;;  %v12965_v38 = vcombine.high %v1456_v23, %v1464_v25  ;;  %v12967_v45 = vcombine.high %v1457_v30, %v1465_v54  ;;  %v1512_v39 = vld [vmem:[#allocation2 + $0x2670] sm:$0xff]  ;;  %v1505_v53 = vld [vmem:[#allocation2 + $0x2638] sm:$0xff] }
 0x582   : > { %9860 = vmatpush1.bf16.msra.mxu0 %v12900_v51  ;;  %10106 = vmatpush1.bf16.msra.mxu1 %v12902_v52  ;;  %v1481_v51 = vld [vmem:[#allocation2 + $0x2578] sm:$0xff]  ;;  %v12964_v52 = vcombine.low %v1456_v23, %v1464_v25  ;;  %v1520_v25 = vld [vmem:[#allocation2 + $0x26b0] sm:$0xff] }
 0x583   : > { %9861 = vmatprep.subr.bf16.mxu0 %v12917_v60  ;;  %10107 = vmatprep.subr.bf16.mxu1 %v12919_v1  ;;  %v12966_v60 = vcombine.low %v1457_v30, %v1465_v54  ;;  %v12981_v1 = vcombine.high %v1472_v49, %v1480_v57  ;;  %v12983_v8 = vcombine.high %v1473_v63, %v1481_v51  ;;  %v1528_v30 = vld [vmem:[#allocation2 + $0x26f0] sm:$0xff]  ;;  %v1521_v54 = vld [vmem:[#allocation2 + $0x26b8] sm:$0xff] }
 0x586   : > { %9862 = vmatpush1.bf16.msra.mxu0 %v12916_v7  ;;  %10108 = vmatpush1.bf16.msra.mxu1 %v12918_v35  ;;  %v1497_v7 = vld [vmem:[#allocation2 + $0x25f8] sm:$0xff]  ;;  %v12980_v35 = vcombine.low %v1472_v49, %v1480_v57  ;;  %v1536_v57 = vld [vmem:[#allocation2 + $0x2730] sm:$0xff] }
 0x587   : > { %9863 = vmatprep.subr.bf16.mxu0 %v12933_v20  ;;  %10109 = vmatprep.subr.bf16.mxu1 %v12935_v24  ;;  %v12982_v20 = vcombine.low %v1473_v63, %v1481_v51  ;;  %v12997_v24 = vcombine.high %v1488_v2, %v1496_v4  ;;  %v12999_v21 = vcombine.high %v1489_v15, %v1497_v7  ;;  %v1544_v63 = vld [vmem:[#allocation2 + $0x2770] sm:$0xff]  ;;  %v1537_v51 = vld [vmem:[#allocation2 + $0x2738] sm:$0xff] }
 0x58a   : > { %9864 = vmatpush1.bf16.msra.mxu0 %v12932_v44  ;;  %10110 = vmatpush1.bf16.msra.mxu1 %v12934_v28  ;;  %v1513_v44 = vld [vmem:[#allocation2 + $0x2678] sm:$0xff]  ;;  %v12996_v28 = vcombine.low %v1488_v2, %v1496_v4  ;;  %v1552_v4 = vld [vmem:[#allocation2 + $0x27b0] sm:$0xff] }
 0x58b   : > { %9865 = vmatprep.subr.bf16.mxu0 %v12949_v41  ;;  %10111 = vmatprep.subr.bf16.mxu1 %v12951_v40  ;;  %v12998_v41 = vcombine.low %v1489_v15, %v1497_v7  ;;  %v13013_v40 = vcombine.high %v1504_v59, %v1512_v39  ;;  %v13015_v23 = vcombine.high %v1505_v53, %v1513_v44  ;;  %v1560_v15 = vld [vmem:[#allocation2 + $0x27f0] sm:$0xff]  ;;  %v14495_v7 = vpop.permute.xlu0 %13661 }
 0x58e   : > { %9866 = vmatpush1.bf16.msra.mxu0 %v12948_v48  ;;  %10112 = vmatpush1.bf16.msra.mxu1 %v12950_v13  ;;  %v1529_v48 = vld [vmem:[#allocation2 + $0x26f8] sm:$0xff]  ;;  %v13012_v13 = vcombine.low %v1504_v59, %v1512_v39  ;;  %v13061_v59 = vcombine.high %v1552_v4, %v1560_v15 }
 0x58f   : > { %9867 = vmatprep.subr.bf16.mxu0 %v12965_v38  ;;  %10113 = vmatprep.subr.bf16.mxu1 %v12967_v45  ;;  %v13014_v38 = vcombine.low %v1505_v53, %v1513_v44  ;;  %v13029_v45 = vcombine.high %v1520_v25, %v1528_v30  ;;  %v13031_v49 = vcombine.high %v1521_v54, %v1529_v48  ;;  %v1568_v53 = vld [vmem:[#allocation2 + $0x2830] sm:$0xff] }
 0x590   : > { %v1576_v44 = vld [vmem:[#allocation2 + $0x2870] sm:$0xff] }
 0x592   : > { %9868 = vmatpush1.bf16.msra.mxu0 %v12964_v52  ;;  %10114 = vmatpush1.bf16.msra.mxu1 %v12966_v60  ;;  %v1545_v52 = vld [vmem:[#allocation2 + $0x2778] sm:$0xff]  ;;  %v13028_v60 = vcombine.low %v1520_v25, %v1528_v30  ;;  %v13077_v30 = vcombine.high %v1568_v53, %v1576_v44 }
 0x593   : > { %9869 = vmatprep.subr.bf16.mxu0 %v12981_v1  ;;  %10115 = vmatprep.subr.bf16.mxu1 %v12983_v8  ;;  %v13030_v1 = vcombine.low %v1521_v54, %v1529_v48  ;;  %v13045_v8 = vcombine.high %v1536_v57, %v1544_v63  ;;  %v13047_v2 = vcombine.high %v1537_v51, %v1545_v52  ;;  %v14499_v54 = vpop.permute.xlu1 %13671 }
 0x596   : > { %9870 = vmatpush1.bf16.msra.mxu0 %v12980_v35  ;;  %10116 = vmatpush1.bf16.msra.mxu1 %v12982_v20  ;;  %v1553_v35 = vld [vmem:[#allocation2 + $0x27b8] sm:$0xff] }
 0x597   : > { %9871 = vmatprep.subr.bf16.mxu0 %v12997_v24  ;;  %10117 = vmatprep.subr.bf16.mxu1 %v12999_v21  ;;  %v1561_v20 = vld [vmem:[#allocation2 + $0x27f8] sm:$0xff]  ;;  %v13044_v24 = vcombine.low %v1536_v57, %v1544_v63  ;;  %v13046_v21 = vcombine.low %v1537_v51, %v1545_v52  ;;  %v13673_v57 = vunpack.i.l.bf16 %v14499_v54  ;;  %v13664_v51 = vunpack.i.h.bf16 %v14495_v7 }
 0x598   : > { %v13063_v39 = vcombine.high %v1553_v35, %v1561_v20  ;;  %v13062_v25 = vcombine.low %v1553_v35, %v1561_v20  ;;  %v13663_v52 = vunpack.i.l.bf16 %v14495_v7 }
 0x59a   : > { %9872 = vmatpush1.bf16.msra.mxu0 %v12996_v28  ;;  %10118 = vmatpush1.bf16.msra.mxu1 %v12998_v41  ;;  %v1569_v28 = vld [vmem:[#allocation2 + $0x2838] sm:$0xff] }
 0x59b   : > { %9873 = vmatprep.subr.bf16.mxu0 %v13013_v40  ;;  %10119 = vmatprep.subr.bf16.mxu1 %v13015_v23  ;;  %v1577_v41 = vld [vmem:[#allocation2 + $0x2878] sm:$0xff]  ;;  %v13060_v40 = vcombine.low %v1552_v4, %v1560_v15  ;;  %v14497_v23 = vpop.permute.xlu0 %13666 }
 0x59c   : > { %v13079_v48 = vcombine.high %v1569_v28, %v1577_v41  ;;  %v13078_v63 = vcombine.low %v1569_v28, %v1577_v41  ;;  %v13716_v28 = vld [vmem:[#allocation7 + $0xd8] sm:$0xff]  }
 0x59d   : > { %v13718_v41 = vld [vmem:[#allocation7 + $0x98] sm:$0xff]  }
 0x59e   : > { %9874 = vmatpush1.bf16.msra.mxu0 %v13012_v13  ;;  %10120 = vmatpush1.bf16.msra.mxu1 %v13014_v38  ;;  %v14502_v13 = vand.u32 127, %v1582_v32  ;;  %v13668_v38 = vunpack.i.l.bf16 %v14497_v23  ;;  %v13704_v32 = vld [vmem:[#allocation7 + $0xc0] sm:$0xff]  }
 0x59f   : > { %9875 = vmatprep.subr.bf16.mxu0 %v13029_v45  ;;  %10121 = vmatprep.subr.bf16.mxu1 %v13031_v49  ;;  %v13076_v45 = vcombine.low %v1568_v53, %v1576_v44  ;;  %v13674_v49 = vunpack.i.h.bf16 %v14499_v54  ;;  %v13714_v53 = vld [vmem:[#allocation7 + $0x90] sm:$0xff]   ;;  %v13715_v44 = vld [vmem:[#allocation7 + $0x58] sm:$0xff]  }
 0x5a0   : > { %vm10227_vm1 = vcmp.lt.s32.totalorder %v14502_v13, 120  ;;  %v13730_v54 = vld [vmem:[#allocation7 + $0xb0] sm:$0xff]   ;;  %v13816_v13 = vld [vmem:[#allocation7 + $0x380] sm:$0xff]  }
 0x5a1   : > { %v10241_v4 = vsel %vm10227_vm1, %v13663_v52, %v13664_v51 }
 0x5a2   : > { %9876 = vmatpush1.bf16.msra.mxu0 %v13028_v60  ;;  %10122 = vmatpush1.bf16.msra.mxu1 %v13030_v1  ;;  %v13703_v60 = vld [vmem:[#allocation7 + $0x40] sm:$0xff]   ;;  %v10240_v1 = vsel %vm10227_vm1, %v13664_v51, %v13668_v38  ;;  %v14540_v20 = vmax.f32 %v10178_v27, %v10241_v4  ;;  %v13709_v27 = vld [vmem:[#allocation7 + $0x8] sm:$0xff]  }
 0x5a3   : > { %9877 = vmatprep.subr.bf16.mxu0 %v13045_v8  ;;  %10123 = vmatprep.subr.bf16.mxu1 %v13047_v2  ;;  %v10238_v8 = vsel %vm10227_vm1, %v13673_v57, %v13674_v49  ;;  %v10239_v2 = vsel %vm10227_vm1, %v13668_v38, %v13673_v57  ;;  %v13722_v38 = vld [vmem:[#allocation7 + $0xa0] sm:$0xff]   ;;  %v13669_v57 = vunpack.i.h.bf16 %v14497_v23  ;;  %v13724_v51 = vld [vmem:[#allocation7 + $0xe8] sm:$0xff]  }
 0x5a4   : > { %v14532_v15 = vmax.f32 %v10180_v36, %v10239_v2  ;;  %v14536_v35 = vmax.f32 %v10181_v61, %v10238_v8  ;;  %v13708_v36 = vld [vmem:[#allocation7 + $0xc8] sm:$0xff]   ;;  %v13711_v61 = vld [vmem:[#allocation7 + $0x50] sm:$0xff]  }
 0x5a5   : > { %v13726_v4 = vld [vmem:[#allocation7 + $0xa8] sm:$0xff]  }
 0x5a6   : > { %9878 = vmatpush1.bf16.msra.mxu0 %v13044_v24  ;;  %10124 = vmatpush1.bf16.msra.mxu1 %v13046_v21  ;;  %v13705_v24 = vld [vmem:[#allocation7] sm:$0xff]   ;;  %v10263_v12 = vmax.f32 %v14532_v15, %v14536_v35  ;;  %v13707_v21 = vld [vmem:[#allocation7 + $0x48] sm:$0xff]  }
 0x5a7   : > { %9879 = vmatprep.subr.bf16.mxu0 %v13061_v59  ;;  %10125 = vmatprep.subr.bf16.mxu1 %v13063_v39  ;;  %v13712_v59 = vld [vmem:[#allocation7 + $0xd0] sm:$0xff]  }
 0x5a8   : > { %v10279_v14 = vpack.c.bf16 %v10263_v12, %v10263_v12  ;;  %v13713_v39 = vld [vmem:[#allocation7 + $0x10] sm:$0xff]  }
 0x5a9   : > { %v13728_v12 = vld [vmem:[#allocation7 + $0xf0] sm:$0xff]  }
 0x5aa   : > { %9880 = vmatpush1.bf16.msra.mxu0 %v13060_v40  ;;  %10126 = vmatpush1.bf16.msra.mxu1 %v13062_v25  ;;  %v13719_v40 = vld [vmem:[#allocation7 + $0x60] sm:$0xff]  }
 0x5ab   : > { %9890 = vmatprep.subr.bf16.mxu0 %v13077_v30  ;;  %10136 = vmatprep.subr.bf16.mxu1 %v13079_v48  ;;  %v13720_v25 = vld [vmem:[#allocation7 + $0xe0] sm:$0xff]   ;;  %v13677_v48 = vpop.permute.xlu1 %13676 }
 0x5ac   : > { %v13721_v30 = vld [vmem:[#allocation7 + $0x20] sm:$0xff]  }
 0x5ad   : > { %9882 = vmatmul.mubr.bf16.vlgmr.msra.gmra.mrb[12].mxu0 %v14304_v29  ;;  %10128 = vmatmul.mubr.bf16.vlgmr.msra.gmra.mrb[12].mxu1 %v14304_v29  ;;  %v14528_v29 = vmax.f32 %v10179_v26, %v10240_v1  ;;  %v13706_v26 = vld [vmem:[#allocation7 + $0x80] sm:$0xff]   ;;  %v13725_v1 = vld [vmem:[#allocation7 + $0x28] sm:$0xff]  }
 0x5ae   : > { %9891 = vmatpush1.bf16.msra.mxu0 %v13076_v45  ;;  %10137 = vmatpush1.bf16.msra.mxu1 %v13078_v63  ;;  %v13723_v45 = vld [vmem:[#allocation7 + $0x68] sm:$0xff]  }
 0x5af   : > { %9922 = vmatprep.mubr.bf16.mxu0 %v14033_v11  ;;  %10168 = vmatprep.mubr.bf16.mxu1 %v14033_v11  ;;  %v10261_v11 = vmax.f32 %v14540_v20, %v14528_v29  ;;  %v10262_v55 = vmax.f32 %v14528_v29, %v14532_v15  ;;  %v13741_v15 = vld [vmem:[#allocation7 + $0x108] sm:$0xff]  }
 0x5b0   : > { %13221 = vmatprep.subr.bf16.mxu0 %v13703_v60  ;;  %13243 = vmatprep.subr.bf16.mxu1 %v13704_v32  ;;  %v13679_v60 = vunpack.i.h.bf16 %v13677_v48  ;;  %v13678_v32 = vunpack.i.l.bf16 %v13677_v48  ;;  %v13747_v48 = vld [vmem:[#allocation7 + $0x158] sm:$0xff]  }
 0x5b1   : > { %v10277_v19 = vpack.c.bf16 %v10261_v11, %v10261_v11  ;;  %v13727_v11 = vld [vmem:[#allocation7 + $0x70] sm:$0xff]  }
 0x5b9   : > { %13086 = vmatmul.mubr.msk.bf16.vlgmr.msra.gmra.mrb[12].mxu0 %vm8205_vm0, %v14321_v16  ;;  %13087 = vmatmul.mubr.msk.bf16.vlgmr.msra.gmra.mrb[12].mxu1 %vm8205_vm0, %v14321_v16  ;;  %v13717_v16 = vld [vmem:[#allocation7 + $0x18] sm:$0xff]  }
 0x5ba   : > { %13222 = vmatpush3.bf16.msra.mxu0 %v13705_v24  ;;  %13244 = vmatpush3.bf16.msra.mxu1 %v13706_v26  ;;  %v14551_v63 = vpop.permute.xlu0 %13681  ;;  %v10242_v24 = vsel %vm10227_vm1, %v13669_v57, %v13663_v52  ;;  %v10236_v26 = vsel %vm10227_vm1, %v13678_v32, %v13679_v60 }
 0x5bb   : > { %11355 = vmatprep.mubr.bf16.mxu0 %v10277_v19  ;;  %11395 = vmatprep.mubr.bf16.mxu1 %v10279_v14  ;;  %v13684_v8 = vunpack.i.h.bf16 %v14551_v63  ;;  %v13683_v2 = vunpack.i.l.bf16 %v14551_v63  ;;  %v13729_v19 = vld [vmem:[#allocation7 + $0x30] sm:$0xff]   ;;  %v14569_v7 = vmax.f32 %v10177_v34, %v10242_v24  ;;  %v13731_v14 = vld [vmem:[#allocation7 + $0x78] sm:$0xff]   ;;  %v14583_v10 = vmax.f32 %v10183_v17, %v10236_v26  ;;  %v13736_v17 = vld [vmem:[#allocation7 + $0x1c0] sm:$0xff]  }
 0x5bc   : > { %13223 = vmatprep.subr.bf16.mxu0 %v13707_v21  ;;  %13245 = vmatprep.subr.bf16.mxu1 %v13708_v36  ;;  %v10237_v21 = vsel %vm10227_vm1, %v13674_v49, %v13678_v32  ;;  %v13732_v49 = vld [vmem:[#allocation7 + $0xf8] sm:$0xff]   ;;  %v13752_v32 = vld [vmem:[#allocation7 + $0x1e0] sm:$0xff]   ;;  %v13756_v24 = vld [vmem:[#allocation7 + $0x1e8] sm:$0xff]  }
 0x5bd   : > { %v10234_v52 = vsel %vm10227_vm1, %v13683_v2, %v13684_v8  ;;  %v10235_v36 = vsel %vm10227_vm1, %v13679_v60, %v13683_v2  ;;  %v13733_v34 = vld [vmem:[#allocation7 + $0x38] sm:$0xff]   ;;  %v10260_v56 = vmax.f32 %v14569_v7, %v14540_v20  ;;  %v13739_v20 = vld [vmem:[#allocation7 + $0x148] sm:$0xff]   ;;  %v13751_v60 = vld [vmem:[#allocation7 + $0x160] sm:$0xff]   ;;  %v14601_v2 = vpop.permute.xlu1 %13686 }
 0x5be   : > { %13224 = vmatpush3.bf16.msra.mxu0 %v13709_v27  ;;  %13246 = vmatpush3.bf16.msra.mxu1 %v13710_v47  ;;  %v14579_v27 = vmax.f32 %v10182_v33, %v10237_v21  ;;  %v14587_v47 = vmax.f32 %v10184_v18, %v10235_v36  ;;  %v13735_v33 = vld [vmem:[#allocation7 + $0x140] sm:$0xff]   ;;  %v13688_v26 = vunpack.i.l.bf16 %v14601_v2  ;;  %v13757_v21 = vld [vmem:[#allocation7 + $0x128] sm:$0xff]   ;;  %v13760_v36 = vld [vmem:[#allocation7 + $0x1f0] sm:$0xff]  }
 0x5bf   : > { %13225 = vmatprep.subr.bf16.mxu0 %v13711_v61  ;;  %13247 = vmatprep.subr.bf16.mxu1 %v13712_v59  ;;  %v14591_v61 = vmax.f32 %v10185_v31, %v10234_v52  ;;  %v13734_v59 = vld [vmem:[#allocation7 + $0xb8] sm:$0xff]   ;;  %v13737_v18 = vld [vmem:[#allocation7 + $0x100] sm:$0xff]   ;;  %v10276_v31 = vpack.c.bf16 %v10260_v56, %v10260_v56  ;;  %v13759_v52 = vld [vmem:[#allocation7 + $0x170] sm:$0xff]  }
 0x5c0   : > { %v10265_v62 = vmax.f32 %v14579_v27, %v14583_v10  ;;  %v13764_v56 = vld [vmem:[#allocation7 + $0x1f8] sm:$0xff]  }
 0x5c1   : > { %v10267_v22 = vmax.f32 %v14587_v47, %v14591_v61  ;;  %v13765_v63 = vld [vmem:[#allocation7 + $0x138] sm:$0xff]  }
 0x5c2   : > { %13226 = vmatpush3.bf16.msra.mxu0 %v13713_v39  ;;  %13248 = vmatpush3.bf16.msra.mxu1 %v13714_v53  ;;  %v13738_v39 = vld [vmem:[#allocation7 + $0x180] sm:$0xff]   ;;  %v10278_v53 = vpack.c.bf16 %v10262_v55, %v10262_v55 }
 0x5c3   : > { %13227 = vmatprep.subr.bf16.mxu0 %v13715_v44  ;;  %13249 = vmatprep.subr.bf16.mxu1 %v13716_v28  ;;  %v10281_v44 = vpack.c.bf16 %v10265_v62, %v10265_v62  ;;  %v13740_v28 = vld [vmem:[#allocation7 + $0x1c8] sm:$0xff]   ;;  %v10283_v29 = vpack.c.bf16 %v10267_v22, %v10267_v22  ;;  %v13767_v62 = vld [vmem:[#allocation7 + $0x240] sm:$0xff]  }
 0x5c6   : > { %13228 = vmatpush3.bf16.msra.mxu0 %v13717_v16  ;;  %13250 = vmatpush3.bf16.msra.mxu1 %v13718_v41  ;;  %v13742_v16 = vld [vmem:[#allocation7 + $0x188] sm:$0xff]   ;;  %v13743_v41 = vld [vmem:[#allocation7 + $0x150] sm:$0xff]  }
 0x5c7   : > { %13229 = vmatprep.subr.bf16.mxu0 %v13719_v40  ;;  %13251 = vmatprep.subr.bf16.mxu1 %v13720_v25  ;;  %v13744_v40 = vld [vmem:[#allocation7 + $0x1d0] sm:$0xff]  }
 0x5c8   : > { %v13745_v25 = vld [vmem:[#allocation7 + $0x110] sm:$0xff]  }
 0x5ca   : > { %13230 = vmatpush3.bf16.msra.mxu0 %v13721_v30  ;;  %13252 = vmatpush3.bf16.msra.mxu1 %v13722_v38  ;;  %v13746_v30 = vld [vmem:[#allocation7 + $0x190] sm:$0xff]   ;;  %v13748_v38 = vld [vmem:[#allocation7 + $0x1d8] sm:$0xff]  }
 0x5cb   : > { %13231 = vmatprep.subr.bf16.mxu0 %v13723_v45  ;;  %13253 = vmatprep.subr.bf16.mxu1 %v13724_v51  ;;  %v13749_v45 = vld [vmem:[#allocation7 + $0x118] sm:$0xff]  }
 0x5cc   : > { %v13750_v51 = vld [vmem:[#allocation7 + $0x198] sm:$0xff]  }
 0x5ce   : > { %13232 = vmatpush3.bf16.msra.mxu0 %v13725_v1  ;;  %13254 = vmatpush3.bf16.msra.mxu1 %v13726_v4  ;;  %v13753_v1 = vld [vmem:[#allocation7 + $0x120] sm:$0xff]  }
 0x5cf   : > { %13233 = vmatprep.subr.bf16.mxu0 %v13727_v11  ;;  %13255 = vmatprep.subr.bf16.mxu1 %v13728_v12  ;;  %v13754_v4 = vld [vmem:[#allocation7 + $0x1a0] sm:$0xff]   ;;  %v13755_v11 = vld [vmem:[#allocation7 + $0x168] sm:$0xff]   ;;  %v13689_v12 = vunpack.i.h.bf16 %v14601_v2 }
 0x5d2   : > { %13234 = vmatpush3.bf16.msra.mxu0 %v13729_v19  ;;  %13256 = vmatpush3.bf16.msra.mxu1 %v13730_v54  ;;  %v13758_v19 = vld [vmem:[#allocation7 + $0x1a8] sm:$0xff]   ;;  %v10232_v54 = vsel %vm10227_vm1, %v13688_v26, %v13689_v12 }
 0x5d3   : > { %13235 = vmatprep.subr.bf16.mxu0 %v13731_v14  ;;  %13257 = vmatprep.subr.bf16.mxu1 %v13732_v49  ;;  %v10233_v14 = vsel %vm10227_vm1, %v13684_v8, %v13688_v26  ;;  %v13761_v49 = vld [vmem:[#allocation7 + $0x130] sm:$0xff]   ;;  %v14617_v55 = vmax.f32 %v10187_v50, %v10232_v54  ;;  %v13766_v8 = vld [vmem:[#allocation7 + $0x1b8] sm:$0xff]   ;;  %v13769_v50 = vld [vmem:[#allocation7 + $0x248] sm:$0xff]  }
 0x5d4   : > { %v13795_v26 = vld [vmem:[#allocation7 + $0x2d8] sm:$0xff]   ;;  %v13801_v54 = vld [vmem:[#allocation7 + $0x360] sm:$0xff]  }
 0x5d6   : > { %13236 = vmatpush3.bf16.msra.mxu0 %v13733_v34  ;;  %13258 = vmatpush3.bf16.msra.mxu1 %v13734_v59  ;;  %v13762_v34 = vld [vmem:[#allocation7 + $0x1b0] sm:$0xff]   ;;  %v13763_v59 = vld [vmem:[#allocation7 + $0x178] sm:$0xff]  }
 0x5d7   : > { %13265 = vmatprep.subr.bf16.mxu0 %v13735_v33  ;;  %13287 = vmatprep.subr.bf16.mxu1 %v13736_v17  ;;  %v10253_v33 = vmax.f32 %v10186_v46, %v10233_v14  ;;  %v10264_v17 = vmax.f32 %v14536_v35, %v14579_v27  ;;  %v13768_v46 = vld [vmem:[#allocation7 + $0x200] sm:$0xff]   ;;  %v13771_v35 = vld [vmem:[#allocation7 + $0x250] sm:$0xff]  }
 0x5d8   : > { %v13772_v27 = vld [vmem:[#allocation7 + $0x210] sm:$0xff]   ;;  %v13800_v14 = vld [vmem:[#allocation7 + $0x2a0] sm:$0xff]  }
 0x5d9   : > { %11356 = vmatmul.mubr.bf16.vlgmr.msra.gmra.mrb[16].mxu0 %v10276_v31  ;;  %11396 = vmatmul.mubr.bf16.vlgmr.msra.gmra.mrb[16].mxu1 %v10278_v53  ;;  %v10269_v42 = vmax.f32 %v10253_v33, %v14617_v55  ;;  %v10280_v3 = vpack.c.bf16 %v10264_v17, %v10264_v17  ;;  %v13775_v53 = vld [vmem:[#allocation7 + $0x260] sm:$0xff]   ;;  %v13807_v17 = vld [vmem:[#allocation7 + $0x2f0] sm:$0xff]  }
 0x5da   : > { %13266 = vmatpush3.bf16.msra.mxu0 %v13737_v18  ;;  %11435 = vmatprep.mubr.bf16.mxu0 %v10281_v44  ;;  %v10266_v18 = vmax.f32 %v14583_v10, %v14587_v47  ;;  %v13773_v10 = vld [vmem:[#allocation7 + $0x258] sm:$0xff]   ;;  %v13777_v44 = vld [vmem:[#allocation7 + $0x268] sm:$0xff]  }
 0x5db   : > { %13288 = vmatpush3.bf16.msra.mxu1 %v13738_v39  ;;  %11475 = vmatprep.mubr.bf16.mxu1 %v10283_v29  ;;  %v10285_v31 = vpack.c.bf16 %v10269_v42, %v10269_v42  ;;  %v13770_v39 = vld [vmem:[#allocation7 + $0x208] sm:$0xff]   ;;  %v13774_v47 = vld [vmem:[#allocation7 + $0x218] sm:$0xff]   ;;  %v13779_v29 = vld [vmem:[#allocation7 + $0x270] sm:$0xff]  }
 0x5dc   : > { %13267 = vmatprep.subr.bf16.mxu0 %v13739_v20  ;;  %13289 = vmatprep.subr.bf16.mxu1 %v13740_v28  ;;  %v10282_v22 = vpack.c.bf16 %v10266_v18, %v10266_v18  ;;  %v13776_v20 = vld [vmem:[#allocation7 + $0x220] sm:$0xff]   ;;  %v13778_v28 = vld [vmem:[#allocation7 + $0x228] sm:$0xff]   ;;  %v13808_v42 = vld [vmem:[#allocation7 + $0x2b0] sm:$0xff]  }
 0x5de   : > { %13268 = vmatpush3.bf16.msra.mxu0 %v13741_v15  ;;  %v13780_v15 = vld [vmem:[#allocation7 + $0x230] sm:$0xff]  }
 0x5df   : > { %13290 = vmatpush3.bf16.msra.mxu1 %v13742_v16  ;;  %13269 = vmatprep.subr.bf16.mxu0 %v13743_v41  ;;  %v13781_v16 = vld [vmem:[#allocation7 + $0x278] sm:$0xff]  }
 0x5e0   : > { %13291 = vmatprep.subr.bf16.mxu1 %v13744_v40  ;;  %v13782_v41 = vld [vmem:[#allocation7 + $0x238] sm:$0xff]   ;;  %v10268_v40 = vmax.f32 %v14591_v61, %v10253_v33  ;;  %v13792_v61 = vld [vmem:[#allocation7 + $0x290] sm:$0xff]   ;;  %v13806_v33 = vld [vmem:[#allocation7 + $0x328] sm:$0xff]  }
 0x5e2   : > { %13270 = vmatpush3.bf16.msra.mxu0 %v13745_v25  ;;  %v10284_v25 = vpack.c.bf16 %v10268_v40, %v10268_v40  ;;  %v13815_v40 = vld [vmem:[#allocation7 + $0x3c0] sm:$0xff]  }
 0x5e3   : > { %13292 = vmatpush3.bf16.msra.mxu1 %v13746_v30  ;;  %13271 = vmatprep.subr.bf16.mxu0 %v13747_v48  ;;  %v13783_v30 = vld [vmem:[#allocation7 + $0x2c0] sm:$0xff]  }
 0x5e4   : > { %13293 = vmatprep.subr.bf16.mxu1 %v13748_v38  ;;  %v13784_v48 = vld [vmem:[#allocation7 + $0x280] sm:$0xff]  }
 0x5e5   : > { %v13785_v38 = vld [vmem:[#allocation7 + $0x340] sm:$0xff]  }
 0x5e6   : > { %13272 = vmatpush3.bf16.msra.mxu0 %v13749_v45  ;;  %v13786_v45 = vld [vmem:[#allocation7 + $0x300] sm:$0xff]  }
 0x5e7   : > { %13294 = vmatpush3.bf16.msra.mxu1 %v13750_v51  ;;  %13273 = vmatprep.subr.bf16.mxu0 %v13751_v60  ;;  %v13787_v51 = vld [vmem:[#allocation7 + $0x2c8] sm:$0xff]  }
 0x5e8   : > { %13295 = vmatprep.subr.bf16.mxu1 %v13752_v32  ;;  %v13789_v60 = vld [vmem:[#allocation7 + $0x348] sm:$0xff]  }
 0x5e9   : > { %v13788_v32 = vld [vmem:[#allocation7 + $0x288] sm:$0xff]  }
 0x5ea   : > { %13274 = vmatpush3.bf16.msra.mxu0 %v13753_v1  ;;  %v13790_v1 = vld [vmem:[#allocation7 + $0x308] sm:$0xff]  }
 0x5eb   : > { %13296 = vmatpush3.bf16.msra.mxu1 %v13754_v4  ;;  %13275 = vmatprep.subr.bf16.mxu0 %v13755_v11  ;;  %v13791_v4 = vld [vmem:[#allocation7 + $0x2d0] sm:$0xff]  }
 0x5ec   : > { %13297 = vmatprep.subr.bf16.mxu1 %v13756_v24  ;;  %v13793_v11 = vld [vmem:[#allocation7 + $0x350] sm:$0xff]  }
 0x5ed   : > { %v13794_v24 = vld [vmem:[#allocation7 + $0x310] sm:$0xff]  }
 0x5ee   : > { %13276 = vmatpush3.bf16.msra.mxu0 %v13757_v21  ;;  %v13797_v21 = vld [vmem:[#allocation7 + $0x358] sm:$0xff]  }
 0x5ef   : > { %13298 = vmatpush3.bf16.msra.mxu1 %v13758_v19  ;;  %13277 = vmatprep.subr.bf16.mxu0 %v13759_v52  ;;  %v13796_v19 = vld [vmem:[#allocation7 + $0x298] sm:$0xff]  }
 0x5f0   : > { %13299 = vmatprep.subr.bf16.mxu1 %v13760_v36  ;;  %v13798_v52 = vld [vmem:[#allocation7 + $0x318] sm:$0xff]   ;;  %v13799_v36 = vld [vmem:[#allocation7 + $0x2e0] sm:$0xff]  }
 0x5f2   : > { %13278 = vmatpush3.bf16.msra.mxu0 %v13761_v49  ;;  %v13802_v49 = vld [vmem:[#allocation7 + $0x320] sm:$0xff]  }
 0x5f3   : > { %13300 = vmatpush3.bf16.msra.mxu1 %v13762_v34  ;;  %13279 = vmatprep.subr.bf16.mxu0 %v13763_v59  ;;  %v13803_v34 = vld [vmem:[#allocation7 + $0x2e8] sm:$0xff]  }
 0x5f4   : > { %13301 = vmatprep.subr.bf16.mxu1 %v13764_v56  ;;  %v13805_v59 = vld [vmem:[#allocation7 + $0x368] sm:$0xff]  }
 0x5f5   : > { %v13804_v56 = vld [vmem:[#allocation7 + $0x2a8] sm:$0xff]  }
 0x5f6   : > { %13280 = vmatpush3.bf16.msra.mxu0 %v13765_v63  ;;  %v13836_v63 = vld [vmem:[#allocation5 + $0x8] sm:$0xff] }
 0x5f7   : > { %13302 = vmatpush3.bf16.msra.mxu1 %v13766_v8  ;;  %13309 = vmatprep.subr.bf16.mxu0 %v13767_v62  ;;  %v1633_v8 = vrot.slane %v13836_v63, %v1600_v0  ;;  %v1641_v62 = vrot.slane %v13836_v63, %v1608_v5  ;;  %v1637_v18 = vrot.slane %v13836_v63, %v1604_v6  ;;  %v13812_v0 = vld [vmem:[#allocation7 + $0x2b8] sm:$0xff]  }
 0x5f8   : > { %13331 = vmatprep.subr.bf16.mxu1 %v13783_v30  ;;  %v13814_v6 = vld [vmem:[#allocation7 + $0x338] sm:$0xff]  }
 0x5f9   : > { %11436 = vmatmul.mubr.bf16.vlgmr.msra.gmra.mrb[20].mxu0 %v10280_v3  ;;  %v13810_v3 = vld [vmem:[#allocation7 + $0x330] sm:$0xff]  }
 0x5fa   : > { %11476 = vmatmul.mubr.bf16.vlgmr.msra.gmra.mrb[20].mxu1 %v10282_v22  ;;  %13310 = vmatpush3.bf16.msra.mxu0 %v13768_v46  ;;  %v13809_v46 = vld [vmem:[#allocation7 + $0x370] sm:$0xff]   ;;  %v13811_v22 = vld [vmem:[#allocation7 + $0x2f8] sm:$0xff]  }
 0x5fb   : > { %11515 = vmatprep.mubr.bf16.mxu0 %v10285_v31  ;;  %13311 = vmatprep.subr.bf16.mxu0 %v13769_v50  ;;  %v1645_v50 = vrot.slane %v13836_v63, %v1612_v9  ;;  %v13813_v31 = vld [vmem:[#allocation7 + $0x378] sm:$0xff]  }
 0x5fc   : > { %13332 = vmatpush3.bf16.msra.mxu1 %v13784_v48 }
 0x5fd   : > { %13333 = vmatprep.subr.bf16.mxu1 %v13787_v51 }
 0x5fe   : > { %13312 = vmatpush3.bf16.msra.mxu0 %v13770_v39 }
 0x5ff   : > { %13313 = vmatprep.subr.bf16.mxu0 %v13771_v35 }
 0x600   : > { %13334 = vmatpush3.bf16.msra.mxu1 %v13788_v32 }
 0x601   : > { %13335 = vmatprep.subr.bf16.mxu1 %v13791_v4 }
 0x602   : > { %13314 = vmatpush3.bf16.msra.mxu0 %v13772_v27 }
 0x603   : > { %13315 = vmatprep.subr.bf16.mxu0 %v13773_v10 }
 0x604   : > { %13336 = vmatpush3.bf16.msra.mxu1 %v13792_v61 }
 0x605   : > { %13337 = vmatprep.subr.bf16.mxu1 %v13795_v26 }
 0x606   : > { %13316 = vmatpush3.bf16.msra.mxu0 %v13774_v47 }
 0x607   : > { %13317 = vmatprep.subr.bf16.mxu0 %v13775_v53 }
 0x608   : > { %13338 = vmatpush3.bf16.msra.mxu1 %v13796_v19 }
 0x609   : > { %13339 = vmatprep.subr.bf16.mxu1 %v13799_v36 }
 0x60a   : > { %13318 = vmatpush3.bf16.msra.mxu0 %v13776_v20 }
 0x60b   : > { %13319 = vmatprep.subr.bf16.mxu0 %v13777_v44 }
 0x60c   : > { %13340 = vmatpush3.bf16.msra.mxu1 %v13800_v14 }
 0x60d   : > { %13341 = vmatprep.subr.bf16.mxu1 %v13803_v34 }
 0x60e   : > { %13320 = vmatpush3.bf16.msra.mxu0 %v13778_v28 }
 0x60f   : > { %13321 = vmatprep.subr.bf16.mxu0 %v13779_v29 }
 0x610   : > { %13342 = vmatpush3.bf16.msra.mxu1 %v13804_v56 }
 0x611   : > { %13343 = vmatprep.subr.bf16.mxu1 %v13807_v17 }
 0x612   : > { %13322 = vmatpush3.bf16.msra.mxu0 %v13780_v15 }
 0x613   : > { %13323 = vmatprep.subr.bf16.mxu0 %v13781_v16 }
 0x614   : > { %13344 = vmatpush3.bf16.msra.mxu1 %v13808_v42 }
 0x615   : > { %13345 = vmatprep.subr.bf16.mxu1 %v13811_v22 }
 0x616   : > { %13324 = vmatpush3.bf16.msra.mxu0 %v13782_v41 }
 0x617   : > { %13353 = vmatprep.subr.bf16.mxu0 %v13785_v38 }
 0x618   : > { %13346 = vmatpush3.bf16.msra.mxu1 %v13812_v0 }
 0x619   : > { %11516 = vmatmul.mubr.bf16.vlgmr.msra.gmra.mrb[24].mxu0 %v10284_v25  ;;  %13375 = vmatprep.subr.bf16.mxu1 %v13815_v40 }
 0x61a   : > { %13354 = vmatpush3.bf16.msra.mxu0 %v13786_v45  ;;  %v13088_v45 = vld [vmem:[#allocation8] ss:$0 sm:$0xff] }
 0x61b   : > { %13355 = vmatprep.subr.bf16.mxu0 %v13789_v60 }
 0x61e   : > { %13356 = vmatpush3.bf16.msra.mxu0 %v13790_v1 }
 0x61f   : > { %13357 = vmatprep.subr.bf16.mxu0 %v13793_v11 }
 0x622   : > { %13358 = vmatpush3.bf16.msra.mxu0 %v13794_v24 }
 0x623   : > { %13359 = vmatprep.subr.bf16.mxu0 %v13797_v21 }
 0x626   : > { %13360 = vmatpush3.bf16.msra.mxu0 %v13798_v52 }
 0x627   : > { %13361 = vmatprep.subr.bf16.mxu0 %v13801_v54 }
 0x62a   : > { %13362 = vmatpush3.bf16.msra.mxu0 %v13802_v49 }
 0x62b   : > { %13363 = vmatprep.subr.bf16.mxu0 %v13805_v59 }
 0x62e   : > { %13364 = vmatpush3.bf16.msra.mxu0 %v13806_v33 }
 0x62f   : > { %13365 = vmatprep.subr.bf16.mxu0 %v13809_v46 }
 0x632   : > { %13366 = vmatpush3.bf16.msra.mxu0 %v13810_v3 }
 0x633   : > { %13367 = vmatprep.subr.bf16.mxu0 %v13813_v31 }
 0x636   : > { %13368 = vmatpush3.bf16.msra.mxu0 %v13814_v6 }
 0x68c   : > { %v9924_v39 = vpop.f32.mrb[12].mxu0  ;;  %v10170_v27 = vpop.f32.mrb[12].mxu1 }
 0x68d   : > { %v14633_v35 = vadd.f32 %v9924_v39, %v1633_v8  ;;  %v9926_v5 = vpop.f32.mrb[13].mxu0  ;;  %v14635_v10 = vadd.f32 %v10170_v27, %v1641_v62  ;;  %v10172_v43 = vpop.f32.mrb[13].mxu1 }
 0x68e   : > { %v14637_v47 = vadd.f32 %v9926_v5, %v1637_v18  ;;  %v9928_v9 = vpop.f32.mrb[14].mxu0  ;;  %v13412_v20 = vadd.f32 %v10172_v43, %v1645_v50  ;;  %v10174_v44 = vpop.f32.mrb[14].mxu1 }
 0x68f   : > { %v10189_v53 = vmax.f32 %v14633_v35, 0.0  ;;  %v9929_v28 = vpop.f32.mrb[15].mxu0  ;;  %v10191_v29 = vmax.f32 %v14635_v10, 0.0  ;;  %v10175_v16 = vpop.f32.mrb[15].mxu1 }
 0x690   : > { %v10190_v15 = vmax.f32 %v14637_v47, 0.0  ;;  %v10192_v41 = vmax.f32 %v13412_v20, 0.0 }
 0x692   : > { %v13690_v25 = vpack.i.bf16 %v10190_v15, %v10189_v53  ;;  %v13695_v30 = vpack.i.bf16 %v10192_v41, %v10191_v29 }
 0x694   : > { %13691 = vrot.lane.b32.xlu0 %v13690_v25, %s14034_s14  ;;  %13696 = vrot.lane.b32.xlu1 %v13695_v30, %s14034_s14 }
 0x6ac   : > { %v13237_v48 = vpop.f32.mrb[16].mxu0  ;;  %v13259_v38 = vpop.f32.mrb[16].mxu1 }
 0x6ad   : > { %v13238_v51 = vpop.f32.mrb[17].mxu0  ;;  %v13260_v32 = vpop.f32.mrb[17].mxu1 }
 0x6ae   : > { %v13239_v60 = vadd.f32 %v13238_v51, %v13237_v48  ;;  %v13240_v1 = vpop.f32.mrb[18].mxu0  ;;  %v13261_v4 = vadd.f32 %v13260_v32, %v13259_v38  ;;  %v13262_v11 = vpop.f32.mrb[18].mxu1  ;;  %v13817_v38 = vld [vmem:[#allocation7 + $0x3c8] sm:$0xff]   ;;  %v13828_v32 = vld [vmem:[#allocation7 + $0x3b0] sm:$0xff]  }
 0x6af   : > { %v13241_v61 = vpop.f32.mrb[19].mxu0  ;;  %v13263_v26 = vpop.f32.mrb[19].mxu1  ;;  %v13826_v51 = vld [vmem:[#allocation7 + $0x3a8] sm:$0xff]   ;;  %v13829_v1 = vld [vmem:[#allocation7 + $0x3f8] sm:$0xff]  }
 0x6b0   : > { %v11358_v24 = vadd.f32 %v13239_v60, %v13088_v45  ;;  %v13825_v45 = vld [vmem:[#allocation7 + $0x3e8] sm:$0xff]   ;;  %v13827_v60 = vld [vmem:[#allocation7 + $0x3f0] sm:$0xff]  }
 0x6b2   : > { %v11398_v21 = vadd.f32 %v13261_v4, %v11358_v24  ;;  %v13830_v4 = vld [vmem:[#allocation7 + $0x3b8] sm:$0xff]  }
 0x6cc   : > { %v13281_v19 = vpop.f32.mrb[20].mxu0 }
 0x6cd   : > { %v13303_v52 = vpop.f32.mrb[20].mxu1  ;;  %v13282_v36 = vpop.f32.mrb[21].mxu0 }
 0x6ce   : > { %v13283_v54 = vadd.f32 %v13282_v36, %v13281_v19  ;;  %v13304_v14 = vpop.f32.mrb[21].mxu1  ;;  %v13284_v49 = vpop.f32.mrb[22].mxu0 }
 0x6cf   : > { %v13305_v34 = vadd.f32 %v13304_v14, %v13303_v52  ;;  %v13306_v59 = vpop.f32.mrb[22].mxu1  ;;  %v13285_v56 = vpop.f32.mrb[23].mxu0 }
 0x6d0   : > { %v11438_v33 = vadd.f32 %v13283_v54, %v11398_v21  ;;  %v13307_v63 = vpop.f32.mrb[23].mxu1 }
 0x6d2   : > { %v11478_v8 = vadd.f32 %v13305_v34, %v11438_v33 }
 0x6ec   : > { %v13325_v17 = vpop.f32.mrb[24].mxu0 }
 0x6ed   : > { %v13326_v62 = vpop.f32.mrb[25].mxu0 }
 0x6ee   : > { %v13327_v18 = vadd.f32 %v13326_v62, %v13325_v17  ;;  %v13328_v42 = vpop.f32.mrb[26].mxu0 }
 0x6ef   : > { %v13329_v46 = vpop.f32.mrb[27].mxu0 }
 0x6f0   : > { %v14644_v3 = vadd.f32 %v13327_v18, %v11478_v8 }
 0x706   : > { %v13692_v50 = vpop.permute.xlu0 %13691  ;;  %v13697_v22 = vpop.permute.xlu1 %13696 }
 0x707   : > { %v13694_v31 = vunpack.i.h.bf16 %v13692_v50  ;;  %v13693_v39 = vunpack.i.l.bf16 %v13692_v50  ;;  %v13699_v0 = vunpack.i.h.bf16 %v13697_v22  ;;  %v13698_v35 = vunpack.i.l.bf16 %v13697_v22 }
 0x709   : > { %v10230_v27 = vsel %vm10227_vm1, %v13693_v39, %v13694_v31  ;;  %v10231_v5 = vsel %vm10227_vm1, %v13689_v12, %v13693_v39  ;;  %v10228_v6 = vsel %vm10227_vm1, %v13698_v35, %v13699_v0  ;;  %v10243_v10 = vsel %vm10227_vm1, %v13699_v0, %v13669_v57 }
 0x70a   : > { %v10229_v47 = vsel %vm10227_vm1, %v13694_v31, %v13698_v35  ;;  %v10255_v43 = vmax.f32 %v10188_v58, %v10231_v5  ;;  %v10256_v9 = vmax.f32 %v10189_v53, %v10230_v27  ;;  %v10258_v2 = vmax.f32 %v10191_v29, %v10228_v6  ;;  %v13818_v58 = vld [vmem:[#allocation7 + $0x388] sm:$0xff]   ;;  %v13820_v53 = vld [vmem:[#allocation7 + $0x390] sm:$0xff]   ;;  %v13822_v29 = vld [vmem:[#allocation7 + $0x398] sm:$0xff]  }
 0x70b   : > { %v10257_v20 = vmax.f32 %v10190_v15, %v10229_v47  ;;  %v10259_v44 = vmax.f32 %v10192_v41, %v10243_v10  ;;  %v13823_v15 = vld [vmem:[#allocation7 + $0x3e0] sm:$0xff]  }
 0x70c   : > { %v10270_v12 = vmax.f32 %v14617_v55, %v10255_v43  ;;  %v10271_v28 = vmax.f32 %v10255_v43, %v10256_v9  ;;  %v13819_v55 = vld [vmem:[#allocation7 + $0x3d0] sm:$0xff]   ;;  %v13824_v41 = vld [vmem:[#allocation7 + $0x3a0] sm:$0xff]  }
 0x70d   : > { %v10273_v16 = vmax.f32 %v10257_v20, %v10258_v2  ;;  %v10272_v40 = vmax.f32 %v10256_v9, %v10257_v20  ;;  %v10275_v23 = vmax.f32 %v10259_v44, %v14569_v7  ;;  %v13821_v7 = vld [vmem:[#allocation7 + $0x3d8] sm:$0xff]   ;;  %v10274_v11 = vmax.f32 %v10258_v2, %v10259_v44 }
 0x70e   : > { %v10286_v25 = vpack.c.bf16 %v10270_v12, %v10270_v12  ;;  %v10287_v30 = vpack.c.bf16 %v10271_v28, %v10271_v28 }
 0x70f   : > { %v10289_v57 = vpack.c.bf16 %v10273_v16, %v10273_v16  ;;  %v10288_v48 = vpack.c.bf16 %v10272_v40, %v10272_v40  ;;  %v10291_v37 = vpack.c.bf16 %v10275_v23, %v10275_v23  ;;  %v10290_v61 = vpack.c.bf16 %v10274_v11, %v10274_v11 }
 0x710   : > { %11555 = vmatprep.mubr.bf16.mxu1 %v10287_v30 }
 0x711   : > { %11595 = vmatprep.mubr.bf16.mxu0 %v10289_v57  ;;  %11556 = vmatmul.mubr.bf16.vlgmr.msra.gmra.mrb[24].mxu1 %v10286_v25 }
 0x712   : > { %11596 = vmatmul.mubr.bf16.vlgmr.msra.gmra.mrb[28].mxu0 %v10288_v48  ;;  %13376 = vmatpush3.bf16.msra.mxu1 %v13816_v13 }
 0x713   : > { %11635 = vmatprep.mubr.bf16.mxu1 %v10291_v37  ;;  %13377 = vmatprep.subr.bf16.mxu1 %v13817_v38 }
 0x716   : > { %13378 = vmatpush3.bf16.msra.mxu1 %v13818_v58 }
 0x717   : > { %13379 = vmatprep.subr.bf16.mxu1 %v13819_v55 }
 0x71a   : > { %13380 = vmatpush3.bf16.msra.mxu1 %v13820_v53 }
 0x71b   : > { %13381 = vmatprep.subr.bf16.mxu1 %v13821_v7 }
 0x71e   : > { %13382 = vmatpush3.bf16.msra.mxu1 %v13822_v29 }
 0x71f   : > { %13383 = vmatprep.subr.bf16.mxu1 %v13823_v15 }
 0x722   : > { %13384 = vmatpush3.bf16.msra.mxu1 %v13824_v41 }
 0x723   : > { %13385 = vmatprep.subr.bf16.mxu1 %v13825_v45 }
 0x726   : > { %13386 = vmatpush3.bf16.msra.mxu1 %v13826_v51 }
 0x727   : > { %13387 = vmatprep.subr.bf16.mxu1 %v13827_v60 }
 0x72a   : > { %13388 = vmatpush3.bf16.msra.mxu1 %v13828_v32 }
 0x72b   : > { %13389 = vmatprep.subr.bf16.mxu1 %v13829_v1 }
 0x72e   : > { %13390 = vmatpush3.bf16.msra.mxu1 %v13830_v4 }
 0x731   : > { %11636 = vmatmul.mubr.bf16.vlgmr.msra.gmra.mrb[28].mxu1 %v10290_v61 }
 0x7e4   : > { %v13347_v24 = vpop.f32.mrb[24].mxu1 }
 0x7e5   : > { %v13369_v26 = vpop.f32.mrb[28].mxu0  ;;  %v13348_v21 = vpop.f32.mrb[25].mxu1 }
 0x7e6   : > { %v13370_v19 = vpop.f32.mrb[29].mxu0  ;;  %v13349_v52 = vadd.f32 %v13348_v21, %v13347_v24  ;;  %v13350_v54 = vpop.f32.mrb[26].mxu1 }
 0x7e7   : > { %v13371_v36 = vadd.f32 %v13370_v19, %v13369_v26  ;;  %v13372_v14 = vpop.f32.mrb[30].mxu0  ;;  %v13351_v49 = vpop.f32.mrb[27].mxu1 }
 0x7e8   : > { %v13373_v34 = vpop.f32.mrb[31].mxu0  ;;  %v11558_v59 = vadd.f32 %v13349_v52, %v14644_v3 }
 0x7ea   : > { %v11598_v56 = vadd.f32 %v13371_v36, %v11558_v59 }
 0x804   : > { %v13391_v33 = vpop.f32.mrb[28].mxu1 }
 0x805   : > { %v13392_v63 = vpop.f32.mrb[29].mxu1 }
 0x806   : > { %v13393_v8 = vadd.f32 %v13392_v63, %v13391_v33  ;;  %v13394_v17 = vpop.f32.mrb[30].mxu1 }
 0x807   : > { %v13395_v62 = vpop.f32.mrb[31].mxu1 }
 0x808   : > { %v11638_v18 = vadd.f32 %v13393_v8, %v11598_v56 }
 0x80a   : > { %v11644_v42 = vsel %vm11643_vm2, %v11638_v18, -inf }
 0x80b   : > { %11645 = vmax.xlane.f32.xlu0 %v11644_v42 }
 0x898   : > { %v11646_v46 = vpop.xlane.xlu0 %11645 }
 0x899   : > { %v11647_v50 = vsub.f32 %v11638_v18, %v11646_v46 }
 0x89b   : > { %v11648_v22 = vmul.f32 1.442695, %v11647_v50 }
 0x89d   : > { %13831 = vpow2.f32 %v11648_v22 }
 0x8a7   : > { %v13832_v31 = vpop.eup %13831 }
 0x8a8   : > { %v11650_v39 = vsel %vm11643_vm2, %v13832_v31, 0.0 }
 0x8a9   : > { %11651 = vadd.xlane.f32.xlu1 %v11650_v39 }
 0x936   : > { %v11652_v3 = vpop.xlane.xlu1 %11651 }
 0x937   : > { %13833 = vrcp.f32 %v11652_v3 }
 0x941   : > { %v13834_v0 = vpop.eup %13833 }
 0x942   : > { %v11654_v35 = vmul.f32 %v13834_v0, %v13832_v31 }
 0x944   : > { %11655 = vst [vmem:[%s272_s25] sm:$0xf] %v11654_v35 }
 0x945   : > { %13962 = shalt.err (!%p13959_p1)
}
 0x946   : > { %s13963_s30 = scalar_lea.hbm %s14670_s12, 64  ;;  %s13967_s13 = scalar_lea.hbm %s14717_s5, 128 }
 0x947   : > { %p13964_p0 = scmp.ne.s32.totalorder %s14670_s12, %s13963_s30  ;;  %p13968_p9 = scmp.lt.u32.totalorder %s14670_s12, %s14717_s5 }
 0x948   : > { %p13969_p12 = scmp.lt.u32.totalorder %s13967_s13, %s13963_s30  ;;  %p13971_p2 = scmp.lt.u32.totalorder %s13963_s30, %s14670_s12 }
 0x949   : > { %p13965_p6 = pnand %p13964_p0, %p14735_p3 }
 0x94a   : > { %p13970_p10 = por %p13969_p12, %p13968_p9 }
 0x94b   : > { %p13966_p5 = pneg %p13965_p6 }
 0x94c   : > { %p13972_p4 = por %p13971_p2, %p13970_p10 }
 0x94e   : > { %p13973_p7 = pnand %p13972_p4, %p13966_p5 }
 0x950   : > { %13976 = shalt.err (!%p13973_p7)
}
 0x951   : > { %13590 = dma.vmem_to_hbm [thread:$0]  (%p14735_p3), %s14672_s26, 64, %s14670_s12, %s11657_s8  }
 0x952 PF: > { %p13617_p8 = scmp.ge.s32.totalorder %s14023_s21, 2  ;;  %s11682_s16 = sand.u32 1, %s14011_s18  }
 0x953   : > { %p14736_p11 = scmp.ne.s32.totalorder %s14723_s29, 0  ;;  %s11683_s17 = scalar_lea.sflag [#allocation4], %s11682_s16 }
 0x955   : > { %p13606_p13 = pnand %p13617_p8, %p14736_p11 }
 0x957   : > { %14006 = dma.done.wait (!%p13606_p13), %s11683_s17, 64  }
 0x958   : > { %14008 = vsyncadd (!%p13606_p13), %s11683_s17, 4294967232  ;;  %p18_p1 = scmp.ge.s32.totalorder %s14091_s24, 4   ;;  %s14737_s18 = smov %s14015_s19 }
 0x959   : > { %s14738_s19 = smov %s14019_s20  ;;  %s14739_s20 = smov %s14102_s27 }
 0x95a   : > { %s14740_s21 = smov %s14091_s24  ;;  %20 = sbr.rel (!%p18_p1) target bundleno = 8 (0x8), region = 92 }
 0x961   :  { %11688 = vsyncpa [#allocation3], 1 }
 0x962   :  { %11690 = vsyncpa [#allocation3 + $0x1], 1 }
 0x963   :  { %11691 = vsyncpa [#allocation6], 1 }
 0x964   :  { %11692 = vsyncpa [#allocation9], 1 }
 0x965   :  { %11693 = vsyncpa [#allocation4], 1 }
 0x966   :  { %11695 = vsyncpa [#allocation4 + $0x1], 1 }

</bundles_post_ra>
